<compile_context>
chip_gen: v7x
topology: tpu7x:2x2x1
jax: 0.10.0
libtpu: 0.0.40
codegen_flags: <defaults>
</compile_context>

<pallas_src>
import math
from functools import partial

import numpy as np
import jax
import jax.numpy as jnp
from jax.experimental import pallas as pl


# ----------------------------- in-kernel helpers ------------------------------

_SQRT_HALF = 0.7071067811865476


def _erf_approx(x):
    # Abramowitz & Stegun 7.1.26 rational approximation, |err| <= 1.5e-7 (f32-exact in practice).
    a1, a2, a3, a4, a5 = (0.254829592, -0.284496736, 1.421413741,
                          -1.453152027, 1.061405429)
    pconst = 0.3275911
    sign = jnp.where(x >= 0.0, 1.0, -1.0)
    ax = jnp.abs(x)
    t = 1.0 / (1.0 + pconst * ax)
    poly = t * (a1 + t * (a2 + t * (a3 + t * (a4 + t * a5))))
    return sign * (1.0 - poly * jnp.exp(-ax * ax))


def _gelu_exact(x):
    # matches torch F.gelu(approximate='none') to ~1e-7
    return 0.5 * x * (1.0 + _erf_approx(x * _SQRT_HALF))


def _leaky_relu(x, slope=0.2):
    return jnp.where(x >= 0.0, x, slope * x)


# ----------------------------- Pallas kernels --------------------------------

def _pe_mlp_kernel(x_ref, w1_ref, b1_ref, w2_ref, b2_ref, pe_ref, o_ref, *, scale):
    # lin1 -> ReLU -> lin2 -> *sqrt(E) -> +pe ; hidden (tokens, 512) stays in VMEM.
    h = jnp.dot(x_ref[...], w1_ref[...], preferred_element_type=jnp.float32) + b1_ref[...]
    h = jnp.maximum(h, 0.0)
    e = jnp.dot(h, w2_ref[...], preferred_element_type=jnp.float32) + b2_ref[...]
    o_ref[...] = e * scale + pe_ref[...]


def _encoder_layer_kernel(x_ref, mask_ref, win_ref, bin_ref, wout_ref, bout_ref,
                          w1_ref, b1_ref, w2_ref, b2_ref,
                          n1w_ref, n1b_ref, n2w_ref, n2b_ref, o_ref,
                          *, nhead, scale, eps):
    """One full post-norm nn.TransformerEncoderLayer on x (M, E), M = B*T*L tokens.

    mask_ref is (M, M): the per-sample attention mask on the diagonal (L, L) blocks,
    -1e9 everywhere else, so attention is computed as one block-diagonal matmul per head.
    """
    x = x_ref[...]                                                  # (M, E) f32
    E = x.shape[1]
    dh = E // nhead
    qkv = jnp.dot(x, win_ref[...], preferred_element_type=jnp.float32) + bin_ref[...]
    mask = mask_ref[...]
    wout = wout_ref[...]

    attn = jnp.zeros_like(x)
    for h in range(nhead):                                          # unrolled; nhead is tiny
        q = qkv[:, h * dh:(h + 1) * dh]
        k = qkv[:, E + h * dh:E + (h + 1) * dh]
        v = qkv[:, 2 * E + h * dh:2 * E + (h + 1) * dh]
        s = jax.lax.dot_general(q, k, (((1,), (1,)), ((), ())),
                                preferred_element_type=jnp.float32) * scale + mask
        s = s - jnp.max(s, axis=-1, keepdims=True)
        ps = jnp.exp(s)
        ps = ps / jnp.sum(ps, axis=-1, keepdims=True)               # exact softmax divide
        ctx = jnp.dot(ps, v, preferred_element_type=jnp.float32)    # (M, dh)
        # concat-of-heads @ Wout  ==  sum_h ctx_h @ Wout[h*dh:(h+1)*dh]   (avoids a concat)
        attn = attn + jnp.dot(ctx, wout[h * dh:(h + 1) * dh, :],
                              preferred_element_type=jnp.float32)
    attn = attn + bout_ref[...]

    y = x + attn                                                    # residual + LayerNorm 1
    mu = jnp.mean(y, axis=-1, keepdims=True)
    var = jnp.mean(jnp.square(y - mu), axis=-1, keepdims=True)
    y = (y - mu) * jax.lax.rsqrt(var + eps) * n1w_ref[...] + n1b_ref[...]

    h1 = jnp.dot(y, w1_ref[...], preferred_element_type=jnp.float32) + b1_ref[...]
    h1 = _gelu_exact(h1)
    h2 = jnp.dot(h1, w2_ref[...], preferred_element_type=jnp.float32) + b2_ref[...]

    z = y + h2                                                      # residual + LayerNorm 2
    mu2 = jnp.mean(z, axis=-1, keepdims=True)
    var2 = jnp.mean(jnp.square(z - mu2), axis=-1, keepdims=True)
    o_ref[...] = (z - mu2) * jax.lax.rsqrt(var2 + eps) * n2w_ref[...] + n2b_ref[...]


def _conv_pair_kernel(pr_ref, wr_ref, br_ref, pp_ref, wp_ref, bp_ref, o_ref, *, slope):
    # leaky_relu( conv_residual(raw) + conv1(parts) ): two matmuls + biases + add + act fused.
    y = (jnp.dot(pr_ref[...], wr_ref[...], preferred_element_type=jnp.float32) + br_ref[...]
         + jnp.dot(pp_ref[...], wp_ref[...], preferred_element_type=jnp.float32) + bp_ref[...])
    o_ref[...] = _leaky_relu(y, slope)


def _conv_kernel(p_ref, w_ref, b_ref, o_ref, *, slope, apply_act):
    y = jnp.dot(p_ref[...], w_ref[...], preferred_element_type=jnp.float32) + b_ref[...]
    if apply_act:
        y = _leaky_relu(y, slope)
    o_ref[...] = y


# ------------------------------ pallas wrappers --------------------------------

def _spec2(shape):
    # all operands here are 2-D full blocks; block == full array so (8,128) rule doesn't apply
    return pl.BlockSpec(shape, lambda i: (0, 0))


def pe_mlp(x2d, w1, b1, w2, b2, pe_rows, scale):
    M, S = x2d.shape
    H = w1.shape[1]
    E = w2.shape[1]
    return pl.pallas_call(
        partial(_pe_mlp_kernel, scale=scale),
        out_shape=jax.ShapeDtypeStruct((M, E), jnp.float32),
        grid=(1,),
        in_specs=[_spec2((M, S)), _spec2((S, H)), _spec2((1, H)),
                  _spec2((H, E)), _spec2((1, E)), _spec2((M, E))],
        out_specs=_spec2((M, E)),
    )(x2d, w1, b1, w2, b2, pe_rows)


def transformer_encoder_layer(x2d, blockmask, lp, nhead, eps=1e-5):
    M, E = x2d.shape
    ff = lp["lin1_w"].shape[1]
    dh = E // nhead
    return pl.pallas_call(
        partial(_encoder_layer_kernel, nhead=nhead, scale=1.0 / math.sqrt(dh), eps=eps),
        out_shape=jax.ShapeDtypeStruct((M, E), jnp.float32),
        grid=(1,),
        in_specs=[_spec2((M, E)), _spec2((M, M)),
                  _spec2((E, 3 * E)), _spec2((1, 3 * E)),
                  _spec2((E, E)), _spec2((1, E)),
                  _spec2((E, ff)), _spec2((1, ff)),
                  _spec2((ff, E)), _spec2((1, E)),
                  _spec2((1, E)), _spec2((1, E)),
                  _spec2((1, E)), _spec2((1, E))],
        out_specs=_spec2((M, E)),
    )(x2d, blockmask,
      lp["in_proj_w"], lp["in_proj_b"], lp["out_proj_w"], lp["out_proj_b"],
      lp["lin1_w"], lp["lin1_b"], lp["lin2_w"], lp["lin2_b"],
      lp["norm1_w"], lp["norm1_b"], lp["norm2_w"], lp["norm2_b"])


def conv_pair(pr, wr, br, pp, wp, bp, slope=0.2):
    M, KR = pr.shape
    KP = pp.shape[1]
    Cout = wr.shape[1]
    return pl.pallas_call(
        partial(_conv_pair_kernel, slope=slope),
        out_shape=jax.ShapeDtypeStruct((M, Cout), jnp.float32),
        grid=(1,),
        in_specs=[_spec2((M, KR)), _spec2((KR, Cout)), _spec2((1, Cout)),
                  _spec2((M, KP)), _spec2((KP, Cout)), _spec2((1, Cout))],
        out_specs=_spec2((M, Cout)),
    )(pr, wr, br, pp, wp, bp)


def conv_single(patches, w, b, apply_act, slope=0.2):
    M, KC = patches.shape
    Cout = w.shape[1]
    return pl.pallas_call(
        partial(_conv_kernel, slope=slope, apply_act=apply_act),
        out_shape=jax.ShapeDtypeStruct((M, Cout), jnp.float32),
        grid=(1,),
        in_specs=[_spec2((M, KC)), _spec2((KC, Cout)), _spec2((1, Cout))],
        out_specs=_spec2((M, Cout)),
    )(patches, w, b)


# ------------------------------ JAX glue ---------------------------------------

def im2col(x_btc, kernel_size, stride, padding, padding_mode):
    """(B, T, C) -> (B*T_out, K*C) patches with rows ordered (kk*C + ci), matching the
    pre-reordered (K*Cin, Cout) weights. Pad/slice glue stays in XLA (tiny ops)."""
    B, T, C = x_btc.shape
    if padding > 0:
        mode = "reflect" if padding_mode == "reflect" else "constant"
        x_btc = jnp.pad(x_btc, ((0, 0), (padding, padding), (0, 0)), mode=mode)
    Tp = x_btc.shape[1]
    T_out = (Tp - kernel_size) // stride + 1
    idx = (np.arange(T_out)[:, None] * stride + np.arange(kernel_size)[None, :]).reshape(-1)
    patches = x_btc[:, idx, :].reshape(B * T_out, kernel_size * C)
    return patches, T_out


def upsample_linear_2x_time(x):
    """nn.Upsample(scale_factor=2, mode='linear', align_corners=False) along axis 1 of (B,T,C)."""
    left = jnp.concatenate([x[:, :1], x[:, :-1]], axis=1)
    right = jnp.concatenate([x[:, 1:], x[:, -1:]], axis=1)
    even = 0.75 * x + 0.25 * left
    odd = 0.75 * x + 0.25 * right
    out = jnp.stack([even, odd], axis=2)                        # (B, T, 2, C)
    return out.reshape(x.shape[0], 2 * x.shape[1], x.shape[2])


# ------------------------ mask construction (from __init__) -------------------
# TODO(synk): get_transformer_matrix / get_part_matrix helpers are not in the provided
# source; deterministic equivalents are synthesized here.

def build_part_matrix(correspondence, nparts, njoints):
    m = np.zeros((nparts, njoints), np.float32)
    for i, part in enumerate(correspondence):
        for j in part:
            m[i, j] = 1.0
    return m


def build_attention_mask_np(correspondence, nparts, njoints):
    S = nparts + njoints
    allowed = np.zeros((S, S), bool)
    np.fill_diagonal(allowed, True)
    for i, part in enumerate(correspondence):
        g = [i] + [nparts + j for j in part]
        for a in g:
            for b in g:
                allowed[a, b] = True
    extra = S - 1                       # global (+1) joint token: fully connected
    allowed[extra, :] = True
    allowed[:, extra] = True
    return np.where(allowed, 0.0, -1e9).astype(np.float32)


def build_block_diag_mask_np(attn_mask_np, n_groups):
    """(n_groups*L, n_groups*L) additive mask: attn_mask on the diagonal blocks, -1e9 off."""
    L = attn_mask_np.shape[0]
    tiled = np.tile(attn_mask_np, (n_groups, n_groups))
    grp = np.repeat(np.arange(n_groups), L)
    same = grp[:, None] == grp[None, :]
    return np.where(same, tiled, np.float32(-1e9)).astype(np.float32)


def build_conv_mask(part_matrix, in_channels, out_channels, kernel_size,
                    joint_num, body_lens, first_layer=False, last_layer=False):
    in_per_part = in_channels // body_lens
    out_per_part = out_channels // body_lens
    in_lists = []
    if not first_layer:
        for i in range(body_lens):
            in_lists.append(list(range(i * in_per_part, (i + 1) * in_per_part)))
    else:
        pjc = in_channels // joint_num
        for i in range(part_matrix.shape[0]):
            idx = np.where(part_matrix[i] == 1)[0]
            in_lists.append([int(k) * pjc + j for k in idx for j in range(pjc)])
    out_lists = []
    if not last_layer:
        for i in range(body_lens):
            out_lists.append(list(range(i * out_per_part, (i + 1) * out_per_part)))
    else:
        pjc = out_channels // joint_num
        for i in range(body_lens):
            idx = np.where(part_matrix[i] == 1)[0]
            out_lists.append([int(k) * pjc + j for k in idx for j in range(pjc)])
    mask = np.zeros((out_channels, in_channels, kernel_size), np.float32)
    for i in range(body_lens):
        for j in out_lists[i]:
            mask[j, in_lists[i], :] = 1.0
    if last_layer:
        covered = set()
        for ol in out_lists:
            covered.update(ol)
        for k in range(out_channels):
            if k not in covered:
                mask[k, ...] = 1.0
    return np.asarray(mask)


# ------------------------------ parameters ------------------------------------

def _uniform(key, shape, fan_in):
    bound = 1.0 / math.sqrt(fan_in)
    return jax.random.uniform(key, shape, jnp.float32, -bound, bound)


def init_motion_ae_params(key, cfg):
    """All weight preprocessing (transpose, mask, im2col reorder, bias reshape) happens once
    here, so the jitted forward only touches ready-to-use operands."""
    src_dim = cfg["src_dim"]
    latent = cfg["latent_dim"]
    nparts = cfg["nparts"]
    njoints = cfg["njoints_total"]
    raw_dim = njoints * src_dim
    conv_dim = latent * nparts
    hid_dim = cfg["hid_dim"]
    ff = cfg["ff_size"]
    ks = cfg["kernel_size"]

    keys = iter(jax.random.split(key, 128))
    p = {}

    def lin_params(cout, cin):
        # torch nn.Linear init, stored pre-transposed as (cin, cout) + (1, cout)
        w = _uniform(next(keys), (cout, cin), cin)
        b = _uniform(next(keys), (cout,), cin)
        return w.T, b.reshape(1, cout)

    # PositionalEncoding
    p["pe_lin1_w"], p["pe_lin1_b"] = lin_params(hid_dim, src_dim)
    p["pe_lin2_w"], p["pe_lin2_b"] = lin_params(latent, hid_dim)
    pe = np.zeros((cfg["max_len"], latent), np.float32)
    pos = np.arange(cfg["max_len"], dtype=np.float32)[:, None]
    div = np.exp(np.arange(0, latent, 2, dtype=np.float32)
                 * -(math.log(10000.0) / latent))
    pe[:, 0::2] = np.sin(pos * div)
    pe[:, 1::2] = np.cos(pos * div)
    p["pe_table"] = jnp.asarray(pe)                               # (max_len, E)
    p["parameter_part"] = 0.1 * jax.random.normal(
        next(keys), (nparts, 1, latent), jnp.float32)

    # Transformer encoder layers (post-norm, exact GELU, dropout = identity at inference)
    layers = []
    for _ in range(cfg["num_layers"]):
        in_w, in_b = lin_params(3 * latent, latent)
        out_w, out_b = lin_params(latent, latent)
        l1w, l1b = lin_params(ff, latent)
        l2w, l2b = lin_params(latent, ff)
        layers.append({
            "in_proj_w": in_w, "in_proj_b": in_b,
            "out_proj_w": out_w, "out_proj_b": out_b,
            "lin1_w": l1w, "lin1_b": l1b,
            "lin2_w": l2w, "lin2_b": l2b,
            "norm1_w": jnp.ones((1, latent), jnp.float32),
            "norm1_b": jnp.zeros((1, latent), jnp.float32),
            "norm2_w": jnp.ones((1, latent), jnp.float32),
            "norm2_b": jnp.zeros((1, latent), jnp.float32),
        })
    p["transformer_layers"] = layers

    part_mat = build_part_matrix(cfg["correspondence"], nparts, njoints)

    def make_conv(cin, cout, first=False, last=False):
        w = _uniform(next(keys), (cout, cin, ks), cin * ks)
        b = _uniform(next(keys), (cout,), cin * ks)
        mask = jnp.asarray(build_conv_mask(part_mat, cin, cout, ks, njoints, nparts,
                                           first_layer=first, last_layer=last))
        # pre-masked, reordered to (ks*cin, cout) so im2col rows (kk, ci) hit it directly
        w2d = (w * mask).transpose(2, 1, 0).reshape(ks * cin, cout)
        return {"w": w2d, "b": b.reshape(1, cout)}

    p["conv_residual"] = make_conv(raw_dim, conv_dim, first=True)
    p["conv1"] = make_conv(conv_dim, conv_dim)
    p["conv2"] = make_conv(conv_dim, conv_dim)

    dec = []
    for i in range(cfg["conv_layers"]):
        last = (i == cfg["conv_layers"] - 1)
        cout = raw_dim if last else conv_dim
        dec.append(make_conv(conv_dim, cout, last=last))
    p["dec_layers"] = dec
    return p


# ------------------------------ model forward ---------------------------------

def motion_encoder_forward(cfg, p, x):
    # x: (B, njoints*src_dim, T) torch layout   [lafan1 branch: no zero-row concat]
    b, c, t = x.shape
    src = cfg["src_dim"]
    latent = cfg["latent_dim"]
    nparts = cfg["nparts"]
    ks = cfg["kernel_size"]
    pad = (ks - 1) // 2
    pmode = cfg["padding_mode"]
    j = c // src
    N = b * t
    L = nparts + j

    raw_btc = x.transpose(0, 2, 1)                                # (B, T, C) for conv path

    # per (sample, joint) tokens, sample-major:  row = n*J + joint
    x_tokens = x.reshape(b, j, src, t).transpose(0, 3, 1, 2).reshape(N * j, src)

    # PositionalEncoding (fused MLP; dropout = identity at inference)
    pe_rows = jnp.tile(p["pe_table"][:j], (N, 1))                 # (N*J, E)
    emb = pe_mlp(x_tokens, p["pe_lin1_w"], p["pe_lin1_b"],
                 p["pe_lin2_w"], p["pe_lin2_b"], pe_rows, math.sqrt(latent))

    # enc_app in sample-major token layout: rows n*L + l  (parts first, then joints)
    prefix = jnp.broadcast_to(p["parameter_part"][:, 0, :][None], (N, nparts, latent))
    h2d = jnp.concatenate([prefix, emb.reshape(N, j, latent)], axis=1).reshape(N * L, latent)

    # block-diagonal additive mask, built in numpy at trace time (baked constant)
    blockmask = jnp.asarray(build_block_diag_mask_np(cfg["attn_mask_np"], N))

    for lp in p["transformer_layers"]:
        h2d = transformer_encoder_layer(h2d, blockmask, lp, cfg["num_heads"])

    # channel index = part*latent + l, identical to torch; kept in (B, T, C) layout
    final_btc = h2d.reshape(N, L, latent)[:, :nparts, :].reshape(b, t, nparts * latent)

    # conv stage 1: leaky_relu( conv_residual(raw) + conv1(parts) ) in one fused kernel
    pr, t2 = im2col(raw_btc, ks, 2, pad, pmode)
    pp, _ = im2col(final_btc, ks, 2, pad, pmode)
    y = conv_pair(pr, p["conv_residual"]["w"], p["conv_residual"]["b"],
                  pp, p["conv1"]["w"], p["conv1"]["b"])
    y = y.reshape(b, t2, nparts * latent)

    # conv2 + leaky_relu
    p2, t4 = im2col(y, ks, 2, pad, pmode)
    z = conv_single(p2, p["conv2"]["w"], p["conv2"]["b"], apply_act=True)
    return z.reshape(b, t4, nparts * latent)                      # (B, T//4, conv_dim)


def motion_decoder_forward(cfg, p, x_btc, offset=None):
    ks = cfg["kernel_size"]
    pad = (ks - 1) // 2
    pmode = cfg["padding_mode"]
    n_layers = cfg["conv_layers"]
    # TODO(synk): skeleton_info == 'additive' offset branch not exercised (add_offset=False).
    for i, lp in enumerate(p["dec_layers"]):
        x_btc = upsample_linear_2x_time(x_btc)
        B = x_btc.shape[0]
        patches, t_out = im2col(x_btc, ks, 1, pad, pmode)
        y = conv_single(patches, lp["w"], lp["b"], apply_act=(i != n_layers - 1))
        x_btc = y.reshape(B, t_out, lp["w"].shape[1])
    return x_btc                      # lafan1 branch: torch returns (B, T, C) — already our layout


def motion_ae_forward(cfg, params, x, offset=None):
    latent_btc = motion_encoder_forward(cfg, params, x)           # (B, T//4, C)
    result = motion_decoder_forward(cfg, params, latent_btc, offset)
    latent = latent_btc.transpose(0, 2, 1)                        # torch layout (B, C, T//4)
    return latent, result


# ------------------------------------ main -------------------------------------

if __name__ == "__main__":
    cfg = dict(
        correspondence=[[0, 1], [2, 3], [4]],   # 3 body parts over joints 0..4
        njoints=5,                               # internal njoints = 5 + 1 = 6
        src_dim=4,
        latent_dim=16,
        hid_dim=512,
        ff_size=32,
        num_heads=2,
        num_layers=2,      # transformer_layers
        kernel_size=3,
        padding_mode="reflect",
        conv_layers=2,
        max_len=100,
        upsampling="linear",
    )
    cfg["nparts"] = len(cfg["correspondence"])
    cfg["njoints_total"] = cfg["njoints"] + 1
    cfg["attn_mask_np"] = build_attention_mask_np(
        cfg["correspondence"], cfg["nparts"], cfg["njoints_total"])

    key = jax.random.PRNGKey(0)
    pkey, xkey = jax.random.split(key)
    params = init_motion_ae_params(pkey, cfg)

    B, T = 2, 8
    raw_dim = cfg["njoints_total"] * cfg["src_dim"]               # 24
    x = jax.random.normal(xkey, (B, raw_dim, T), jnp.float32)

    fwd = jax.jit(partial(motion_ae_forward, cfg))
    latent, result = fwd(params, x)
    jax.block_until_ready((latent, result))

    assert latent.shape == (B, cfg["latent_dim"] * cfg["nparts"], T // 4)
    assert result.shape == (B, T, raw_dim)
    print("KERNEL_OK")
</pallas_src>

<mosaic_0001>
module attributes {stable_mosaic.version = 11 : i64} {
  func.func @_pe_mlp_kernel(%arg0: i32, %arg1: memref<96x4xf32, #tpu.memory_space<vmem>>, %arg2: memref<4x512xf32, #tpu.memory_space<vmem>>, %arg3: memref<1x512xf32, #tpu.memory_space<vmem>>, %arg4: memref<512x16xf32, #tpu.memory_space<vmem>>, %arg5: memref<1x16xf32, #tpu.memory_space<vmem>>, %arg6: memref<96x16xf32, #tpu.memory_space<vmem>>, %arg7: memref<96x16xf32, #tpu.memory_space<vmem>>) attributes {dimension_semantics = [#tpu.dimension_semantics<arbitrary>], iteration_bounds = array<i64: 1>, scalar_prefetch = 0 : i64, scratch_operands = 0 : i64, tpu.core_type = #tpu.core_type<tc>, window_params = [{pipeline_mode = #tpu.pipeline_mode<synchronous>, transform_indices = @transform_0, window_bounds = array<i64: 96, 4>}, {pipeline_mode = #tpu.pipeline_mode<synchronous>, transform_indices = @transform_1, window_bounds = array<i64: 4, 512>}, {pipeline_mode = #tpu.pipeline_mode<synchronous>, transform_indices = @transform_2, window_bounds = array<i64: 1, 512>}, {pipeline_mode = #tpu.pipeline_mode<synchronous>, transform_indices = @transform_3, window_bounds = array<i64: 512, 16>}, {pipeline_mode = #tpu.pipeline_mode<synchronous>, transform_indices = @transform_4, window_bounds = array<i64: 1, 16>}, {pipeline_mode = #tpu.pipeline_mode<synchronous>, transform_indices = @transform_5, window_bounds = array<i64: 96, 16>}, {pipeline_mode = #tpu.pipeline_mode<synchronous>, transform_indices = @transform_6, window_bounds = array<i64: 96, 16>}]} {
    %c0 = arith.constant 0 : index
    %c0_0 = arith.constant 0 : index
    %0 = vector.load %arg1[%c0, %c0_0] : memref<96x4xf32, #tpu.memory_space<vmem>>, vector<96x4xf32>
    %c0_1 = arith.constant 0 : index
    %c0_2 = arith.constant 0 : index
    %1 = vector.load %arg2[%c0_1, %c0_2] : memref<4x512xf32, #tpu.memory_space<vmem>>, vector<4x512xf32>
    %cst = arith.constant dense<0.000000e+00> : vector<96x512xf32>
    %2 = tpu.matmul %0, %1, %cst {dimension_numbers = #tpu.dot_dimension_numbers<[1], [0], [0], [1], [0, 0, 1, 1], [], []>} : vector<96x4xf32>, vector<4x512xf32>, vector<96x512xf32> -> vector<96x512xf32>
    %c0_3 = arith.constant 0 : index
    %c0_4 = arith.constant 0 : index
    %3 = vector.load %arg3[%c0_3, %c0_4] : memref<1x512xf32, #tpu.memory_space<vmem>>, vector<1x512xf32>
    %4 = vector.broadcast %3 : vector<1x512xf32> to vector<96x512xf32>
    %5 = arith.addf %2, %4 : vector<96x512xf32>
    %cst_5 = arith.constant 0.000000e+00 : f32
    %6 = vector.broadcast %cst_5 : f32 to vector<96x512xf32>
    %7 = arith.maximumf %5, %6 : vector<96x512xf32>
    %c0_6 = arith.constant 0 : index
    %c0_7 = arith.constant 0 : index
    %8 = vector.load %arg4[%c0_6, %c0_7] : memref<512x16xf32, #tpu.memory_space<vmem>>, vector<512x16xf32>
    %cst_8 = arith.constant dense<0.000000e+00> : vector<96x16xf32>
    %9 = tpu.matmul %7, %8, %cst_8 {dimension_numbers = #tpu.dot_dimension_numbers<[1], [0], [0], [1], [0, 0, 1, 1], [], []>} : vector<96x512xf32>, vector<512x16xf32>, vector<96x16xf32> -> vector<96x16xf32>
    %c0_9 = arith.constant 0 : index
    %c0_10 = arith.constant 0 : index
    %10 = vector.load %arg5[%c0_9, %c0_10] : memref<1x16xf32, #tpu.memory_space<vmem>>, vector<1x16xf32>
    %11 = vector.broadcast %10 : vector<1x16xf32> to vector<96x16xf32>
    %12 = arith.addf %9, %11 : vector<96x16xf32>
    %cst_11 = arith.constant 4.000000e+00 : f32
    %13 = vector.broadcast %cst_11 : f32 to vector<96x16xf32>
    %14 = arith.mulf %12, %13 : vector<96x16xf32>
    %c0_12 = arith.constant 0 : index
    %c0_13 = arith.constant 0 : index
    %15 = vector.load %arg6[%c0_12, %c0_13] : memref<96x16xf32, #tpu.memory_space<vmem>>, vector<96x16xf32>
    %16 = arith.addf %14, %15 : vector<96x16xf32>
    %c0_14 = arith.constant 0 : index
    %c0_15 = arith.constant 0 : index
    %17 = vector.load %arg7[%c0_14, %c0_15] : memref<96x16xf32, #tpu.memory_space<vmem>>, vector<96x16xf32>
    tpu.vector_store %arg7[%c0_14, %c0_15], %16 {strides = array<i32>} : memref<96x16xf32, #tpu.memory_space<vmem>>, vector<96x16xf32>,
    return
  }
  func.func @transform_0(%arg0: i32) -> (i32, i32) {
    %c0_i32 = arith.constant 0 : i32
    %c0_i32_0 = arith.constant 0 : i32
    %c0_i32_1 = arith.constant 0 : i32
    return %c0_i32, %c0_i32_0 : i32, i32
  }
  func.func @transform_1(%arg0: i32) -> (i32, i32) {
    %c0_i32 = arith.constant 0 : i32
    %c0_i32_0 = arith.constant 0 : i32
    %c0_i32_1 = arith.constant 0 : i32
    return %c0_i32, %c0_i32_0 : i32, i32
  }
  func.func @transform_2(%arg0: i32) -> (i32, i32) {
    %c0_i32 = arith.constant 0 : i32
    %c0_i32_0 = arith.constant 0 : i32
    %c0_i32_1 = arith.constant 0 : i32
    return %c0_i32, %c0_i32_0 : i32, i32
  }
  func.func @transform_3(%arg0: i32) -> (i32, i32) {
    %c0_i32 = arith.constant 0 : i32
    %c0_i32_0 = arith.constant 0 : i32
    %c0_i32_1 = arith.constant 0 : i32
    return %c0_i32, %c0_i32_0 : i32, i32
  }
  func.func @transform_4(%arg0: i32) -> (i32, i32) {
    %c0_i32 = arith.constant 0 : i32
    %c0_i32_0 = arith.constant 0 : i32
    %c0_i32_1 = arith.constant 0 : i32
    return %c0_i32, %c0_i32_0 : i32, i32
  }
  func.func @transform_5(%arg0: i32) -> (i32, i32) {
    %c0_i32 = arith.constant 0 : i32
    %c0_i32_0 = arith.constant 0 : i32
    %c0_i32_1 = arith.constant 0 : i32
    return %c0_i32, %c0_i32_0 : i32, i32
  }
  func.func @transform_6(%arg0: i32) -> (i32, i32) {
    %c0_i32 = arith.constant 0 : i32
    %c0_i32_0 = arith.constant 0 : i32
    %c0_i32_1 = arith.constant 0 : i32
    return %c0_i32, %c0_i32_0 : i32, i32
  }
}

module attributes {stable_mosaic.version = 11 : i64} {
  func.func @_encoder_layer_kernel(%arg0: i32, %arg1: memref<144x16xf32, #tpu.memory_space<vmem>>, %arg2: memref<144x144xf32, #tpu.memory_space<vmem>>, %arg3: memref<16x48xf32, #tpu.memory_space<vmem>>, %arg4: memref<1x48xf32, #tpu.memory_space<vmem>>, %arg5: memref<16x16xf32, #tpu.memory_space<vmem>>, %arg6: memref<1x16xf32, #tpu.memory_space<vmem>>, %arg7: memref<16x32xf32, #tpu.memory_space<vmem>>, %arg8: memref<1x32xf32, #tpu.memory_space<vmem>>, %arg9: memref<32x16xf32, #tpu.memory_space<vmem>>, %arg10: memref<1x16xf32, #tpu.memory_space<vmem>>, %arg11: memref<1x16xf32, #tpu.memory_space<vmem>>, %arg12: memref<1x16xf32, #tpu.memory_space<vmem>>, %arg13: memref<1x16xf32, #tpu.memory_space<vmem>>, %arg14: memref<1x16xf32, #tpu.memory_space<vmem>>, %arg15: memref<144x16xf32, #tpu.memory_space<vmem>>) attributes {dimension_semantics = [#tpu.dimension_semantics<arbitrary>], iteration_bounds = array<i64: 1>, scalar_prefetch = 0 : i64, scratch_operands = 0 : i64, tpu.core_type = #tpu.core_type<tc>, window_params = [{pipeline_mode = #tpu.pipeline_mode<synchronous>, transform_indices = @transform_0, window_bounds = array<i64: 144, 16>}, {pipeline_mode = #tpu.pipeline_mode<synchronous>, transform_indices = @transform_1, window_bounds = array<i64: 144, 144>}, {pipeline_mode = #tpu.pipeline_mode<synchronous>, transform_indices = @transform_2, window_bounds = array<i64: 16, 48>}, {pipeline_mode = #tpu.pipeline_mode<synchronous>, transform_indices = @transform_3, window_bounds = array<i64: 1, 48>}, {pipeline_mode = #tpu.pipeline_mode<synchronous>, transform_indices = @transform_4, window_bounds = array<i64: 16, 16>}, {pipeline_mode = #tpu.pipeline_mode<synchronous>, transform_indices = @transform_5, window_bounds = array<i64: 1, 16>}, {pipeline_mode = #tpu.pipeline_mode<synchronous>, transform_indices = @transform_6, window_bounds = array<i64: 16, 32>}, {pipeline_mode = #tpu.pipeline_mode<synchronous>, transform_indices = @transform_7, window_bounds = array<i64: 1, 32>}, {pipeline_mode = #tpu.pipeline_mode<synchronous>, transform_indices = @transform_8, window_bounds = array<i64: 32, 16>}, {pipeline_mode = #tpu.pipeline_mode<synchronous>, transform_indices = @transform_9, window_bounds = array<i64: 1, 16>}, {pipeline_mode = #tpu.pipeline_mode<synchronous>, transform_indices = @transform_10, window_bounds = array<i64: 1, 16>}, {pipeline_mode = #tpu.pipeline_mode<synchronous>, transform_indices = @transform_11, window_bounds = array<i64: 1, 16>}, {pipeline_mode = #tpu.pipeline_mode<synchronous>, transform_indices = @transform_12, window_bounds = array<i64: 1, 16>}, {pipeline_mode = #tpu.pipeline_mode<synchronous>, transform_indices = @transform_13, window_bounds = array<i64: 1, 16>}, {pipeline_mode = #tpu.pipeline_mode<synchronous>, transform_indices = @transform_14, window_bounds = array<i64: 144, 16>}]} {
    %c0 = arith.constant 0 : index
    %c0_0 = arith.constant 0 : index
    %0 = vector.load %arg1[%c0, %c0_0] : memref<144x16xf32, #tpu.memory_space<vmem>>, vector<144x16xf32>
    %c0_1 = arith.constant 0 : index
    %c0_2 = arith.constant 0 : index
    %1 = vector.load %arg3[%c0_1, %c0_2] : memref<16x48xf32, #tpu.memory_space<vmem>>, vector<16x48xf32>
    %cst = arith.constant dense<0.000000e+00> : vector<144x48xf32>
    %2 = tpu.matmul %0, %1, %cst {dimension_numbers = #tpu.dot_dimension_numbers<[1], [0], [0], [1], [0, 0, 1, 1], [], []>} : vector<144x16xf32>, vector<16x48xf32>, vector<144x48xf32> -> vector<144x48xf32>
    %c0_3 = arith.constant 0 : index
    %c0_4 = arith.constant 0 : index
    %3 = vector.load %arg4[%c0_3, %c0_4] : memref<1x48xf32, #tpu.memory_space<vmem>>, vector<1x48xf32>
    %4 = vector.broadcast %3 : vector<1x48xf32> to vector<144x48xf32>
    %5 = arith.addf %2, %4 : vector<144x48xf32>
    %c0_5 = arith.constant 0 : index
    %c0_6 = arith.constant 0 : index
    %6 = vector.load %arg2[%c0_5, %c0_6] : memref<144x144xf32, #tpu.memory_space<vmem>>, vector<144x144xf32>
    %c0_7 = arith.constant 0 : index
    %c0_8 = arith.constant 0 : index
    %7 = vector.load %arg5[%c0_7, %c0_8] : memref<16x16xf32, #tpu.memory_space<vmem>>, vector<16x16xf32>
    %cst_9 = arith.constant 0.000000e+00 : f32
    %8 = vector.broadcast %cst_9 : f32 to vector<144x16xf32>
    %9 = vector.extract_strided_slice %5 {offsets = [0, 0], sizes = [144, 8], strides = [1, 1]} : vector<144x48xf32> to vector<144x8xf32>
    %10 = vector.extract_strided_slice %5 {offsets = [0, 16], sizes = [144, 8], strides = [1, 1]} : vector<144x48xf32> to vector<144x8xf32>
    %11 = vector.extract_strided_slice %5 {offsets = [0, 32], sizes = [144, 8], strides = [1, 1]} : vector<144x48xf32> to vector<144x8xf32>
    %cst_10 = arith.constant dense<0.000000e+00> : vector<144x144xf32>
    %12 = tpu.matmul %9, %10, %cst_10 {dimension_numbers = #tpu.dot_dimension_numbers<[1], [1], [0], [0], [0, 0, 1, 0], [], []>} : vector<144x8xf32>, vector<144x8xf32>, vector<144x144xf32> -> vector<144x144xf32>
    %cst_11 = arith.constant 0.353553385 : f32
    %13 = vector.broadcast %cst_11 : f32 to vector<144x144xf32>
    %14 = arith.mulf %12, %13 : vector<144x144xf32>
    %15 = arith.addf %14, %6 : vector<144x144xf32>
    %cst_12 = arith.constant dense<0xFF800000> : vector<144xf32>
    %16 = vector.multi_reduction <maximumf>, %15, %cst_12 [1] : vector<144x144xf32> to vector<144xf32>
    %17 = vector.shape_cast %16 : vector<144xf32> to vector<144x1xf32>
    %18 = vector.broadcast %17 : vector<144x1xf32> to vector<144x144xf32>
    %19 = arith.subf %15, %18 : vector<144x144xf32>
    %20 = math.exp %19 : vector<144x144xf32>
    %cst_13 = arith.constant dense<0.000000e+00> : vector<144xf32>
    %21 = vector.multi_reduction <add>, %20, %cst_13 [1] : vector<144x144xf32> to vector<144xf32>
    %22 = vector.shape_cast %21 : vector<144xf32> to vector<144x1xf32>
    %23 = vector.broadcast %22 : vector<144x1xf32> to vector<144x144xf32>
    %24 = arith.divf %20, %23 : vector<144x144xf32>
    %cst_14 = arith.constant dense<0.000000e+00> : vector<144x8xf32>
    %25 = tpu.matmul %24, %11, %cst_14 {dimension_numbers = #tpu.dot_dimension_numbers<[1], [0], [0], [1], [0, 0, 1, 1], [], []>} : vector<144x144xf32>, vector<144x8xf32>, vector<144x8xf32> -> vector<144x8xf32>
    %26 = vector.extract_strided_slice %7 {offsets = [0, 0], sizes = [8, 16], strides = [1, 1]} : vector<16x16xf32> to vector<8x16xf32>
    %cst_15 = arith.constant dense<0.000000e+00> : vector<144x16xf32>
    %27 = tpu.matmul %25, %26, %cst_15 {dimension_numbers = #tpu.dot_dimension_numbers<[1], [0], [0], [1], [0, 0, 1, 1], [], []>} : vector<144x8xf32>, vector<8x16xf32>, vector<144x16xf32> -> vector<144x16xf32>
    %28 = arith.addf %8, %27 : vector<144x16xf32>
    %29 = vector.extract_strided_slice %5 {offsets = [0, 8], sizes = [144, 8], strides = [1, 1]} : vector<144x48xf32> to vector<144x8xf32>
    %30 = vector.extract_strided_slice %5 {offsets = [0, 24], sizes = [144, 8], strides = [1, 1]} : vector<144x48xf32> to vector<144x8xf32>
    %31 = vector.extract_strided_slice %5 {offsets = [0, 40], sizes = [144, 8], strides = [1, 1]} : vector<144x48xf32> to vector<144x8xf32>
    %cst_16 = arith.constant dense<0.000000e+00> : vector<144x144xf32>
    %32 = tpu.matmul %29, %30, %cst_16 {dimension_numbers = #tpu.dot_dimension_numbers<[1], [1], [0], [0], [0, 0, 1, 0], [], []>} : vector<144x8xf32>, vector<144x8xf32>, vector<144x144xf32> -> vector<144x144xf32>
    %cst_17 = arith.constant 0.353553385 : f32
    %33 = vector.broadcast %cst_17 : f32 to vector<144x144xf32>
    %34 = arith.mulf %32, %33 : vector<144x144xf32>
    %35 = arith.addf %34, %6 : vector<144x144xf32>
    %cst_18 = arith.constant dense<0xFF800000> : vector<144xf32>
    %36 = vector.multi_reduction <maximumf>, %35, %cst_18 [1] : vector<144x144xf32> to vector<144xf32>
    %37 = vector.shape_cast %36 : vector<144xf32> to vector<144x1xf32>
    %38 = vector.broadcast %37 : vector<144x1xf32> to vector<144x144xf32>
    %39 = arith.subf %35, %38 : vector<144x144xf32>
    %40 = math.exp %39 : vector<144x144xf32>
    %cst_19 = arith.constant dense<0.000000e+00> : vector<144xf32>
    %41 = vector.multi_reduction <add>, %40, %cst_19 [1] : vector<144x144xf32> to vector<144xf32>
    %42 = vector.shape_cast %41 : vector<144xf32> to vector<144x1xf32>
    %43 = vector.broadcast %42 : vector<144x1xf32> to vector<144x144xf32>
    %44 = arith.divf %40, %43 : vector<144x144xf32>
    %cst_20 = arith.constant dense<0.000000e+00> : vector<144x8xf32>
    %45 = tpu.matmul %44, %31, %cst_20 {dimension_numbers = #tpu.dot_dimension_numbers<[1], [0], [0], [1], [0, 0, 1, 1], [], []>} : vector<144x144xf32>, vector<144x8xf32>, vector<144x8xf32> -> vector<144x8xf32>
    %46 = vector.extract_strided_slice %7 {offsets = [8, 0], sizes = [8, 16], strides = [1, 1]} : vector<16x16xf32> to vector<8x16xf32>
    %cst_21 = arith.constant dense<0.000000e+00> : vector<144x16xf32>
    %47 = tpu.matmul %45, %46, %cst_21 {dimension_numbers = #tpu.dot_dimension_numbers<[1], [0], [0], [1], [0, 0, 1, 1], [], []>} : vector<144x8xf32>, vector<8x16xf32>, vector<144x16xf32> -> vector<144x16xf32>
    %48 = arith.addf %28, %47 : vector<144x16xf32>
    %c0_22 = arith.constant 0 : index
    %c0_23 = arith.constant 0 : index
    %49 = vector.load %arg6[%c0_22, %c0_23] : memref<1x16xf32, #tpu.memory_space<vmem>>, vector<1x16xf32>
    %50 = vector.broadcast %49 : vector<1x16xf32> to vector<144x16xf32>
    %51 = arith.addf %48, %50 : vector<144x16xf32>
    %52 = arith.addf %0, %51 : vector<144x16xf32>
    %cst_24 = arith.constant dense<0.000000e+00> : vector<144xf32>
    %53 = vector.multi_reduction <add>, %52, %cst_24 [1] : vector<144x16xf32> to vector<144xf32>
    %54 = vector.shape_cast %53 : vector<144xf32> to vector<144x1xf32>
    %cst_25 = arith.constant 1.600000e+01 : f32
    %55 = vector.broadcast %cst_25 : f32 to vector<144x1xf32>
    %56 = arith.divf %54, %55 : vector<144x1xf32>
    %57 = vector.broadcast %56 : vector<144x1xf32> to vector<144x16xf32>
    %58 = arith.subf %52, %57 : vector<144x16xf32>
    %59 = arith.mulf %58, %58 : vector<144x16xf32>
    %cst_26 = arith.constant dense<0.000000e+00> : vector<144xf32>
    %60 = vector.multi_reduction <add>, %59, %cst_26 [1] : vector<144x16xf32> to vector<144xf32>
    %61 = vector.shape_cast %60 : vector<144xf32> to vector<144x1xf32>
    %cst_27 = arith.constant 1.600000e+01 : f32
    %62 = vector.broadcast %cst_27 : f32 to vector<144x1xf32>
    %63 = arith.divf %61, %62 : vector<144x1xf32>
    %64 = vector.broadcast %56 : vector<144x1xf32> to vector<144x16xf32>
    %65 = arith.subf %52, %64 : vector<144x16xf32>
    %cst_28 = arith.constant 9.99999974E-6 : f32
    %66 = vector.broadcast %cst_28 : f32 to vector<144x1xf32>
    %67 = arith.addf %63, %66 : vector<144x1xf32>
    %68 = math.rsqrt %67 : vector<144x1xf32>
    %69 = vector.broadcast %68 : vector<144x1xf32> to vector<144x16xf32>
    %70 = arith.mulf %65, %69 : vector<144x16xf32>
    %c0_29 = arith.constant 0 : index
    %c0_30 = arith.constant 0 : index
    %71 = vector.load %arg11[%c0_29, %c0_30] : memref<1x16xf32, #tpu.memory_space<vmem>>, vector<1x16xf32>
    %72 = vector.broadcast %71 : vector<1x16xf32> to vector<144x16xf32>
    %73 = arith.mulf %70, %72 : vector<144x16xf32>
    %c0_31 = arith.constant 0 : index
    %c0_32 = arith.constant 0 : index
    %74 = vector.load %arg12[%c0_31, %c0_32] : memref<1x16xf32, #tpu.memory_space<vmem>>, vector<1x16xf32>
    %75 = vector.broadcast %74 : vector<1x16xf32> to vector<144x16xf32>
    %76 = arith.addf %73, %75 : vector<144x16xf32>
    %c0_33 = arith.constant 0 : index
    %c0_34 = arith.constant 0 : index
    %77 = vector.load %arg7[%c0_33, %c0_34] : memref<16x32xf32, #tpu.memory_space<vmem>>, vector<16x32xf32>
    %cst_35 = arith.constant dense<0.000000e+00> : vector<144x32xf32>
    %78 = tpu.matmul %76, %77, %cst_35 {dimension_numbers = #tpu.dot_dimension_numbers<[1], [0], [0], [1], [0, 0, 1, 1], [], []>} : vector<144x16xf32>, vector<16x32xf32>, vector<144x32xf32> -> vector<144x32xf32>
    %c0_36 = arith.constant 0 : index
    %c0_37 = arith.constant 0 : index
    %79 = vector.load %arg8[%c0_36, %c0_37] : memref<1x32xf32, #tpu.memory_space<vmem>>, vector<1x32xf32>
    %80 = vector.broadcast %79 : vector<1x32xf32> to vector<144x32xf32>
    %81 = arith.addf %78, %80 : vector<144x32xf32>
    %cst_38 = arith.constant 5.000000e-01 : f32
    %82 = vector.broadcast %cst_38 : f32 to vector<144x32xf32>
    %83 = arith.mulf %82, %81 : vector<144x32xf32>
    %cst_39 = arith.constant 0.707106769 : f32
    %84 = vector.broadcast %cst_39 : f32 to vector<144x32xf32>
    %85 = arith.mulf %81, %84 : vector<144x32xf32>
    %cst_40 = arith.constant 0.000000e+00 : f32
    %86 = vector.broadcast %cst_40 : f32 to vector<144x32xf32>
    %87 = arith.cmpf oge, %85, %86 : vector<144x32xf32>
    %cst_41 = arith.constant 1.000000e+00 : f32
    %cst_42 = arith.constant -1.000000e+00 : f32
    %88 = vector.broadcast %cst_41 : f32 to vector<144x32xf32>
    %89 = vector.broadcast %cst_42 : f32 to vector<144x32xf32>
    %90 = arith.select %87, %88, %89 : vector<144x32xi1>, vector<144x32xf32>
    %91 = math.absf %85 : vector<144x32xf32>
    %cst_43 = arith.constant 0.327591091 : f32
    %92 = vector.broadcast %cst_43 : f32 to vector<144x32xf32>
    %93 = arith.mulf %92, %91 : vector<144x32xf32>
    %cst_44 = arith.constant 1.000000e+00 : f32
    %94 = vector.broadcast %cst_44 : f32 to vector<144x32xf32>
    %95 = arith.addf %94, %93 : vector<144x32xf32>
    %cst_45 = arith.constant 1.000000e+00 : f32
    %96 = vector.broadcast %cst_45 : f32 to vector<144x32xf32>
    %97 = arith.divf %96, %95 : vector<144x32xf32>
    %cst_46 = arith.constant 1.06140542 : f32
    %98 = vector.broadcast %cst_46 : f32 to vector<144x32xf32>
    %99 = arith.mulf %97, %98 : vector<144x32xf32>
    %cst_47 = arith.constant -1.45315206 : f32
    %100 = vector.broadcast %cst_47 : f32 to vector<144x32xf32>
    %101 = arith.addf %100, %99 : vector<144x32xf32>
    %102 = arith.mulf %97, %101 : vector<144x32xf32>
    %cst_48 = arith.constant 1.42141378 : f32
    %103 = vector.broadcast %cst_48 : f32 to vector<144x32xf32>
    %104 = arith.addf %103, %102 : vector<144x32xf32>
    %105 = arith.mulf %97, %104 : vector<144x32xf32>
    %cst_49 = arith.constant -0.284496725 : f32
    %106 = vector.broadcast %cst_49 : f32 to vector<144x32xf32>
    %107 = arith.addf %106, %105 : vector<144x32xf32>
    %108 = arith.mulf %97, %107 : vector<144x32xf32>
    %cst_50 = arith.constant 0.254829586 : f32
    %109 = vector.broadcast %cst_50 : f32 to vector<144x32xf32>
    %110 = arith.addf %109, %108 : vector<144x32xf32>
    %111 = arith.mulf %97, %110 : vector<144x32xf32>
    %cst_51 = arith.constant 0.000000e+00 : f32
    %112 = vector.broadcast %cst_51 : f32 to vector<144x32xf32>
    %113 = arith.subf %112, %91 : vector<144x32xf32>
    %114 = arith.mulf %113, %91 : vector<144x32xf32>
    %115 = math.exp %114 : vector<144x32xf32>
    %116 = arith.mulf %111, %115 : vector<144x32xf32>
    %cst_52 = arith.constant 1.000000e+00 : f32
    %117 = vector.broadcast %cst_52 : f32 to vector<144x32xf32>
    %118 = arith.subf %117, %116 : vector<144x32xf32>
    %119 = arith.mulf %90, %118 : vector<144x32xf32>
    %cst_53 = arith.constant 1.000000e+00 : f32
    %120 = vector.broadcast %cst_53 : f32 to vector<144x32xf32>
    %121 = arith.addf %120, %119 : vector<144x32xf32>
    %122 = arith.mulf %83, %121 : vector<144x32xf32>
    %c0_54 = arith.constant 0 : index
    %c0_55 = arith.constant 0 : index
    %123 = vector.load %arg9[%c0_54, %c0_55] : memref<32x16xf32, #tpu.memory_space<vmem>>, vector<32x16xf32>
    %cst_56 = arith.constant dense<0.000000e+00> : vector<144x16xf32>
    %124 = tpu.matmul %122, %123, %cst_56 {dimension_numbers = #tpu.dot_dimension_numbers<[1], [0], [0], [1], [0, 0, 1, 1], [], []>} : vector<144x32xf32>, vector<32x16xf32>, vector<144x16xf32> -> vector<144x16xf32>
    %c0_57 = arith.constant 0 : index
    %c0_58 = arith.constant 0 : index
    %125 = vector.load %arg10[%c0_57, %c0_58] : memref<1x16xf32, #tpu.memory_space<vmem>>, vector<1x16xf32>
    %126 = vector.broadcast %125 : vector<1x16xf32> to vector<144x16xf32>
    %127 = arith.addf %124, %126 : vector<144x16xf32>
    %128 = arith.addf %76, %127 : vector<144x16xf32>
    %cst_59 = arith.constant dense<0.000000e+00> : vector<144xf32>
    %129 = vector.multi_reduction <add>, %128, %cst_59 [1] : vector<144x16xf32> to vector<144xf32>
    %130 = vector.shape_cast %129 : vector<144xf32> to vector<144x1xf32>
    %cst_60 = arith.constant 1.600000e+01 : f32
    %131 = vector.broadcast %cst_60 : f32 to vector<144x1xf32>
    %132 = arith.divf %130, %131 : vector<144x1xf32>
    %133 = vector.broadcast %132 : vector<144x1xf32> to vector<144x16xf32>
    %134 = arith.subf %128, %133 : vector<144x16xf32>
    %135 = arith.mulf %134, %134 : vector<144x16xf32>
    %cst_61 = arith.constant dense<0.000000e+00> : vector<144xf32>
    %136 = vector.multi_reduction <add>, %135, %cst_61 [1] : vector<144x16xf32> to vector<144xf32>
    %137 = vector.shape_cast %136 : vector<144xf32> to vector<144x1xf32>
    %cst_62 = arith.constant 1.600000e+01 : f32
    %138 = vector.broadcast %cst_62 : f32 to vector<144x1xf32>
    %139 = arith.divf %137, %138 : vector<144x1xf32>
    %140 = vector.broadcast %132 : vector<144x1xf32> to vector<144x16xf32>
    %141 = arith.subf %128, %140 : vector<144x16xf32>
    %cst_63 = arith.constant 9.99999974E-6 : f32
    %142 = vector.broadcast %cst_63 : f32 to vector<144x1xf32>
    %143 = arith.addf %139, %142 : vector<144x1xf32>
    %144 = math.rsqrt %143 : vector<144x1xf32>
    %145 = vector.broadcast %144 : vector<144x1xf32> to vector<144x16xf32>
    %146 = arith.mulf %141, %145 : vector<144x16xf32>
    %c0_64 = arith.constant 0 : index
    %c0_65 = arith.constant 0 : index
    %147 = vector.load %arg13[%c0_64, %c0_65] : memref<1x16xf32, #tpu.memory_space<vmem>>, vector<1x16xf32>
    %148 = vector.broadcast %147 : vector<1x16xf32> to vector<144x16xf32>
    %149 = arith.mulf %146, %148 : vector<144x16xf32>
    %c0_66 = arith.constant 0 : index
    %c0_67 = arith.constant 0 : index
    %150 = vector.load %arg14[%c0_66, %c0_67] : memref<1x16xf32, #tpu.memory_space<vmem>>, vector<1x16xf32>
    %151 = vector.broadcast %150 : vector<1x16xf32> to vector<144x16xf32>
    %152 = arith.addf %149, %151 : vector<144x16xf32>
    %c0_68 = arith.constant 0 : index
    %c0_69 = arith.constant 0 : index
    %153 = vector.load %arg15[%c0_68, %c0_69] : memref<144x16xf32, #tpu.memory_space<vmem>>, vector<144x16xf32>
    tpu.vector_store %arg15[%c0_68, %c0_69], %152 {strides = array<i32>} : memref<144x16xf32, #tpu.memory_space<vmem>>, vector<144x16xf32>,
    return
  }
  func.func @transform_0(%arg0: i32) -> (i32, i32) {
    %c0_i32 = arith.constant 0 : i32
    %c0_i32_0 = arith.constant 0 : i32
    %c0_i32_1 = arith.constant 0 : i32
    return %c0_i32, %c0_i32_0 : i32, i32
  }
  func.func @transform_1(%arg0: i32) -> (i32, i32) {
    %c0_i32 = arith.constant 0 : i32
    %c0_i32_0 = arith.constant 0 : i32
    %c0_i32_1 = arith.constant 0 : i32
    return %c0_i32, %c0_i32_0 : i32, i32
  }
  func.func @transform_2(%arg0: i32) -> (i32, i32) {
    %c0_i32 = arith.constant 0 : i32
    %c0_i32_0 = arith.constant 0 : i32
    %c0_i32_1 = arith.constant 0 : i32
    return %c0_i32, %c0_i32_0 : i32, i32
  }
  func.func @transform_3(%arg0: i32) -> (i32, i32) {
    %c0_i32 = arith.constant 0 : i32
    %c0_i32_0 = arith.constant 0 : i32
    %c0_i32_1 = arith.constant 0 : i32
    return %c0_i32, %c0_i32_0 : i32, i32
  }
  func.func @transform_4(%arg0: i32) -> (i32, i32) {
    %c0_i32 = arith.constant 0 : i32
    %c0_i32_0 = arith.constant 0 : i32
    %c0_i32_1 = arith.constant 0 : i32
    return %c0_i32, %c0_i32_0 : i32, i32
  }
  func.func @transform_5(%arg0: i32) -> (i32, i32) {
    %c0_i32 = arith.constant 0 : i32
    %c0_i32_0 = arith.constant 0 : i32
    %c0_i32_1 = arith.constant 0 : i32
    return %c0_i32, %c0_i32_0 : i32, i32
  }
  func.func @transform_6(%arg0: i32) -> (i32, i32) {
    %c0_i32 = arith.constant 0 : i32
    %c0_i32_0 = arith.constant 0 : i32
    %c0_i32_1 = arith.constant 0 : i32
    return %c0_i32, %c0_i32_0 : i32, i32
  }
  func.func @transform_7(%arg0: i32) -> (i32, i32) {
    %c0_i32 = arith.constant 0 : i32
    %c0_i32_0 = arith.constant 0 : i32
    %c0_i32_1 = arith.constant 0 : i32
    return %c0_i32, %c0_i32_0 : i32, i32
  }
  func.func @transform_8(%arg0: i32) -> (i32, i32) {
    %c0_i32 = arith.constant 0 : i32
    %c0_i32_0 = arith.constant 0 : i32
    %c0_i32_1 = arith.constant 0 : i32
    return %c0_i32, %c0_i32_0 : i32, i32
  }
  func.func @transform_9(%arg0: i32) -> (i32, i32) {
    %c0_i32 = arith.constant 0 : i32
    %c0_i32_0 = arith.constant 0 : i32
    %c0_i32_1 = arith.constant 0 : i32
    return %c0_i32, %c0_i32_0 : i32, i32
  }
  func.func @transform_10(%arg0: i32) -> (i32, i32) {
    %c0_i32 = arith.constant 0 : i32
    %c0_i32_0 = arith.constant 0 : i32
    %c0_i32_1 = arith.constant 0 : i32
    return %c0_i32, %c0_i32_0 : i32, i32
  }
  func.func @transform_11(%arg0: i32) -> (i32, i32) {
    %c0_i32 = arith.constant 0 : i32
    %c0_i32_0 = arith.constant 0 : i32
    %c0_i32_1 = arith.constant 0 : i32
    return %c0_i32, %c0_i32_0 : i32, i32
  }
  func.func @transform_12(%arg0: i32) -> (i32, i32) {
    %c0_i32 = arith.constant 0 : i32
    %c0_i32_0 = arith.constant 0 : i32
    %c0_i32_1 = arith.constant 0 : i32
    return %c0_i32, %c0_i32_0 : i32, i32
  }
  func.func @transform_13(%arg0: i32) -> (i32, i32) {
    %c0_i32 = arith.constant 0 : i32
    %c0_i32_0 = arith.constant 0 : i32
    %c0_i32_1 = arith.constant 0 : i32
    return %c0_i32, %c0_i32_0 : i32, i32
  }
  func.func @transform_14(%arg0: i32) -> (i32, i32) {
    %c0_i32 = arith.constant 0 : i32
    %c0_i32_0 = arith.constant 0 : i32
    %c0_i32_1 = arith.constant 0 : i32
    return %c0_i32, %c0_i32_0 : i32, i32
  }
}

module attributes {stable_mosaic.version = 11 : i64} {
  func.func @_conv_pair_kernel(%arg0: i32, %arg1: memref<8x72xf32, #tpu.memory_space<vmem>>, %arg2: memref<72x48xf32, #tpu.memory_space<vmem>>, %arg3: memref<1x48xf32, #tpu.memory_space<vmem>>, %arg4: memref<8x144xf32, #tpu.memory_space<vmem>>, %arg5: memref<144x48xf32, #tpu.memory_space<vmem>>, %arg6: memref<1x48xf32, #tpu.memory_space<vmem>>, %arg7: memref<8x48xf32, #tpu.memory_space<vmem>>) attributes {dimension_semantics = [#tpu.dimension_semantics<arbitrary>], iteration_bounds = array<i64: 1>, scalar_prefetch = 0 : i64, scratch_operands = 0 : i64, tpu.core_type = #tpu.core_type<tc>, window_params = [{pipeline_mode = #tpu.pipeline_mode<synchronous>, transform_indices = @transform_0, window_bounds = array<i64: 8, 72>}, {pipeline_mode = #tpu.pipeline_mode<synchronous>, transform_indices = @transform_1, window_bounds = array<i64: 72, 48>}, {pipeline_mode = #tpu.pipeline_mode<synchronous>, transform_indices = @transform_2, window_bounds = array<i64: 1, 48>}, {pipeline_mode = #tpu.pipeline_mode<synchronous>, transform_indices = @transform_3, window_bounds = array<i64: 8, 144>}, {pipeline_mode = #tpu.pipeline_mode<synchronous>, transform_indices = @transform_4, window_bounds = array<i64: 144, 48>}, {pipeline_mode = #tpu.pipeline_mode<synchronous>, transform_indices = @transform_5, window_bounds = array<i64: 1, 48>}, {pipeline_mode = #tpu.pipeline_mode<synchronous>, transform_indices = @transform_6, window_bounds = array<i64: 8, 48>}]} {
    %c0 = arith.constant 0 : index
    %c0_0 = arith.constant 0 : index
    %0 = vector.load %arg1[%c0, %c0_0] : memref<8x72xf32, #tpu.memory_space<vmem>>, vector<8x72xf32>
    %c0_1 = arith.constant 0 : index
    %c0_2 = arith.constant 0 : index
    %1 = vector.load %arg2[%c0_1, %c0_2] : memref<72x48xf32, #tpu.memory_space<vmem>>, vector<72x48xf32>
    %cst = arith.constant dense<0.000000e+00> : vector<8x48xf32>
    %2 = tpu.matmul %0, %1, %cst {dimension_numbers = #tpu.dot_dimension_numbers<[1], [0], [0], [1], [0, 0, 1, 1], [], []>} : vector<8x72xf32>, vector<72x48xf32>, vector<8x48xf32> -> vector<8x48xf32>
    %c0_3 = arith.constant 0 : index
    %c0_4 = arith.constant 0 : index
    %3 = vector.load %arg3[%c0_3, %c0_4] : memref<1x48xf32, #tpu.memory_space<vmem>>, vector<1x48xf32>
    %4 = vector.broadcast %3 : vector<1x48xf32> to vector<8x48xf32>
    %5 = arith.addf %2, %4 : vector<8x48xf32>
    %c0_5 = arith.constant 0 : index
    %c0_6 = arith.constant 0 : index
    %6 = vector.load %arg4[%c0_5, %c0_6] : memref<8x144xf32, #tpu.memory_space<vmem>>, vector<8x144xf32>
    %c0_7 = arith.constant 0 : index
    %c0_8 = arith.constant 0 : index
    %7 = vector.load %arg5[%c0_7, %c0_8] : memref<144x48xf32, #tpu.memory_space<vmem>>, vector<144x48xf32>
    %cst_9 = arith.constant dense<0.000000e+00> : vector<8x48xf32>
    %8 = tpu.matmul %6, %7, %cst_9 {dimension_numbers = #tpu.dot_dimension_numbers<[1], [0], [0], [1], [0, 0, 1, 1], [], []>} : vector<8x144xf32>, vector<144x48xf32>, vector<8x48xf32> -> vector<8x48xf32>
    %9 = arith.addf %5, %8 : vector<8x48xf32>
    %c0_10 = arith.constant 0 : index
    %c0_11 = arith.constant 0 : index
    %10 = vector.load %arg6[%c0_10, %c0_11] : memref<1x48xf32, #tpu.memory_space<vmem>>, vector<1x48xf32>
    %11 = vector.broadcast %10 : vector<1x48xf32> to vector<8x48xf32>
    %12 = arith.addf %9, %11 : vector<8x48xf32>
    %cst_12 = arith.constant 0.000000e+00 : f32
    %13 = vector.broadcast %cst_12 : f32 to vector<8x48xf32>
    %14 = arith.cmpf oge, %12, %13 : vector<8x48xf32>
    %cst_13 = arith.constant 2.000000e-01 : f32
    %15 = vector.broadcast %cst_13 : f32 to vector<8x48xf32>
    %16 = arith.mulf %15, %12 : vector<8x48xf32>
    %17 = arith.select %14, %12, %16 : vector<8x48xi1>, vector<8x48xf32>
    %c0_14 = arith.constant 0 : index
    %c0_15 = arith.constant 0 : index
    %18 = vector.load %arg7[%c0_14, %c0_15] : memref<8x48xf32, #tpu.memory_space<vmem>>, vector<8x48xf32>
    tpu.vector_store %arg7[%c0_14, %c0_15], %17 {strides = array<i32>} : memref<8x48xf32, #tpu.memory_space<vmem>>, vector<8x48xf32>,
    return
  }
  func.func @transform_0(%arg0: i32) -> (i32, i32) {
    %c0_i32 = arith.constant 0 : i32
    %c0_i32_0 = arith.constant 0 : i32
    %c0_i32_1 = arith.constant 0 : i32
    return %c0_i32, %c0_i32_0 : i32, i32
  }
  func.func @transform_1(%arg0: i32) -> (i32, i32) {
    %c0_i32 = arith.constant 0 : i32
    %c0_i32_0 = arith.constant 0 : i32
    %c0_i32_1 = arith.constant 0 : i32
    return %c0_i32, %c0_i32_0 : i32, i32
  }
  func.func @transform_2(%arg0: i32) -> (i32, i32) {
    %c0_i32 = arith.constant 0 : i32
    %c0_i32_0 = arith.constant 0 : i32
    %c0_i32_1 = arith.constant 0 : i32
    return %c0_i32, %c0_i32_0 : i32, i32
  }
  func.func @transform_3(%arg0: i32) -> (i32, i32) {
    %c0_i32 = arith.constant 0 : i32
    %c0_i32_0 = arith.constant 0 : i32
    %c0_i32_1 = arith.constant 0 : i32
    return %c0_i32, %c0_i32_0 : i32, i32
  }
  func.func @transform_4(%arg0: i32) -> (i32, i32) {
    %c0_i32 = arith.constant 0 : i32
    %c0_i32_0 = arith.constant 0 : i32
    %c0_i32_1 = arith.constant 0 : i32
    return %c0_i32, %c0_i32_0 : i32, i32
  }
  func.func @transform_5(%arg0: i32) -> (i32, i32) {
    %c0_i32 = arith.constant 0 : i32
    %c0_i32_0 = arith.constant 0 : i32
    %c0_i32_1 = arith.constant 0 : i32
    return %c0_i32, %c0_i32_0 : i32, i32
  }
  func.func @transform_6(%arg0: i32) -> (i32, i32) {
    %c0_i32 = arith.constant 0 : i32
    %c0_i32_0 = arith.constant 0 : i32
    %c0_i32_1 = arith.constant 0 : i32
    return %c0_i32, %c0_i32_0 : i32, i32
  }
}

module attributes {stable_mosaic.version = 11 : i64} {
  func.func @_conv_kernel(%arg0: i32, %arg1: memref<4x144xf32, #tpu.memory_space<vmem>>, %arg2: memref<144x48xf32, #tpu.memory_space<vmem>>, %arg3: memref<1x48xf32, #tpu.memory_space<vmem>>, %arg4: memref<4x48xf32, #tpu.memory_space<vmem>>) attributes {dimension_semantics = [#tpu.dimension_semantics<arbitrary>], iteration_bounds = array<i64: 1>, scalar_prefetch = 0 : i64, scratch_operands = 0 : i64, tpu.core_type = #tpu.core_type<tc>, window_params = [{pipeline_mode = #tpu.pipeline_mode<synchronous>, transform_indices = @transform_0, window_bounds = array<i64: 4, 144>}, {pipeline_mode = #tpu.pipeline_mode<synchronous>, transform_indices = @transform_1, window_bounds = array<i64: 144, 48>}, {pipeline_mode = #tpu.pipeline_mode<synchronous>, transform_indices = @transform_2, window_bounds = array<i64: 1, 48>}, {pipeline_mode = #tpu.pipeline_mode<synchronous>, transform_indices = @transform_3, window_bounds = array<i64: 4, 48>}]} {
    %c0 = arith.constant 0 : index
    %c0_0 = arith.constant 0 : index
    %0 = vector.load %arg1[%c0, %c0_0] : memref<4x144xf32, #tpu.memory_space<vmem>>, vector<4x144xf32>
    %c0_1 = arith.constant 0 : index
    %c0_2 = arith.constant 0 : index
    %1 = vector.load %arg2[%c0_1, %c0_2] : memref<144x48xf32, #tpu.memory_space<vmem>>, vector<144x48xf32>
    %cst = arith.constant dense<0.000000e+00> : vector<4x48xf32>
    %2 = tpu.matmul %0, %1, %cst {dimension_numbers = #tpu.dot_dimension_numbers<[1], [0], [0], [1], [0, 0, 1, 1], [], []>} : vector<4x144xf32>, vector<144x48xf32>, vector<4x48xf32> -> vector<4x48xf32>
    %c0_3 = arith.constant 0 : index
    %c0_4 = arith.constant 0 : index
    %3 = vector.load %arg3[%c0_3, %c0_4] : memref<1x48xf32, #tpu.memory_space<vmem>>, vector<1x48xf32>
    %4 = vector.broadcast %3 : vector<1x48xf32> to vector<4x48xf32>
    %5 = arith.addf %2, %4 : vector<4x48xf32>
    %cst_5 = arith.constant 0.000000e+00 : f32
    %6 = vector.broadcast %cst_5 : f32 to vector<4x48xf32>
    %7 = arith.cmpf oge, %5, %6 : vector<4x48xf32>
    %cst_6 = arith.constant 2.000000e-01 : f32
    %8 = vector.broadcast %cst_6 : f32 to vector<4x48xf32>
    %9 = arith.mulf %8, %5 : vector<4x48xf32>
    %10 = arith.select %7, %5, %9 : vector<4x48xi1>, vector<4x48xf32>
    %c0_7 = arith.constant 0 : index
    %c0_8 = arith.constant 0 : index
    %11 = vector.load %arg4[%c0_7, %c0_8] : memref<4x48xf32, #tpu.memory_space<vmem>>, vector<4x48xf32>
    tpu.vector_store %arg4[%c0_7, %c0_8], %10 {strides = array<i32>} : memref<4x48xf32, #tpu.memory_space<vmem>>, vector<4x48xf32>,
    return
  }
  func.func @transform_0(%arg0: i32) -> (i32, i32) {
    %c0_i32 = arith.constant 0 : i32
    %c0_i32_0 = arith.constant 0 : i32
    %c0_i32_1 = arith.constant 0 : i32
    return %c0_i32, %c0_i32_0 : i32, i32
  }
  func.func @transform_1(%arg0: i32) -> (i32, i32) {
    %c0_i32 = arith.constant 0 : i32
    %c0_i32_0 = arith.constant 0 : i32
    %c0_i32_1 = arith.constant 0 : i32
    return %c0_i32, %c0_i32_0 : i32, i32
  }
  func.func @transform_2(%arg0: i32) -> (i32, i32) {
    %c0_i32 = arith.constant 0 : i32
    %c0_i32_0 = arith.constant 0 : i32
    %c0_i32_1 = arith.constant 0 : i32
    return %c0_i32, %c0_i32_0 : i32, i32
  }
  func.func @transform_3(%arg0: i32) -> (i32, i32) {
    %c0_i32 = arith.constant 0 : i32
    %c0_i32_0 = arith.constant 0 : i32
    %c0_i32_1 = arith.constant 0 : i32
    return %c0_i32, %c0_i32_0 : i32, i32
  }
}

module attributes {stable_mosaic.version = 11 : i64} {
  func.func @_conv_kernel(%arg0: i32, %arg1: memref<8x144xf32, #tpu.memory_space<vmem>>, %arg2: memref<144x48xf32, #tpu.memory_space<vmem>>, %arg3: memref<1x48xf32, #tpu.memory_space<vmem>>, %arg4: memref<8x48xf32, #tpu.memory_space<vmem>>) attributes {dimension_semantics = [#tpu.dimension_semantics<arbitrary>], iteration_bounds = array<i64: 1>, scalar_prefetch = 0 : i64, scratch_operands = 0 : i64, tpu.core_type = #tpu.core_type<tc>, window_params = [{pipeline_mode = #tpu.pipeline_mode<synchronous>, transform_indices = @transform_0, window_bounds = array<i64: 8, 144>}, {pipeline_mode = #tpu.pipeline_mode<synchronous>, transform_indices = @transform_1, window_bounds = array<i64: 144, 48>}, {pipeline_mode = #tpu.pipeline_mode<synchronous>, transform_indices = @transform_2, window_bounds = array<i64: 1, 48>}, {pipeline_mode = #tpu.pipeline_mode<synchronous>, transform_indices = @transform_3, window_bounds = array<i64: 8, 48>}]} {
    %c0 = arith.constant 0 : index
    %c0_0 = arith.constant 0 : index
    %0 = vector.load %arg1[%c0, %c0_0] : memref<8x144xf32, #tpu.memory_space<vmem>>, vector<8x144xf32>
    %c0_1 = arith.constant 0 : index
    %c0_2 = arith.constant 0 : index
    %1 = vector.load %arg2[%c0_1, %c0_2] : memref<144x48xf32, #tpu.memory_space<vmem>>, vector<144x48xf32>
    %cst = arith.constant dense<0.000000e+00> : vector<8x48xf32>
    %2 = tpu.matmul %0, %1, %cst {dimension_numbers = #tpu.dot_dimension_numbers<[1], [0], [0], [1], [0, 0, 1, 1], [], []>} : vector<8x144xf32>, vector<144x48xf32>, vector<8x48xf32> -> vector<8x48xf32>
    %c0_3 = arith.constant 0 : index
    %c0_4 = arith.constant 0 : index
    %3 = vector.load %arg3[%c0_3, %c0_4] : memref<1x48xf32, #tpu.memory_space<vmem>>, vector<1x48xf32>
    %4 = vector.broadcast %3 : vector<1x48xf32> to vector<8x48xf32>
    %5 = arith.addf %2, %4 : vector<8x48xf32>
    %cst_5 = arith.constant 0.000000e+00 : f32
    %6 = vector.broadcast %cst_5 : f32 to vector<8x48xf32>
    %7 = arith.cmpf oge, %5, %6 : vector<8x48xf32>
    %cst_6 = arith.constant 2.000000e-01 : f32
    %8 = vector.broadcast %cst_6 : f32 to vector<8x48xf32>
    %9 = arith.mulf %8, %5 : vector<8x48xf32>
    %10 = arith.select %7, %5, %9 : vector<8x48xi1>, vector<8x48xf32>
    %c0_7 = arith.constant 0 : index
    %c0_8 = arith.constant 0 : index
    %11 = vector.load %arg4[%c0_7, %c0_8] : memref<8x48xf32, #tpu.memory_space<vmem>>, vector<8x48xf32>
    tpu.vector_store %arg4[%c0_7, %c0_8], %10 {strides = array<i32>} : memref<8x48xf32, #tpu.memory_space<vmem>>, vector<8x48xf32>,
    return
  }
  func.func @transform_0(%arg0: i32) -> (i32, i32) {
    %c0_i32 = arith.constant 0 : i32
    %c0_i32_0 = arith.constant 0 : i32
    %c0_i32_1 = arith.constant 0 : i32
    return %c0_i32, %c0_i32_0 : i32, i32
  }
  func.func @transform_1(%arg0: i32) -> (i32, i32) {
    %c0_i32 = arith.constant 0 : i32
    %c0_i32_0 = arith.constant 0 : i32
    %c0_i32_1 = arith.constant 0 : i32
    return %c0_i32, %c0_i32_0 : i32, i32
  }
  func.func @transform_2(%arg0: i32) -> (i32, i32) {
    %c0_i32 = arith.constant 0 : i32
    %c0_i32_0 = arith.constant 0 : i32
    %c0_i32_1 = arith.constant 0 : i32
    return %c0_i32, %c0_i32_0 : i32, i32
  }
  func.func @transform_3(%arg0: i32) -> (i32, i32) {
    %c0_i32 = arith.constant 0 : i32
    %c0_i32_0 = arith.constant 0 : i32
    %c0_i32_1 = arith.constant 0 : i32
    return %c0_i32, %c0_i32_0 : i32, i32
  }
}

module attributes {stable_mosaic.version = 11 : i64} {
  func.func @_conv_kernel(%arg0: i32, %arg1: memref<16x144xf32, #tpu.memory_space<vmem>>, %arg2: memref<144x24xf32, #tpu.memory_space<vmem>>, %arg3: memref<1x24xf32, #tpu.memory_space<vmem>>, %arg4: memref<16x24xf32, #tpu.memory_space<vmem>>) attributes {dimension_semantics = [#tpu.dimension_semantics<arbitrary>], iteration_bounds = array<i64: 1>, scalar_prefetch = 0 : i64, scratch_operands = 0 : i64, tpu.core_type = #tpu.core_type<tc>, window_params = [{pipeline_mode = #tpu.pipeline_mode<synchronous>, transform_indices = @transform_0, window_bounds = array<i64: 16, 144>}, {pipeline_mode = #tpu.pipeline_mode<synchronous>, transform_indices = @transform_1, window_bounds = array<i64: 144, 24>}, {pipeline_mode = #tpu.pipeline_mode<synchronous>, transform_indices = @transform_2, window_bounds = array<i64: 1, 24>}, {pipeline_mode = #tpu.pipeline_mode<synchronous>, transform_indices = @transform_3, window_bounds = array<i64: 16, 24>}]} {
    %c0 = arith.constant 0 : index
    %c0_0 = arith.constant 0 : index
    %0 = vector.load %arg1[%c0, %c0_0] : memref<16x144xf32, #tpu.memory_space<vmem>>, vector<16x144xf32>
    %c0_1 = arith.constant 0 : index
    %c0_2 = arith.constant 0 : index
    %1 = vector.load %arg2[%c0_1, %c0_2] : memref<144x24xf32, #tpu.memory_space<vmem>>, vector<144x24xf32>
    %cst = arith.constant dense<0.000000e+00> : vector<16x24xf32>
    %2 = tpu.matmul %0, %1, %cst {dimension_numbers = #tpu.dot_dimension_numbers<[1], [0], [0], [1], [0, 0, 1, 1], [], []>} : vector<16x144xf32>, vector<144x24xf32>, vector<16x24xf32> -> vector<16x24xf32>
    %c0_3 = arith.constant 0 : index
    %c0_4 = arith.constant 0 : index
    %3 = vector.load %arg3[%c0_3, %c0_4] : memref<1x24xf32, #tpu.memory_space<vmem>>, vector<1x24xf32>
    %4 = vector.broadcast %3 : vector<1x24xf32> to vector<16x24xf32>
    %5 = arith.addf %2, %4 : vector<16x24xf32>
    %c0_5 = arith.constant 0 : index
    %c0_6 = arith.constant 0 : index
    %6 = vector.load %arg4[%c0_5, %c0_6] : memref<16x24xf32, #tpu.memory_space<vmem>>, vector<16x24xf32>
    tpu.vector_store %arg4[%c0_5, %c0_6], %5 {strides = array<i32>} : memref<16x24xf32, #tpu.memory_space<vmem>>, vector<16x24xf32>,
    return
  }
  func.func @transform_0(%arg0: i32) -> (i32, i32) {
    %c0_i32 = arith.constant 0 : i32
    %c0_i32_0 = arith.constant 0 : i32
    %c0_i32_1 = arith.constant 0 : i32
    return %c0_i32, %c0_i32_0 : i32, i32
  }
  func.func @transform_1(%arg0: i32) -> (i32, i32) {
    %c0_i32 = arith.constant 0 : i32
    %c0_i32_0 = arith.constant 0 : i32
    %c0_i32_1 = arith.constant 0 : i32
    return %c0_i32, %c0_i32_0 : i32, i32
  }
  func.func @transform_2(%arg0: i32) -> (i32, i32) {
    %c0_i32 = arith.constant 0 : i32
    %c0_i32_0 = arith.constant 0 : i32
    %c0_i32_1 = arith.constant 0 : i32
    return %c0_i32, %c0_i32_0 : i32, i32
  }
  func.func @transform_3(%arg0: i32) -> (i32, i32) {
    %c0_i32 = arith.constant 0 : i32
    %c0_i32_0 = arith.constant 0 : i32
    %c0_i32_1 = arith.constant 0 : i32
    return %c0_i32, %c0_i32_0 : i32, i32
  }
}

</mosaic_0001>

<bundles_post_ra>
// kernel: tile.9
= control target key start
LH: loop header
LB: loop body
LE: loop exit
PB: predicated region body
PF: predicated region fallthrough
CT: control target
= control target key end

     0   :  { %vm3_vm0 = vcmask 130048   ;;  %s232_s0 = inlined_call_operand.vmem [shape: f32[16,6,16], index: 0, kind: input, shape index: {}]   ;;  %s233_s1 = inlined_call_operand.vmem [shape: f32[96,16], index: 1, kind: output, shape index: {}]  }
   0x1   :  { %v2_v0 = vld [vmem:[%s232_s0] sm:$0x3f]   ;;  %v80_v1 = vld [vmem:[%s232_s0 + $0x8] sm:$0x3f]   ;;  %v82_v2 = vld [vmem:[%s232_s0 + $0x10] sm:$0x3f]  }
   0x2   :  { %4 = vst.msk [vmem:[%s233_s1] sm:$0x3f] %vm3_vm0, %v2_v0   ;;  %81 = vst.msk [vmem:[%s233_s1 + $0x6] sm:$0x3f] %vm3_vm0, %v80_v1   ;;  %v84_v3 = vld [vmem:[%s232_s0 + $0x18] sm:$0x3f]  }
   0x3   :  { %83 = vst.msk [vmem:[%s233_s1 + $0xc] sm:$0x3f] %vm3_vm0, %v82_v2   ;;  %v86_v4 = vld [vmem:[%s232_s0 + $0x20] sm:$0x3f]   ;;  %v88_v5 = vld [vmem:[%s232_s0 + $0x28] sm:$0x3f]  }
   0x4   :  { %85 = vst.msk [vmem:[%s233_s1 + $0x12] sm:$0x3f] %vm3_vm0, %v84_v3   ;;  %87 = vst.msk [vmem:[%s233_s1 + $0x18] sm:$0x3f] %vm3_vm0, %v86_v4   ;;  %v90_v6 = vld [vmem:[%s232_s0 + $0x30] sm:$0x3f]  }
   0x5   :  { %89 = vst.msk [vmem:[%s233_s1 + $0x1e] sm:$0x3f] %vm3_vm0, %v88_v5   ;;  %v92_v7 = vld [vmem:[%s232_s0 + $0x38] sm:$0x3f]   ;;  %v94_v8 = vld [vmem:[%s232_s0 + $0x40] sm:$0x3f]  }
   0x6   :  { %91 = vst.msk [vmem:[%s233_s1 + $0x24] sm:$0x3f] %vm3_vm0, %v90_v6   ;;  %93 = vst.msk [vmem:[%s233_s1 + $0x2a] sm:$0x3f] %vm3_vm0, %v92_v7   ;;  %v96_v9 = vld [vmem:[%s232_s0 + $0x48] sm:$0x3f]  }
   0x7   :  { %95 = vst.msk [vmem:[%s233_s1 + $0x30] sm:$0x3f] %vm3_vm0, %v94_v8   ;;  %v98_v10 = vld [vmem:[%s232_s0 + $0x50] sm:$0x3f]   ;;  %v100_v11 = vld [vmem:[%s232_s0 + $0x58] sm:$0x3f]  }
   0x8   :  { %97 = vst.msk [vmem:[%s233_s1 + $0x36] sm:$0x3f] %vm3_vm0, %v96_v9   ;;  %99 = vst.msk [vmem:[%s233_s1 + $0x3c] sm:$0x3f] %vm3_vm0, %v98_v10   ;;  %v102_v12 = vld [vmem:[%s232_s0 + $0x60] sm:$0x3f]  }
   0x9   :  { %101 = vst.msk [vmem:[%s233_s1 + $0x42] sm:$0x3f] %vm3_vm0, %v100_v11   ;;  %v104_v13 = vld [vmem:[%s232_s0 + $0x68] sm:$0x3f]   ;;  %v106_v14 = vld [vmem:[%s232_s0 + $0x70] sm:$0x3f]  }
   0xa   :  { %103 = vst.msk [vmem:[%s233_s1 + $0x48] sm:$0x3f] %vm3_vm0, %v102_v12   ;;  %105 = vst.msk [vmem:[%s233_s1 + $0x4e] sm:$0x3f] %vm3_vm0, %v104_v13   ;;  %v108_v15 = vld [vmem:[%s232_s0 + $0x78] sm:$0x3f]  }
   0xb   :  { %107 = vst.msk [vmem:[%s233_s1 + $0x54] sm:$0x3f] %vm3_vm0, %v106_v14   ;;  %109 = vst.msk [vmem:[%s233_s1 + $0x5a] sm:$0x3f] %vm3_vm0, %v108_v15  }

// kernel: motion_ae_forward.7
= control target key start
LH: loop header
LB: loop body
LE: loop exit
PB: predicated region body
PF: predicated region fallthrough
CT: control target
= control target key end

     0   :  { %vm100_vm0 = vcmask 1043456   ;;  %v1037_v2 = vmov 0.0   ;;  %vm63_vm1 = vcmask 31744   ;;  %vm788_vm2 = vcmask 130048   ;;  %s1515_s1 = inlined_call_operand.vmem [shape: f32[4,512], index: 1, kind: input, shape index: {}]   ;;  %s1516_s0 = inlined_call_operand.vmem [shape: f32[96,4], index: 0, kind: input, shape index: {}]   ;;  %s1517_s3 = inlined_call_operand.vmem [shape: f32[512,16], index: 3, kind: input, shape index: {}]   ;;  %s1518_s2 = inlined_call_operand.vmem [shape: f32[1,512], index: 2, kind: input, shape index: {}]   ;;  %s1519_s4 = inlined_call_operand.vmem [shape: f32[1,16], index: 4, kind: input, shape index: {}]   ;;  %s1520_s5 = inlined_call_operand.vmem [shape: f32[96,16], index: 5, kind: input, shape index: {}]   ;;  %s1521_s6 = inlined_call_operand.vmem [shape: f32[96,16], index: 6, kind: output, shape index: {}]  }
   0x1   :  { %v35_v0 = vld [vmem:[%s1515_s1] sm:$0xff]  ;;  %v36_v1 = vld [vmem:[%s1515_s1 + $0x8] sm:$0xff]  ;;  %173 = vmatprep.mubr.f32.mxu0 %v1037_v2  ;;  %310 = vmatprep.mubr.f32.mxu1 %v1037_v2  ;;  %v449_v18 = vld [vmem:[%s1517_s3 + $0x90] sm:$0xff] }
   0x2   :  { %v61_v3 = vcombine.high %v35_v0, %v35_v0  ;;  %v62_v4 = vcombine.high %v36_v1, %v36_v1  ;;  %v23_v5 = vld [vmem:[%s1516_s0] sm:$0xff]  ;;  %v24_v6 = vld [vmem:[%s1516_s0 + $0x8] sm:$0xff]  ;;  %v450_v19 = vld [vmem:[%s1517_s3 + $0x98] sm:$0xff] }
   0x3   :  { %v447_v7 = vld [vmem:[%s1517_s3 + $0x80] sm:$0xff]  ;;  %v448_v8 = vld [vmem:[%s1517_s3 + $0x88] sm:$0xff]  ;;  %v974_v21 = vpack.c.bf16 %v450_v19, %v449_v18  ;;  %v433_v22 = vld [vmem:[%s1517_s3 + $0x10] sm:$0xff] }
   0x4   :  { %805 = vmatprep.subr.msk.mxu0 %vm100_vm0, %v61_v3  ;;  %819 = vmatprep.subr.msk.mxu1 %vm100_vm0, %v62_v4  ;;  %v431_v9 = vld [vmem:[%s1517_s3] sm:$0xff]  ;;  %v432_v10 = vld [vmem:[%s1517_s3 + $0x8] sm:$0xff]  ;;  %v970_v11 = vpack.c.bf16 %v448_v8, %v447_v7  ;;  %v434_v23 = vld [vmem:[%s1517_s3 + $0x18] sm:$0xff] }
   0x5   :  { %806 = vmatpush1.msk.msra.mxu0 %vm100_vm0, %v35_v0  ;;  %820 = vmatpush1.msk.msra.mxu1 %vm100_vm0, %v36_v1  ;;  %v479_v12 = vld [vmem:[%s1517_s3 + $0x180] sm:$0xff]  ;;  %v480_v13 = vld [vmem:[%s1517_s3 + $0x188] sm:$0xff]  ;;  %v972_v15 = vpack.c.bf16 %v432_v10, %v431_v9  ;;  %v481_v24 = vld [vmem:[%s1517_s3 + $0x190] sm:$0xff]  ;;  %v976_v31 = vpack.c.bf16 %v434_v23, %v433_v22 }
   0x6   :  { %807 = vmatmul.mubr.msk.f32.vlgmr.msra.gmra.mrb[0].mxu0 %vm63_vm1, %v23_v5  ;;  %821 = vmatmul.mubr.msk.f32.vlgmr.msra.gmra.mrb[0].mxu1 %vm63_vm1, %v23_v5  ;;  %v463_v14 = vld [vmem:[%s1517_s3 + $0x100] sm:$0xff]  ;;  %v1002_v16 = vpack.c.bf16 %v480_v13, %v479_v12  ;;  %v464_v17 = vld [vmem:[%s1517_s3 + $0x108] sm:$0xff]  ;;  %v482_v25 = vld [vmem:[%s1517_s3 + $0x198] sm:$0xff] }
   0x7   :  { %179 = vmatprep.mubr.f32.mxu0 %v1037_v2  ;;  %316 = vmatprep.mubr.f32.mxu1 %v1037_v2  ;;  %v1004_v20 = vpack.c.bf16 %v464_v17, %v463_v14  ;;  %v465_v26 = vld [vmem:[%s1517_s3 + $0x110] sm:$0xff]  ;;  %v466_v27 = vld [vmem:[%s1517_s3 + $0x118] sm:$0xff]  ;;  %v451_v29 = vld [vmem:[%s1517_s3 + $0xa0] sm:$0xff]  ;;  %v1006_v32 = vpack.c.bf16 %v482_v25, %v481_v24 }
   0x8   :  { %971 = vmatprep.subr.bf16.mxu0 %v970_v11  ;;  %v25_v28 = vld [vmem:[%s1516_s0 + $0x10] sm:$0xff]  ;;  %v452_v30 = vld [vmem:[%s1517_s3 + $0xa8] sm:$0xff]  ;;  %1003 = vmatprep.subr.bf16.mxu1 %v1002_v16  ;;  %v435_v33 = vld [vmem:[%s1517_s3 + $0x20] sm:$0xff]  ;;  %v1008_v35 = vpack.c.bf16 %v466_v27, %v465_v26 }
   0x9   :  { %973 = vmatpush3.bf16.msra.mxu0 %v972_v15  ;;  %v436_v34 = vld [vmem:[%s1517_s3 + $0x28] sm:$0xff]  ;;  %1005 = vmatpush3.bf16.msra.mxu1 %v1004_v20  ;;  %v978_v36 = vpack.c.bf16 %v452_v30, %v451_v29  ;;  %v483_v37 = vld [vmem:[%s1517_s3 + $0x1a0] sm:$0xff]  ;;  %v453_v41 = vld [vmem:[%s1517_s3 + $0xb0] sm:$0xff] }
   0xa   :  { %808 = vmatmul.mubr.msk.f32.gmra.mrb[2].mxu0 %vm63_vm1, %v24_v6  ;;  %822 = vmatmul.mubr.msk.f32.gmra.mrb[2].mxu1 %vm63_vm1, %v24_v6  ;;  %v484_v38 = vld [vmem:[%s1517_s3 + $0x1a8] sm:$0xff]  ;;  %v467_v39 = vld [vmem:[%s1517_s3 + $0x120] sm:$0xff]  ;;  %v454_v42 = vld [vmem:[%s1517_s3 + $0xb8] sm:$0xff]  ;;  %v980_v44 = vpack.c.bf16 %v436_v34, %v435_v33 }
   0xb   :  { %185 = vmatprep.mubr.f32.mxu0 %v1037_v2  ;;  %322 = vmatprep.mubr.f32.mxu1 %v1037_v2  ;;  %v468_v40 = vld [vmem:[%s1517_s3 + $0x128] sm:$0xff]  ;;  %v26_v43 = vld [vmem:[%s1516_s0 + $0x18] sm:$0xff]  ;;  %v1010_v45 = vpack.c.bf16 %v484_v38, %v483_v37  ;;  %v437_v46 = vld [vmem:[%s1517_s3 + $0x30] sm:$0xff]  ;;  %v982_v49 = vpack.c.bf16 %v454_v42, %v453_v41 }
   0xc   :  { %975 = vmatprep.subr.bf16.mxu0 %v974_v21  ;;  %1007 = vmatprep.subr.bf16.mxu1 %v1006_v32  ;;  %v438_v47 = vld [vmem:[%s1517_s3 + $0x38] sm:$0xff]  ;;  %v1012_v48 = vpack.c.bf16 %v468_v40, %v467_v39  ;;  %v485_v50 = vld [vmem:[%s1517_s3 + $0x1b0] sm:$0xff]  ;;  %v455_v54 = vld [vmem:[%s1517_s3 + $0xc0] sm:$0xff] }
   0xd   :  { %977 = vmatpush3.bf16.msra.mxu0 %v976_v31  ;;  %1009 = vmatpush3.bf16.msra.mxu1 %v1008_v35  ;;  %v486_v51 = vld [vmem:[%s1517_s3 + $0x1b8] sm:$0xff]  ;;  %v469_v52 = vld [vmem:[%s1517_s3 + $0x130] sm:$0xff]  ;;  %v456_v55 = vld [vmem:[%s1517_s3 + $0xc8] sm:$0xff]  ;;  %v984_v57 = vpack.c.bf16 %v438_v47, %v437_v46 }
   0xe   :  { %809 = vmatmul.mubr.msk.f32.gmra.mrb[4].mxu0 %vm63_vm1, %v25_v28  ;;  %823 = vmatmul.mubr.msk.f32.gmra.mrb[4].mxu1 %vm63_vm1, %v25_v28  ;;  %v470_v53 = vld [vmem:[%s1517_s3 + $0x138] sm:$0xff]  ;;  %v27_v56 = vld [vmem:[%s1516_s0 + $0x20] sm:$0xff]  ;;  %v1014_v58 = vpack.c.bf16 %v486_v51, %v485_v50  ;;  %v440_v60 = vld [vmem:[%s1517_s3 + $0x48] sm:$0xff]  ;;  %v986_v62 = vpack.c.bf16 %v456_v55, %v455_v54 }
   0xf   :  { %191 = vmatprep.mubr.f32.mxu0 %v1037_v2  ;;  %328 = vmatprep.mubr.f32.mxu1 %v1037_v2  ;;  %v439_v59 = vld [vmem:[%s1517_s3 + $0x40] sm:$0xff]  ;;  %v1016_v61 = vpack.c.bf16 %v470_v53, %v469_v52  ;;  %v488_v0 = vld [vmem:[%s1517_s3 + $0x1c8] sm:$0xff]  ;;  %v457_v4 = vld [vmem:[%s1517_s3 + $0xd0] sm:$0xff] }
  0x10   :  { %979 = vmatprep.subr.bf16.mxu0 %v978_v36  ;;  %1011 = vmatprep.subr.bf16.mxu1 %v1010_v45  ;;  %v487_v63 = vld [vmem:[%s1517_s3 + $0x1c0] sm:$0xff]  ;;  %v472_v3 = vld [vmem:[%s1517_s3 + $0x148] sm:$0xff]  ;;  %v458_v5 = vld [vmem:[%s1517_s3 + $0xd8] sm:$0xff]  ;;  %v988_v7 = vpack.c.bf16 %v440_v60, %v439_v59 }
  0x11   :  { %981 = vmatpush3.bf16.msra.mxu0 %v980_v44  ;;  %1013 = vmatpush3.bf16.msra.mxu1 %v1012_v48  ;;  %v471_v1 = vld [vmem:[%s1517_s3 + $0x140] sm:$0xff]  ;;  %v28_v6 = vld [vmem:[%s1516_s0 + $0x28] sm:$0xff]  ;;  %v1018_v8 = vpack.c.bf16 %v488_v0, %v487_v63  ;;  %v441_v9 = vld [vmem:[%s1517_s3 + $0x50] sm:$0xff]  ;;  %v990_v12 = vpack.c.bf16 %v458_v5, %v457_v4 }
  0x12   :  { %810 = vmatmul.mubr.msk.f32.gmra.mrb[6].mxu0 %vm63_vm1, %v26_v43  ;;  %824 = vmatmul.mubr.msk.f32.gmra.mrb[6].mxu1 %vm63_vm1, %v26_v43  ;;  %v442_v10 = vld [vmem:[%s1517_s3 + $0x58] sm:$0xff]  ;;  %v1020_v11 = vpack.c.bf16 %v472_v3, %v471_v1  ;;  %v489_v13 = vld [vmem:[%s1517_s3 + $0x1d0] sm:$0xff]  ;;  %v459_v17 = vld [vmem:[%s1517_s3 + $0xe0] sm:$0xff] }
  0x13   :  { %197 = vmatprep.mubr.f32.mxu0 %v1037_v2  ;;  %334 = vmatprep.mubr.f32.mxu1 %v1037_v2  ;;  %v490_v14 = vld [vmem:[%s1517_s3 + $0x1d8] sm:$0xff]  ;;  %v473_v15 = vld [vmem:[%s1517_s3 + $0x150] sm:$0xff]  ;;  %v460_v18 = vld [vmem:[%s1517_s3 + $0xe8] sm:$0xff]  ;;  %v992_v20 = vpack.c.bf16 %v442_v10, %v441_v9 }
  0x14   :  { %983 = vmatprep.subr.bf16.mxu0 %v982_v49  ;;  %1015 = vmatprep.subr.bf16.mxu1 %v1014_v58  ;;  %v474_v16 = vld [vmem:[%s1517_s3 + $0x158] sm:$0xff]  ;;  %v29_v19 = vld [vmem:[%s1516_s0 + $0x30] sm:$0xff]  ;;  %v1022_v21 = vpack.c.bf16 %v490_v14, %v489_v13  ;;  %v443_v22 = vld [vmem:[%s1517_s3 + $0x60] sm:$0xff]  ;;  %v994_v24 = vpack.c.bf16 %v460_v18, %v459_v17  ;;  %v39_v49 = vlaneseq }
  0x15   :  { %985 = vmatpush3.bf16.msra.mxu0 %v984_v57  ;;  %1017 = vmatpush3.bf16.msra.mxu1 %v1016_v61  ;;  %v1024_v23 = vpack.c.bf16 %v474_v16, %v473_v15  ;;  %v444_v25 = vld [vmem:[%s1517_s3 + $0x68] sm:$0xff]  ;;  %v491_v26 = vld [vmem:[%s1517_s3 + $0x1e0] sm:$0xff]  ;;  %v30_v30 = vld [vmem:[%s1516_s0 + $0x38] sm:$0xff] }
  0x16   :  { %811 = vmatmul.mubr.msk.f32.gmra.mrb[8].mxu0 %vm63_vm1, %v27_v56  ;;  %825 = vmatmul.mubr.msk.f32.gmra.mrb[8].mxu1 %vm63_vm1, %v27_v56  ;;  %v492_v27 = vld [vmem:[%s1517_s3 + $0x1e8] sm:$0xff]  ;;  %v475_v28 = vld [vmem:[%s1517_s3 + $0x160] sm:$0xff]  ;;  %v996_v31 = vpack.c.bf16 %v444_v25, %v443_v22  ;;  %v33_v36 = vld [vmem:[%s1516_s0 + $0x50] sm:$0xff]  ;;  %v40_v50 = vshrl.u32 %v39_v49, 7 }
  0x17   :  { %203 = vmatprep.mubr.f32.mxu0 %v1037_v2  ;;  %340 = vmatprep.mubr.f32.mxu1 %v1037_v2  ;;  %v476_v29 = vld [vmem:[%s1517_s3 + $0x168] sm:$0xff]  ;;  %v1026_v32 = vpack.c.bf16 %v492_v27, %v491_v26  ;;  %v31_v34 = vld [vmem:[%s1516_s0 + $0x40] sm:$0xff]  ;;  %v34_v37 = vld [vmem:[%s1516_s0 + $0x58] sm:$0xff] }
  0x18   :  { %987 = vmatprep.subr.bf16.mxu0 %v986_v62  ;;  %1019 = vmatprep.subr.bf16.mxu1 %v1018_v8  ;;  %v1028_v33 = vpack.c.bf16 %v476_v29, %v475_v28  ;;  %v32_v35 = vld [vmem:[%s1516_s0 + $0x48] sm:$0xff]  ;;  %v461_v38 = vld [vmem:[%s1517_s3 + $0xf0] sm:$0xff]  ;;  %v462_v39 = vld [vmem:[%s1517_s3 + $0xf8] sm:$0xff]  ;;  %v41_v51 = vsub.s32 0, %v40_v50  ;;  %v49_v52 = vsub.s32 2, %v40_v50  ;;  %v45_v54 = vsub.s32 1, %v40_v50 }
  0x19   :  { %989 = vmatpush3.bf16.msra.mxu0 %v988_v7  ;;  %1021 = vmatpush3.bf16.msra.mxu1 %v1020_v11  ;;  %v998_v40 = vpack.c.bf16 %v462_v39, %v461_v38  ;;  %v445_v41 = vld [vmem:[%s1517_s3 + $0x70] sm:$0xff]  ;;  %v446_v42 = vld [vmem:[%s1517_s3 + $0x78] sm:$0xff]  ;;  %v37_v53 = vld [vmem:[%s1518_s2] sm:$0xf]  ;;  %v53_v55 = vsub.s32 3, %v40_v50 }
  0x1a   :  { %812 = vmatmul.mubr.msk.f32.gmra.mrb[10].mxu0 %vm63_vm1, %v28_v6  ;;  %826 = vmatmul.mubr.msk.f32.gmra.mrb[10].mxu1 %vm63_vm1, %v28_v6  ;;  %v494_v43 = vld [vmem:[%s1517_s3 + $0x1f8] sm:$0xff]  ;;  %v1000_v44 = vpack.c.bf16 %v446_v42, %v445_v41  ;;  %v477_v46 = vld [vmem:[%s1517_s3 + $0x170] sm:$0xff]  ;;  %v1358_v56 = vrot.slane %v37_v53, %v41_v51  ;;  %v1360_v57 = vrot.slane %v37_v53, %v49_v52 }
  0x1b   :  { %209 = vmatprep.mubr.f32.mxu0 %v1037_v2  ;;  %346 = vmatprep.mubr.f32.mxu1 %v1037_v2  ;;  %v478_v47 = vld [vmem:[%s1517_s3 + $0x178] sm:$0xff]  ;;  %v1362_v58 = vrot.slane %v37_v53, %v45_v54  ;;  %v1364_v59 = vrot.slane %v37_v53, %v53_v55 }
  0x1c   :  { %991 = vmatprep.subr.bf16.mxu0 %v990_v12  ;;  %1023 = vmatprep.subr.bf16.mxu1 %v1022_v21  ;;  %v1032_v48 = vpack.c.bf16 %v478_v47, %v477_v46 }
  0x1d   :  { %993 = vmatpush3.bf16.msra.mxu0 %v992_v20  ;;  %1025 = vmatpush3.bf16.msra.mxu1 %v1024_v23 }
  0x1e   :  { %813 = vmatmul.mubr.msk.f32.gmra.mrb[12].mxu0 %vm63_vm1, %v29_v19  ;;  %827 = vmatmul.mubr.msk.f32.gmra.mrb[12].mxu1 %vm63_vm1, %v29_v19 }
  0x1f   :  { %215 = vmatprep.mubr.f32.mxu0 %v1037_v2  ;;  %352 = vmatprep.mubr.f32.mxu1 %v1037_v2 }
  0x20   :  { %995 = vmatprep.subr.bf16.mxu0 %v994_v24  ;;  %1027 = vmatprep.subr.bf16.mxu1 %v1026_v32 }
  0x21   :  { %997 = vmatpush3.bf16.msra.mxu0 %v996_v31  ;;  %1029 = vmatpush3.bf16.msra.mxu1 %v1028_v33 }
  0x22   :  { %814 = vmatmul.mubr.msk.f32.gmra.mrb[14].mxu0 %vm63_vm1, %v30_v30  ;;  %828 = vmatmul.mubr.msk.f32.gmra.mrb[14].mxu1 %vm63_vm1, %v30_v30 }
  0x23   :  { %221 = vmatprep.mubr.f32.mxu0 %v1037_v2  ;;  %358 = vmatprep.mubr.f32.mxu1 %v1037_v2 }
  0x24   :  { %999 = vmatprep.subr.bf16.mxu0 %v998_v40 }
  0x25   :  { %1001 = vmatpush3.bf16.msra.mxu0 %v1000_v44 }
  0x26   :  { %815 = vmatmul.mubr.msk.f32.gmra.mrb[16].mxu0 %vm63_vm1, %v31_v34  ;;  %829 = vmatmul.mubr.msk.f32.gmra.mrb[16].mxu1 %vm63_vm1, %v31_v34 }
  0x27   :  { %227 = vmatprep.mubr.f32.mxu0 %v1037_v2  ;;  %364 = vmatprep.mubr.f32.mxu1 %v1037_v2 }
  0x2a   :  { %816 = vmatmul.mubr.msk.f32.gmra.mrb[18].mxu0 %vm63_vm1, %v32_v35  ;;  %830 = vmatmul.mubr.msk.f32.gmra.mrb[18].mxu1 %vm63_vm1, %v32_v35 }
  0x2b   :  { %233 = vmatprep.mubr.f32.mxu0 %v1037_v2  ;;  %370 = vmatprep.mubr.f32.mxu1 %v1037_v2 }
  0x2e   :  { %817 = vmatmul.mubr.msk.f32.gmra.mrb[20].mxu0 %vm63_vm1, %v33_v36  ;;  %831 = vmatmul.mubr.msk.f32.gmra.mrb[20].mxu1 %vm63_vm1, %v33_v36 }
  0x2f   :  { %239 = vmatprep.mubr.f32.mxu0 %v1037_v2  ;;  %376 = vmatprep.mubr.f32.mxu1 %v1037_v2  ;;  %v493_v2 = vld [vmem:[%s1517_s3 + $0x1f0] sm:$0xff] }
  0x30   :  { %v1030_v45 = vpack.c.bf16 %v494_v43, %v493_v2 }
  0x32   :  { %818 = vmatmul.mubr.msk.f32.gmra.mrb[22].mxu0 %vm63_vm1, %v34_v37  ;;  %832 = vmatmul.mubr.msk.f32.gmra.mrb[22].mxu1 %vm63_vm1, %v34_v37 }
  0x33   :  { %1031 = vmatprep.subr.bf16.mxu1 %v1030_v45 }
  0x34   :  { %1033 = vmatpush3.bf16.msra.mxu1 %v1032_v48 }
  0xd9   :  { %v175_v60 = vpop.f32.mrb[0].mxu0  ;;  %v312_v61 = vpop.f32.mrb[0].mxu1 }
  0xda   :  { %v176_v62 = vadd.f32 %v175_v60, %v1358_v56  ;;  %v313_v63 = vadd.f32 %v312_v61, %v1360_v57  ;;  %v177_v0 = vpop.f32.mrb[1].mxu0  ;;  %v314_v1 = vpop.f32.mrb[1].mxu1 }
  0xdb   :  { %v178_v3 = vadd.f32 %v177_v0, %v1362_v58  ;;  %v315_v4 = vadd.f32 %v314_v1, %v1364_v59 }
  0xdc   :  { %v385_v5 = vmax.f32 %v313_v63, 0.0  ;;  %v383_v10 = vmax.f32 %v176_v62, 0.0 }
  0xdd   :  { %v384_v6 = vmax.f32 %v178_v3, 0.0  ;;  %v386_v7 = vmax.f32 %v315_v4, 0.0  ;;  %v181_v8 = vpop.f32.mrb[2].mxu0  ;;  %v318_v9 = vpop.f32.mrb[2].mxu1 }
  0xde   :  { %v182_v11 = vadd.f32 %v181_v8, %v1358_v56  ;;  %v319_v12 = vadd.f32 %v318_v9, %v1360_v57  ;;  %v183_v13 = vpop.f32.mrb[3].mxu0  ;;  %v320_v14 = vpop.f32.mrb[3].mxu1 }
  0xdf   :  { %v184_v15 = vadd.f32 %v183_v13, %v1362_v58  ;;  %v321_v16 = vadd.f32 %v320_v14, %v1364_v59  ;;  %566 = vmatprep.mubr.f32.mxu0 %v384_v6  ;;  %691 = vmatprep.mubr.f32.mxu1 %v386_v7 }
  0xe0   :  { %v389_v17 = vmax.f32 %v319_v12, 0.0  ;;  %567 = vmatmul.mubr.f32.vlgmr.msra.gmra.mrb[24].mxu0 %v383_v10  ;;  %692 = vmatmul.mubr.f32.vlgmr.msra.gmra.mrb[24].mxu1 %v385_v5  ;;  %v387_v22 = vmax.f32 %v182_v11, 0.0 }
  0xe1   :  { %v388_v18 = vmax.f32 %v184_v15, 0.0  ;;  %v390_v19 = vmax.f32 %v321_v16, 0.0  ;;  %v187_v20 = vpop.f32.mrb[4].mxu0  ;;  %v324_v21 = vpop.f32.mrb[4].mxu1 }
  0xe2   :  { %v188_v23 = vadd.f32 %v187_v20, %v1358_v56  ;;  %v325_v24 = vadd.f32 %v324_v21, %v1360_v57  ;;  %v189_v25 = vpop.f32.mrb[5].mxu0  ;;  %v326_v26 = vpop.f32.mrb[5].mxu1 }
  0xe3   :  { %v190_v27 = vadd.f32 %v189_v25, %v1362_v58  ;;  %v327_v28 = vadd.f32 %v326_v26, %v1364_v59  ;;  %571 = vmatprep.mubr.f32.mxu0 %v388_v18  ;;  %696 = vmatprep.mubr.f32.mxu1 %v390_v19 }
  0xe4   :  { %v393_v29 = vmax.f32 %v325_v24, 0.0  ;;  %572 = vmatmul.mubr.f32.gmra.mrb[26].mxu0 %v387_v22  ;;  %697 = vmatmul.mubr.f32.gmra.mrb[26].mxu1 %v389_v17  ;;  %v391_v34 = vmax.f32 %v188_v23, 0.0 }
  0xe5   :  { %v392_v30 = vmax.f32 %v190_v27, 0.0  ;;  %v394_v31 = vmax.f32 %v327_v28, 0.0  ;;  %v193_v32 = vpop.f32.mrb[6].mxu0  ;;  %v330_v33 = vpop.f32.mrb[6].mxu1 }
  0xe6   :  { %v194_v35 = vadd.f32 %v193_v32, %v1358_v56  ;;  %v331_v36 = vadd.f32 %v330_v33, %v1360_v57  ;;  %v195_v37 = vpop.f32.mrb[7].mxu0  ;;  %v332_v38 = vpop.f32.mrb[7].mxu1 }
  0xe7   :  { %v196_v39 = vadd.f32 %v195_v37, %v1362_v58  ;;  %v333_v2 = vadd.f32 %v332_v38, %v1364_v59  ;;  %576 = vmatprep.mubr.f32.mxu0 %v392_v30  ;;  %701 = vmatprep.mubr.f32.mxu1 %v394_v31 }
  0xe8   :  { %v397_v40 = vmax.f32 %v331_v36, 0.0  ;;  %577 = vmatmul.mubr.f32.gmra.mrb[28].mxu0 %v391_v34  ;;  %702 = vmatmul.mubr.f32.gmra.mrb[28].mxu1 %v393_v29  ;;  %v395_v45 = vmax.f32 %v194_v35, 0.0 }
  0xe9   :  { %v396_v41 = vmax.f32 %v196_v39, 0.0  ;;  %v398_v42 = vmax.f32 %v333_v2, 0.0  ;;  %v199_v43 = vpop.f32.mrb[8].mxu0  ;;  %v336_v44 = vpop.f32.mrb[8].mxu1 }
  0xea   :  { %v200_v46 = vadd.f32 %v199_v43, %v1358_v56  ;;  %v337_v47 = vadd.f32 %v336_v44, %v1360_v57  ;;  %v201_v48 = vpop.f32.mrb[9].mxu0  ;;  %v338_v49 = vpop.f32.mrb[9].mxu1 }
  0xeb   :  { %v202_v50 = vadd.f32 %v201_v48, %v1362_v58  ;;  %v339_v51 = vadd.f32 %v338_v49, %v1364_v59  ;;  %581 = vmatprep.mubr.f32.mxu0 %v396_v41  ;;  %706 = vmatprep.mubr.f32.mxu1 %v398_v42 }
  0xec   :  { %v401_v52 = vmax.f32 %v337_v47, 0.0  ;;  %582 = vmatmul.mubr.f32.gmra.mrb[30].mxu0 %v395_v45  ;;  %707 = vmatmul.mubr.f32.gmra.mrb[30].mxu1 %v397_v40  ;;  %v399_v61 = vmax.f32 %v200_v46, 0.0 }
  0xed   :  { %v400_v53 = vmax.f32 %v202_v50, 0.0  ;;  %v402_v54 = vmax.f32 %v339_v51, 0.0  ;;  %v205_v55 = vpop.f32.mrb[10].mxu0  ;;  %v342_v60 = vpop.f32.mrb[10].mxu1 }
  0xee   :  { %v206_v62 = vadd.f32 %v205_v55, %v1358_v56  ;;  %v343_v63 = vadd.f32 %v342_v60, %v1360_v57  ;;  %v207_v0 = vpop.f32.mrb[11].mxu0  ;;  %v344_v1 = vpop.f32.mrb[11].mxu1 }
  0xef   :  { %v208_v3 = vadd.f32 %v207_v0, %v1362_v58  ;;  %v345_v4 = vadd.f32 %v344_v1, %v1364_v59  ;;  %586 = vmatprep.mubr.f32.mxu0 %v400_v53  ;;  %711 = vmatprep.mubr.f32.mxu1 %v402_v54 }
  0xf0   :  { %v405_v5 = vmax.f32 %v343_v63, 0.0  ;;  %587 = vmatmul.mubr.f32.gmra.mrb[32].mxu0 %v399_v61  ;;  %712 = vmatmul.mubr.f32.gmra.mrb[32].mxu1 %v401_v52  ;;  %v403_v10 = vmax.f32 %v206_v62, 0.0 }
  0xf1   :  { %v404_v6 = vmax.f32 %v208_v3, 0.0  ;;  %v406_v7 = vmax.f32 %v345_v4, 0.0  ;;  %v211_v8 = vpop.f32.mrb[12].mxu0  ;;  %v348_v9 = vpop.f32.mrb[12].mxu1 }
  0xf2   :  { %v212_v11 = vadd.f32 %v211_v8, %v1358_v56  ;;  %v349_v12 = vadd.f32 %v348_v9, %v1360_v57  ;;  %v213_v13 = vpop.f32.mrb[13].mxu0  ;;  %v350_v14 = vpop.f32.mrb[13].mxu1 }
  0xf3   :  { %v214_v15 = vadd.f32 %v213_v13, %v1362_v58  ;;  %v351_v16 = vadd.f32 %v350_v14, %v1364_v59  ;;  %591 = vmatprep.mubr.f32.mxu0 %v404_v6  ;;  %716 = vmatprep.mubr.f32.mxu1 %v406_v7 }
  0xf4   :  { %v409_v17 = vmax.f32 %v349_v12, 0.0  ;;  %592 = vmatmul.mubr.f32.gmra.mrb[34].mxu0 %v403_v10  ;;  %717 = vmatmul.mubr.f32.gmra.mrb[34].mxu1 %v405_v5  ;;  %v407_v22 = vmax.f32 %v212_v11, 0.0 }
  0xf5   :  { %v408_v18 = vmax.f32 %v214_v15, 0.0  ;;  %v410_v19 = vmax.f32 %v351_v16, 0.0  ;;  %v217_v20 = vpop.f32.mrb[14].mxu0  ;;  %v354_v21 = vpop.f32.mrb[14].mxu1 }
  0xf6   :  { %v218_v23 = vadd.f32 %v217_v20, %v1358_v56  ;;  %v355_v24 = vadd.f32 %v354_v21, %v1360_v57  ;;  %v219_v25 = vpop.f32.mrb[15].mxu0  ;;  %v356_v26 = vpop.f32.mrb[15].mxu1 }
  0xf7   :  { %v220_v27 = vadd.f32 %v219_v25, %v1362_v58  ;;  %v357_v28 = vadd.f32 %v356_v26, %v1364_v59  ;;  %596 = vmatprep.mubr.f32.mxu0 %v408_v18  ;;  %721 = vmatprep.mubr.f32.mxu1 %v410_v19 }
  0xf8   :  { %v413_v29 = vmax.f32 %v355_v24, 0.0  ;;  %597 = vmatmul.mubr.f32.gmra.mrb[36].mxu0 %v407_v22  ;;  %722 = vmatmul.mubr.f32.gmra.mrb[36].mxu1 %v409_v17  ;;  %v411_v34 = vmax.f32 %v218_v23, 0.0 }
  0xf9   :  { %v412_v30 = vmax.f32 %v220_v27, 0.0  ;;  %v414_v31 = vmax.f32 %v357_v28, 0.0  ;;  %v223_v32 = vpop.f32.mrb[16].mxu0  ;;  %v360_v33 = vpop.f32.mrb[16].mxu1 }
  0xfa   :  { %v224_v35 = vadd.f32 %v223_v32, %v1358_v56  ;;  %v361_v36 = vadd.f32 %v360_v33, %v1360_v57  ;;  %v225_v37 = vpop.f32.mrb[17].mxu0  ;;  %v362_v38 = vpop.f32.mrb[17].mxu1  ;;  %v764_v32 = vld [vmem:[%s1520_s5] sm:$0xff] }
  0xfb   :  { %v226_v39 = vadd.f32 %v225_v37, %v1362_v58  ;;  %v363_v2 = vadd.f32 %v362_v38, %v1364_v59  ;;  %601 = vmatprep.mubr.f32.mxu0 %v412_v30  ;;  %726 = vmatprep.mubr.f32.mxu1 %v414_v31 }
  0xfc   :  { %v417_v40 = vmax.f32 %v361_v36, 0.0  ;;  %602 = vmatmul.mubr.f32.gmra.mrb[38].mxu0 %v411_v34  ;;  %727 = vmatmul.mubr.f32.gmra.mrb[38].mxu1 %v413_v29  ;;  %v415_v45 = vmax.f32 %v224_v35, 0.0 }
  0xfd   :  { %v416_v41 = vmax.f32 %v226_v39, 0.0  ;;  %v418_v42 = vmax.f32 %v363_v2, 0.0  ;;  %v229_v43 = vpop.f32.mrb[18].mxu0  ;;  %v366_v44 = vpop.f32.mrb[18].mxu1 }
  0xfe   :  { %v230_v46 = vadd.f32 %v229_v43, %v1358_v56  ;;  %v367_v47 = vadd.f32 %v366_v44, %v1360_v57  ;;  %v231_v48 = vpop.f32.mrb[19].mxu0  ;;  %v368_v49 = vpop.f32.mrb[19].mxu1 }
  0xff   :  { %v232_v50 = vadd.f32 %v231_v48, %v1362_v58  ;;  %v369_v51 = vadd.f32 %v368_v49, %v1364_v59  ;;  %606 = vmatprep.mubr.f32.mxu0 %v416_v41  ;;  %731 = vmatprep.mubr.f32.mxu1 %v418_v42  ;;  %v765_v42 = vld [vmem:[%s1520_s5 + $0x8] sm:$0xff] }
 0x100   :  { %v421_v52 = vmax.f32 %v367_v47, 0.0  ;;  %607 = vmatmul.mubr.f32.gmra.mrb[40].mxu0 %v415_v45  ;;  %732 = vmatmul.mubr.f32.gmra.mrb[40].mxu1 %v417_v40  ;;  %v419_v61 = vmax.f32 %v230_v46, 0.0 }
 0x101   :  { %v420_v53 = vmax.f32 %v232_v50, 0.0  ;;  %v422_v54 = vmax.f32 %v369_v51, 0.0  ;;  %v235_v55 = vpop.f32.mrb[20].mxu0  ;;  %v372_v60 = vpop.f32.mrb[20].mxu1 }
 0x102   :  { %v236_v62 = vadd.f32 %v235_v55, %v1358_v56  ;;  %v373_v63 = vadd.f32 %v372_v60, %v1360_v57  ;;  %v237_v0 = vpop.f32.mrb[21].mxu0  ;;  %v374_v1 = vpop.f32.mrb[21].mxu1 }
 0x103   :  { %v238_v3 = vadd.f32 %v237_v0, %v1362_v58  ;;  %v375_v4 = vadd.f32 %v374_v1, %v1364_v59  ;;  %611 = vmatprep.mubr.f32.mxu0 %v420_v53  ;;  %736 = vmatprep.mubr.f32.mxu1 %v422_v54  ;;  %v766_v53 = vld [vmem:[%s1520_s5 + $0x10] sm:$0xff] }
 0x104   :  { %v425_v5 = vmax.f32 %v373_v63, 0.0  ;;  %612 = vmatmul.mubr.f32.gmra.mrb[42].mxu0 %v419_v61  ;;  %737 = vmatmul.mubr.f32.gmra.mrb[42].mxu1 %v421_v52  ;;  %v423_v10 = vmax.f32 %v236_v62, 0.0 }
 0x105   :  { %v424_v6 = vmax.f32 %v238_v3, 0.0  ;;  %v426_v7 = vmax.f32 %v375_v4, 0.0  ;;  %v241_v8 = vpop.f32.mrb[22].mxu0  ;;  %v378_v9 = vpop.f32.mrb[22].mxu1 }
 0x106   :  { %v242_v11 = vadd.f32 %v241_v8, %v1358_v56  ;;  %v379_v12 = vadd.f32 %v378_v9, %v1360_v57  ;;  %v243_v13 = vpop.f32.mrb[23].mxu0  ;;  %v380_v14 = vpop.f32.mrb[23].mxu1 }
 0x107   :  { %v244_v15 = vadd.f32 %v243_v13, %v1362_v58  ;;  %v381_v16 = vadd.f32 %v380_v14, %v1364_v59  ;;  %616 = vmatprep.mubr.f32.mxu0 %v424_v6  ;;  %741 = vmatprep.mubr.f32.mxu1 %v426_v7  ;;  %v1417_v58 = vld [vmem:[%s1519_s4] ss:$0 sm:$0xff] }
 0x108   :  { %v429_v17 = vmax.f32 %v379_v12, 0.0  ;;  %617 = vmatmul.mubr.f32.gmra.mrb[44].mxu0 %v423_v10  ;;  %742 = vmatmul.mubr.f32.gmra.mrb[44].mxu1 %v425_v5  ;;  %v427_v20 = vmax.f32 %v242_v11, 0.0  ;;  %v767_v5 = vld [vmem:[%s1520_s5 + $0x18] sm:$0xff] }
 0x109   :  { %v428_v18 = vmax.f32 %v244_v15, 0.0  ;;  %v430_v19 = vmax.f32 %v381_v16, 0.0  ;;  %v768_v16 = vld [vmem:[%s1520_s5 + $0x20] sm:$0xff] }
 0x10b   :  { %621 = vmatprep.mubr.f32.mxu0 %v428_v18  ;;  %746 = vmatprep.mubr.f32.mxu1 %v430_v19 }
 0x10c   :  { %622 = vmatmul.mubr.f32.gmra.mrb[46].mxu0 %v427_v20  ;;  %747 = vmatmul.mubr.f32.gmra.mrb[46].mxu1 %v429_v17 }
 0x1b3   :  { %v866_v56 = vpop.f32.mrb[24].mxu0  ;;  %v934_v57 = vpop.f32.mrb[24].mxu1 }
 0x1b4   :  { %v867_v59 = vpop.f32.mrb[25].mxu0  ;;  %v935_v21 = vpop.f32.mrb[25].mxu1 }
 0x1b5   :  { %v868_v22 = vadd.f32 %v867_v59, %v866_v56  ;;  %v936_v23 = vadd.f32 %v935_v21, %v934_v57 }
 0x1b7   :  { %v569_v24 = vadd.f32 %v868_v22, %v1417_v58  ;;  %v869_v25 = vpop.f32.mrb[26].mxu0  ;;  %v937_v26 = vpop.f32.mrb[26].mxu1 }
 0x1b8   :  { %v870_v27 = vpop.f32.mrb[27].mxu0  ;;  %v938_v28 = vpop.f32.mrb[27].mxu1 }
 0x1b9   :  { %v694_v29 = vadd.f32 %v936_v23, %v569_v24  ;;  %v871_v30 = vadd.f32 %v870_v27, %v869_v25  ;;  %v939_v31 = vadd.f32 %v938_v28, %v937_v26  ;;  %v769_v24 = vld [vmem:[%s1520_s5 + $0x28] sm:$0xff] }
 0x1bb   :  { %v752_v33 = vmul.f32 4.0, %v694_v29  ;;  %v574_v34 = vadd.f32 %v871_v30, %v1417_v58  ;;  %v872_v35 = vpop.f32.mrb[28].mxu0  ;;  %v940_v36 = vpop.f32.mrb[28].mxu1 }
 0x1bc   :  { %v873_v37 = vpop.f32.mrb[29].mxu0  ;;  %v941_v38 = vpop.f32.mrb[29].mxu1 }
 0x1bd   :  { %v776_v39 = vadd.f32 %v764_v32, %v752_v33  ;;  %v699_v2 = vadd.f32 %v939_v31, %v574_v34  ;;  %v874_v40 = vadd.f32 %v873_v37, %v872_v35  ;;  %v942_v41 = vadd.f32 %v941_v38, %v940_v36  ;;  %v770_v35 = vld [vmem:[%s1520_s5 + $0x30] sm:$0xff] }
 0x1bf   :  { %789 = vst.msk [vmem:[%s1521_s6] sm:$0xff] %vm788_vm2, %v776_v39  ;;  %v753_v43 = vmul.f32 4.0, %v699_v2  ;;  %v579_v44 = vadd.f32 %v874_v40, %v1417_v58  ;;  %v875_v45 = vpop.f32.mrb[30].mxu0  ;;  %v943_v46 = vpop.f32.mrb[30].mxu1 }
 0x1c0   :  { %v876_v47 = vpop.f32.mrb[31].mxu0  ;;  %v944_v48 = vpop.f32.mrb[31].mxu1 }
 0x1c1   :  { %v777_v49 = vadd.f32 %v765_v42, %v753_v43  ;;  %v704_v50 = vadd.f32 %v942_v41, %v579_v44  ;;  %v877_v51 = vadd.f32 %v876_v47, %v875_v45  ;;  %v945_v52 = vadd.f32 %v944_v48, %v943_v46  ;;  %v771_v45 = vld [vmem:[%s1520_s5 + $0x38] sm:$0xff] }
 0x1c3   :  { %790 = vst.msk [vmem:[%s1521_s6 + $0x8] sm:$0xff] %vm788_vm2, %v777_v49  ;;  %v754_v54 = vmul.f32 4.0, %v704_v50  ;;  %v584_v55 = vadd.f32 %v877_v51, %v1417_v58  ;;  %v878_v60 = vpop.f32.mrb[32].mxu0  ;;  %v946_v61 = vpop.f32.mrb[32].mxu1 }
 0x1c4   :  { %v879_v62 = vpop.f32.mrb[33].mxu0  ;;  %v947_v63 = vpop.f32.mrb[33].mxu1 }
 0x1c5   :  { %v778_v0 = vadd.f32 %v766_v53, %v754_v54  ;;  %v709_v1 = vadd.f32 %v945_v52, %v584_v55  ;;  %v880_v3 = vadd.f32 %v879_v62, %v878_v60  ;;  %v948_v4 = vadd.f32 %v947_v63, %v946_v61  ;;  %v772_v60 = vld [vmem:[%s1520_s5 + $0x40] sm:$0xff] }
 0x1c7   :  { %791 = vst.msk [vmem:[%s1521_s6 + $0x10] sm:$0xff] %vm788_vm2, %v778_v0  ;;  %v755_v6 = vmul.f32 4.0, %v709_v1  ;;  %v589_v7 = vadd.f32 %v880_v3, %v1417_v58  ;;  %v881_v8 = vpop.f32.mrb[34].mxu0  ;;  %v949_v9 = vpop.f32.mrb[34].mxu1 }
 0x1c8   :  { %v882_v10 = vpop.f32.mrb[35].mxu0  ;;  %v950_v11 = vpop.f32.mrb[35].mxu1 }
 0x1c9   :  { %v779_v12 = vadd.f32 %v767_v5, %v755_v6  ;;  %v714_v13 = vadd.f32 %v948_v4, %v589_v7  ;;  %v883_v14 = vadd.f32 %v882_v10, %v881_v8  ;;  %v951_v15 = vadd.f32 %v950_v11, %v949_v9  ;;  %v773_v8 = vld [vmem:[%s1520_s5 + $0x48] sm:$0xff] }
 0x1cb   :  { %792 = vst.msk [vmem:[%s1521_s6 + $0x18] sm:$0xff] %vm788_vm2, %v779_v12  ;;  %v756_v17 = vmul.f32 4.0, %v714_v13  ;;  %v594_v18 = vadd.f32 %v883_v14, %v1417_v58  ;;  %v884_v19 = vpop.f32.mrb[36].mxu0  ;;  %v952_v20 = vpop.f32.mrb[36].mxu1 }
 0x1cc   :  { %v885_v56 = vpop.f32.mrb[37].mxu0  ;;  %v953_v57 = vpop.f32.mrb[37].mxu1 }
 0x1cd   :  { %v780_v59 = vadd.f32 %v768_v16, %v756_v17  ;;  %v719_v21 = vadd.f32 %v951_v15, %v594_v18  ;;  %v886_v22 = vadd.f32 %v885_v56, %v884_v19  ;;  %v954_v23 = vadd.f32 %v953_v57, %v952_v20  ;;  %v774_v19 = vld [vmem:[%s1520_s5 + $0x50] sm:$0xff] }
 0x1cf   :  { %793 = vst.msk [vmem:[%s1521_s6 + $0x20] sm:$0xff] %vm788_vm2, %v780_v59  ;;  %v757_v25 = vmul.f32 4.0, %v719_v21  ;;  %v599_v26 = vadd.f32 %v886_v22, %v1417_v58  ;;  %v887_v27 = vpop.f32.mrb[38].mxu0  ;;  %v955_v28 = vpop.f32.mrb[38].mxu1  ;;  %v775_v21 = vld [vmem:[%s1520_s5 + $0x58] sm:$0xff] }
 0x1d0   :  { %v888_v29 = vpop.f32.mrb[39].mxu0  ;;  %v956_v30 = vpop.f32.mrb[39].mxu1 }
 0x1d1   :  { %v781_v31 = vadd.f32 %v769_v24, %v757_v25  ;;  %v724_v32 = vadd.f32 %v954_v23, %v599_v26  ;;  %v889_v33 = vadd.f32 %v888_v29, %v887_v27  ;;  %v957_v34 = vadd.f32 %v956_v30, %v955_v28 }
 0x1d3   :  { %794 = vst.msk [vmem:[%s1521_s6 + $0x28] sm:$0xff] %vm788_vm2, %v781_v31  ;;  %v758_v36 = vmul.f32 4.0, %v724_v32  ;;  %v604_v37 = vadd.f32 %v889_v33, %v1417_v58  ;;  %v890_v38 = vpop.f32.mrb[40].mxu0  ;;  %v958_v39 = vpop.f32.mrb[40].mxu1 }
 0x1d4   :  { %v891_v2 = vpop.f32.mrb[41].mxu0  ;;  %v959_v40 = vpop.f32.mrb[41].mxu1 }
 0x1d5   :  { %v782_v41 = vadd.f32 %v770_v35, %v758_v36  ;;  %v729_v42 = vadd.f32 %v957_v34, %v604_v37  ;;  %v892_v43 = vadd.f32 %v891_v2, %v890_v38  ;;  %v960_v44 = vadd.f32 %v959_v40, %v958_v39 }
 0x1d7   :  { %795 = vst.msk [vmem:[%s1521_s6 + $0x30] sm:$0xff] %vm788_vm2, %v782_v41  ;;  %v759_v46 = vmul.f32 4.0, %v729_v42  ;;  %v609_v47 = vadd.f32 %v892_v43, %v1417_v58  ;;  %v893_v48 = vpop.f32.mrb[42].mxu0  ;;  %v961_v49 = vpop.f32.mrb[42].mxu1 }
 0x1d8   :  { %v894_v50 = vpop.f32.mrb[43].mxu0  ;;  %v962_v51 = vpop.f32.mrb[43].mxu1 }
 0x1d9   :  { %v783_v52 = vadd.f32 %v771_v45, %v759_v46  ;;  %v734_v53 = vadd.f32 %v960_v44, %v609_v47  ;;  %v895_v54 = vadd.f32 %v894_v50, %v893_v48  ;;  %v963_v55 = vadd.f32 %v962_v51, %v961_v49 }
 0x1db   :  { %796 = vst.msk [vmem:[%s1521_s6 + $0x38] sm:$0xff] %vm788_vm2, %v783_v52  ;;  %v760_v61 = vmul.f32 4.0, %v734_v53  ;;  %v614_v62 = vadd.f32 %v895_v54, %v1417_v58  ;;  %v896_v63 = vpop.f32.mrb[44].mxu0  ;;  %v964_v0 = vpop.f32.mrb[44].mxu1 }
 0x1dc   :  { %v897_v1 = vpop.f32.mrb[45].mxu0  ;;  %v965_v3 = vpop.f32.mrb[45].mxu1 }
 0x1dd   :  { %v784_v4 = vadd.f32 %v772_v60, %v760_v61  ;;  %v739_v5 = vadd.f32 %v963_v55, %v614_v62  ;;  %v898_v6 = vadd.f32 %v897_v1, %v896_v63  ;;  %v966_v7 = vadd.f32 %v965_v3, %v964_v0 }
 0x1df   :  { %797 = vst.msk [vmem:[%s1521_s6 + $0x40] sm:$0xff] %vm788_vm2, %v784_v4  ;;  %v761_v9 = vmul.f32 4.0, %v739_v5  ;;  %v619_v10 = vadd.f32 %v898_v6, %v1417_v58  ;;  %v899_v11 = vpop.f32.mrb[46].mxu0  ;;  %v967_v12 = vpop.f32.mrb[46].mxu1 }
 0x1e0   :  { %v900_v13 = vpop.f32.mrb[47].mxu0  ;;  %v968_v14 = vpop.f32.mrb[47].mxu1 }
 0x1e1   :  { %v785_v15 = vadd.f32 %v773_v8, %v761_v9  ;;  %v744_v16 = vadd.f32 %v966_v7, %v619_v10  ;;  %v901_v17 = vadd.f32 %v900_v13, %v899_v11  ;;  %v969_v18 = vadd.f32 %v968_v14, %v967_v12 }
 0x1e3   :  { %798 = vst.msk [vmem:[%s1521_s6 + $0x48] sm:$0xff] %vm788_vm2, %v785_v15  ;;  %v762_v20 = vmul.f32 4.0, %v744_v16  ;;  %v624_v56 = vadd.f32 %v901_v17, %v1417_v58 }
 0x1e5   :  { %v786_v57 = vadd.f32 %v774_v19, %v762_v20  ;;  %v749_v59 = vadd.f32 %v969_v18, %v624_v56 }
 0x1e7   :  { %799 = vst.msk [vmem:[%s1521_s6 + $0x50] sm:$0xff] %vm788_vm2, %v786_v57  ;;  %v763_v22 = vmul.f32 4.0, %v749_v59 }
 0x1e9   :  { %v787_v23 = vadd.f32 %v775_v21, %v763_v22 }
 0x1eb   :  { %800 = vst.msk [vmem:[%s1521_s6 + $0x58] sm:$0xff] %vm788_vm2, %v787_v23 }

// kernel: motion_ae_forward.10
= control target key start
LH: loop header
LB: loop body
LE: loop exit
PB: predicated region body
PF: predicated region fallthrough
CT: control target
= control target key end

     0   :  { %v303_v0 = vmov 0.0|0.0   ;;  %vm304_vm0 = vmmov 0   ;;  %v305_v6 = vmov 0.0   ;;  %vm134_vm1 = vcmask 130048   ;;  %s453_s4 = inlined_call_operand.vmem [shape: f32[144,48], index: 4, kind: input, shape index: {}]   ;;  %s454_s1 = inlined_call_operand.vmem [shape: f32[72,48], index: 1, kind: input, shape index: {}]   ;;  %s455_s3 = inlined_call_operand.vmem [shape: f32[8,144], index: 3, kind: input, shape index: {}]   ;;  %s456_s0 = inlined_call_operand.vmem [shape: f32[8,72], index: 0, kind: input, shape index: {}]   ;;  %s457_s2 = inlined_call_operand.vmem [shape: f32[1,48], index: 2, kind: input, shape index: {}]   ;;  %s458_s5 = inlined_call_operand.vmem [shape: f32[1,48], index: 5, kind: input, shape index: {}]   ;;  %s459_s6 = inlined_call_operand.vmem [shape: f32[8,48], index: 6, kind: output, shape index: {}]  }
   0x1   :  { %273 = vmatprep.subr.bf16.mxu1 %v303_v0  ;;  %v116_v1 = vld [vmem:[%s453_s4] sm:$0xff]  ;;  %v117_v2 = vld [vmem:[%s453_s4 + $0x8] sm:$0xff]  ;;  %v118_v3 = vld [vmem:[%s453_s4 + $0x10] sm:$0xff]  ;;  %261 = vmatprep.subr.bf16.mxu0 %v303_v0  ;;  %vm40_vm2 = vcmask 588800   ;;  %vm220_vm4 = vcmask 392192  }
   0x2   :  { %v274_v4 = vpack.c.bf16 %v117_v2, %v116_v1  ;;  %v119_v5 = vld [vmem:[%s453_s4 + $0x18] sm:$0xff]  ;;  %258 = vmatprep.mubr.msk.f32.mxu0 %vm304_vm0, %v305_v6  ;;  %v24_v7 = vld [vmem:[%s454_s1] sm:$0xff]  ;;  %v25_v10 = vld [vmem:[%s454_s1 + $0x8] sm:$0xff] }
   0x3   :  { %v277_v8 = vpack.c.bf16 %v119_v5, %v118_v3  ;;  %v120_v9 = vld [vmem:[%s453_s4 + $0x20] sm:$0xff]  ;;  %v121_v11 = vld [vmem:[%s453_s4 + $0x28] sm:$0xff]  ;;  %v262_v12 = vpack.c.bf16 %v25_v10, %v24_v7  ;;  %v26_v13 = vld [vmem:[%s454_s1 + $0x10] sm:$0xff] }
   0x4   :  { %275 = vmatpush1.bf16.msra.mxu1 %v274_v4  ;;  %v27_v14 = vld [vmem:[%s454_s1 + $0x18] sm:$0xff]  ;;  %v280_v16 = vpack.c.bf16 %v121_v11, %v120_v9  ;;  %v28_v17 = vld [vmem:[%s454_s1 + $0x20] sm:$0xff]  ;;  %v29_v18 = vld [vmem:[%s454_s1 + $0x28] sm:$0xff] }
   0x5   :  { %276 = vmatprep.subr.bf16.mxu1 %v303_v0  ;;  %263 = vmatpush3.bf16.msra.mxu0 %v262_v12  ;;  %v265_v15 = vpack.c.bf16 %v27_v14, %v26_v13  ;;  %v122_v19 = vld [vmem:[%s453_s4 + $0x30] sm:$0xff]  ;;  %v123_v20 = vld [vmem:[%s453_s4 + $0x38] sm:$0xff]  ;;  %v115_v21 = vld [vmem:[%s455_s3 + $0x8] sm:$0xff]  ;;  %v268_v22 = vpack.c.bf16 %v29_v18, %v28_v17 }
   0x6   :  { %264 = vmatprep.subr.bf16.mxu0 %v303_v0  ;;  %228 = vmatprep.mubr.msk.f32.mxu1 %vm134_vm1, %v115_v21  ;;  %v283_v23 = vpack.c.bf16 %v123_v20, %v122_v19  ;;  %v30_v24 = vld [vmem:[%s454_s1 + $0x30] sm:$0xff]  ;;  %v31_v25 = vld [vmem:[%s454_s1 + $0x38] sm:$0xff]  ;;  %v124_v26 = vld [vmem:[%s453_s4 + $0x40] sm:$0xff] }
   0x7   :  { %v125_v27 = vld [vmem:[%s453_s4 + $0x48] sm:$0xff]  ;;  %v271_v28 = vpack.c.bf16 %v31_v25, %v30_v24  ;;  %v126_v30 = vld [vmem:[%s453_s4 + $0x50] sm:$0xff]  ;;  %v127_v31 = vld [vmem:[%s453_s4 + $0x58] sm:$0xff] }
   0x8   :  { %278 = vmatpush1.bf16.msra.mxu1 %v277_v8  ;;  %v286_v29 = vpack.c.bf16 %v125_v27, %v124_v26  ;;  %v289_v32 = vpack.c.bf16 %v127_v31, %v126_v30  ;;  %v32_v33 = vld [vmem:[%s454_s1 + $0x40] sm:$0xff]  ;;  %v129_v35 = vld [vmem:[%s453_s4 + $0x68] sm:$0xff]  ;;  %v130_v38 = vld [vmem:[%s453_s4 + $0x70] sm:$0xff] }
   0x9   :  { %279 = vmatprep.subr.bf16.mxu1 %v303_v0  ;;  %266 = vmatpush3.bf16.msra.mxu0 %v265_v15  ;;  %v128_v34 = vld [vmem:[%s453_s4 + $0x60] sm:$0xff]  ;;  %v131_v39 = vld [vmem:[%s453_s4 + $0x78] sm:$0xff]  ;;  %v133_v42 = vld [vmem:[%s453_s4 + $0x88] sm:$0xff] }
   0xa   :  { %267 = vmatprep.subr.bf16.mxu0 %v303_v0  ;;  %v23_v36 = vld [vmem:[%s456_s0] sm:$0xff]  ;;  %v292_v37 = vpack.c.bf16 %v129_v35, %v128_v34  ;;  %v295_v40 = vpack.c.bf16 %v131_v39, %v130_v38 }
   0xb   :  { %v132_v41 = vld [vmem:[%s453_s4 + $0x80] sm:$0xff] }
   0xc   :  { %281 = vmatpush1.bf16.msra.mxu1 %v280_v16  ;;  %v298_v43 = vpack.c.bf16 %v133_v42, %v132_v41  ;;  %v114_v44 = vld [vmem:[%s455_s3] sm:$0xff] }
   0xd   :  { %282 = vmatprep.subr.bf16.mxu1 %v303_v0  ;;  %269 = vmatpush3.bf16.msra.mxu0 %v268_v22  ;;  %v226_v47 = vld [vmem:[%s457_s2] ss:$0 sm:$0xff] }
   0xe   :  { %270 = vmatprep.subr.bf16.mxu0 %v303_v0  ;;  %v229_v50 = vld [vmem:[%s458_s5] ss:$0 sm:$0xff] }
  0x10   :  { %284 = vmatpush1.bf16.msra.mxu1 %v283_v23 }
  0x11   :  { %285 = vmatprep.subr.bf16.mxu1 %v303_v0  ;;  %272 = vmatpush3.bf16.msra.mxu0 %v271_v28 }
  0x12   :  { %256 = vmatprep.subr.mxu0 %v305_v6 }
  0x14   :  { %287 = vmatpush1.bf16.msra.mxu1 %v286_v29 }
  0x15   :  { %288 = vmatprep.subr.bf16.mxu1 %v303_v0  ;;  %257 = vmatpush3.msra.mxu0 %v32_v33 }
  0x16   :  { %259 = vmatmul.mubr.msk.f32.vlgmr.msra.gmra.mrb[0].mxu0 %vm40_vm2, %v23_v36 }
  0x18   :  { %290 = vmatpush1.bf16.msra.mxu1 %v289_v32 }
  0x19   :  { %291 = vmatprep.subr.bf16.mxu1 %v303_v0 }
  0x1c   :  { %293 = vmatpush1.bf16.msra.mxu1 %v292_v37 }
  0x1d   :  { %294 = vmatprep.subr.bf16.mxu1 %v303_v0 }
  0x20   :  { %296 = vmatpush1.bf16.msra.mxu1 %v295_v40 }
  0x21   :  { %297 = vmatprep.subr.bf16.mxu1 %v303_v0 }
  0x24   :  { %299 = vmatpush1.bf16.msra.mxu1 %v298_v43 }
  0x27   :  { %203 = vmatmul.mubr.f32.vlgmr.msra.gmra.mrb[0].mxu1 %v114_v44 }
  0xe9   :  { %v110_v45 = vpop.f32.mrb[0].mxu0 }
  0xea   :  { %v260_v46 = vpop.f32.mrb[1].mxu0  ;;  %v111_v48 = vadd.f32 %v226_v47, %v110_v45 }
  0xfa   :  { %v204_v49 = vpop.f32.mrb[0].mxu1 }
  0xfb   :  { %v208_v51 = vadd.f32 %v204_v49, %v111_v48  ;;  %v206_v52 = vpop.f32.mrb[1].mxu1 }
  0xfd   :  { %v216_v53 = vadd.f32 %v229_v50, %v208_v51 }
  0xff   :  { %vm217_vm3 = vcmp.ge.f32.partialorder %v216_v53, 0.0  ;;  %v218_v54 = vmul.f32 0.2, %v216_v53 }
 0x101   :  { %v219_v55 = vsel %vm217_vm3, %v216_v53, %v218_v54 }
 0x102   :  { %221 = vst.msk [vmem:[%s459_s6] sm:$0xff] %vm220_vm4, %v219_v55 }

// kernel: motion_ae_forward.11
= control target key start
LH: loop header
LB: loop body
LE: loop exit
PB: predicated region body
PF: predicated region fallthrough
CT: control target
= control target key end

     0   :  { %v155_v0 = vmov 0.0|0.0   ;;  %vm42_vm0 = vcmask 130048   ;;  %vm118_vm2 = vcmask 388096   ;;  %s239_s1 = inlined_call_operand.vmem [shape: f32[144,48], index: 1, kind: input, shape index: {}]   ;;  %s240_s0 = inlined_call_operand.vmem [shape: f32[4,144], index: 0, kind: input, shape index: {}]   ;;  %s241_s2 = inlined_call_operand.vmem [shape: f32[1,48], index: 2, kind: input, shape index: {}]   ;;  %s242_s3 = inlined_call_operand.vmem [shape: f32[4,48], index: 3, kind: output, shape index: {}]  }
   0x1   :  { %126 = vmatprep.subr.bf16.mxu0 %v155_v0  ;;  %v15_v1 = vld [vmem:[%s239_s1] sm:$0xff]  ;;  %v16_v2 = vld [vmem:[%s239_s1 + $0x8] sm:$0xff]  ;;  %v17_v3 = vld [vmem:[%s239_s1 + $0x10] sm:$0xff] }
   0x2   :  { %v127_v4 = vpack.c.bf16 %v16_v2, %v15_v1  ;;  %v18_v5 = vld [vmem:[%s239_s1 + $0x18] sm:$0xff]  ;;  %v19_v7 = vld [vmem:[%s239_s1 + $0x20] sm:$0xff]  ;;  %v20_v8 = vld [vmem:[%s239_s1 + $0x28] sm:$0xff] }
   0x3   :  { %v130_v6 = vpack.c.bf16 %v18_v5, %v17_v3  ;;  %v14_v9 = vld [vmem:[%s240_s0] sm:$0xff]  ;;  %v133_v10 = vpack.c.bf16 %v20_v8, %v19_v7  ;;  %v21_v12 = vld [vmem:[%s239_s1 + $0x30] sm:$0xff]  ;;  %v22_v13 = vld [vmem:[%s239_s1 + $0x38] sm:$0xff] }
   0x4   :  { %128 = vmatpush1.bf16.msra.mxu0 %v127_v4  ;;  %v41_v11 = vcombine.high %v14_v9, %v14_v9  ;;  %v136_v14 = vpack.c.bf16 %v22_v13, %v21_v12  ;;  %v23_v15 = vld [vmem:[%s239_s1 + $0x40] sm:$0xff]  ;;  %v24_v16 = vld [vmem:[%s239_s1 + $0x48] sm:$0xff]  ;;  %v25_v18 = vld [vmem:[%s239_s1 + $0x50] sm:$0xff] }
   0x5   :  { %129 = vmatprep.subr.bf16.mxu0 %v155_v0  ;;  %v139_v17 = vpack.c.bf16 %v24_v16, %v23_v15  ;;  %v26_v19 = vld [vmem:[%s239_s1 + $0x58] sm:$0xff]  ;;  %v27_v21 = vld [vmem:[%s239_s1 + $0x60] sm:$0xff]  ;;  %v28_v22 = vld [vmem:[%s239_s1 + $0x68] sm:$0xff] }
   0x6   :  { %125 = vmatprep.mubr.msk.f32.mxu0 %vm42_vm0, %v41_v11  ;;  %v142_v20 = vpack.c.bf16 %v26_v19, %v25_v18  ;;  %v145_v23 = vpack.c.bf16 %v28_v22, %v27_v21  ;;  %v29_v24 = vld [vmem:[%s239_s1 + $0x70] sm:$0xff]  ;;  %v30_v25 = vld [vmem:[%s239_s1 + $0x78] sm:$0xff]  ;;  %v31_v27 = vld [vmem:[%s239_s1 + $0x80] sm:$0xff] }
   0x7   :  { %v148_v26 = vpack.c.bf16 %v30_v25, %v29_v24  ;;  %v32_v28 = vld [vmem:[%s239_s1 + $0x88] sm:$0xff]  ;;  %v124_v30 = vld [vmem:[%s241_s2] ss:$0 sm:$0xff] }
   0x8   :  { %131 = vmatpush1.bf16.msra.mxu0 %v130_v6  ;;  %v151_v29 = vpack.c.bf16 %v32_v28, %v31_v27 }
   0x9   :  { %132 = vmatprep.subr.bf16.mxu0 %v155_v0 }
   0xc   :  { %134 = vmatpush1.bf16.msra.mxu0 %v133_v10 }
   0xd   :  { %135 = vmatprep.subr.bf16.mxu0 %v155_v0 }
  0x10   :  { %137 = vmatpush1.bf16.msra.mxu0 %v136_v14 }
  0x11   :  { %138 = vmatprep.subr.bf16.mxu0 %v155_v0 }
  0x14   :  { %140 = vmatpush1.bf16.msra.mxu0 %v139_v17 }
  0x15   :  { %141 = vmatprep.subr.bf16.mxu0 %v155_v0 }
  0x18   :  { %143 = vmatpush1.bf16.msra.mxu0 %v142_v20 }
  0x19   :  { %144 = vmatprep.subr.bf16.mxu0 %v155_v0 }
  0x1c   :  { %146 = vmatpush1.bf16.msra.mxu0 %v145_v23 }
  0x1d   :  { %147 = vmatprep.subr.bf16.mxu0 %v155_v0 }
  0x20   :  { %149 = vmatpush1.bf16.msra.mxu0 %v148_v26 }
  0x21   :  { %150 = vmatprep.subr.bf16.mxu0 %v155_v0 }
  0x24   :  { %152 = vmatpush1.bf16.msra.mxu0 %v151_v29 }
  0x27   :  { %110 = vmatmul.mubr.f32.vlgmr.msra.gmra.mrb[0].mxu0 %v14_v9 }
  0xfa   :  { %v111_v31 = vpop.f32.mrb[0].mxu0 }
  0xfb   :  { %v112_v32 = vadd.f32 %v124_v30, %v111_v31  ;;  %v113_v33 = vpop.f32.mrb[1].mxu0 }
  0xfd   :  { %vm115_vm1 = vcmp.ge.f32.partialorder %v112_v32, 0.0  ;;  %v116_v34 = vmul.f32 0.2, %v112_v32 }
  0xff   :  { %v117_v35 = vsel %vm115_vm1, %v112_v32, %v116_v34 }
 0x100   :  { %119 = vst.msk [vmem:[%s242_s3] sm:$0xf] %vm118_vm2, %v117_v35 }

// kernel: motion_ae_forward.12
= control target key start
LH: loop header
LB: loop body
LE: loop exit
PB: predicated region body
PF: predicated region fallthrough
CT: control target
= control target key end

     0   :  { %v154_v0 = vmov 0.0|0.0   ;;  %vm41_vm0 = vcmask 130048   ;;  %vm118_vm2 = vcmask 392192   ;;  %s241_s1 = inlined_call_operand.vmem [shape: f32[144,48], index: 1, kind: input, shape index: {}]   ;;  %s242_s0 = inlined_call_operand.vmem [shape: f32[8,144], index: 0, kind: input, shape index: {}]   ;;  %s243_s2 = inlined_call_operand.vmem [shape: f32[1,48], index: 2, kind: input, shape index: {}]   ;;  %s244_s3 = inlined_call_operand.vmem [shape: f32[8,48], index: 3, kind: output, shape index: {}]  }
   0x1   :  { %126 = vmatprep.subr.bf16.mxu0 %v154_v0  ;;  %v16_v1 = vld [vmem:[%s241_s1] sm:$0xff]  ;;  %v17_v2 = vld [vmem:[%s241_s1 + $0x8] sm:$0xff]  ;;  %v18_v3 = vld [vmem:[%s241_s1 + $0x10] sm:$0xff] }
   0x2   :  { %v127_v4 = vpack.c.bf16 %v17_v2, %v16_v1  ;;  %v19_v5 = vld [vmem:[%s241_s1 + $0x18] sm:$0xff]  ;;  %v20_v7 = vld [vmem:[%s241_s1 + $0x20] sm:$0xff]  ;;  %v21_v8 = vld [vmem:[%s241_s1 + $0x28] sm:$0xff] }
   0x3   :  { %v130_v6 = vpack.c.bf16 %v19_v5, %v18_v3  ;;  %v15_v9 = vld [vmem:[%s242_s0 + $0x8] sm:$0xff]  ;;  %v133_v10 = vpack.c.bf16 %v21_v8, %v20_v7  ;;  %v22_v11 = vld [vmem:[%s241_s1 + $0x30] sm:$0xff]  ;;  %v23_v12 = vld [vmem:[%s241_s1 + $0x38] sm:$0xff] }
   0x4   :  { %128 = vmatpush1.bf16.msra.mxu0 %v127_v4  ;;  %125 = vmatprep.mubr.msk.f32.mxu0 %vm41_vm0, %v15_v9  ;;  %v136_v13 = vpack.c.bf16 %v23_v12, %v22_v11  ;;  %v24_v14 = vld [vmem:[%s241_s1 + $0x40] sm:$0xff]  ;;  %v25_v15 = vld [vmem:[%s241_s1 + $0x48] sm:$0xff]  ;;  %v26_v17 = vld [vmem:[%s241_s1 + $0x50] sm:$0xff] }
   0x5   :  { %129 = vmatprep.subr.bf16.mxu0 %v154_v0  ;;  %v139_v16 = vpack.c.bf16 %v25_v15, %v24_v14  ;;  %v27_v18 = vld [vmem:[%s241_s1 + $0x58] sm:$0xff]  ;;  %v28_v20 = vld [vmem:[%s241_s1 + $0x60] sm:$0xff]  ;;  %v29_v21 = vld [vmem:[%s241_s1 + $0x68] sm:$0xff] }
   0x6   :  { %v142_v19 = vpack.c.bf16 %v27_v18, %v26_v17  ;;  %v145_v22 = vpack.c.bf16 %v29_v21, %v28_v20  ;;  %v30_v23 = vld [vmem:[%s241_s1 + $0x70] sm:$0xff]  ;;  %v31_v24 = vld [vmem:[%s241_s1 + $0x78] sm:$0xff]  ;;  %v32_v26 = vld [vmem:[%s241_s1 + $0x80] sm:$0xff] }
   0x7   :  { %v148_v25 = vpack.c.bf16 %v31_v24, %v30_v23  ;;  %v33_v27 = vld [vmem:[%s241_s1 + $0x88] sm:$0xff]  ;;  %v14_v29 = vld [vmem:[%s242_s0] sm:$0xff] }
   0x8   :  { %131 = vmatpush1.bf16.msra.mxu0 %v130_v6  ;;  %v151_v28 = vpack.c.bf16 %v33_v27, %v32_v26  ;;  %v124_v30 = vld [vmem:[%s243_s2] ss:$0 sm:$0xff] }
   0x9   :  { %132 = vmatprep.subr.bf16.mxu0 %v154_v0 }
   0xc   :  { %134 = vmatpush1.bf16.msra.mxu0 %v133_v10 }
   0xd   :  { %135 = vmatprep.subr.bf16.mxu0 %v154_v0 }
  0x10   :  { %137 = vmatpush1.bf16.msra.mxu0 %v136_v13 }
  0x11   :  { %138 = vmatprep.subr.bf16.mxu0 %v154_v0 }
  0x14   :  { %140 = vmatpush1.bf16.msra.mxu0 %v139_v16 }
  0x15   :  { %141 = vmatprep.subr.bf16.mxu0 %v154_v0 }
  0x18   :  { %143 = vmatpush1.bf16.msra.mxu0 %v142_v19 }
  0x19   :  { %144 = vmatprep.subr.bf16.mxu0 %v154_v0 }
  0x1c   :  { %146 = vmatpush1.bf16.msra.mxu0 %v145_v22 }
  0x1d   :  { %147 = vmatprep.subr.bf16.mxu0 %v154_v0 }
  0x20   :  { %149 = vmatpush1.bf16.msra.mxu0 %v148_v25 }
  0x21   :  { %150 = vmatprep.subr.bf16.mxu0 %v154_v0 }
  0x24   :  { %152 = vmatpush1.bf16.msra.mxu0 %v151_v28 }
  0x27   :  { %110 = vmatmul.mubr.f32.vlgmr.msra.gmra.mrb[0].mxu0 %v14_v29 }
  0xfa   :  { %v111_v31 = vpop.f32.mrb[0].mxu0 }
  0xfb   :  { %v112_v32 = vadd.f32 %v124_v30, %v111_v31  ;;  %v113_v33 = vpop.f32.mrb[1].mxu0 }
  0xfd   :  { %vm115_vm1 = vcmp.ge.f32.partialorder %v112_v32, 0.0  ;;  %v116_v34 = vmul.f32 0.2, %v112_v32 }
  0xff   :  { %v117_v35 = vsel %vm115_vm1, %v112_v32, %v116_v34 }
 0x100   :  { %119 = vst.msk [vmem:[%s244_s3] sm:$0xff] %vm118_vm2, %v117_v35 }

// kernel: motion_ae_forward.8
= control target key start
LH: loop header
LB: loop body
LE: loop exit
PB: predicated region body
PF: predicated region fallthrough
CT: control target
= control target key end

     0   :  { %vm74_vm0 = vcmask 130048   ;;  %v8184_v21 = vmov 0.0|0.0   ;;  %s5458_s21 = smov 112   ;;  %s5460_s22 = smov 104   ;;  %vm376_vm1 = vcmask 64512   ;;  %vm3682_vm7 = vcmask 261120   ;;  %s8167_s2 = inlined_call_operand.vmem [shape: f32[16,48], index: 2, kind: input, shape index: {}]   ;;  %s8168_s0 = inlined_call_operand.vmem [shape: f32[144,16], index: 0, kind: input, shape index: {}]   ;;  %s8169_s3 = inlined_call_operand.vmem [shape: f32[1,48], index: 3, kind: input, shape index: {}]   ;;  %s8170_s1 = inlined_call_operand.vmem [shape: f32[144,144], index: 1, kind: input, shape index: {}]   ;;  %s8171_s4 = inlined_call_operand.vmem [shape: f32[16,16], index: 4, kind: input, shape index: {}]   ;;  %s8172_s5 = inlined_call_operand.vmem [shape: f32[1,16], index: 5, kind: input, shape index: {}]   ;;  %s8173_s6 = inlined_call_operand.vmem [shape: f32[16,32], index: 6, kind: input, shape index: {}]   ;;  %s8174_s10 = inlined_call_operand.vmem [shape: f32[1,16], index: 10, kind: input, shape index: {}]   ;;  %s8175_s11 = inlined_call_operand.vmem [shape: f32[1,16], index: 11, kind: input, shape index: {}]   ;;  %s8176_s8 = inlined_call_operand.vmem [shape: f32[32,16], index: 8, kind: input, shape index: {}]   ;;  %s8177_s7 = inlined_call_operand.vmem [shape: f32[1,32], index: 7, kind: input, shape index: {}]   ;;  %s8178_s9 = inlined_call_operand.vmem [shape: f32[1,16], index: 9, kind: input, shape index: {}]   ;;  %s8179_s12 = inlined_call_operand.vmem [shape: f32[1,16], index: 12, kind: input, shape index: {}]   ;;  %s8180_s13 = inlined_call_operand.vmem [shape: f32[1,16], index: 13, kind: input, shape index: {}]   ;;  %s8181_s14 = inlined_call_operand.vmem [shape: f32[144,16], index: 14, kind: output, shape index: {}]  }
   0x1   :  { %v65_v0 = vld [vmem:[%s8167_s2] sm:$0xff]  ;;  %v66_v1 = vld [vmem:[%s8167_s2 + $0x8] sm:$0xff]  ;;  %v49_v5 = vld [vmem:[%s8168_s0 + $0x10] sm:$0xff]  ;;  %4681 = vmatprep.subr.bf16.mxu1 %v8184_v21  ;;  %s5462_s26 = smov 120  }
   0x2   :  { %v47_v2 = vld [vmem:[%s8168_s0] sm:$0xff]  ;;  %v4677_v3 = vpack.c.bf16 %v66_v1, %v65_v0  ;;  %v48_v4 = vld [vmem:[%s8168_s0 + $0x8] sm:$0xff]  ;;  %v50_v6 = vld [vmem:[%s8168_s0 + $0x18] sm:$0xff] }
   0x3   :  { %4526 = vmatprep.mubr.msk.f32.mxu0 %vm74_vm0, %v47_v2  ;;  %v51_v7 = vld [vmem:[%s8168_s0 + $0x20] sm:$0xff]  ;;  %v52_v8 = vld [vmem:[%s8168_s0 + $0x28] sm:$0xff]  ;;  %v53_v9 = vld [vmem:[%s8168_s0 + $0x30] sm:$0xff] }
   0x4   :  { %4678 = vmatprep.subr.bf16.mxu0 %v4677_v3  ;;  %v54_v10 = vld [vmem:[%s8168_s0 + $0x38] sm:$0xff]  ;;  %v55_v11 = vld [vmem:[%s8168_s0 + $0x40] sm:$0xff]  ;;  %v56_v12 = vld [vmem:[%s8168_s0 + $0x48] sm:$0xff] }
   0x5   :  { %4680 = vmatpush3.bf16.msra.mxu0 %v4677_v3  ;;  %v57_v13 = vld [vmem:[%s8168_s0 + $0x50] sm:$0xff]  ;;  %v58_v14 = vld [vmem:[%s8168_s0 + $0x58] sm:$0xff]  ;;  %v59_v15 = vld [vmem:[%s8168_s0 + $0x60] sm:$0xff] }
   0x6   :  { %v60_v16 = vld [vmem:[%s8168_s0 + $0x68] sm:$0xff]  ;;  %v61_v17 = vld [vmem:[%s8168_s0 + $0x70] sm:$0xff]  ;;  %v62_v18 = vld [vmem:[%s8168_s0 + $0x78] sm:$0xff]  ;;  %4717 = vmatprep.subr.bf16.mxu0 %v8184_v21 }
   0x7   :  { %v63_v19 = vld [vmem:[%s8168_s0 + $0x80] sm:$0xff]  ;;  %v64_v20 = vld [vmem:[%s8168_s0 + $0x88] sm:$0xff]  ;;  %vm5731_vm2 = vmpackc.low %vm376_vm1, %vm376_vm1 }
   0x8   :  { %4527 = vmatmul.mubr.msk.f32.vlgmr.msra.gmra.mrb[0].mxu0 %vm74_vm0, %v48_v4  ;;  %v4216_v22 = vld [vmem:[%s8169_s3] ss:$0 sm:$0xff]  ;;  %s5459_s3 = smov 96   ;;  %v8182_v4 = vmov 0.0  }
   0x9   :  { %4529 = vmatprep.mubr.msk.f32.mxu0 %vm74_vm0, %v49_v5  ;;  %513 = vmatprep.mubr.f32.mxu1 %v8182_v4 }
   0xc   :  { %4530 = vmatmul.mubr.msk.f32.gmra.mrb[2].mxu0 %vm74_vm0, %v50_v6 }
   0xd   :  { %4532 = vmatprep.mubr.msk.f32.mxu0 %vm74_vm0, %v51_v7 }
  0x10   :  { %4533 = vmatmul.mubr.msk.f32.gmra.mrb[4].mxu0 %vm74_vm0, %v52_v8 }
  0x11   :  { %4535 = vmatprep.mubr.msk.f32.mxu0 %vm74_vm0, %v53_v9 }
  0x14   :  { %4536 = vmatmul.mubr.msk.f32.gmra.mrb[6].mxu0 %vm74_vm0, %v54_v10 }
  0x15   :  { %4538 = vmatprep.mubr.msk.f32.mxu0 %vm74_vm0, %v55_v11 }
  0x18   :  { %4539 = vmatmul.mubr.msk.f32.gmra.mrb[8].mxu0 %vm74_vm0, %v56_v12 }
  0x19   :  { %4541 = vmatprep.mubr.msk.f32.mxu0 %vm74_vm0, %v57_v13 }
  0x1c   :  { %4542 = vmatmul.mubr.msk.f32.gmra.mrb[10].mxu0 %vm74_vm0, %v58_v14 }
  0x1d   :  { %4544 = vmatprep.mubr.msk.f32.mxu0 %vm74_vm0, %v59_v15 }
  0x20   :  { %4545 = vmatmul.mubr.msk.f32.gmra.mrb[12].mxu0 %vm74_vm0, %v60_v16 }
  0x21   :  { %4547 = vmatprep.mubr.msk.f32.mxu0 %vm74_vm0, %v61_v17 }
  0x24   :  { %4548 = vmatmul.mubr.msk.f32.gmra.mrb[14].mxu0 %vm74_vm0, %v62_v18 }
  0x25   :  { %4550 = vmatprep.mubr.msk.f32.mxu0 %vm74_vm0, %v63_v19 }
  0x28   :  { %4551 = vmatmul.mubr.msk.f32.gmra.mrb[16].mxu0 %vm74_vm0, %v64_v20 }
  0xdb   :  { %v4528_v23 = vpop.f32.mrb[0].mxu0 }
  0xdc   :  { %v5623_v24 = vadd.f32 %v4528_v23, %v4216_v22  ;;  %v195_v25 = vpop.f32.mrb[1].mxu0 }
  0xdd   :  { %v5625_v26 = vadd.f32 %v4216_v22, %v195_v25 }
  0xde   :  { %8217 = vst [vmem:[#allocation2_spill] sm:$0xff] %v5623_v24 }
  0xdf   :  { %8218 = vst [vmem:[#allocation3_spill] sm:$0xff] %v5625_v26  ;;  %v5629_v27 = vpack.i.bf16 %v5623_v24, %v5625_v26  ;;  %v4531_v28 = vpop.f32.mrb[2].mxu0 }
  0xe0   :  { %v5631_v29 = vadd.f32 %v4531_v28, %v4216_v22  ;;  %v205_v30 = vpop.f32.mrb[3].mxu0 }
  0xe1   :  { %8219 = vst [vmem:[#allocation4_spill] sm:$0xff] %v5629_v27  ;;  %4864 = vrot.lane.b32.xlu0 %v5629_v27, %s5458_s21  ;;  %v5635_v31 = vadd.f32 %v4216_v22, %v205_v30 }
  0xe2   :  { %8220 = vst [vmem:[#allocation5_spill] sm:$0xff] %v5631_v29 }
  0xe3   :  { %8221 = vst [vmem:[#allocation6_spill] sm:$0xff] %v5635_v31  ;;  %v5639_v32 = vpack.i.bf16 %v5631_v29, %v5635_v31  ;;  %v4534_v33 = vpop.f32.mrb[4].mxu0 }
  0xe4   :  { %v5641_v34 = vadd.f32 %v4534_v33, %v4216_v22  ;;  %v215_v35 = vpop.f32.mrb[5].mxu0 }
  0xe5   :  { %8222 = vst [vmem:[#allocation7_spill] sm:$0xff] %v5639_v32  ;;  %4869 = vrot.lane.b32.xlu0 %v5639_v32, %s5458_s21  ;;  %v5645_v36 = vadd.f32 %v4216_v22, %v215_v35 }
  0xe7   :  { %8223 = vst [vmem:[#allocation8_spill] sm:$0xff] %v5645_v36  ;;  %v4537_v37 = vpop.f32.mrb[6].mxu0  ;;  %v5649_v38 = vpack.i.bf16 %v5641_v34, %v5645_v36 }
  0xe8   :  { %v5651_v39 = vadd.f32 %v4537_v37, %v4216_v22  ;;  %v225_v40 = vpop.f32.mrb[7].mxu0 }
  0xe9   :  { %8224 = vst [vmem:[#allocation9_spill] sm:$0xff] %v5649_v38  ;;  %v5653_v41 = vadd.f32 %v4216_v22, %v225_v40  ;;  %4874 = vrot.lane.b32.xlu1 %v5649_v38, %s5458_s21 }
  0xeb   :  { %8225 = vst [vmem:[#allocation10_spill] sm:$0xff] %v5653_v41  ;;  %v4540_v42 = vpop.f32.mrb[8].mxu0  ;;  %v5659_v43 = vpack.i.bf16 %v5651_v39, %v5653_v41 }
  0xec   :  { %v5661_v44 = vadd.f32 %v4540_v42, %v4216_v22  ;;  %v235_v45 = vpop.f32.mrb[9].mxu0 }
  0xed   :  { %8226 = vst [vmem:[#allocation11_spill] sm:$0xff] %v5659_v43  ;;  %v5663_v46 = vadd.f32 %v4216_v22, %v235_v45  ;;  %4879 = vrot.lane.b32.xlu1 %v5659_v43, %s5458_s21 }
  0xef   :  { %8227 = vst [vmem:[#allocation12_spill] sm:$0xff] %v5663_v46  ;;  %v4543_v47 = vpop.f32.mrb[10].mxu0  ;;  %v5669_v48 = vpack.i.bf16 %v5661_v44, %v5663_v46 }
  0xf0   :  { %v5671_v49 = vadd.f32 %v4543_v47, %v4216_v22  ;;  %v245_v50 = vpop.f32.mrb[11].mxu0 }
  0xf1   :  { %8228 = vst [vmem:[#allocation13_spill] sm:$0xff] %v5669_v48  ;;  %v5673_v51 = vadd.f32 %v4216_v22, %v245_v50  ;;  %4884 = vrot.lane.b32.xlu0 %v5669_v48, %s5458_s21 }
  0xf3   :  { %8229 = vst [vmem:[#allocation14_spill] sm:$0xff] %v5673_v51  ;;  %v4546_v52 = vpop.f32.mrb[12].mxu0  ;;  %v5679_v53 = vpack.i.bf16 %v5671_v49, %v5673_v51 }
  0xf4   :  { %v5681_v54 = vadd.f32 %v4546_v52, %v4216_v22  ;;  %v255_v55 = vpop.f32.mrb[13].mxu0 }
  0xf5   :  { %v5683_v56 = vadd.f32 %v4216_v22, %v255_v55  ;;  %4889 = vrot.lane.b32.xlu1 %v5679_v53, %s5458_s21 }
  0xf7   :  { %8230 = vst [vmem:[#allocation15_spill] sm:$0xff] %v5683_v56  ;;  %v4549_v57 = vpop.f32.mrb[14].mxu0  ;;  %v5689_v58 = vpack.i.bf16 %v5681_v54, %v5683_v56 }
  0xf8   :  { %v5691_v59 = vadd.f32 %v4549_v57, %v4216_v22  ;;  %v265_v60 = vpop.f32.mrb[15].mxu0 }
  0xf9   :  { %v5693_v61 = vadd.f32 %v4216_v22, %v265_v60  ;;  %4894 = vrot.lane.b32.xlu0 %v5689_v58, %s5458_s21 }
  0xfb   :  { %8231 = vst [vmem:[#allocation16_spill] sm:$0xff] %v5693_v61  ;;  %v4552_v62 = vpop.f32.mrb[16].mxu0  ;;  %v5699_v63 = vpack.i.bf16 %v5691_v59, %v5693_v61 }
  0xfc   :  { %v5701_v0 = vadd.f32 %v4552_v62, %v4216_v22  ;;  %v275_v1 = vpop.f32.mrb[17].mxu0 }
  0xfd   :  { %v5703_v2 = vadd.f32 %v4216_v22, %v275_v1  ;;  %4899 = vrot.lane.b32.xlu1 %v5699_v63, %s5458_s21 }
  0xff   :  { %8232 = vst [vmem:[#allocation17_spill] sm:$0xff] %v5703_v2  ;;  %v5709_v3 = vpack.i.bf16 %v5701_v0, %v5703_v2 }
 0x101   :  { %4914 = vrot.lane.b32.xlu1 %v5639_v32, %s5459_s3  ;;  %4904 = vrot.lane.b32.xlu0 %v5709_v3, %s5458_s21 }
 0x105   :  { %4919 = vrot.lane.b32.xlu1 %v5649_v38, %s5459_s3  ;;  %4909 = vrot.lane.b32.xlu0 %v5629_v27, %s5459_s3 }
 0x109   :  { %4934 = vrot.lane.b32.xlu1 %v5679_v53, %s5459_s3  ;;  %4924 = vrot.lane.b32.xlu0 %v5659_v43, %s5459_s3 }
 0x10d   :  { %4949 = vrot.lane.b32.xlu1 %v5629_v27, %s5460_s22  ;;  %4929 = vrot.lane.b32.xlu0 %v5669_v48, %s5459_s3 }
 0x111   :  { %4959 = vrot.lane.b32.xlu1 %v5649_v38, %s5460_s22  ;;  %4939 = vrot.lane.b32.xlu0 %v5689_v58, %s5459_s3 }
 0x115   :  { %4944 = vrot.lane.b32.xlu0 %v5699_v63, %s5459_s3  ;;  %4964 = vrot.lane.b32.xlu1 %v5709_v3, %s5459_s3 }
 0x119   :  { %4954 = vrot.lane.b32.xlu0 %v5639_v32, %s5460_s22 }
 0x153   :  { %v4865_v5 = vpop.permute.xlu0 %4864 }
 0x154   :  { %v4867_v6 = vunpack.i.h.bf16 %v4865_v5  ;;  %v4866_v7 = vunpack.i.l.bf16 %v4865_v5 }
 0x156   :  { %v4682_v9 = vpack.c.bf16 %v4867_v6, %v4866_v7 }
 0x157   :  { %v4870_v10 = vpop.permute.xlu0 %4869 }
 0x158   :  { %4684 = vmatpush1.bf16.xpose.msk.msra.mxu1 %vm5731_vm2, %v4682_v9  ;;  %v4872_v11 = vunpack.i.h.bf16 %v4870_v10  ;;  %v4871_v12 = vunpack.i.l.bf16 %v4870_v10 }
 0x159   :  { %4685 = vmatprep.subr.bf16.mxu1 %v8184_v21 }
 0x15a   :  { %v4686_v13 = vpack.c.bf16 %v4872_v11, %v4871_v12 }
 0x15b   :  { %v4875_v14 = vpop.permute.xlu1 %4874 }
 0x15c   :  { %v4877_v15 = vunpack.i.h.bf16 %v4875_v14  ;;  %v4876_v16 = vunpack.i.l.bf16 %v4875_v14 }
 0x15e   :  { %v4690_v18 = vpack.c.bf16 %v4877_v15, %v4876_v16 }
 0x15f   :  { %v4880_v17 = vpop.permute.xlu1 %4879 }
 0x160   :  { %4688 = vmatpush1.bf16.xpose.msk.msra.mxu1 %vm5731_vm2, %v4686_v13  ;;  %v4882_v20 = vunpack.i.h.bf16 %v4880_v17  ;;  %v4881_v22 = vunpack.i.l.bf16 %v4880_v17 }
 0x161   :  { %4689 = vmatprep.subr.bf16.mxu1 %v8184_v21 }
 0x162   :  { %v4694_v25 = vpack.c.bf16 %v4882_v20, %v4881_v22 }
 0x163   :  { %v4885_v19 = vpop.permute.xlu0 %4884 }
 0x164   :  { %v4887_v33 = vunpack.i.h.bf16 %v4885_v19  ;;  %v4886_v35 = vunpack.i.l.bf16 %v4885_v19 }
 0x166   :  { %v4698_v40 = vpack.c.bf16 %v4887_v33, %v4886_v35 }
 0x167   :  { %v4890_v23 = vpop.permute.xlu1 %4889 }
 0x168   :  { %4692 = vmatpush1.bf16.xpose.msk.msra.mxu1 %vm5731_vm2, %v4690_v18  ;;  %v4892_v47 = vunpack.i.h.bf16 %v4890_v23  ;;  %v4891_v50 = vunpack.i.l.bf16 %v4890_v23 }
 0x169   :  { %4693 = vmatprep.subr.bf16.mxu1 %v8184_v21 }
 0x16a   :  { %v4702_v5 = vpack.c.bf16 %v4892_v47, %v4891_v50 }
 0x16b   :  { %v4895_v28 = vpop.permute.xlu0 %4894 }
 0x16c   :  { %v4897_v11 = vunpack.i.h.bf16 %v4895_v28  ;;  %v4896_v12 = vunpack.i.l.bf16 %v4895_v28 }
 0x16e   :  { %v4706_v18 = vpack.c.bf16 %v4897_v11, %v4896_v12 }
 0x16f   :  { %v4900_v30 = vpop.permute.xlu1 %4899 }
 0x170   :  { %4696 = vmatpush1.bf16.xpose.msk.msra.mxu1 %vm5731_vm2, %v4694_v25  ;;  %v4902_v23 = vunpack.i.h.bf16 %v4900_v30  ;;  %v4901_v25 = vunpack.i.l.bf16 %v4900_v30 }
 0x171   :  { %4697 = vmatprep.subr.bf16.mxu1 %v8184_v21 }
 0x173   :  { %v5747_v37 = vpop.permute.xlu0 %4904  ;;  %v4915_v42 = vpop.permute.xlu1 %4914 }
 0x174   :  { %v4917_v57 = vunpack.i.h.bf16 %v4915_v42  ;;  %v4916_v60 = vunpack.i.l.bf16 %v4915_v42 }
 0x176   :  { %v4721_v7 = vpack.c.bf16 %v4917_v57, %v4916_v60  ;;  %v4906_v57 = vunpack.i.l.bf16 %v5747_v37 }
 0x177   :  { %v4910_v45 = vpop.permute.xlu0 %4909  ;;  %v4920_v1 = vpop.permute.xlu1 %4919 }
 0x178   :  { %v4912_v52 = vunpack.i.h.bf16 %v4910_v45  ;;  %v4911_v55 = vunpack.i.l.bf16 %v4910_v45  ;;  %4700 = vmatpush1.bf16.xpose.msk.msra.mxu1 %vm5731_vm2, %v4698_v40  ;;  %v4922_v9 = vunpack.i.h.bf16 %v4920_v1  ;;  %v4921_v10 = vunpack.i.l.bf16 %v4920_v1 }
 0x179   :  { %4701 = vmatprep.subr.bf16.mxu1 %v8184_v21  ;;  %v4710_v45 = vpack.c.bf16 %v4902_v23, %v4901_v25  ;;  %v287_v23 = vld [vmem:[%s8170_s1 + $0x18] sm:$0xff] }
 0x17a   :  { %v4718_v62 = vpack.c.bf16 %v4912_v52, %v4911_v55  ;;  %v4724_v13 = vpack.c.bf16 %v4922_v9, %v4921_v10  ;;  %v4907_v55 = vunpack.i.h.bf16 %v5747_v37 }
 0x17b   :  { %v4925_v6 = vpop.permute.xlu0 %4924  ;;  %v4935_v16 = vpop.permute.xlu1 %4934 }
 0x17c   :  { %4719 = vmatpush1.bf16.msra.mxu0 %v4718_v62  ;;  %v4927_v14 = vunpack.i.h.bf16 %v4925_v6  ;;  %v4926_v15 = vunpack.i.l.bf16 %v4925_v6  ;;  %v4937_v33 = vunpack.i.h.bf16 %v4935_v16  ;;  %v4936_v35 = vunpack.i.l.bf16 %v4935_v16  ;;  %v284_v16 = vld [vmem:[%s8170_s1] sm:$0xff] }
 0x17d   :  { %4720 = vmatprep.subr.bf16.mxu0 %v8184_v21 }
 0x17e   :  { %v4727_v19 = vpack.c.bf16 %v4927_v14, %v4926_v15  ;;  %v4733_v47 = vpack.c.bf16 %v4937_v33, %v4936_v35  ;;  %v285_v14 = vld [vmem:[%s8170_s1 + $0x8] sm:$0xff]  ;;  %v286_v33 = vld [vmem:[%s8170_s1 + $0x10] sm:$0xff] }
 0x17f   :  { %v4930_v17 = vpop.permute.xlu0 %4929  ;;  %v5760_v28 = vpop.permute.xlu1 %4949 }
 0x180   :  { %4704 = vmatpush1.bf16.xpose.msk.msra.mxu1 %vm5731_vm2, %v4702_v5  ;;  %4722 = vmatpush1.bf16.msra.mxu0 %v4721_v7  ;;  %v4932_v20 = vunpack.i.h.bf16 %v4930_v17  ;;  %v4931_v22 = vunpack.i.l.bf16 %v4930_v17  ;;  %v4714_v7 = vpack.c.bf16 %v4907_v55, %v4906_v57  ;;  %v289_v55 = vld [vmem:[%s8170_s1 + $0x28] sm:$0xff] }
 0x181   :  { %4723 = vmatprep.subr.bf16.mxu0 %v8184_v21  ;;  %4705 = vmatprep.subr.bf16.mxu1 %v8184_v21 }
 0x182   :  { %v4730_v40 = vpack.c.bf16 %v4932_v20, %v4931_v22 }
 0x183   :  { %v4940_v42 = vpop.permute.xlu0 %4939  ;;  %v5765_v52 = vpop.permute.xlu1 %4959 }
 0x184   :  { %4725 = vmatpush1.bf16.msra.mxu0 %v4724_v13  ;;  %v4942_v30 = vunpack.i.h.bf16 %v4940_v42  ;;  %v4941_v50 = vunpack.i.l.bf16 %v4940_v42  ;;  %8235 = vst [vmem:[#allocation18_spill] sm:$0xff] %v5765_v52  ;;  %v319_v52 = vld [vmem:[%s8170_s1 + $0x118] sm:$0xff] }
 0x185   :  { %4726 = vmatprep.subr.bf16.mxu0 %v8184_v21 }
 0x186   :  { %v4736_v62 = vpack.c.bf16 %v4942_v30, %v4941_v50 }
 0x187   :  { %v4945_v60 = vpop.permute.xlu0 %4944  ;;  %v4965_v6 = vpop.permute.xlu1 %4964 }
 0x188   :  { %4708 = vmatpush1.bf16.xpose.msk.msra.mxu1 %vm5731_vm2, %v4706_v18  ;;  %4728 = vmatpush1.bf16.msra.mxu0 %v4727_v19  ;;  %v4947_v1 = vunpack.i.h.bf16 %v4945_v60  ;;  %v4946_v5 = vunpack.i.l.bf16 %v4945_v60  ;;  %v4967_v10 = vunpack.i.h.bf16 %v4965_v6  ;;  %v4966_v37 = vunpack.i.l.bf16 %v4965_v6  ;;  %v288_v60 = vld [vmem:[%s8170_s1 + $0x20] sm:$0xff] }
 0x189   :  { %4729 = vmatprep.subr.bf16.mxu0 %v8184_v21  ;;  %4709 = vmatprep.subr.bf16.mxu1 %v8184_v21 }
 0x18a   :  { %v4739_v9 = vpack.c.bf16 %v4947_v1, %v4946_v5  ;;  %v4742_v11 = vpack.c.bf16 %v4967_v10, %v4966_v37  ;;  %v291_v37 = vld [vmem:[%s8170_s1 + $0x38] sm:$0xff] }
 0x18c   :  { %4731 = vmatpush1.bf16.msra.mxu0 %v4730_v40 }
 0x18d   :  { %4732 = vmatprep.subr.bf16.mxu0 %v8184_v21 }
 0x190   :  { %4712 = vmatpush1.bf16.xpose.msk.msra.mxu1 %vm5731_vm2, %v4710_v45  ;;  %4734 = vmatpush1.bf16.msra.mxu0 %v4733_v47 }
 0x191   :  { %4735 = vmatprep.subr.bf16.mxu0 %v8184_v21  ;;  %4713 = vmatprep.subr.bf16.mxu1 %v8184_v21 }
 0x194   :  { %4737 = vmatpush1.bf16.msra.mxu0 %v4736_v62 }
 0x195   :  { %4738 = vmatprep.subr.bf16.mxu0 %v8184_v21 }
 0x198   :  { %4716 = vmatpush1.bf16.xpose.msk.msra.mxu1 %vm5731_vm2, %v4714_v7  ;;  %4740 = vmatpush1.bf16.msra.mxu0 %v4739_v9 }
 0x199   :  { %4741 = vmatprep.subr.bf16.mxu0 %v8184_v21  ;;  %4819 = vmatprep.subr.bf16.mxu1 %v8184_v21 }
 0x19c   :  { %4743 = vmatpush1.bf16.msra.mxu0 %v4742_v11 }
 0x19d   :  { %4744 = vmatprep.subr.bf16.mxu0 %v8184_v21 }
 0x19f   :  { %4253 = vmatmul.mubr.msk.f32.vlgmr.msra.gmra.mrb[0].mxu1 %vm376_vm1, %v5625_v26  ;;  %v317_v26 = vld [vmem:[%s8170_s1 + $0x108] sm:$0xff] }
 0x1a0   :  { %519 = vmatprep.mubr.f32.mxu1 %v8182_v4 }
 0x1a3   :  { %4254 = vmatmul.mubr.msk.f32.gmra.mrb[2].mxu1 %vm376_vm1, %v5623_v24 }
 0x1a4   :  { %525 = vmatprep.mubr.f32.mxu1 %v8182_v4 }
 0x1a7   :  { %4255 = vmatmul.mubr.msk.f32.gmra.mrb[4].mxu1 %vm376_vm1, %v5635_v31 }
 0x1a8   :  { %531 = vmatprep.mubr.f32.mxu1 %v8182_v4 }
 0x1ab   :  { %4256 = vmatmul.mubr.msk.f32.gmra.mrb[6].mxu1 %vm376_vm1, %v5631_v29  ;;  %v315_v29 = vld [vmem:[%s8170_s1 + $0xf8] sm:$0xff] }
 0x1ac   :  { %537 = vmatprep.mubr.f32.mxu1 %v8182_v4 }
 0x1af   :  { %4257 = vmatmul.mubr.msk.f32.gmra.mrb[8].mxu1 %vm376_vm1, %v5645_v36  ;;  %v313_v36 = vld [vmem:[%s8170_s1 + $0xe8] sm:$0xff] }
 0x1b0   :  { %543 = vmatprep.mubr.f32.mxu1 %v8182_v4 }
 0x1b3   :  { %4258 = vmatmul.mubr.msk.f32.gmra.mrb[10].mxu1 %vm376_vm1, %v5641_v34 }
 0x1b4   :  { %549 = vmatprep.mubr.f32.mxu1 %v8182_v4 }
 0x1b7   :  { %4259 = vmatmul.mubr.msk.f32.gmra.mrb[12].mxu1 %vm376_vm1, %v5653_v41 }
 0x1b8   :  { %555 = vmatprep.mubr.f32.mxu1 %v8182_v4 }
 0x1bb   :  { %4260 = vmatmul.mubr.msk.f32.gmra.mrb[14].mxu1 %vm376_vm1, %v5651_v39 }
 0x1bc   :  { %561 = vmatprep.mubr.f32.mxu1 %v8182_v4 }
 0x1bf   :  { %4261 = vmatmul.mubr.msk.f32.gmra.mrb[16].mxu1 %vm376_vm1, %v5663_v46 }
 0x1c0   :  { %567 = vmatprep.mubr.f32.mxu1 %v8182_v4 }
 0x1c3   :  { %4262 = vmatmul.mubr.msk.f32.gmra.mrb[18].mxu1 %vm376_vm1, %v5661_v44 }
 0x1c4   :  { %573 = vmatprep.mubr.f32.mxu1 %v8182_v4 }
 0x1c7   :  { %4263 = vmatmul.mubr.msk.f32.gmra.mrb[20].mxu1 %vm376_vm1, %v5673_v51 }
 0x1c8   :  { %579 = vmatprep.mubr.f32.mxu1 %v8182_v4 }
 0x1cb   :  { %4264 = vmatmul.mubr.msk.f32.gmra.mrb[22].mxu1 %vm376_vm1, %v5671_v49 }
 0x1cc   :  { %585 = vmatprep.mubr.f32.mxu1 %v8182_v4 }
 0x1cf   :  { %4265 = vmatmul.mubr.msk.f32.gmra.mrb[24].mxu1 %vm376_vm1, %v5683_v56 }
 0x1d0   :  { %591 = vmatprep.mubr.f32.mxu1 %v8182_v4 }
 0x1d3   :  { %4266 = vmatmul.mubr.msk.f32.gmra.mrb[26].mxu1 %vm376_vm1, %v5681_v54 }
 0x1d4   :  { %597 = vmatprep.mubr.f32.mxu1 %v8182_v4 }
 0x1d7   :  { %4267 = vmatmul.mubr.msk.f32.gmra.mrb[28].mxu1 %vm376_vm1, %v5693_v61 }
 0x1d8   :  { %603 = vmatprep.mubr.f32.mxu1 %v8182_v4 }
 0x1db   :  { %4268 = vmatmul.mubr.msk.f32.gmra.mrb[30].mxu1 %vm376_vm1, %v5691_v59 }
 0x1dc   :  { %609 = vmatprep.mubr.f32.mxu1 %v8182_v4 }
 0x1df   :  { %4269 = vmatmul.mubr.msk.f32.gmra.mrb[32].mxu1 %vm376_vm1, %v5703_v2 }
 0x1e0   :  { %615 = vmatprep.mubr.f32.mxu1 %v8182_v4 }
 0x1e3   :  { %4270 = vmatmul.mubr.msk.f32.gmra.mrb[34].mxu1 %vm376_vm1, %v5701_v0 }
 0x272   :  { %v515_v12 = vpop.f32.mrb[0].mxu1 }
 0x273   :  { %v622_v13 = vmul.f32 0.35355338, %v515_v12  ;;  %v517_v15 = vpop.f32.mrb[1].mxu1  ;;  %v290_v12 = vld [vmem:[%s8170_s1 + $0x30] sm:$0xff] }
 0x274   :  { %v623_v17 = vmul.f32 0.35355338, %v517_v15 }
 0x275   :  { %v5840_v20 = vadd.f32 %v622_v13, %v284_v16 }
 0x276   :  { %v5838_v18 = vadd.f32 %v623_v17, %v285_v14  ;;  %v521_v19 = vpop.f32.mrb[2].mxu1 }
 0x277   :  { %v624_v22 = vmul.f32 0.35355338, %v521_v19  ;;  %v523_v25 = vpop.f32.mrb[3].mxu1 }
 0x278   :  { %v625_v35 = vmul.f32 0.35355338, %v523_v25  ;;  %v694_v40 = vsel %vm74_vm0, %v5838_v18, -inf }
 0x279   :  { %v695_v42 = vmax.f32 %v5840_v20, %v694_v40  ;;  %v5853_v30 = vadd.f32 %v624_v22, %v286_v33  ;;  %v292_v33 = vld [vmem:[%s8170_s1 + $0x40] sm:$0xff] }
 0x27a   :  { %v5851_v45 = vadd.f32 %v625_v35, %v287_v23  ;;  %v527_v47 = vpop.f32.mrb[4].mxu1  ;;  %v293_v23 = vld [vmem:[%s8170_s1 + $0x48] sm:$0xff] }
 0x27b   :  { %v626_v50 = vmul.f32 0.35355338, %v527_v47  ;;  %696 = vmax.xlane.f32.xlu1 %v695_v42  ;;  %v529_v57 = vpop.f32.mrb[5].mxu1 }
 0x27c   :  { %v627_v62 = vmul.f32 0.35355338, %v529_v57  ;;  %v698_v1 = vsel %vm74_vm0, %v5851_v45, -inf }
 0x27d   :  { %v699_v5 = vmax.f32 %v5853_v30, %v698_v1  ;;  %v5866_v9 = vadd.f32 %v626_v50, %v288_v60  ;;  %v295_v60 = vld [vmem:[%s8170_s1 + $0x58] sm:$0xff]  ;;  %v294_v1 = vld [vmem:[%s8170_s1 + $0x50] sm:$0xff] }
 0x27e   :  { %v5864_v6 = vadd.f32 %v627_v62, %v289_v55  ;;  %v533_v7 = vpop.f32.mrb[6].mxu1 }
 0x27f   :  { %v628_v10 = vmul.f32 0.35355338, %v533_v7  ;;  %700 = vmax.xlane.f32.xlu0 %v699_v5  ;;  %v535_v11 = vpop.f32.mrb[7].mxu1 }
 0x280   :  { %v629_v13 = vmul.f32 0.35355338, %v535_v11  ;;  %v702_v14 = vsel %vm74_vm0, %v5864_v6, -inf }
 0x281   :  { %v703_v15 = vmax.f32 %v5866_v9, %v702_v14  ;;  %v5879_v19 = vadd.f32 %v628_v10, %v290_v12  ;;  %v297_v14 = vld [vmem:[%s8170_s1 + $0x68] sm:$0xff] }
 0x282   :  { %v5877_v16 = vadd.f32 %v629_v13, %v291_v37  ;;  %v539_v17 = vpop.f32.mrb[8].mxu1 }
 0x283   :  { %v630_v22 = vmul.f32 0.35355338, %v539_v17  ;;  %704 = vmax.xlane.f32.xlu0 %v703_v15  ;;  %v541_v25 = vpop.f32.mrb[9].mxu1  ;;  %v296_v17 = vld [vmem:[%s8170_s1 + $0x60] sm:$0xff] }
 0x284   :  { %v631_v35 = vmul.f32 0.35355338, %v541_v25  ;;  %v706_v40 = vsel %vm74_vm0, %v5877_v16, -inf }
 0x285   :  { %v707_v42 = vmax.f32 %v5879_v19, %v706_v40  ;;  %v5892_v55 = vadd.f32 %v630_v22, %v292_v33 }
 0x286   :  { %v5890_v47 = vadd.f32 %v631_v35, %v293_v23  ;;  %v545_v50 = vpop.f32.mrb[10].mxu1 }
 0x287   :  { %v632_v57 = vmul.f32 0.35355338, %v545_v50  ;;  %708 = vmax.xlane.f32.xlu1 %v707_v42  ;;  %v547_v62 = vpop.f32.mrb[11].mxu1  ;;  %v299_v50 = vld [vmem:[%s8170_s1 + $0x78] sm:$0xff] }
 0x288   :  { %v633_v5 = vmul.f32 0.35355338, %v547_v62  ;;  %v710_v7 = vsel %vm74_vm0, %v5890_v47, -inf }
 0x289   :  { %v711_v10 = vmax.f32 %v5892_v55, %v710_v7  ;;  %v5905_v12 = vadd.f32 %v632_v57, %v294_v1 }
 0x28a   :  { %v5903_v37 = vadd.f32 %v633_v5, %v295_v60  ;;  %v551_v11 = vpop.f32.mrb[12].mxu1  ;;  %v298_v60 = vld [vmem:[%s8170_s1 + $0x70] sm:$0xff] }
 0x28b   :  { %v634_v13 = vmul.f32 0.35355338, %v551_v11  ;;  %712 = vmax.xlane.f32.xlu0 %v711_v10  ;;  %v553_v15 = vpop.f32.mrb[13].mxu1 }
 0x28c   :  { %v635_v22 = vmul.f32 0.35355338, %v553_v15  ;;  %v714_v23 = vsel %vm74_vm0, %v5903_v37, -inf }
 0x28d   :  { %v715_v25 = vmax.f32 %v5905_v12, %v714_v23  ;;  %v5918_v40 = vadd.f32 %v634_v13, %v296_v17  ;;  %v300_v17 = vld [vmem:[%s8170_s1 + $0x80] sm:$0xff] }
 0x28e   :  { %v5916_v33 = vadd.f32 %v635_v22, %v297_v14  ;;  %v557_v35 = vpop.f32.mrb[14].mxu1  ;;  %v301_v14 = vld [vmem:[%s8170_s1 + $0x88] sm:$0xff] }
 0x28f   :  { %v636_v42 = vmul.f32 0.35355338, %v557_v35  ;;  %716 = vmax.xlane.f32.xlu1 %v715_v25  ;;  %v559_v57 = vpop.f32.mrb[15].mxu1 }
 0x290   :  { %v637_v62 = vmul.f32 0.35355338, %v559_v57  ;;  %v718_v1 = vsel %vm74_vm0, %v5916_v33, -inf }
 0x291   :  { %v719_v5 = vmax.f32 %v5918_v40, %v718_v1  ;;  %v5931_v11 = vadd.f32 %v636_v42, %v298_v60  ;;  %v303_v60 = vld [vmem:[%s8170_s1 + $0x98] sm:$0xff]  ;;  %v302_v1 = vld [vmem:[%s8170_s1 + $0x90] sm:$0xff] }
 0x292   :  { %v5929_v7 = vadd.f32 %v637_v62, %v299_v50  ;;  %v563_v10 = vpop.f32.mrb[16].mxu1 }
 0x293   :  { %v638_v13 = vmul.f32 0.35355338, %v563_v10  ;;  %720 = vmax.xlane.f32.xlu0 %v719_v5  ;;  %v565_v15 = vpop.f32.mrb[17].mxu1 }
 0x294   :  { %v639_v22 = vmul.f32 0.35355338, %v565_v15  ;;  %v722_v23 = vsel %vm74_vm0, %v5929_v7, -inf }
 0x295   :  { %v723_v25 = vmax.f32 %v5931_v11, %v722_v23  ;;  %v5944_v50 = vadd.f32 %v638_v13, %v300_v17  ;;  %v305_v23 = vld [vmem:[%s8170_s1 + $0xa8] sm:$0xff] }
 0x296   :  { %v5942_v35 = vadd.f32 %v639_v22, %v301_v14  ;;  %v569_v42 = vpop.f32.mrb[18].mxu1 }
 0x297   :  { %v640_v57 = vmul.f32 0.35355338, %v569_v42  ;;  %724 = vmax.xlane.f32.xlu1 %v723_v25  ;;  %v571_v62 = vpop.f32.mrb[19].mxu1  ;;  %v304_v42 = vld [vmem:[%s8170_s1 + $0xa0] sm:$0xff] }
 0x298   :  { %v641_v5 = vmul.f32 0.35355338, %v571_v62  ;;  %v726_v10 = vsel %vm74_vm0, %v5942_v35, -inf }
 0x299   :  { %v727_v14 = vmax.f32 %v5944_v50, %v726_v10  ;;  %v5957_v17 = vadd.f32 %v640_v57, %v302_v1 }
 0x29a   :  { %v5955_v15 = vadd.f32 %v641_v5, %v303_v60  ;;  %v575_v13 = vpop.f32.mrb[20].mxu1 }
 0x29b   :  { %v642_v22 = vmul.f32 0.35355338, %v575_v13  ;;  %728 = vmax.xlane.f32.xlu0 %v727_v14  ;;  %v577_v25 = vpop.f32.mrb[21].mxu1  ;;  %v307_v13 = vld [vmem:[%s8170_s1 + $0xb8] sm:$0xff] }
 0x29c   :  { %v643_v62 = vmul.f32 0.35355338, %v577_v25  ;;  %v730_v10 = vsel %vm74_vm0, %v5955_v15, -inf  ;;  %v306_v25 = vld [vmem:[%s8170_s1 + $0xb0] sm:$0xff] }
 0x29d   :  { %v731_v60 = vmax.f32 %v5957_v17, %v730_v10  ;;  %v5970_v1 = vadd.f32 %v642_v22, %v304_v42 }
 0x29e   :  { %v5968_v5 = vadd.f32 %v643_v62, %v305_v23  ;;  %v581_v57 = vpop.f32.mrb[22].mxu1 }
 0x29f   :  { %v644_v14 = vmul.f32 0.35355338, %v581_v57  ;;  %732 = vmax.xlane.f32.xlu1 %v731_v60  ;;  %v583_v4 = vpop.f32.mrb[23].mxu1  ;;  %v309_v57 = vld [vmem:[%s8170_s1 + $0xc8] sm:$0xff] }
 0x2a0   :  { %v645_v21 = vmul.f32 0.35355338, %v583_v4  ;;  %v734_v10 = vsel %vm74_vm0, %v5968_v5, -inf  ;;  %v308_v4 = vld [vmem:[%s8170_s1 + $0xc0] sm:$0xff] }
 0x2a1   :  { %v735_v23 = vmax.f32 %v5970_v1, %v734_v10  ;;  %v5983_v42 = vadd.f32 %v644_v14, %v306_v25 }
 0x2a2   :  { %v5981_v62 = vadd.f32 %v645_v21, %v307_v13  ;;  %v587_v22 = vpop.f32.mrb[24].mxu1 }
 0x2a3   :  { %v646_v60 = vmul.f32 0.35355338, %v587_v22  ;;  %736 = vmax.xlane.f32.xlu0 %v735_v23  ;;  %v589_v38 = vpop.f32.mrb[25].mxu1 }
 0x2a4   :  { %v647_v32 = vmul.f32 0.35355338, %v589_v38  ;;  %v738_v10 = vsel %vm74_vm0, %v5981_v62, -inf }
 0x2a5   :  { %v739_v21 = vmax.f32 %v5983_v42, %v738_v10  ;;  %v5996_v25 = vadd.f32 %v646_v60, %v308_v4 }
 0x2a6   :  { %v5994_v13 = vadd.f32 %v647_v32, %v309_v57  ;;  %v593_v14 = vpop.f32.mrb[26].mxu1  ;;  %v311_v57 = vld [vmem:[%s8170_s1 + $0xd8] sm:$0xff] }
 0x2a7   :  { %740 = vmax.xlane.f32.xlu1 %v739_v21  ;;  %v595_v23 = vpop.f32.mrb[27].mxu1 }
 0x2a8   :  { %v742_v22 = vsel %vm74_vm0, %v5994_v13, -inf  ;;  %v649_v60 = vmul.f32 0.35355338, %v595_v23  ;;  %v310_v23 = vld [vmem:[%s8170_s1 + $0xd0] sm:$0xff] }
 0x2a9   :  { %v743_v2 = vmax.f32 %v5996_v25, %v742_v22  ;;  %v648_v22 = vmul.f32 0.35355338, %v593_v14 }
 0x2aa   :  { %v599_v61 = vpop.f32.mrb[28].mxu1  ;;  %v6008_v4 = vadd.f32 %v649_v60, %v311_v57 }
 0x2ab   :  { %744 = vmax.xlane.f32.xlu0 %v743_v2  ;;  %v601_v38 = vpop.f32.mrb[29].mxu1  ;;  %v6025_v57 = vadd.f32 %v648_v22, %v310_v23  ;;  %v650_v31 = vmul.f32 0.35355338, %v599_v61 }
 0x2ac   :  { %v651_v2 = vmul.f32 0.35355338, %v601_v38 }
 0x2ae   :  { %v605_v56 = vpop.f32.mrb[30].mxu1  ;;  %v6021_v60 = vadd.f32 %v651_v2, %v313_v36  ;;  %v312_v36 = vld [vmem:[%s8170_s1 + $0xe0] sm:$0xff] }
 0x2af   :  { %v607_v51 = vpop.f32.mrb[31].mxu1  ;;  %v652_v24 = vmul.f32 0.35355338, %v605_v56 }
 0x2b0   :  { %v653_v21 = vmul.f32 0.35355338, %v607_v51 }
 0x2b2   :  { %v611_v46 = vpop.f32.mrb[32].mxu1  ;;  %v6023_v38 = vadd.f32 %v653_v21, %v315_v29  ;;  %v314_v29 = vld [vmem:[%s8170_s1 + $0xf0] sm:$0xff]  ;;  %v6048_v21 = vadd.f32 %v650_v31, %v312_v36 }
 0x2b3   :  { %v613_v41 = vpop.f32.mrb[33].mxu1  ;;  %v6050_v22 = vadd.f32 %v652_v24, %v314_v29  ;;  %v654_v23 = vmul.f32 0.35355338, %v611_v46  ;;  %v6070_v29 = vpop.permute.xlu0 %4954 }
 0x2b4   :  { %v655_v51 = vmul.f32 0.35355338, %v613_v41  ;;  %v754_v2 = vsel %vm74_vm0, %v6023_v38, -inf }
 0x2b6   :  { %v617_v10 = vpop.f32.mrb[34].mxu1  ;;  %v6040_v61 = vadd.f32 %v655_v51, %v317_v26  ;;  %v316_v26 = vld [vmem:[%s8170_s1 + $0x100] sm:$0xff]  ;;  %v755_v51 = vmax.f32 %v6050_v22, %v754_v2 }
 0x2b7   :  { %v619_v32 = vpop.f32.mrb[35].mxu1  ;;  %v6064_v46 = vadd.f32 %v654_v23, %v316_v26 }
 0x2b8   :  { %4974 = vrot.lane.b32.xlu1 %v5669_v48, %s5460_s22  ;;  %v657_v14 = vmul.f32 0.35355338, %v619_v32  ;;  %v750_v32 = vsel %vm74_vm0, %v6021_v60, -inf  ;;  %v656_v48 = vmul.f32 0.35355338, %v617_v10  ;;  %v758_v31 = vsel %vm74_vm0, %v6040_v61, -inf }
 0x2ba   :  { %v6042_v56 = vadd.f32 %v657_v14, %v319_v52  ;;  %v751_v52 = vmax.f32 %v6048_v21, %v750_v32  ;;  %v759_v14 = vmax.f32 %v6064_v46, %v758_v31 }
 0x2bc   :  { %v762_v24 = vsel %vm74_vm0, %v6042_v56, -inf }
 0x2c1   :  { %4969 = vrot.lane.b32.xlu0 %v5659_v43, %s5460_s22  ;;  %v746_v43 = vsel %vm74_vm0, %v6008_v4, -inf }
 0x2c2   :  { %v747_v41 = vmax.f32 %v6025_v57, %v746_v43  ;;  %v318_v43 = vld [vmem:[%s8170_s1 + $0x110] sm:$0xff] }
 0x2c3   :  { %v6066_v10 = vadd.f32 %v656_v48, %v318_v43 }
 0x2c5   :  { %v763_v36 = vmax.f32 %v6066_v10, %v762_v24 }
 0x2dc   :  { %748 = vmax.xlane.f32.xlu1 %v747_v41 }
 0x2e0   :  { %752 = vmax.xlane.f32.xlu0 %v751_v52  ;;  %756 = vmax.xlane.f32.xlu1 %v755_v51 }
 0x2e4   :  { %760 = vmax.xlane.f32.xlu0 %v759_v14  ;;  %764 = vmax.xlane.f32.xlu1 %v763_v36 }
 0x308   :  { %v697_v41 = vpop.xlane.xlu1 %696 }
 0x309   :  { %v766_v32 = vsub.f32 %v5840_v20, %v697_v41  ;;  %v767_v2 = vsub.f32 %v5838_v18, %v697_v41 }
 0x30b   :  { %v802_v27 = vmul.f32 1.442695, %v766_v32  ;;  %v804_v23 = vmul.f32 1.442695, %v767_v2 }
 0x30c   :  { %v701_v26 = vpop.xlane.xlu0 %700 }
 0x30d   :  { %5043 = vpow2.f32 %v802_v27  ;;  %v768_v48 = vsub.f32 %v5853_v30, %v701_v26  ;;  %v769_v43 = vsub.f32 %v5851_v45, %v701_v26 }
 0x30e   :  { %5045 = vpow2.f32 %v804_v23 }
 0x30f   :  { %v806_v52 = vmul.f32 1.442695, %v768_v48  ;;  %v808_v51 = vmul.f32 1.442695, %v769_v43 }
 0x310   :  { %v705_v31 = vpop.xlane.xlu0 %704 }
 0x311   :  { %5047 = vpow2.f32 %v806_v52  ;;  %v770_v24 = vsub.f32 %v5866_v9, %v705_v31  ;;  %v771_v14 = vsub.f32 %v5864_v6, %v705_v31 }
 0x312   :  { %5049 = vpow2.f32 %v808_v51 }
 0x313   :  { %v810_v20 = vmul.f32 1.442695, %v770_v24  ;;  %v812_v18 = vmul.f32 1.442695, %v771_v14 }
 0x314   :  { %v709_v36 = vpop.xlane.xlu1 %708 }
 0x315   :  { %5051 = vpow2.f32 %v810_v20  ;;  %v772_v27 = vsub.f32 %v5879_v19, %v709_v36  ;;  %v773_v30 = vsub.f32 %v5877_v16, %v709_v36 }
 0x316   :  { %5053 = vpow2.f32 %v812_v18 }
 0x317   :  { %v6080_v45 = vpop.eup %5043  ;;  %v814_v41 = vmul.f32 1.442695, %v772_v27  ;;  %v816_v32 = vmul.f32 1.442695, %v773_v30 }
 0x318   :  { %v6082_v2 = vpop.eup %5045  ;;  %v713_v23 = vpop.xlane.xlu0 %712 }
 0x319   :  { %5055 = vpow2.f32 %v814_v41  ;;  %v774_v6 = vsub.f32 %v5892_v55, %v713_v23  ;;  %v775_v9 = vsub.f32 %v5890_v47, %v713_v23  ;;  %v874_v26 = vsel %vm74_vm0, %v6082_v2, 0.0 }
 0x31a   :  { %5057 = vpow2.f32 %v816_v32  ;;  %v875_v19 = vadd.f32 %v6080_v45, %v874_v26 }
 0x31b   :  { %v6089_v16 = vpop.eup %5047  ;;  %v818_v48 = vmul.f32 1.442695, %v774_v6  ;;  %v820_v43 = vmul.f32 1.442695, %v775_v9 }
 0x31c   :  { %v6091_v52 = vpop.eup %5049  ;;  %876 = vadd.xlane.f32.xlu1 %v875_v19  ;;  %v717_v51 = vpop.xlane.xlu1 %716 }
 0x31d   :  { %5059 = vpow2.f32 %v818_v48  ;;  %v776_v31 = vsub.f32 %v5905_v12, %v717_v51  ;;  %v777_v55 = vsub.f32 %v5903_v37, %v717_v51  ;;  %v878_v47 = vsel %vm74_vm0, %v6091_v52, 0.0 }
 0x31e   :  { %5061 = vpow2.f32 %v820_v43  ;;  %v879_v24 = vadd.f32 %v6089_v16, %v878_v47 }
 0x31f   :  { %v6098_v14 = vpop.eup %5051  ;;  %v822_v20 = vmul.f32 1.442695, %v776_v31  ;;  %v824_v18 = vmul.f32 1.442695, %v777_v55 }
 0x320   :  { %v6100_v36 = vpop.eup %5053  ;;  %880 = vadd.xlane.f32.xlu0 %v879_v24  ;;  %v721_v27 = vpop.xlane.xlu0 %720 }
 0x321   :  { %5063 = vpow2.f32 %v822_v20  ;;  %v778_v30 = vsub.f32 %v5918_v40, %v721_v27  ;;  %v779_v12 = vsub.f32 %v5916_v33, %v721_v27  ;;  %v882_v37 = vsel %vm74_vm0, %v6100_v36, 0.0 }
 0x322   :  { %5065 = vpow2.f32 %v824_v18  ;;  %v883_v41 = vadd.f32 %v6098_v14, %v882_v37 }
 0x323   :  { %v6107_v32 = vpop.eup %5055  ;;  %v826_v23 = vmul.f32 1.442695, %v778_v30  ;;  %v828_v6 = vmul.f32 1.442695, %v779_v12 }
 0x324   :  { %v6109_v9 = vpop.eup %5057  ;;  %884 = vadd.xlane.f32.xlu0 %v883_v41  ;;  %v725_v26 = vpop.xlane.xlu1 %724 }
 0x325   :  { %5067 = vpow2.f32 %v826_v23  ;;  %v780_v19 = vsub.f32 %v5931_v11, %v725_v26  ;;  %v781_v40 = vsub.f32 %v5929_v7, %v725_v26  ;;  %v886_v33 = vsel %vm74_vm0, %v6109_v9, 0.0 }
 0x326   :  { %5069 = vpow2.f32 %v828_v6  ;;  %v887_v48 = vadd.f32 %v6107_v32, %v886_v33 }
 0x327   :  { %v6116_v43 = vpop.eup %5059  ;;  %v830_v51 = vmul.f32 1.442695, %v780_v19  ;;  %v832_v31 = vmul.f32 1.442695, %v781_v40 }
 0x328   :  { %v6118_v55 = vpop.eup %5061  ;;  %888 = vadd.xlane.f32.xlu1 %v887_v48  ;;  %v729_v47 = vpop.xlane.xlu0 %728 }
 0x329   :  { %5071 = vpow2.f32 %v830_v51  ;;  %v782_v24 = vsub.f32 %v5944_v50, %v729_v47  ;;  %v783_v11 = vsub.f32 %v5942_v35, %v729_v47  ;;  %v890_v7 = vsel %vm74_vm0, %v6118_v55, 0.0 }
 0x32a   :  { %5073 = vpow2.f32 %v832_v31  ;;  %v891_v20 = vadd.f32 %v6116_v43, %v890_v7 }
 0x32b   :  { %v6125_v18 = vpop.eup %5063  ;;  %v834_v27 = vmul.f32 1.442695, %v782_v24  ;;  %v836_v30 = vmul.f32 1.442695, %v783_v11 }
 0x32c   :  { %v6127_v12 = vpop.eup %5065  ;;  %892 = vadd.xlane.f32.xlu0 %v891_v20  ;;  %v733_v37 = vpop.xlane.xlu1 %732 }
 0x32d   :  { %5075 = vpow2.f32 %v834_v27  ;;  %v784_v41 = vsub.f32 %v5957_v17, %v733_v37  ;;  %v785_v50 = vsub.f32 %v5955_v15, %v733_v37  ;;  %v894_v35 = vsel %vm74_vm0, %v6127_v12, 0.0 }
 0x32e   :  { %5077 = vpow2.f32 %v836_v30  ;;  %v895_v23 = vadd.f32 %v6125_v18, %v894_v35 }
 0x32f   :  { %v6134_v6 = vpop.eup %5067  ;;  %v838_v26 = vmul.f32 1.442695, %v784_v41  ;;  %v840_v19 = vmul.f32 1.442695, %v785_v50 }
 0x330   :  { %v6136_v40 = vpop.eup %5069  ;;  %896 = vadd.xlane.f32.xlu0 %v895_v23  ;;  %v737_v33 = vpop.xlane.xlu0 %736 }
 0x331   :  { %5079 = vpow2.f32 %v838_v26  ;;  %v786_v48 = vsub.f32 %v5970_v1, %v737_v33  ;;  %v787_v17 = vsub.f32 %v5968_v5, %v737_v33  ;;  %v898_v15 = vsel %vm74_vm0, %v6136_v40, 0.0 }
 0x332   :  { %5081 = vpow2.f32 %v840_v19  ;;  %v899_v51 = vadd.f32 %v6134_v6, %v898_v15 }
 0x333   :  { %v6143_v31 = vpop.eup %5071  ;;  %v842_v47 = vmul.f32 1.442695, %v786_v48  ;;  %v844_v24 = vmul.f32 1.442695, %v787_v17 }
 0x334   :  { %v6145_v11 = vpop.eup %5073  ;;  %900 = vadd.xlane.f32.xlu0 %v899_v51  ;;  %v741_v7 = vpop.xlane.xlu1 %740 }
 0x335   :  { %5083 = vpow2.f32 %v842_v47  ;;  %v788_v20 = vsub.f32 %v5983_v42, %v741_v7  ;;  %v789_v1 = vsub.f32 %v5981_v62, %v741_v7  ;;  %v902_v5 = vsel %vm74_vm0, %v6145_v11, 0.0 }
 0x336   :  { %5085 = vpow2.f32 %v844_v24  ;;  %v903_v27 = vadd.f32 %v6143_v31, %v902_v5 }
 0x337   :  { %v6152_v30 = vpop.eup %5075  ;;  %v846_v37 = vmul.f32 1.442695, %v788_v20  ;;  %v848_v41 = vmul.f32 1.442695, %v789_v1 }
 0x338   :  { %v6154_v50 = vpop.eup %5077  ;;  %904 = vadd.xlane.f32.xlu0 %v903_v27  ;;  %v745_v20 = vpop.xlane.xlu0 %744 }
 0x339   :  { %5087 = vpow2.f32 %v846_v37  ;;  %v906_v42 = vsel %vm74_vm0, %v6154_v50, 0.0  ;;  %v791_v1 = vsub.f32 %v5994_v13, %v745_v20  ;;  %v790_v5 = vsub.f32 %v5996_v25, %v745_v20  ;;  %v6186_v37 = vpop.permute.xlu1 %4974 }
 0x33a   :  { %5089 = vpow2.f32 %v848_v41  ;;  %v907_v62 = vadd.f32 %v6152_v30, %v906_v42 }
 0x33b   :  { %v6158_v35 = vpop.eup %5079  ;;  %v852_v27 = vmul.f32 1.442695, %v791_v1  ;;  %v850_v41 = vmul.f32 1.442695, %v790_v5 }
 0x33c   :  { %v6161_v23 = vpop.eup %5081  ;;  %908 = vadd.xlane.f32.xlu1 %v907_v62  ;;  %v6188_v42 = vpop.permute.xlu0 %4969 }
 0x33d   :  { %v910_v26 = vsel %vm74_vm0, %v6161_v23, 0.0  ;;  %5091 = vpow2.f32 %v852_v27 }
 0x33e   :  { %v911_v19 = vadd.f32 %v6158_v35, %v910_v26  ;;  %5093 = vpow2.f32 %v850_v41 }
 0x33f   :  { %v6166_v33 = vpop.eup %5083 }
 0x340   :  { %v6168_v48 = vpop.eup %5085  ;;  %912 = vadd.xlane.f32.xlu0 %v911_v19 }
 0x341   :  { %v914_v17 = vsel %vm74_vm0, %v6168_v48, 0.0 }
 0x342   :  { %v915_v15 = vadd.f32 %v6166_v33, %v914_v17 }
 0x343   :  { %v6173_v51 = vpop.eup %5087 }
 0x344   :  { %v6175_v47 = vpop.eup %5089  ;;  %916 = vadd.xlane.f32.xlu1 %v915_v15 }
 0x345   :  { %v918_v24 = vsel %vm74_vm0, %v6175_v47, 0.0 }
 0x346   :  { %v919_v7 = vadd.f32 %v6173_v51, %v918_v24 }
 0x348   :  { %920 = vadd.xlane.f32.xlu0 %v919_v7 }
 0x355   :  { %4984 = vrot.lane.b32.xlu1 %v5689_v58, %s5460_s22 }
 0x35e   :  { %4979 = vrot.lane.b32.xlu0 %v5679_v53, %s5460_s22 }
 0x369   :  { %v749_v62 = vpop.xlane.xlu1 %748 }
 0x36a   :  { %v792_v26 = vsub.f32 %v6025_v57, %v749_v62  ;;  %v793_v19 = vsub.f32 %v6008_v4, %v749_v62  ;;  %v6196_v57 = vpop.eup %5091 }
 0x36c   :  { %v854_v17 = vmul.f32 1.442695, %v792_v26  ;;  %v856_v15 = vmul.f32 1.442695, %v793_v19  ;;  %v6200_v19 = vpop.eup %5093 }
 0x36d   :  { %v753_v24 = vpop.xlane.xlu0 %752  ;;  %v757_v7 = vpop.xlane.xlu1 %756 }
 0x36e   :  { %5095 = vpow2.f32 %v854_v17  ;;  %v794_v13 = vsub.f32 %v6048_v21, %v753_v24  ;;  %v795_v25 = vsub.f32 %v6021_v60, %v753_v24  ;;  %v796_v20 = vsub.f32 %v6050_v22, %v757_v7 }
 0x36f   :  { %5097 = vpow2.f32 %v856_v15  ;;  %v797_v1 = vsub.f32 %v6023_v38, %v757_v7  ;;  %v922_v38 = vsel %vm74_vm0, %v6196_v57, 0.0 }
 0x370   :  { %v858_v5 = vmul.f32 1.442695, %v794_v13  ;;  %v860_v27 = vmul.f32 1.442695, %v795_v25  ;;  %v862_v41 = vmul.f32 1.442695, %v796_v20  ;;  %v923_v17 = vadd.f32 %v6200_v19, %v922_v38 }
 0x371   :  { %v864_v4 = vmul.f32 1.442695, %v797_v1  ;;  %v765_v62 = vpop.xlane.xlu1 %764 }
 0x372   :  { %5099 = vpow2.f32 %v858_v5  ;;  %v800_v26 = vsub.f32 %v6066_v10, %v765_v62  ;;  %v801_v21 = vsub.f32 %v6042_v56, %v765_v62 }
 0x373   :  { %5101 = vpow2.f32 %v860_v27 }
 0x374   :  { %5103 = vpow2.f32 %v862_v41  ;;  %v870_v60 = vmul.f32 1.442695, %v800_v26  ;;  %v872_v22 = vmul.f32 1.442695, %v801_v21 }
 0x375   :  { %5105 = vpow2.f32 %v864_v4 }
 0x376   :  { %5107 = vpow2.f32 %v870_v60  ;;  %v761_v60 = vpop.xlane.xlu0 %760 }
 0x377   :  { %5109 = vpow2.f32 %v872_v22  ;;  %v799_v38 = vsub.f32 %v6040_v61, %v761_v60  ;;  %v798_v22 = vsub.f32 %v6064_v46, %v761_v60 }
 0x378   :  { %v6205_v15 = vpop.eup %5095 }
 0x379   :  { %v6207_v24 = vpop.eup %5097  ;;  %924 = vadd.xlane.f32.xlu1 %v923_v17  ;;  %v868_v17 = vmul.f32 1.442695, %v799_v38  ;;  %v4957_v38 = vunpack.i.h.bf16 %v6070_v29 }
 0x37a   :  { %v926_v56 = vsel %vm74_vm0, %v6207_v24, 0.0 }
 0x37b   :  { %v927_v10 = vadd.f32 %v6205_v15, %v926_v56  ;;  %v866_v56 = vmul.f32 1.442695, %v798_v22  ;;  %5111 = vpow2.f32 %v868_v17  ;;  %v4956_v22 = vunpack.i.l.bf16 %v6070_v29  ;;  %v8238_v29 = vld [vmem:[#allocation13_spill] sm:$0xff] }
 0x37c   :  { %v6212_v7 = vpop.eup %5099 }
 0x37d   :  { %v6214_v13 = vpop.eup %5101  ;;  %928 = vadd.xlane.f32.xlu0 %v927_v10  ;;  %5113 = vpow2.f32 %v866_v56 }
 0x37e   :  { %v6216_v25 = vpop.eup %5103  ;;  %v930_v20 = vsel %vm74_vm0, %v6214_v13, 0.0 }
 0x37f   :  { %v6220_v1 = vpop.eup %5105  ;;  %v931_v5 = vadd.f32 %v6212_v7, %v930_v20 }
 0x380   :  { %v934_v27 = vsel %vm74_vm0, %v6220_v1, 0.0  ;;  %v6226_v4 = vpop.eup %5107 }
 0x381   :  { %v935_v41 = vadd.f32 %v6216_v25, %v934_v27  ;;  %932 = vadd.xlane.f32.xlu1 %v931_v5  ;;  %v6228_v62 = vpop.eup %5109  ;;  %v4951_v5 = vunpack.i.l.bf16 %v5760_v28 }
 0x382   :  { %v942_v26 = vsel %vm74_vm0, %v6228_v62, 0.0 }
 0x383   :  { %936 = vadd.xlane.f32.xlu0 %v935_v41  ;;  %v943_v21 = vadd.f32 %v6226_v4, %v942_v26 }
 0x385   :  { %v6247_v10 = vpop.eup %5111 }
 0x387   :  { %944 = vadd.xlane.f32.xlu0 %v943_v21  ;;  %v6249_v20 = vpop.eup %5113 }
 0x392   :  { %4989 = vrot.lane.b32.xlu1 %v5699_v63, %s5460_s22 }
 0x39d   :  { %4994 = vrot.lane.b32.xlu0 %v5709_v3, %s5460_s22  ;;  %s5463_s22 = smov 88  }
 0x3a1   :  { %1273 = vrot.lane.b32.xlu0 %v5641_v34, %s5462_s26 }
 0x3a5   :  { %1277 = vrot.lane.b32.xlu0 %v5651_v39, %s5462_s26  ;;  %v938_v39 = vsel %vm74_vm0, %v6247_v10, 0.0 }
 0x3a9   :  { %1281 = vrot.lane.b32.xlu0 %v5661_v44, %s5462_s26  ;;  %v877_v61 = vpop.xlane.xlu1 %876  ;;  %v4952_v44 = vunpack.i.h.bf16 %v5760_v28 }
 0x3aa   :  { %5115 = vrcp.f32 %v877_v61  ;;  %v4749_v61 = vpack.c.bf16 %v4957_v38, %v4956_v22 }
 0x3ab   :  { %v4745_v21 = vpack.c.bf16 %v4952_v44, %v4951_v5 }
 0x3ad   :  { %1285 = vrot.lane.b32.xlu0 %v5671_v49, %s5462_s26  ;;  %v881_v46 = vpop.xlane.xlu0 %880  ;;  %v939_v49 = vadd.f32 %v6249_v20, %v938_v39 }
 0x3ae   :  { %5117 = vrcp.f32 %v881_v46 }
 0x3b1   :  { %1289 = vrot.lane.b32.xlu0 %v5681_v54, %s5462_s26  ;;  %v885_v34 = vpop.xlane.xlu0 %884 }
 0x3b2   :  { %5119 = vrcp.f32 %v885_v34 }
 0x3b4   :  { %v5116_v27 = vpop.eup %5115 }
 0x3b5   :  { %1293 = vrot.lane.b32.xlu0 %v5691_v59, %s5462_s26  ;;  %v889_v41 = vpop.xlane.xlu1 %888  ;;  %v948_v26 = vmul.f32 %v5116_v27, %v6082_v2  ;;  %v947_v54 = vmul.f32 %v5116_v27, %v6080_v45  ;;  %v8236_v45 = vmov 0.0|0.0  }
 0x3b6   :  { %5121 = vrcp.f32 %v889_v41  ;;  %940 = vadd.xlane.f32.xlu1 %v939_v49 }
 0x3b7   :  { %4271 = vmatprep.mubr.msk.f32.mxu0 %vm74_vm0, %v948_v26 }
 0x3b8   :  { %v5118_v60 = vpop.eup %5117  ;;  %1173 = vmatmul.mubr.f32.vlgmr.msra.gmra.mrb[18].mxu0 %v947_v54 }
 0x3b9   :  { %1297 = vrot.lane.b32.xlu0 %v5701_v0, %s5462_s26  ;;  %4747 = vmatpush1.bf16.xpose.msk.msra.mxu0 %vm5731_vm2, %v4745_v21  ;;  %v893_v28 = vpop.xlane.xlu0 %892  ;;  %v951_v59 = vmul.f32 %v5118_v60, %v6091_v52  ;;  %v950_v2 = vmul.f32 %v5118_v60, %v6089_v16  ;;  %v8237_v0 = vld [vmem:[#allocation4_spill] sm:$0xff] }
 0x3ba   :  { %5123 = vrcp.f32 %v893_v28  ;;  %4748 = vmatprep.subr.bf16.mxu0 %v8236_v45 }
 0x3bb   :  { %4272 = vmatprep.mubr.msk.f32.mxu0 %vm74_vm0, %v951_v59  ;;  %v8241_v59 = vld [vmem:[#allocation2_spill] sm:$0xff] }
 0x3bc   :  { %v5120_v17 = vpop.eup %5119  ;;  %1178 = vmatmul.mubr.f32.gmra.mrb[20].mxu0 %v950_v2 }
 0x3bd   :  { %4999 = vrot.lane.b32.xlu0 %v8237_v0, %s5463_s22  ;;  %v897_v56 = vpop.xlane.xlu0 %896  ;;  %v954_v52 = vmul.f32 %v5120_v17, %v6100_v36  ;;  %v953_v16 = vmul.f32 %v5120_v17, %v6098_v14  ;;  %v8239_v14 = vld [vmem:[#allocation18_spill] sm:$0xff] }
 0x3be   :  { %5125 = vrcp.f32 %v897_v56  ;;  %v4962_v36 = vunpack.i.h.bf16 %v8239_v14  ;;  %v4961_v5 = vunpack.i.l.bf16 %v8239_v14  ;;  %v8242_v17 = vld [vmem:[#allocation6_spill] sm:$0xff] }
 0x3bf   :  { %4273 = vmatprep.mubr.msk.f32.mxu0 %vm74_vm0, %v954_v52 }
 0x3c0   :  { %v5122_v46 = vpop.eup %5121  ;;  %1183 = vmatmul.mubr.f32.gmra.mrb[22].mxu0 %v953_v16  ;;  %v4976_v16 = vunpack.i.l.bf16 %v6186_v37 }
 0x3c1   :  { %5019 = vrot.lane.b32.xlu0 %v8238_v29, %s5463_s22  ;;  %4751 = vmatpush1.bf16.xpose.msk.msra.mxu0 %vm5731_vm2, %v4749_v61  ;;  %v901_v34 = vpop.xlane.xlu0 %900  ;;  %v957_v39 = vmul.f32 %v5122_v46, %v6109_v9  ;;  %v956_v44 = vmul.f32 %v5122_v46, %v6107_v32  ;;  %v4753_v9 = vpack.c.bf16 %v4962_v36, %v4961_v5  ;;  %v8240_v32 = vld [vmem:[#allocation3_spill] sm:$0xff] }
 0x3c2   :  { %5127 = vrcp.f32 %v901_v34  ;;  %4752 = vmatprep.subr.bf16.mxu0 %v8236_v45 }
 0x3c3   :  { %4274 = vmatprep.mubr.msk.f32.mxu0 %vm74_vm0, %v957_v39 }
 0x3c4   :  { %v5124_v27 = vpop.eup %5123  ;;  %1188 = vmatmul.mubr.f32.gmra.mrb[24].mxu0 %v956_v44 }
 0x3c5   :  { %v905_v49 = vpop.xlane.xlu0 %904  ;;  %v960_v41 = vmul.f32 %v5124_v27, %v6118_v55  ;;  %v959_v26 = vmul.f32 %v5124_v27, %v6116_v43  ;;  %v4972_v43 = vunpack.i.h.bf16 %v6188_v42  ;;  %v4971_v55 = vunpack.i.l.bf16 %v6188_v42 }
 0x3c6   :  { %5129 = vrcp.f32 %v905_v49 }
 0x3c7   :  { %1263 = vrot.lane.b32.xlu1 %v8240_v32, %s5462_s26  ;;  %4275 = vmatprep.mubr.msk.f32.mxu0 %vm74_vm0, %v960_v41  ;;  %v4757_v22 = vpack.c.bf16 %v4972_v43, %v4971_v55  ;;  %v8252_v43 = vld [vmem:[#allocation9_spill] sm:$0xff]  ;;  %v8253_v55 = vld [vmem:[#allocation11_spill] sm:$0xff] }
 0x3c8   :  { %v5126_v54 = vpop.eup %5125  ;;  %1193 = vmatmul.mubr.f32.gmra.mrb[26].mxu0 %v959_v26 }
 0x3c9   :  { %4755 = vmatpush1.bf16.xpose.msk.msra.mxu0 %vm5731_vm2, %v4753_v9  ;;  %v963_v21 = vmul.f32 %v5126_v54, %v6127_v12  ;;  %v962_v60 = vmul.f32 %v5126_v54, %v6125_v18  ;;  %v909_v28 = vpop.xlane.xlu1 %908 }
 0x3ca   :  { %4756 = vmatprep.subr.bf16.mxu0 %v8236_v45  ;;  %5131 = vrcp.f32 %v909_v28  ;;  %v8251_v28 = vld [vmem:[#allocation7_spill] sm:$0xff] }
 0x3cb   :  { %1265 = vrot.lane.b32.xlu1 %v8241_v59, %s5462_s26  ;;  %4276 = vmatprep.mubr.msk.f32.mxu0 %vm74_vm0, %v963_v21  ;;  %v8248_v21 = vld [vmem:[#allocation15_spill] sm:$0xff] }
 0x3cc   :  { %v5128_v2 = vpop.eup %5127  ;;  %1198 = vmatmul.mubr.f32.gmra.mrb[28].mxu0 %v962_v60 }
 0x3cd   :  { %v913_v38 = vpop.xlane.xlu0 %912  ;;  %v966_v12 = vmul.f32 %v5128_v2, %v6136_v40  ;;  %v965_v18 = vmul.f32 %v5128_v2, %v6134_v6  ;;  %v8243_v6 = vld [vmem:[#allocation5_spill] sm:$0xff]  ;;  %v4977_v40 = vunpack.i.h.bf16 %v6186_v37 }
 0x3ce   :  { %5133 = vrcp.f32 %v913_v38 }
 0x3cf   :  { %1267 = vrot.lane.b32.xlu1 %v8242_v17, %s5462_s26  ;;  %4277 = vmatprep.mubr.msk.f32.mxu0 %vm74_vm0, %v966_v12  ;;  %v4761_v39 = vpack.c.bf16 %v4977_v40, %v4976_v16 }
 0x3d0   :  { %v5130_v42 = vpop.eup %5129  ;;  %1203 = vmatmul.mubr.f32.gmra.mrb[30].mxu0 %v965_v18 }
 0x3d1   :  { %4759 = vmatpush1.bf16.xpose.msk.msra.mxu0 %vm5731_vm2, %v4757_v22  ;;  %v917_v0 = vpop.xlane.xlu1 %916  ;;  %v969_v56 = vmul.f32 %v5130_v42, %v6145_v11  ;;  %v968_v52 = vmul.f32 %v5130_v42, %v6143_v31  ;;  %v8244_v31 = vld [vmem:[#allocation8_spill] sm:$0xff] }
 0x3d2   :  { %5135 = vrcp.f32 %v917_v0  ;;  %4760 = vmatprep.subr.bf16.mxu0 %v8236_v45 }
 0x3d3   :  { %1269 = vrot.lane.b32.xlu1 %v8243_v6, %s5462_s26  ;;  %4278 = vmatprep.mubr.msk.f32.mxu0 %vm74_vm0, %v969_v56 }
 0x3d4   :  { %1208 = vmatmul.mubr.f32.gmra.mrb[32].mxu0 %v968_v52  ;;  %v5132_v61 = vpop.eup %5131 }
 0x3d5   :  { %v921_v46 = vpop.xlane.xlu0 %920  ;;  %v972_v11 = vmul.f32 %v5132_v61, %v6154_v50  ;;  %v971_v29 = vmul.f32 %v5132_v61, %v6152_v30  ;;  %v8245_v50 = vld [vmem:[#allocation10_spill] sm:$0xff]  ;;  %v4985_v26 = vpop.permute.xlu1 %4984 }
 0x3d6   :  { %5137 = vrcp.f32 %v921_v46  ;;  %v4986_v54 = vunpack.i.l.bf16 %v4985_v26 }
 0x3d7   :  { %1271 = vrot.lane.b32.xlu1 %v8244_v31, %s5462_s26  ;;  %4279 = vmatprep.mubr.msk.f32.mxu0 %vm74_vm0, %v972_v11 }
 0x3d8   :  { %v5134_v34 = vpop.eup %5133  ;;  %1213 = vmatmul.mubr.f32.gmra.mrb[34].mxu0 %v971_v29 }
 0x3d9   :  { %v4980_v44 = vpop.permute.xlu0 %4979  ;;  %v975_v14 = vmul.f32 %v5134_v34, %v6161_v23  ;;  %v974_v37 = vmul.f32 %v5134_v34, %v6158_v35  ;;  %4763 = vmatpush1.bf16.xpose.msk.msra.mxu0 %vm5731_vm2, %v4761_v39  ;;  %v8246_v35 = vld [vmem:[#allocation12_spill] sm:$0xff] }
 0x3da   :  { %v4982_v30 = vunpack.i.h.bf16 %v4980_v44  ;;  %v4981_v5 = vunpack.i.l.bf16 %v4980_v44  ;;  %4764 = vmatprep.subr.bf16.mxu0 %v8236_v45 }
 0x3db   :  { %1275 = vrot.lane.b32.xlu1 %v8245_v50, %s5462_s26  ;;  %4280 = vmatprep.mubr.msk.f32.mxu0 %vm74_vm0, %v975_v14 }
 0x3dc   :  { %v5136_v36 = vpop.eup %5135  ;;  %1218 = vmatmul.mubr.f32.gmra.mrb[36].mxu0 %v974_v37  ;;  %v4765_v41 = vpack.c.bf16 %v4982_v30, %v4981_v5 }
 0x3dd   :  { %v978_v27 = vmul.f32 %v5136_v36, %v6168_v48  ;;  %v977_v23 = vmul.f32 %v5136_v36, %v6166_v33  ;;  %v8247_v48 = vld [vmem:[#allocation14_spill] sm:$0xff]  ;;  %v4987_v33 = vunpack.i.h.bf16 %v4985_v26 }
 0x3df   :  { %1279 = vrot.lane.b32.xlu1 %v8246_v35, %s5462_s26  ;;  %4281 = vmatprep.mubr.msk.f32.mxu0 %vm74_vm0, %v978_v27  ;;  %v4769_v60 = vpack.c.bf16 %v4987_v33, %v4986_v54 }
 0x3e0   :  { %v5138_v49 = vpop.eup %5137  ;;  %1223 = vmatmul.mubr.f32.gmra.mrb[38].mxu0 %v977_v23 }
 0x3e1   :  { %v981_v9 = vmul.f32 %v5138_v49, %v6175_v47  ;;  %v980_v32 = vmul.f32 %v5138_v49, %v6173_v51  ;;  %4767 = vmatpush1.bf16.xpose.msk.msra.mxu0 %vm5731_vm2, %v4765_v41  ;;  %v8249_v51 = vld [vmem:[#allocation16_spill] sm:$0xff]  ;;  %v8250_v47 = vld [vmem:[#allocation17_spill] sm:$0xff] }
 0x3e2   :  { %4768 = vmatprep.subr.bf16.mxu0 %v8236_v45 }
 0x3e3   :  { %1283 = vrot.lane.b32.xlu1 %v8247_v48, %s5462_s26  ;;  %4282 = vmatprep.mubr.msk.f32.mxu0 %vm74_vm0, %v981_v9 }
 0x3e4   :  { %1228 = vmatmul.mubr.f32.gmra.mrb[40].mxu0 %v980_v32 }
 0x3e7   :  { %1287 = vrot.lane.b32.xlu1 %v8248_v21, %s5462_s26  ;;  %v8254_v21 = vmov 0.0  }
 0x3e9   :  { %4771 = vmatpush1.bf16.xpose.msk.msra.mxu0 %vm5731_vm2, %v4769_v60 }
 0x3ea   :  { %4772 = vmatprep.subr.bf16.mxu0 %v8236_v45 }
 0x3eb   :  { %1291 = vrot.lane.b32.xlu1 %v8249_v51, %s5462_s26 }
 0x3ef   :  { %1295 = vrot.lane.b32.xlu1 %v8250_v47, %s5462_s26 }
 0x3f3   :  { %5004 = vrot.lane.b32.xlu1 %v8251_v28, %s5463_s22 }
 0x3f7   :  { %5009 = vrot.lane.b32.xlu1 %v8252_v43, %s5463_s22 }
 0x3fb   :  { %5014 = vrot.lane.b32.xlu1 %v8253_v55, %s5463_s22 }
 0x406   :  { %v925_v59 = vpop.xlane.xlu1 %924 }
 0x407   :  { %5139 = vrcp.f32 %v925_v59 }
 0x40a   :  { %v929_v2 = vpop.xlane.xlu0 %928 }
 0x40b   :  { %5141 = vrcp.f32 %v929_v2 }
 0x40e   :  { %v933_v38 = vpop.xlane.xlu1 %932 }
 0x40f   :  { %5143 = vrcp.f32 %v933_v38 }
 0x410   :  { %v937_v12 = vpop.xlane.xlu0 %936 }
 0x411   :  { %v5140_v18 = vpop.eup %5139  ;;  %5145 = vrcp.f32 %v937_v12 }
 0x412   :  { %v4990_v22 = vpop.permute.xlu1 %4989  ;;  %v984_v17 = vmul.f32 %v5140_v18, %v6196_v57  ;;  %v983_v42 = vmul.f32 %v5140_v18, %v6200_v19 }
 0x413   :  { %v4992_v0 = vunpack.i.h.bf16 %v4990_v22  ;;  %v4991_v56 = vunpack.i.l.bf16 %v4990_v22 }
 0x414   :  { %v945_v52 = vpop.xlane.xlu0 %944  ;;  %4283 = vmatprep.mubr.msk.f32.mxu0 %vm74_vm0, %v984_v17 }
 0x415   :  { %v5142_v6 = vpop.eup %5141  ;;  %v4773_v40 = vpack.c.bf16 %v4992_v0, %v4991_v56  ;;  %1233 = vmatmul.mubr.f32.gmra.mrb[42].mxu0 %v983_v42  ;;  %5147 = vrcp.f32 %v945_v52 }
 0x416   :  { %v987_v16 = vmul.f32 %v5142_v6, %v6207_v24  ;;  %v986_v61 = vmul.f32 %v5142_v6, %v6205_v15 }
 0x417   :  { %4775 = vmatpush1.bf16.xpose.msk.msra.mxu0 %vm5731_vm2, %v4773_v40 }
 0x418   :  { %v4995_v46 = vpop.permute.xlu0 %4994  ;;  %4284 = vmatprep.mubr.msk.f32.mxu0 %vm74_vm0, %v987_v16  ;;  %4776 = vmatprep.subr.bf16.mxu0 %v8236_v45 }
 0x419   :  { %v5144_v57 = vpop.eup %5143  ;;  %v4997_v19 = vunpack.i.h.bf16 %v4995_v46  ;;  %v4996_v11 = vunpack.i.l.bf16 %v4995_v46  ;;  %1238 = vmatmul.mubr.f32.gmra.mrb[44].mxu0 %v986_v61 }
 0x41a   :  { %v990_v31 = vmul.f32 %v5144_v57, %v6214_v13  ;;  %v989_v29 = vmul.f32 %v5144_v57, %v6212_v7 }
 0x41b   :  { %v5146_v34 = vpop.eup %5145  ;;  %v4777_v39 = vpack.c.bf16 %v4997_v19, %v4996_v11 }
 0x41c   :  { %v1274_v24 = vpop.permute.xlu0 %1273  ;;  %4285 = vmatprep.mubr.msk.f32.mxu0 %vm74_vm0, %v990_v31  ;;  %v993_v15 = vmul.f32 %v5146_v34, %v6220_v1  ;;  %v992_v44 = vmul.f32 %v5146_v34, %v6216_v25 }
 0x41d   :  { %1243 = vmatmul.mubr.f32.gmra.mrb[46].mxu0 %v989_v29 }
 0x41e   :  { %4286 = vmatprep.mubr.msk.f32.mxu0 %vm74_vm0, %v993_v15 }
 0x41f   :  { %4779 = vmatpush1.bf16.xpose.msk.msra.mxu0 %vm5731_vm2, %v4777_v39  ;;  %v5148_v35 = vpop.eup %5147 }
 0x420   :  { %v1278_v14 = vpop.permute.xlu0 %1277  ;;  %4780 = vmatprep.subr.bf16.mxu0 %v8236_v45  ;;  %v999_v32 = vmul.f32 %v5148_v35, %v6228_v62  ;;  %v998_v33 = vmul.f32 %v5148_v35, %v6226_v4 }
 0x421   :  { %1248 = vmatmul.mubr.f32.gmra.mrb[48].mxu0 %v992_v44 }
 0x424   :  { %v6377_v7 = vpop.permute.xlu0 %1281 }
 0x428   :  { %v6379_v13 = vpop.permute.xlu0 %1285 }
 0x42c   :  { %v6381_v37 = vpop.permute.xlu0 %1289 }
 0x430   :  { %v6383_v1 = vpop.permute.xlu0 %1293 }
 0x434   :  { %v6385_v50 = vpop.permute.xlu0 %1297 }
 0x438   :  { %v5000_v36 = vpop.permute.xlu0 %4999 }
 0x439   :  { %v5002_v30 = vunpack.i.h.bf16 %v5000_v36  ;;  %v5001_v8 = vunpack.i.l.bf16 %v5000_v36 }
 0x43b   :  { %v4781_v5 = vpack.c.bf16 %v5002_v30, %v5001_v8 }
 0x43c   :  { %v5020_v18 = vpop.permute.xlu0 %5019 }
 0x43d   :  { %4828 = vmatpush1.bf16.msra.mxu1 %v4781_v5  ;;  %v5022_v0 = vunpack.i.h.bf16 %v5020_v18  ;;  %v5021_v56 = vunpack.i.l.bf16 %v5020_v18 }
 0x43e   :  { %4820 = vmatprep.subr.bf16.mxu1 %v8236_v45 }
 0x43f   :  { %v4793_v6 = vpack.c.bf16 %v5022_v0, %v5021_v56 }
 0x443   :  { %v941_v25 = vpop.xlane.xlu1 %940 }
 0x444   :  { %5149 = vrcp.f32 %v941_v25 }
 0x447   :  { %v1264_v27 = vpop.permute.xlu1 %1263 }
 0x44b   :  { %v1266_v23 = vpop.permute.xlu1 %1265 }
 0x44e   :  { %v5150_v49 = vpop.eup %5149 }
 0x44f   :  { %v1268_v41 = vpop.permute.xlu1 %1267  ;;  %v996_v26 = vmul.f32 %v5150_v49, %v6247_v10  ;;  %v995_v9 = vmul.f32 %v5150_v49, %v6249_v20 }
 0x451   :  { %4287 = vmatprep.mubr.msk.f32.mxu0 %vm74_vm0, %v996_v26 }
 0x452   :  { %1253 = vmatmul.mubr.f32.gmra.mrb[50].mxu0 %v995_v9 }
 0x453   :  { %4288 = vmatprep.mubr.msk.f32.mxu0 %vm74_vm0, %v999_v32  ;;  %v1270_v48 = vpop.permute.xlu1 %1269 }
 0x456   :  { %1258 = vmatmul.mubr.f32.gmra.mrb[52].mxu0 %v998_v33 }
 0x457   :  { %v1272_v54 = vpop.permute.xlu1 %1271  ;;  %1471 = vmatprep.mubr.f32.mxu0 %v8254_v21 }
 0x45a   :  { %4307 = vmatmul.mubr.msk.f32.vlgmr.msra.gmra.mrb[54].mxu0 %vm376_vm1, %v1264_v27 }
 0x45b   :  { %4782 = vmatpush1.bf16.msra.mxu0 %v4781_v5  ;;  %v1276_v10 = vpop.permute.xlu1 %1275  ;;  %1477 = vmatprep.mubr.f32.mxu0 %v8254_v21 }
 0x45c   :  { %4783 = vmatprep.subr.bf16.mxu0 %v8236_v45 }
 0x45e   :  { %4308 = vmatmul.mubr.msk.f32.gmra.mrb[56].mxu0 %vm376_vm1, %v1266_v23 }
 0x45f   :  { %v1280_v62 = vpop.permute.xlu1 %1279  ;;  %1483 = vmatprep.mubr.f32.mxu0 %v8254_v21 }
 0x462   :  { %4309 = vmatmul.mubr.msk.f32.gmra.mrb[58].mxu0 %vm376_vm1, %v1268_v41 }
 0x463   :  { %v1284_v4 = vpop.permute.xlu1 %1283  ;;  %1489 = vmatprep.mubr.f32.mxu0 %v8254_v21 }
 0x466   :  { %4310 = vmatmul.mubr.msk.f32.gmra.mrb[60].mxu0 %vm376_vm1, %v1270_v48 }
 0x467   :  { %v1288_v20 = vpop.permute.xlu1 %1287  ;;  %1495 = vmatprep.mubr.f32.mxu0 %v8254_v21 }
 0x46a   :  { %4311 = vmatmul.mubr.msk.f32.gmra.mrb[62].mxu0 %vm376_vm1, %v1272_v54 }
 0x46b   :  { %v1292_v60 = vpop.permute.xlu1 %1291  ;;  %1501 = vmatprep.mubr.f32.mxu0 %v8254_v21 }
 0x46e   :  { %4312 = vmatmul.mubr.msk.f32.gmra.mrb[64].mxu0 %vm376_vm1, %v1274_v24 }
 0x46f   :  { %v1296_v51 = vpop.permute.xlu1 %1295  ;;  %1507 = vmatprep.mubr.f32.mxu0 %v8254_v21 }
 0x472   :  { %4313 = vmatmul.mubr.msk.f32.gmra.mrb[66].mxu0 %vm376_vm1, %v1276_v10 }
 0x473   :  { %v5005_v47 = vpop.permute.xlu1 %5004  ;;  %1513 = vmatprep.mubr.f32.mxu0 %v8254_v21 }
 0x474   :  { %v5007_v28 = vunpack.i.h.bf16 %v5005_v47  ;;  %v5006_v43 = vunpack.i.l.bf16 %v5005_v47  ;;  %v5404_v47 = vld [vmem:[%s8170_s1] sm:$0xff] }
 0x476   :  { %v4784_v55 = vpack.c.bf16 %v5007_v28, %v5006_v43  ;;  %4314 = vmatmul.mubr.msk.f32.gmra.mrb[68].mxu0 %vm376_vm1, %v1278_v14 }
 0x477   :  { %v5010_v59 = vpop.permute.xlu1 %5009  ;;  %1519 = vmatprep.mubr.f32.mxu0 %v8254_v21 }
 0x478   :  { %v5012_v2 = vunpack.i.h.bf16 %v5010_v59  ;;  %v5011_v38 = vunpack.i.l.bf16 %v5010_v59  ;;  %4785 = vmatpush1.bf16.msra.mxu0 %v4784_v55  ;;  %4829 = vmatpush1.bf16.msra.mxu1 %v4784_v55 }
 0x479   :  { %4786 = vmatprep.subr.bf16.mxu0 %v8236_v45  ;;  %4821 = vmatprep.subr.bf16.mxu1 %v8236_v45 }
 0x47a   :  { %v4787_v12 = vpack.c.bf16 %v5012_v2, %v5011_v38  ;;  %4315 = vmatmul.mubr.msk.f32.gmra.mrb[70].mxu0 %vm376_vm1, %v1280_v62 }
 0x47b   :  { %v5015_v22 = vpop.permute.xlu1 %5014  ;;  %1525 = vmatprep.mubr.f32.mxu0 %v8254_v21 }
 0x47c   :  { %v5017_v17 = vunpack.i.h.bf16 %v5015_v22  ;;  %v5016_v42 = vunpack.i.l.bf16 %v5015_v22  ;;  %4788 = vmatpush1.bf16.msra.mxu0 %v4787_v12  ;;  %4830 = vmatpush1.bf16.msra.mxu1 %v4787_v12  ;;  %v5405_v12 = vld [vmem:[%s8170_s1 + $0x18] sm:$0xff] }
 0x47d   :  { %4789 = vmatprep.subr.bf16.mxu0 %v8236_v45  ;;  %4822 = vmatprep.subr.bf16.mxu1 %v8236_v45 }
 0x47e   :  { %v4790_v52 = vpack.c.bf16 %v5017_v17, %v5016_v42  ;;  %4316 = vmatmul.mubr.msk.f32.gmra.mrb[72].mxu0 %vm376_vm1, %v6377_v7  ;;  %v5406_v17 = vld [vmem:[%s8170_s1 + $0x10] sm:$0xff] }
 0x47f   :  { %1531 = vmatprep.mubr.f32.mxu0 %v8254_v21 }
 0x480   :  { %4791 = vmatpush1.bf16.msra.mxu0 %v4790_v52  ;;  %4831 = vmatpush1.bf16.msra.mxu1 %v4790_v52 }
 0x481   :  { %4792 = vmatprep.subr.bf16.mxu0 %v8236_v45  ;;  %4823 = vmatprep.subr.bf16.mxu1 %v8236_v45 }
 0x482   :  { %4317 = vmatmul.mubr.msk.f32.gmra.mrb[74].mxu0 %vm376_vm1, %v1284_v4 }
 0x483   :  { %1537 = vmatprep.mubr.f32.mxu0 %v8254_v21 }
 0x484   :  { %4794 = vmatpush1.bf16.msra.mxu0 %v4793_v6  ;;  %4832 = vmatpush1.bf16.msra.mxu1 %v4793_v6 }
 0x485   :  { %4795 = vmatprep.subr.bf16.mxu0 %v8236_v45  ;;  %4824 = vmatprep.subr.bf16.mxu1 %v8236_v45 }
 0x486   :  { %4318 = vmatmul.mubr.msk.f32.gmra.mrb[76].mxu0 %vm376_vm1, %v6379_v13 }
 0x487   :  { %1543 = vmatprep.mubr.f32.mxu0 %v8254_v21 }
 0x48a   :  { %4319 = vmatmul.mubr.msk.f32.gmra.mrb[78].mxu0 %vm376_vm1, %v1288_v20  ;;  %v5403_v20 = vld [vmem:[%s8170_s1 + $0x8] sm:$0xff] }
 0x48b   :  { %v6431_v40 = vpop.f32.mrb[18].mxu0  ;;  %1549 = vmatprep.mubr.f32.mxu0 %v8254_v21 }
 0x48c   :  { %v1176_v16 = vpop.f32.mrb[19].mxu0 }
 0x48e   :  { %4320 = vmatmul.mubr.msk.f32.gmra.mrb[80].mxu0 %vm376_vm1, %v6381_v37 }
 0x48f   :  { %v6436_v61 = vpop.f32.mrb[20].mxu0  ;;  %1555 = vmatprep.mubr.f32.mxu0 %v8254_v21 }
 0x490   :  { %v1181_v46 = vpop.f32.mrb[21].mxu0 }
 0x491   :  { %v5407_v46 = vld [vmem:[%s8170_s1 + $0x28] sm:$0xff] }
 0x492   :  { %4321 = vmatmul.mubr.msk.f32.gmra.mrb[82].mxu0 %vm376_vm1, %v1292_v60 }
 0x493   :  { %v6440_v57 = vpop.f32.mrb[22].mxu0  ;;  %1561 = vmatprep.mubr.f32.mxu0 %v8254_v21 }
 0x494   :  { %v1186_v19 = vpop.f32.mrb[23].mxu0 }
 0x496   :  { %4322 = vmatmul.mubr.msk.f32.gmra.mrb[84].mxu0 %vm376_vm1, %v6383_v1 }
 0x497   :  { %v6445_v11 = vpop.f32.mrb[24].mxu0  ;;  %1567 = vmatprep.mubr.f32.mxu0 %v8254_v21 }
 0x498   :  { %v1191_v31 = vpop.f32.mrb[25].mxu0 }
 0x49a   :  { %4323 = vmatmul.mubr.msk.f32.gmra.mrb[86].mxu0 %vm376_vm1, %v1296_v51 }
 0x49b   :  { %v6449_v29 = vpop.f32.mrb[26].mxu0  ;;  %1573 = vmatprep.mubr.f32.mxu0 %v8254_v21 }
 0x49c   :  { %v1196_v34 = vpop.f32.mrb[27].mxu0 }
 0x49d   :  { %v5408_v34 = vld [vmem:[%s8170_s1 + $0x20] sm:$0xff] }
 0x49e   :  { %4324 = vmatmul.mubr.msk.f32.gmra.mrb[88].mxu0 %vm376_vm1, %v6385_v50 }
 0x49f   :  { %v6454_v24 = vpop.f32.mrb[28].mxu0 }
 0x4a0   :  { %v1201_v15 = vpop.f32.mrb[29].mxu0 }
 0x4a3   :  { %v6456_v39 = vpop.f32.mrb[30].mxu0 }
 0x4a4   :  { %v1206_v44 = vpop.f32.mrb[31].mxu0 }
 0x4a7   :  { %v6458_v14 = vpop.f32.mrb[32].mxu0 }
 0x4a8   :  { %v1211_v7 = vpop.f32.mrb[33].mxu0 }
 0x4ab   :  { %v6460_v13 = vpop.f32.mrb[34].mxu0 }
 0x4ac   :  { %v1216_v37 = vpop.f32.mrb[35].mxu0 }
 0x4af   :  { %v6462_v1 = vpop.f32.mrb[36].mxu0 }
 0x4b0   :  { %v1221_v36 = vpop.f32.mrb[37].mxu0 }
 0x4b3   :  { %v6464_v30 = vpop.f32.mrb[38].mxu0 }
 0x4b4   :  { %8255 = vst [vmem:[#allocation4_spill] sm:$0xff] %v6464_v30  ;;  %v1226_v8 = vpop.f32.mrb[39].mxu0 }
 0x4b7   :  { %v6466_v5 = vpop.f32.mrb[40].mxu0 }
 0x4b8   :  { %8256 = vst [vmem:[#allocation13_spill] sm:$0xff] %v6466_v5  ;;  %v1231_v50 = vpop.f32.mrb[41].mxu0 }
 0x4b9   :  { %v5409_v50 = vld [vmem:[%s8170_s1 + $0x38] sm:$0xff] }
 0x4e8   :  { %v6468_v25 = vpop.f32.mrb[42].mxu0 }
 0x4e9   :  { %8257 = vst [vmem:[#allocation18_spill] sm:$0xff] %v6468_v25  ;;  %v1236_v27 = vpop.f32.mrb[43].mxu0 }
 0x4ec   :  { %v6470_v23 = vpop.f32.mrb[44].mxu0 }
 0x4ed   :  { %8258 = vst [vmem:[#allocation3_spill] sm:$0xff] %v6470_v23  ;;  %v1241_v35 = vpop.f32.mrb[45].mxu0  ;;  %v5434_v23 = vld [vmem:[%s8170_s1 + $0xf8] sm:$0xff] }
 0x4f0   :  { %v6472_v49 = vpop.f32.mrb[46].mxu0 }
 0x4f1   :  { %8259 = vst [vmem:[#allocation2_spill] sm:$0xff] %v6472_v49  ;;  %v1246_v41 = vpop.f32.mrb[47].mxu0 }
 0x4f2   :  { %v5410_v41 = vld [vmem:[%s8170_s1 + $0x30] sm:$0xff] }
 0x4f4   :  { %v6474_v26 = vpop.f32.mrb[48].mxu0 }
 0x4f5   :  { %8260 = vst [vmem:[#allocation6_spill] sm:$0xff] %v6474_v26  ;;  %v1251_v9 = vpop.f32.mrb[49].mxu0 }
 0x525   :  { %v6476_v32 = vpop.f32.mrb[50].mxu0 }
 0x526   :  { %8261 = vst [vmem:[#allocation5_spill] sm:$0xff] %v6476_v32  ;;  %v1256_v48 = vpop.f32.mrb[51].mxu0 }
 0x529   :  { %v6478_v33 = vpop.f32.mrb[52].mxu0 }
 0x52a   :  { %8262 = vst [vmem:[#allocation8_spill] sm:$0xff] %v6478_v33  ;;  %v1261_v54 = vpop.f32.mrb[53].mxu0 }
 0x52d   :  { %v1473_v21 = vpop.f32.mrb[54].mxu0 }
 0x52e   :  { %v1580_v10 = vmul.f32 0.35355338, %v1473_v21  ;;  %v1475_v62 = vpop.f32.mrb[55].mxu0 }
 0x52f   :  { %v1581_v4 = vmul.f32 0.35355338, %v1475_v62 }
 0x530   :  { %v6488_v28 = vadd.f32 %v5404_v47, %v1580_v10  ;;  %v5412_v47 = vld [vmem:[%s8170_s1 + $0x40] sm:$0xff] }
 0x531   :  { %v6483_v60 = vadd.f32 %v5403_v20, %v1581_v4  ;;  %v1479_v51 = vpop.f32.mrb[56].mxu0  ;;  %v5411_v4 = vld [vmem:[%s8170_s1 + $0x48] sm:$0xff] }
 0x532   :  { %v1582_v43 = vmul.f32 0.35355338, %v1479_v51  ;;  %v1481_v55 = vpop.f32.mrb[57].mxu0 }
 0x533   :  { %v1583_v59 = vmul.f32 0.35355338, %v1481_v55  ;;  %v1652_v2 = vsel %vm74_vm0, %v6483_v60, -inf }
 0x534   :  { %v1653_v38 = vmax.f32 %v6488_v28, %v1652_v2  ;;  %v6501_v42 = vadd.f32 %v5406_v17, %v1582_v43 }
 0x535   :  { %v6496_v18 = vadd.f32 %v5405_v12, %v1583_v59  ;;  %v1485_v22 = vpop.f32.mrb[58].mxu0 }
 0x536   :  { %v1584_v0 = vmul.f32 0.35355338, %v1485_v22  ;;  %1654 = vmax.xlane.f32.xlu1 %v1653_v38  ;;  %v1487_v56 = vpop.f32.mrb[59].mxu0  ;;  %v5413_v22 = vld [vmem:[%s8170_s1 + $0x58] sm:$0xff] }
 0x537   :  { %v1585_v52 = vmul.f32 0.35355338, %v1487_v56  ;;  %v1656_v6 = vsel %vm74_vm0, %v6496_v18, -inf  ;;  %v5414_v56 = vld [vmem:[%s8170_s1 + $0x50] sm:$0xff] }
 0x538   :  { %v1657_v16 = vmax.f32 %v6501_v42, %v1656_v6  ;;  %v6514_v15 = vadd.f32 %v5408_v34, %v1584_v0 }
 0x539   :  { %v6509_v19 = vadd.f32 %v5407_v46, %v1585_v52  ;;  %v1491_v31 = vpop.f32.mrb[60].mxu0 }
 0x53a   :  { %v1586_v44 = vmul.f32 0.35355338, %v1491_v31  ;;  %1658 = vmax.xlane.f32.xlu1 %v1657_v16  ;;  %v1493_v7 = vpop.f32.mrb[61].mxu0 }
 0x53b   :  { %v1587_v37 = vmul.f32 0.35355338, %v1493_v7  ;;  %v1660_v36 = vsel %vm74_vm0, %v6509_v19, -inf }
 0x53c   :  { %v1661_v8 = vmax.f32 %v6514_v15, %v1660_v36  ;;  %v6527_v9 = vadd.f32 %v5410_v41, %v1586_v44  ;;  %v5415_v44 = vld [vmem:[%s8170_s1 + $0x68] sm:$0xff]  ;;  %v5416_v36 = vld [vmem:[%s8170_s1 + $0x60] sm:$0xff] }
 0x53d   :  { %v6522_v27 = vadd.f32 %v5409_v50, %v1587_v37  ;;  %v1497_v35 = vpop.f32.mrb[62].mxu0 }
 0x53e   :  { %v1588_v48 = vmul.f32 0.35355338, %v1497_v35  ;;  %1662 = vmax.xlane.f32.xlu1 %v1661_v8  ;;  %v1499_v54 = vpop.f32.mrb[63].mxu0 }
 0x53f   :  { %v1589_v21 = vmul.f32 0.35355338, %v1499_v54  ;;  %v1664_v10 = vsel %vm74_vm0, %v6522_v27, -inf }
 0x540   :  { %v1665_v62 = vmax.f32 %v6527_v9, %v1664_v10  ;;  %v6540_v43 = vadd.f32 %v5412_v47, %v1588_v48 }
 0x541   :  { %v6535_v20 = vadd.f32 %v5411_v4, %v1589_v21  ;;  %v1503_v51 = vpop.f32.mrb[64].mxu0  ;;  %v5417_v21 = vld [vmem:[%s8170_s1 + $0x78] sm:$0xff]  ;;  %v5418_v4 = vld [vmem:[%s8170_s1 + $0x70] sm:$0xff] }
 0x542   :  { %v1590_v55 = vmul.f32 0.35355338, %v1503_v51  ;;  %1666 = vmax.xlane.f32.xlu1 %v1665_v62  ;;  %v1505_v59 = vpop.f32.mrb[65].mxu0 }
 0x543   :  { %v1591_v2 = vmul.f32 0.35355338, %v1505_v59  ;;  %v1668_v38 = vsel %vm74_vm0, %v6535_v20, -inf }
 0x544   :  { %v1669_v12 = vmax.f32 %v6540_v43, %v1668_v38  ;;  %v6553_v52 = vadd.f32 %v5414_v56, %v1590_v55  ;;  %v5420_v56 = vld [vmem:[%s8170_s1 + $0x80] sm:$0xff] }
 0x545   :  { %v6548_v17 = vadd.f32 %v5413_v22, %v1591_v2  ;;  %v1509_v0 = vpop.f32.mrb[66].mxu0 }
 0x546   :  { %v1592_v6 = vmul.f32 0.35355338, %v1509_v0  ;;  %1670 = vmax.xlane.f32.xlu1 %v1669_v12  ;;  %v1511_v16 = vpop.f32.mrb[67].mxu0  ;;  %v5419_v12 = vld [vmem:[%s8170_s1 + $0x88] sm:$0xff] }
 0x547   :  { %v1593_v46 = vmul.f32 0.35355338, %v1511_v16  ;;  %v1672_v31 = vsel %vm74_vm0, %v6548_v17, -inf }
 0x548   :  { %v1673_v34 = vmax.f32 %v6553_v52, %v1672_v31  ;;  %v6566_v8 = vadd.f32 %v5416_v36, %v1592_v6 }
 0x549   :  { %v6561_v7 = vadd.f32 %v5415_v44, %v1593_v46  ;;  %v1515_v37 = vpop.f32.mrb[68].mxu0 }
 0x54a   :  { %v1594_v50 = vmul.f32 0.35355338, %v1515_v37  ;;  %1674 = vmax.xlane.f32.xlu0 %v1673_v34  ;;  %v1517_v35 = vpop.f32.mrb[69].mxu0  ;;  %v5421_v37 = vld [vmem:[%s8170_s1 + $0x98] sm:$0xff] }
 0x54b   :  { %v1595_v41 = vmul.f32 0.35355338, %v1517_v35  ;;  %v1676_v48 = vsel %vm74_vm0, %v6561_v7, -inf  ;;  %v5422_v35 = vld [vmem:[%s8170_s1 + $0x90] sm:$0xff] }
 0x54c   :  { %v1677_v54 = vmax.f32 %v6566_v8, %v1676_v48  ;;  %v6579_v51 = vadd.f32 %v5418_v4, %v1594_v50 }
 0x54d   :  { %v6574_v10 = vadd.f32 %v5417_v21, %v1595_v41  ;;  %v1521_v62 = vpop.f32.mrb[70].mxu0 }
 0x54e   :  { %v1596_v47 = vmul.f32 0.35355338, %v1521_v62  ;;  %1678 = vmax.xlane.f32.xlu0 %v1677_v54  ;;  %v1523_v55 = vpop.f32.mrb[71].mxu0 }
 0x54f   :  { %v1597_v59 = vmul.f32 0.35355338, %v1523_v55  ;;  %v1680_v2 = vsel %vm74_vm0, %v6574_v10, -inf }
 0x550   :  { %v1681_v38 = vmax.f32 %v6579_v51, %v1680_v2  ;;  %v6592_v6 = vadd.f32 %v5420_v56, %v1596_v47  ;;  %v5423_v47 = vld [vmem:[%s8170_s1 + $0xa8] sm:$0xff]  ;;  %v5424_v2 = vld [vmem:[%s8170_s1 + $0xa0] sm:$0xff] }
 0x551   :  { %v6587_v22 = vadd.f32 %v5419_v12, %v1597_v59  ;;  %v1527_v0 = vpop.f32.mrb[72].mxu0 }
 0x552   :  { %v1598_v16 = vmul.f32 0.35355338, %v1527_v0  ;;  %1682 = vmax.xlane.f32.xlu0 %v1681_v38  ;;  %v1529_v46 = vpop.f32.mrb[73].mxu0 }
 0x553   :  { %v1599_v31 = vmul.f32 0.35355338, %v1529_v46  ;;  %v1684_v34 = vsel %vm74_vm0, %v6587_v22, -inf }
 0x554   :  { %v1685_v44 = vmax.f32 %v6592_v6, %v1684_v34  ;;  %v6605_v41 = vadd.f32 %v5422_v35, %v1598_v16  ;;  %v5425_v34 = vld [vmem:[%s8170_s1 + $0xc8] sm:$0xff] }
 0x555   :  { %v6600_v36 = vadd.f32 %v5421_v37, %v1599_v31  ;;  %v1533_v50 = vpop.f32.mrb[74].mxu0 }
 0x556   :  { %v1600_v48 = vmul.f32 0.35355338, %v1533_v50  ;;  %1686 = vmax.xlane.f32.xlu0 %v1685_v44  ;;  %v1535_v54 = vpop.f32.mrb[75].mxu0  ;;  %v5426_v50 = vld [vmem:[%s8170_s1 + $0xc0] sm:$0xff] }
 0x557   :  { %v1601_v21 = vmul.f32 0.35355338, %v1535_v54  ;;  %5024 = vrot.lane.b32.xlu1 %v5679_v53, %s5463_s22  ;;  %v1688_v62 = vsel %vm74_vm0, %v6600_v36, -inf }
 0x558   :  { %v1689_v4 = vmax.f32 %v6605_v41, %v1688_v62  ;;  %v6620_v38 = vadd.f32 %v5424_v2, %v1600_v48 }
 0x559   :  { %v6615_v55 = vadd.f32 %v5423_v47, %v1601_v21  ;;  %v1539_v59 = vpop.f32.mrb[76].mxu0 }
 0x55a   :  { %1690 = vmax.xlane.f32.xlu0 %v1689_v4  ;;  %v1541_v53 = vpop.f32.mrb[77].mxu0 }
 0x55b   :  { %v1692_v12 = vsel %vm74_vm0, %v6615_v55, -inf }
 0x55c   :  { %v1693_v0 = vmax.f32 %v6620_v38, %v1692_v12  ;;  %v5427_v12 = vld [vmem:[%s8170_s1 + $0xe8] sm:$0xff] }
 0x55d   :  { %v1545_v56 = vpop.f32.mrb[78].mxu0 }
 0x55e   :  { %v1604_v16 = vmul.f32 0.35355338, %v1545_v56  ;;  %1694 = vmax.xlane.f32.xlu0 %v1693_v0  ;;  %v1547_v46 = vpop.f32.mrb[79].mxu0 }
 0x55f   :  { %v1605_v31 = vmul.f32 0.35355338, %v1547_v46 }
 0x560   :  { %v6633_v35 = vadd.f32 %v5426_v50, %v1604_v16  ;;  %v5428_v16 = vld [vmem:[%s8170_s1 + $0xe0] sm:$0xff] }
 0x561   :  { %v6628_v44 = vadd.f32 %v5425_v34, %v1605_v31  ;;  %v1551_v37 = vpop.f32.mrb[80].mxu0 }
 0x562   :  { %v1553_v48 = vpop.f32.mrb[81].mxu0 }
 0x563   :  { %v1700_v54 = vsel %vm74_vm0, %v6628_v44, -inf }
 0x564   :  { %v1701_v21 = vmax.f32 %v6633_v35, %v1700_v54 }
 0x565   :  { %v1557_v62 = vpop.f32.mrb[82].mxu0 }
 0x566   :  { %v1608_v4 = vmul.f32 0.35355338, %v1557_v62  ;;  %1702 = vmax.xlane.f32.xlu0 %v1701_v21  ;;  %v1559_v47 = vpop.f32.mrb[83].mxu0  ;;  %v1603_v21 = vmul.f32 0.35355338, %v1541_v53  ;;  %v5431_v53 = vld [vmem:[%s8170_s1 + $0x100] sm:$0xff] }
 0x567   :  { %v1609_v2 = vmul.f32 0.35355338, %v1559_v47 }
 0x568   :  { %v6646_v46 = vadd.f32 %v5428_v16, %v1608_v4  ;;  %v5430_v16 = vld [vmem:[%s8170_s1 + $0xb8] sm:$0xff] }
 0x569   :  { %v6641_v0 = vadd.f32 %v5427_v12, %v1609_v2  ;;  %v1563_v56 = vpop.f32.mrb[84].mxu0  ;;  %v5429_v12 = vld [vmem:[%s8170_s1 + $0x108] sm:$0xff]  ;;  %v6659_v32 = vadd.f32 %v5430_v16, %v1603_v21 }
 0x56a   :  { %v1565_v31 = vpop.f32.mrb[85].mxu0 }
 0x56b   :  { %v1708_v34 = vsel %vm74_vm0, %v6641_v0, -inf  ;;  %v1696_v26 = vsel %vm74_vm0, %v6659_v32, -inf  ;;  %v1611_v16 = vmul.f32 0.35355338, %v1565_v31 }
 0x56c   :  { %v1709_v50 = vmax.f32 %v6646_v46, %v1708_v34  ;;  %v1607_v34 = vmul.f32 0.35355338, %v1553_v48  ;;  %v5432_v48 = vld [vmem:[%s8170_s1 + $0xd8] sm:$0xff] }
 0x56d   :  { %v1569_v54 = vpop.f32.mrb[86].mxu0 }
 0x56e   :  { %v1612_v62 = vmul.f32 0.35355338, %v1569_v54  ;;  %1710 = vmax.xlane.f32.xlu0 %v1709_v50  ;;  %v1571_v47 = vpop.f32.mrb[87].mxu0  ;;  %v6674_v21 = vadd.f32 %v5432_v48, %v1607_v34  ;;  %v6687_v34 = vadd.f32 %v5434_v23, %v1611_v16 }
 0x56f   :  { %v1613_v2 = vmul.f32 0.35355338, %v1571_v47  ;;  %v1602_v47 = vmul.f32 0.35355338, %v1539_v59  ;;  %v5433_v59 = vld [vmem:[%s8170_s1 + $0xb0] sm:$0xff] }
 0x570   :  { %v6664_v50 = vadd.f32 %v5431_v53, %v1612_v62  ;;  %v1606_v53 = vmul.f32 0.35355338, %v1551_v37  ;;  %v1704_v49 = vsel %vm74_vm0, %v6674_v21, -inf  ;;  %v1712_v37 = vsel %vm74_vm0, %v6687_v34, -inf }
 0x571   :  { %v6654_v33 = vadd.f32 %v5429_v12, %v1613_v2  ;;  %v1575_v4 = vpop.f32.mrb[88].mxu0  ;;  %v6679_v62 = vadd.f32 %v5433_v59, %v1602_v47  ;;  %v1610_v47 = vmul.f32 0.35355338, %v1563_v56  ;;  %v5436_v59 = vld [vmem:[%s8170_s1 + $0x118] sm:$0xff] }
 0x572   :  { %v1577_v54 = vpop.f32.mrb[89].mxu0 }
 0x573   :  { %v1716_v2 = vsel %vm74_vm0, %v6654_v33, -inf  ;;  %v1615_v31 = vmul.f32 0.35355338, %v1577_v54  ;;  %v5437_v54 = vld [vmem:[%s8170_s1 + $0xf0] sm:$0xff] }
 0x574   :  { %v1717_v12 = vmax.f32 %v6664_v50, %v1716_v2  ;;  %v1697_v2 = vmax.f32 %v6679_v62, %v1696_v26  ;;  %v6705_v16 = vadd.f32 %v5437_v54, %v1610_v47 }
 0x575   :  { %v6700_v23 = vadd.f32 %v5436_v59, %v1615_v31 }
 0x576   :  { %1718 = vmax.xlane.f32.xlu0 %v1717_v12  ;;  %v5435_v12 = vld [vmem:[%s8170_s1 + $0xd0] sm:$0xff]  ;;  %v1713_v56 = vmax.f32 %v6705_v16, %v1712_v37 }
 0x577   :  { %v6692_v48 = vadd.f32 %v5435_v12, %v1606_v53  ;;  %v1614_v53 = vmul.f32 0.35355338, %v1575_v4 }
 0x579   :  { %v1705_v26 = vmax.f32 %v6692_v48, %v1704_v49  ;;  %v1720_v49 = vsel %vm74_vm0, %v6700_v23, -inf }
 0x57b   :  { %1698 = vmax.xlane.f32.xlu1 %v1697_v2  ;;  %v5438_v2 = vld [vmem:[%s8170_s1 + $0x110] sm:$0xff] }
 0x57c   :  { %v6713_v12 = vadd.f32 %v5438_v2, %v1614_v53 }
 0x57e   :  { %v1721_v31 = vmax.f32 %v6713_v12, %v1720_v49 }
 0x57f   :  { %1706 = vmax.xlane.f32.xlu1 %v1705_v26 }
 0x583   :  { %1714 = vmax.xlane.f32.xlu1 %v1713_v56 }
 0x587   :  { %1722 = vmax.xlane.f32.xlu1 %v1721_v31 }
 0x58c   :  { %5029 = vrot.lane.b32.xlu0 %v5689_v58, %s5463_s22 }
 0x598   :  { %5034 = vrot.lane.b32.xlu1 %v5699_v63, %s5463_s22 }
 0x5c3   :  { %v1655_v4 = vpop.xlane.xlu1 %1654 }
 0x5c4   :  { %v1724_v47 = vsub.f32 %v6488_v28, %v1655_v4  ;;  %v1725_v26 = vsub.f32 %v6483_v60, %v1655_v4 }
 0x5c6   :  { %v1760_v37 = vmul.f32 1.442695, %v1724_v47  ;;  %v1762_v59 = vmul.f32 1.442695, %v1725_v26 }
 0x5c7   :  { %v1659_v54 = vpop.xlane.xlu1 %1658 }
 0x5c8   :  { %5151 = vpow2.f32 %v1760_v37  ;;  %v1726_v53 = vsub.f32 %v6501_v42, %v1659_v54  ;;  %v1727_v56 = vsub.f32 %v6496_v18, %v1659_v54 }
 0x5c9   :  { %5153 = vpow2.f32 %v1762_v59 }
 0x5ca   :  { %v1764_v49 = vmul.f32 1.442695, %v1726_v53  ;;  %v1766_v2 = vmul.f32 1.442695, %v1727_v56 }
 0x5cb   :  { %v1663_v58 = vpop.xlane.xlu1 %1662 }
 0x5cc   :  { %5155 = vpow2.f32 %v1764_v49  ;;  %v1728_v63 = vsub.f32 %v6514_v15, %v1663_v58  ;;  %v1729_v31 = vsub.f32 %v6509_v19, %v1663_v58 }
 0x5cd   :  { %5157 = vpow2.f32 %v1766_v2 }
 0x5ce   :  { %v1768_v28 = vmul.f32 1.442695, %v1728_v63  ;;  %v1770_v60 = vmul.f32 1.442695, %v1729_v31 }
 0x5cf   :  { %v6726_v4 = vpop.xlane.xlu1 %1666 }
 0x5d0   :  { %5159 = vpow2.f32 %v1768_v28 }
 0x5d1   :  { %5161 = vpow2.f32 %v1770_v60 }
 0x5d2   :  { %v6728_v47 = vpop.eup %5151 }
 0x5d3   :  { %v6730_v42 = vpop.eup %5153  ;;  %v1671_v18 = vpop.xlane.xlu1 %1670 }
 0x5d4   :  { %v1732_v26 = vsub.f32 %v6540_v43, %v1671_v18  ;;  %v1733_v37 = vsub.f32 %v6535_v20, %v1671_v18  ;;  %v1832_v15 = vsel %vm74_vm0, %v6730_v42, 0.0 }
 0x5d5   :  { %v1833_v19 = vadd.f32 %v6728_v47, %v1832_v15 }
 0x5d6   :  { %v6737_v59 = vpop.eup %5155  ;;  %v1776_v54 = vmul.f32 1.442695, %v1732_v26  ;;  %v1778_v53 = vmul.f32 1.442695, %v1733_v37 }
 0x5d7   :  { %v6739_v56 = vpop.eup %5157  ;;  %1834 = vadd.xlane.f32.xlu0 %v1833_v19  ;;  %v5025_v49 = vpop.permute.xlu1 %5024 }
 0x5d8   :  { %v1675_v2 = vpop.xlane.xlu0 %1674  ;;  %5163 = vpow2.f32 %v1776_v54  ;;  %v5027_v58 = vunpack.i.h.bf16 %v5025_v49  ;;  %v5026_v63 = vunpack.i.l.bf16 %v5025_v49  ;;  %v1836_v31 = vsel %vm74_vm0, %v6739_v56, 0.0 }
 0x5d9   :  { %v1734_v43 = vsub.f32 %v6553_v52, %v1675_v2  ;;  %5165 = vpow2.f32 %v1778_v53  ;;  %v1735_v20 = vsub.f32 %v6548_v17, %v1675_v2  ;;  %v1837_v26 = vadd.f32 %v6737_v59, %v1836_v31 }
 0x5da   :  { %v6745_v28 = vpop.eup %5159  ;;  %v4796_v60 = vpack.c.bf16 %v5027_v58, %v5026_v63 }
 0x5db   :  { %v1780_v18 = vmul.f32 1.442695, %v1734_v43  ;;  %v6748_v37 = vpop.eup %5161  ;;  %v1782_v15 = vmul.f32 1.442695, %v1735_v20  ;;  %1838 = vadd.xlane.f32.xlu1 %v1837_v26 }
 0x5dc   :  { %v1679_v19 = vpop.xlane.xlu0 %1678  ;;  %4797 = vmatpush1.bf16.msra.mxu0 %v4796_v60  ;;  %v1840_v17 = vsel %vm74_vm0, %v6748_v37, 0.0  ;;  %4833 = vmatpush1.bf16.msra.mxu1 %v4796_v60  ;;  %v1731_v60 = vsub.f32 %v6522_v27, %v6726_v4  ;;  %v1730_v27 = vsub.f32 %v6527_v9, %v6726_v4 }
 0x5dd   :  { %5167 = vpow2.f32 %v1780_v18  ;;  %v1736_v52 = vsub.f32 %v6566_v8, %v1679_v19  ;;  %v1737_v54 = vsub.f32 %v6561_v7, %v1679_v19  ;;  %v1841_v53 = vadd.f32 %v6745_v28, %v1840_v17  ;;  %4798 = vmatprep.subr.bf16.mxu0 %v8236_v45  ;;  %4825 = vmatprep.subr.bf16.mxu1 %v8236_v45 }
 0x5de   :  { %5169 = vpow2.f32 %v1782_v15  ;;  %v1772_v9 = vmul.f32 1.442695, %v1730_v27 }
 0x5df   :  { %v1784_v49 = vmul.f32 1.442695, %v1736_v52  ;;  %v1786_v2 = vmul.f32 1.442695, %v1737_v54  ;;  %1842 = vadd.xlane.f32.xlu0 %v1841_v53  ;;  %v1774_v53 = vmul.f32 1.442695, %v1731_v60 }
 0x5e0   :  { %v1683_v58 = vpop.xlane.xlu0 %1682 }
 0x5e1   :  { %5171 = vpow2.f32 %v1784_v49  ;;  %v1738_v8 = vsub.f32 %v6579_v51, %v1683_v58  ;;  %v1739_v7 = vsub.f32 %v6574_v10, %v1683_v58 }
 0x5e2   :  { %5173 = vpow2.f32 %v1786_v2  ;;  %v6759_v63 = vpop.eup %5163 }
 0x5e3   :  { %v1788_v43 = vmul.f32 1.442695, %v1738_v8  ;;  %v1790_v20 = vmul.f32 1.442695, %v1739_v7  ;;  %v6761_v31 = vpop.eup %5165 }
 0x5e4   :  { %v1687_v18 = vpop.xlane.xlu0 %1686  ;;  %v1848_v51 = vsel %vm74_vm0, %v6761_v31, 0.0 }
 0x5e5   :  { %5175 = vpow2.f32 %v1788_v43  ;;  %v1740_v26 = vsub.f32 %v6592_v6, %v1687_v18  ;;  %v1741_v15 = vsub.f32 %v6587_v22, %v1687_v18  ;;  %v1849_v10 = vadd.f32 %v6759_v63, %v1848_v51 }
 0x5e6   :  { %5177 = vpow2.f32 %v1790_v20 }
 0x5e7   :  { %v6770_v19 = vpop.eup %5167  ;;  %v1792_v52 = vmul.f32 1.442695, %v1740_v26  ;;  %v1794_v54 = vmul.f32 1.442695, %v1741_v15  ;;  %1850 = vadd.xlane.f32.xlu0 %v1849_v10 }
 0x5e8   :  { %v6772_v17 = vpop.eup %5169  ;;  %v1691_v6 = vpop.xlane.xlu0 %1690 }
 0x5e9   :  { %5179 = vpow2.f32 %v1792_v52  ;;  %v1742_v22 = vsub.f32 %v6605_v41, %v1691_v6  ;;  %v1743_v49 = vsub.f32 %v6600_v36, %v1691_v6  ;;  %v1852_v2 = vsel %vm74_vm0, %v6772_v17, 0.0 }
 0x5ea   :  { %5181 = vpow2.f32 %v1794_v54  ;;  %v1853_v58 = vadd.f32 %v6770_v19, %v1852_v2 }
 0x5eb   :  { %v6781_v8 = vpop.eup %5171  ;;  %v1796_v7 = vmul.f32 1.442695, %v1742_v22  ;;  %v1798_v43 = vmul.f32 1.442695, %v1743_v49  ;;  %5183 = vpow2.f32 %v1774_v53 }
 0x5ec   :  { %v6783_v20 = vpop.eup %5173  ;;  %1854 = vadd.xlane.f32.xlu1 %v1853_v58  ;;  %v1695_v6 = vpop.xlane.xlu0 %1694 }
 0x5ed   :  { %5185 = vpow2.f32 %v1796_v7  ;;  %v1856_v41 = vsel %vm74_vm0, %v6783_v20, 0.0 }
 0x5ee   :  { %5187 = vpow2.f32 %v1798_v43  ;;  %v1857_v36 = vadd.f32 %v6781_v8, %v1856_v41  ;;  %v1745_v41 = vsub.f32 %v6615_v55, %v1695_v6 }
 0x5ef   :  { %v6788_v4 = vpop.eup %5175  ;;  %5189 = vpow2.f32 %v1772_v9 }
 0x5f0   :  { %v6790_v60 = vpop.eup %5177  ;;  %1858 = vadd.xlane.f32.xlu1 %v1857_v36  ;;  %v1744_v36 = vsub.f32 %v6620_v38, %v1695_v6 }
 0x5f1   :  { %v1860_v18 = vsel %vm74_vm0, %v6790_v60, 0.0 }
 0x5f2   :  { %v1861_v26 = vadd.f32 %v6788_v4, %v1860_v18 }
 0x5f3   :  { %v6795_v15 = vpop.eup %5179  ;;  %v1703_v7 = vpop.xlane.xlu0 %1702 }
 0x5f4   :  { %v6797_v51 = vpop.eup %5181  ;;  %1862 = vadd.xlane.f32.xlu1 %v1861_v26  ;;  %v1802_v26 = vmul.f32 1.442695, %v1745_v41 }
 0x5f5   :  { %v1864_v10 = vsel %vm74_vm0, %v6797_v51, 0.0  ;;  %v6801_v52 = vpop.eup %5183 }
 0x5f6   :  { %v1865_v54 = vadd.f32 %v6795_v15, %v1864_v10  ;;  %v1844_v58 = vsel %vm74_vm0, %v6801_v52, 0.0  ;;  %v1749_v10 = vsub.f32 %v6628_v44, %v1703_v7  ;;  %5191 = vpow2.f32 %v1802_v26 }
 0x5f7   :  { %v6804_v27 = vpop.eup %5185 }
 0x5f8   :  { %v6806_v53 = vpop.eup %5187  ;;  %1866 = vadd.xlane.f32.xlu1 %v1865_v54  ;;  %v1800_v54 = vmul.f32 1.442695, %v1744_v36 }
 0x5f9   :  { %v1868_v22 = vsel %vm74_vm0, %v6806_v53, 0.0  ;;  %v6811_v2 = vpop.eup %5189 }
 0x5fa   :  { %v1869_v49 = vadd.f32 %v6804_v27, %v1868_v22  ;;  %v1845_v43 = vadd.f32 %v6811_v2, %v1844_v58  ;;  %v1748_v58 = vsub.f32 %v6633_v35, %v1703_v7  ;;  %5193 = vpow2.f32 %v1800_v54 }
 0x5fb   :  { %v1711_v9 = vpop.xlane.xlu0 %1710 }
 0x5fc   :  { %1870 = vadd.xlane.f32.xlu1 %v1869_v49  ;;  %v1810_v49 = vmul.f32 1.442695, %v1749_v10  ;;  %v1808_v44 = vmul.f32 1.442695, %v1748_v58 }
 0x5fd   :  { %5039 = vrot.lane.b32.xlu0 %v5709_v3, %s5463_s22 }
 0x5fe   :  { %5195 = vpow2.f32 %v1810_v49 }
 0x600   :  { %1846 = vadd.xlane.f32.xlu1 %v1845_v43 }
 0x603   :  { %v6820_v18 = vpop.xlane.xlu0 %1718 }
 0x604   :  { %v1756_v58 = vsub.f32 %v6664_v50, %v6820_v18 }
 0x607   :  { %v5030_v22 = vpop.permute.xlu0 %5029 }
 0x608   :  { %v5032_v25 = vunpack.i.h.bf16 %v5030_v22  ;;  %v5031_v5 = vunpack.i.l.bf16 %v5030_v22  ;;  %v1699_v3 = vpop.xlane.xlu1 %1698 }
 0x609   :  { %v1746_v43 = vsub.f32 %v6679_v62, %v1699_v3  ;;  %v1747_v55 = vsub.f32 %v6659_v32, %v1699_v3  ;;  %v1753_v32 = vsub.f32 %v6641_v0, %v1711_v9 }
 0x60a   :  { %v4799_v30 = vpack.c.bf16 %v5032_v25, %v5031_v5  ;;  %v1752_v25 = vsub.f32 %v6646_v46, %v1711_v9  ;;  %v1757_v9 = vsub.f32 %v6654_v33, %v6820_v18 }
 0x60b   :  { %v1804_v38 = vmul.f32 1.442695, %v1746_v43  ;;  %v1806_v6 = vmul.f32 1.442695, %v1747_v55  ;;  %v1818_v7 = vmul.f32 1.442695, %v1753_v32 }
 0x60c   :  { %v1707_v41 = vpop.xlane.xlu1 %1706  ;;  %4800 = vmatpush1.bf16.msra.mxu0 %v4799_v30  ;;  %4834 = vmatpush1.bf16.msra.mxu1 %v4799_v30  ;;  %v6832_v30 = vpop.eup %5191 }
 0x60d   :  { %5197 = vpow2.f32 %v1804_v38  ;;  %v1750_v36 = vsub.f32 %v6692_v48, %v1707_v41  ;;  %v1751_v26 = vsub.f32 %v6674_v21, %v1707_v41  ;;  %4801 = vmatprep.subr.bf16.mxu0 %v8236_v45  ;;  %4826 = vmatprep.subr.bf16.mxu1 %v8236_v45  ;;  %v1816_v21 = vmul.f32 1.442695, %v1752_v25  ;;  %v6835_v54 = vpop.eup %5193 }
 0x60e   :  { %5199 = vpow2.f32 %v1806_v6  ;;  %v1872_v22 = vsel %vm74_vm0, %v6832_v30, 0.0  ;;  %v6840_v46 = vpop.eup %5195 }
 0x60f   :  { %v1814_v5 = vmul.f32 1.442695, %v1751_v26  ;;  %5201 = vpow2.f32 %v1808_v44  ;;  %v1812_v62 = vmul.f32 1.442695, %v1750_v36  ;;  %v1826_v44 = vmul.f32 1.442695, %v1757_v9 }
 0x610   :  { %v1715_v35 = vpop.xlane.xlu1 %1714  ;;  %v1880_v50 = vsel %vm74_vm0, %v6840_v46, 0.0 }
 0x611   :  { %5203 = vpow2.f32 %v1814_v5  ;;  %v1755_v48 = vsub.f32 %v6687_v34, %v1715_v35  ;;  %v1754_v0 = vsub.f32 %v6705_v16, %v1715_v35  ;;  %v1873_v16 = vadd.f32 %v6835_v54, %v1872_v22 }
 0x612   :  { %5205 = vpow2.f32 %v1812_v62  ;;  %v1824_v5 = vmul.f32 1.442695, %v1756_v58 }
 0x613   :  { %5207 = vpow2.f32 %v1818_v7  ;;  %v1822_v49 = vmul.f32 1.442695, %v1755_v48  ;;  %v1820_v55 = vmul.f32 1.442695, %v1754_v0 }
 0x614   :  { %v1723_v10 = vpop.xlane.xlu1 %1722  ;;  %5209 = vpow2.f32 %v1816_v21 }
 0x615   :  { %5211 = vpow2.f32 %v1822_v49  ;;  %v1759_v33 = vsub.f32 %v6700_v23, %v1723_v10  ;;  %v1758_v25 = vsub.f32 %v6713_v12, %v1723_v10 }
 0x616   :  { %5213 = vpow2.f32 %v1820_v55 }
 0x617   :  { %v6844_v3 = vpop.eup %5197  ;;  %5215 = vpow2.f32 %v1826_v44  ;;  %v1830_v23 = vmul.f32 1.442695, %v1759_v33  ;;  %v1828_v12 = vmul.f32 1.442695, %v1758_v25 }
 0x618   :  { %v6846_v34 = vpop.eup %5199  ;;  %v5035_v43 = vpop.permute.xlu1 %5034  ;;  %5217 = vpow2.f32 %v1824_v5 }
 0x619   :  { %v5037_v38 = vunpack.i.h.bf16 %v5035_v43  ;;  %v5036_v6 = vunpack.i.l.bf16 %v5035_v43  ;;  %v1876_v41 = vsel %vm74_vm0, %v6846_v34, 0.0  ;;  %v6855_v26 = vpop.eup %5201  ;;  %5219 = vpow2.f32 %v1830_v23 }
 0x61a   :  { %v1877_v36 = vadd.f32 %v6844_v3, %v1876_v41  ;;  %v1881_v35 = vadd.f32 %v6855_v26, %v1880_v50  ;;  %5221 = vpow2.f32 %v1828_v12 }
 0x61b   :  { %v4802_v32 = vpack.c.bf16 %v5037_v38, %v5036_v6  ;;  %v6859_v18 = vpop.eup %5203 }
 0x61c   :  { %1874 = vadd.xlane.f32.xlu0 %v1873_v16  ;;  %1878 = vadd.xlane.f32.xlu1 %v1877_v36  ;;  %v6865_v62 = vpop.eup %5205  ;;  %v1884_v7 = vsel %vm74_vm0, %v6859_v18, 0.0 }
 0x61d   :  { %4803 = vmatpush1.bf16.msra.mxu0 %v4802_v32  ;;  %4835 = vmatpush1.bf16.msra.mxu1 %v4802_v32  ;;  %v6869_v48 = vpop.eup %5207  ;;  %v1885_v10 = vadd.f32 %v6865_v62, %v1884_v7 }
 0x61e   :  { %4804 = vmatprep.subr.bf16.mxu0 %v8236_v45  ;;  %4827 = vmatprep.subr.bf16.mxu1 %v8236_v45  ;;  %v6871_v21 = vpop.eup %5209  ;;  %v1888_v0 = vsel %vm74_vm0, %v6869_v48, 0.0 }
 0x61f   :  { %v6876_v22 = vpop.eup %5211  ;;  %v1889_v45 = vadd.f32 %v6871_v21, %v1888_v0 }
 0x620   :  { %1882 = vadd.xlane.f32.xlu1 %v1881_v35  ;;  %v6879_v9 = vpop.eup %5213  ;;  %v1892_v49 = vsel %vm74_vm0, %v6876_v22, 0.0 }
 0x621   :  { %v6883_v58 = vpop.eup %5215  ;;  %v1893_v43 = vadd.f32 %v6879_v9, %v1892_v49 }
 0x622   :  { %v6886_v16 = vpop.eup %5217  ;;  %v1896_v55 = vsel %vm74_vm0, %v6883_v58, 0.0 }
 0x623   :  { %v6890_v38 = vpop.eup %5219  ;;  %v1897_v6 = vadd.f32 %v6886_v16, %v1896_v55 }
 0x624   :  { %1886 = vadd.xlane.f32.xlu1 %v1885_v10  ;;  %v6893_v41 = vpop.eup %5221  ;;  %v1900_v44 = vsel %vm74_vm0, %v6890_v38, 0.0 }
 0x625   :  { %v1901_v33 = vadd.f32 %v6893_v41, %v1900_v44 }
 0x628   :  { %1890 = vadd.xlane.f32.xlu1 %v1889_v45 }
 0x62c   :  { %1894 = vadd.xlane.f32.xlu1 %v1893_v43 }
 0x630   :  { %1898 = vadd.xlane.f32.xlu1 %v1897_v6 }
 0x634   :  { %1902 = vadd.xlane.f32.xlu1 %v1901_v33 }
 0x664   :  { %v1835_v36 = vpop.xlane.xlu0 %1834 }
 0x665   :  { %5223 = vrcp.f32 %v1835_v36 }
 0x668   :  { %v1839_v50 = vpop.xlane.xlu1 %1838 }
 0x669   :  { %5225 = vrcp.f32 %v1839_v50 }
 0x66c   :  { %v1843_v5 = vpop.xlane.xlu0 %1842 }
 0x66f   :  { %v5224_v32 = vpop.eup %5223 }
 0x670   :  { %v1906_v25 = vmul.f32 %v5224_v32, %v6730_v42  ;;  %v1905_v43 = vmul.f32 %v5224_v32, %v6728_v47 }
 0x672   :  { %4325 = vmatprep.mubr.msk.f32.mxu0 %vm74_vm0, %v1906_v25 }
 0x673   :  { %v5226_v45 = vpop.eup %5225 }
 0x674   :  { %v1851_v23 = vpop.xlane.xlu0 %1850  ;;  %v1909_v55 = vmul.f32 %v5226_v45, %v6739_v56  ;;  %v1908_v50 = vmul.f32 %v5226_v45, %v6737_v59 }
 0x675   :  { %5227 = vrcp.f32 %v1851_v23 }
 0x676   :  { %5229 = vrcp.f32 %v1843_v5 }
 0x678   :  { %v5040_v35 = vpop.permute.xlu0 %5039 }
 0x679   :  { %v1855_v7 = vpop.xlane.xlu1 %1854  ;;  %v5042_v12 = vunpack.i.h.bf16 %v5040_v35  ;;  %v5041_v10 = vunpack.i.l.bf16 %v5040_v35 }
 0x67a   :  { %5231 = vrcp.f32 %v1855_v7 }
 0x67b   :  { %v4805_v0 = vpack.c.bf16 %v5042_v12, %v5041_v10 }
 0x67d   :  { %v1859_v49 = vpop.xlane.xlu1 %1858  ;;  %4806 = vmatpush1.bf16.msra.mxu0 %v4805_v0  ;;  %4836 = vmatpush1.bf16.msra.mxu1 %v4805_v0 }
 0x67e   :  { %5233 = vrcp.f32 %v1859_v49 }
 0x67f   :  { %v5228_v42 = vpop.eup %5227 }
 0x680   :  { %v5230_v6 = vpop.eup %5229  ;;  %v1917_v44 = vmul.f32 %v5228_v42, %v6759_v63  ;;  %2131 = vmatmul.mubr.f32.vlgmr.msra.gmra.mrb[90].mxu0 %v1905_v43  ;;  %v1918_v36 = vmul.f32 %v5228_v42, %v6761_v31 }
 0x681   :  { %v1863_v33 = vpop.xlane.xlu1 %1862  ;;  %4326 = vmatprep.mubr.msk.f32.mxu0 %vm74_vm0, %v1909_v55  ;;  %v1912_v47 = vmul.f32 %v5230_v6, %v6748_v37  ;;  %v1911_v31 = vmul.f32 %v5230_v6, %v6745_v28 }
 0x682   :  { %5235 = vrcp.f32 %v1863_v33  ;;  %4329 = vmatprep.mubr.msk.f32.mxu1 %vm74_vm0, %v1918_v36 }
 0x683   :  { %2151 = vmatmul.mubr.f32.vlgmr.msra.gmra.mrb[36].mxu1 %v1917_v44 }
 0x684   :  { %v5232_v5 = vpop.eup %5231  ;;  %2136 = vmatmul.mubr.f32.gmra.mrb[92].mxu0 %v1908_v50 }
 0x685   :  { %v1867_v32 = vpop.xlane.xlu1 %1866  ;;  %v1921_v56 = vmul.f32 %v5232_v5, %v6772_v17  ;;  %v1920_v63 = vmul.f32 %v5232_v5, %v6770_v19  ;;  %4327 = vmatprep.mubr.msk.f32.mxu0 %vm74_vm0, %v1912_v47 }
 0x686   :  { %5237 = vrcp.f32 %v1867_v32 }
 0x687   :  { %4330 = vmatprep.mubr.msk.f32.mxu1 %vm74_vm0, %v1921_v56 }
 0x688   :  { %v5234_v25 = vpop.eup %5233  ;;  %2156 = vmatmul.mubr.f32.gmra.mrb[38].mxu1 %v1920_v63  ;;  %2141 = vmatmul.mubr.f32.gmra.mrb[94].mxu0 %v1911_v31 }
 0x689   :  { %v1871_v59 = vpop.xlane.xlu1 %1870  ;;  %v1924_v23 = vmul.f32 %v5234_v25, %v6783_v20  ;;  %v1923_v37 = vmul.f32 %v5234_v25, %v6781_v8 }
 0x68a   :  { %5239 = vrcp.f32 %v1871_v59 }
 0x68b   :  { %4331 = vmatprep.mubr.msk.f32.mxu1 %vm74_vm0, %v1924_v23 }
 0x68c   :  { %v5236_v17 = vpop.eup %5235  ;;  %2161 = vmatmul.mubr.f32.gmra.mrb[40].mxu1 %v1923_v37 }
 0x68d   :  { %v1847_v19 = vpop.xlane.xlu1 %1846  ;;  %v1927_v35 = vmul.f32 %v5236_v17, %v6790_v60  ;;  %v1926_v7 = vmul.f32 %v5236_v17, %v6788_v4 }
 0x68e   :  { %5241 = vrcp.f32 %v1847_v19 }
 0x68f   :  { %4332 = vmatprep.mubr.msk.f32.mxu1 %vm74_vm0, %v1927_v35 }
 0x690   :  { %v5238_v28 = vpop.eup %5237  ;;  %2166 = vmatmul.mubr.f32.gmra.mrb[42].mxu1 %v1926_v7 }
 0x691   :  { %v1930_v12 = vmul.f32 %v5238_v28, %v6797_v51  ;;  %v1929_v20 = vmul.f32 %v5238_v28, %v6795_v15 }
 0x693   :  { %4333 = vmatprep.mubr.msk.f32.mxu1 %vm74_vm0, %v1930_v12 }
 0x694   :  { %v5240_v8 = vpop.eup %5239  ;;  %2171 = vmatmul.mubr.f32.gmra.mrb[44].mxu1 %v1929_v20 }
 0x695   :  { %v1933_v10 = vmul.f32 %v5240_v8, %v6806_v53  ;;  %v1932_v0 = vmul.f32 %v5240_v8, %v6804_v27 }
 0x697   :  { %4334 = vmatprep.mubr.msk.f32.mxu1 %vm74_vm0, %v1933_v10 }
 0x698   :  { %v5242_v4 = vpop.eup %5241  ;;  %2176 = vmatmul.mubr.f32.gmra.mrb[46].mxu1 %v1932_v0 }
 0x699   :  { %v1915_v60 = vmul.f32 %v5242_v4, %v6801_v52  ;;  %v1914_v45 = vmul.f32 %v5242_v4, %v6811_v2 }
 0x69b   :  { %4328 = vmatprep.mubr.msk.f32.mxu0 %vm74_vm0, %v1915_v60 }
 0x69c   :  { %2146 = vmatmul.mubr.f32.gmra.mrb[96].mxu0 %v1914_v45 }
 0x6a9   :  { %v1875_v15 = vpop.xlane.xlu0 %1874  ;;  %v1879_v51 = vpop.xlane.xlu1 %1878 }
 0x6aa   :  { %5243 = vrcp.f32 %v1875_v15 }
 0x6ab   :  { %5245 = vrcp.f32 %v1879_v51 }
 0x6ad   :  { %v1883_v49 = vpop.xlane.xlu1 %1882 }
 0x6ae   :  { %5247 = vrcp.f32 %v1883_v49 }
 0x6b1   :  { %v1887_v53 = vpop.xlane.xlu1 %1886 }
 0x6b2   :  { %5249 = vrcp.f32 %v1887_v53 }
 0x6b4   :  { %v5244_v27 = vpop.eup %5243 }
 0x6b5   :  { %v5246_v43 = vpop.eup %5245  ;;  %v1891_v42 = vpop.xlane.xlu1 %1890  ;;  %v1936_v55 = vmul.f32 %v5244_v27, %v6832_v30  ;;  %v1935_v52 = vmul.f32 %v5244_v27, %v6835_v54 }
 0x6b6   :  { %5251 = vrcp.f32 %v1891_v42  ;;  %v1939_v2 = vmul.f32 %v5246_v43, %v6846_v34  ;;  %v1938_v33 = vmul.f32 %v5246_v43, %v6844_v3 }
 0x6b7   :  { %4335 = vmatprep.mubr.msk.f32.mxu1 %vm74_vm0, %v1936_v55 }
 0x6b8   :  { %v5248_v6 = vpop.eup %5247  ;;  %2181 = vmatmul.mubr.f32.gmra.mrb[48].mxu1 %v1935_v52 }
 0x6b9   :  { %v1895_v44 = vpop.xlane.xlu1 %1894  ;;  %4336 = vmatprep.mubr.msk.f32.mxu1 %vm74_vm0, %v1939_v2  ;;  %v1942_v36 = vmul.f32 %v5248_v6, %v6840_v46  ;;  %v1941_v54 = vmul.f32 %v5248_v6, %v6855_v26 }
 0x6ba   :  { %5253 = vrcp.f32 %v1895_v44 }
 0x6bc   :  { %v5250_v50 = vpop.eup %5249  ;;  %2186 = vmatmul.mubr.f32.gmra.mrb[50].mxu1 %v1938_v33 }
 0x6bd   :  { %v1899_v30 = vpop.xlane.xlu1 %1898  ;;  %4337 = vmatprep.mubr.msk.f32.mxu1 %vm74_vm0, %v1942_v36  ;;  %v1945_v34 = vmul.f32 %v5250_v50, %v6859_v18  ;;  %v1944_v3 = vmul.f32 %v5250_v50, %v6865_v62 }
 0x6be   :  { %5255 = vrcp.f32 %v1899_v30 }
 0x6c0   :  { %v5252_v5 = vpop.eup %5251  ;;  %2191 = vmatmul.mubr.f32.gmra.mrb[52].mxu1 %v1941_v54 }
 0x6c1   :  { %v1903_v47 = vpop.xlane.xlu1 %1902  ;;  %4338 = vmatprep.mubr.msk.f32.mxu1 %vm74_vm0, %v1945_v34  ;;  %v1948_v46 = vmul.f32 %v5252_v5, %v6869_v48  ;;  %v1947_v56 = vmul.f32 %v5252_v5, %v6871_v21 }
 0x6c2   :  { %5257 = vrcp.f32 %v1903_v47  ;;  %v5439_v47 = vld [vmem:[%s8168_s0 + $0x8] sm:$0xff] }
 0x6c4   :  { %v5254_v32 = vpop.eup %5253  ;;  %2196 = vmatmul.mubr.f32.gmra.mrb[54].mxu1 %v1944_v3 }
 0x6c5   :  { %4339 = vmatprep.mubr.msk.f32.mxu1 %vm74_vm0, %v1948_v46  ;;  %v1951_v26 = vmul.f32 %v5254_v32, %v6876_v22  ;;  %v1950_v18 = vmul.f32 %v5254_v32, %v6879_v9  ;;  %v321_v22 = vld [vmem:[%s8171_s4 + $0x8] sm:$0xff]  ;;  %v320_v9 = vld [vmem:[%s8171_s4] sm:$0xff] }
 0x6c6   :  { %4553 = vmatprep.subr.mxu0 %v321_v22  ;;  %v5440_v46 = vld [vmem:[%s8168_s0] sm:$0xff] }
 0x6c7   :  { %4554 = vmatpush3.msra.mxu0 %v321_v22 }
 0x6c8   :  { %v5256_v63 = vpop.eup %5255  ;;  %2201 = vmatmul.mubr.f32.gmra.mrb[56].mxu1 %v1947_v56  ;;  %4582 = vmatprep.subr.mxu0 %v320_v9 }
 0x6c9   :  { %4340 = vmatprep.mubr.msk.f32.mxu1 %vm74_vm0, %v1951_v26  ;;  %v1954_v31 = vmul.f32 %v5256_v63, %v6883_v58  ;;  %v1953_v62 = vmul.f32 %v5256_v63, %v6886_v16 }
 0x6cc   :  { %v5258_v25 = vpop.eup %5257  ;;  %2206 = vmatmul.mubr.f32.gmra.mrb[58].mxu1 %v1950_v18 }
 0x6cd   :  { %4341 = vmatprep.mubr.msk.f32.mxu1 %vm74_vm0, %v1954_v31  ;;  %v1957_v48 = vmul.f32 %v5258_v25, %v6890_v38  ;;  %v1956_v21 = vmul.f32 %v5258_v25, %v6893_v41 }
 0x6d0   :  { %2211 = vmatmul.mubr.f32.gmra.mrb[60].mxu1 %v1953_v62  ;;  %v5441_v62 = vld [vmem:[%s8168_s0 + $0x18] sm:$0xff] }
 0x6d1   :  { %4342 = vmatprep.mubr.msk.f32.mxu1 %vm74_vm0, %v1957_v48 }
 0x6d4   :  { %2216 = vmatmul.mubr.f32.gmra.mrb[62].mxu1 %v1956_v21  ;;  %v5442_v21 = vld [vmem:[%s8168_s0 + $0x10] sm:$0xff] }
 0x753   :  { %v2132_v58 = vpop.f32.mrb[90].mxu0 }
 0x754   :  { %v2134_v16 = vpop.f32.mrb[91].mxu0  ;;  %4555 = vmatprep.mubr.msk.f32.mxu0 %vm376_vm1, %v2132_v58 }
 0x756   :  { %v2152_v38 = vpop.f32.mrb[36].mxu1 }
 0x757   :  { %v2137_v59 = vpop.f32.mrb[92].mxu0  ;;  %v2154_v23 = vpop.f32.mrb[37].mxu1 }
 0x758   :  { %v2139_v41 = vpop.f32.mrb[93].mxu0  ;;  %4556 = vmatmul.mubr.msk.f32.vlgmr.msra.gmra.mrb[98].mxu0 %vm376_vm1, %v2137_v59 }
 0x759   :  { %4583 = vmatpush3.msra.mxu0 %v320_v9  ;;  %v5443_v41 = vld [vmem:[%s8168_s0 + $0x28] sm:$0xff] }
 0x75b   :  { %v2157_v37 = vpop.f32.mrb[38].mxu1  ;;  %v2142_v17 = vpop.f32.mrb[94].mxu0 }
 0x75c   :  { %v2159_v19 = vpop.f32.mrb[39].mxu1  ;;  %v2144_v35 = vpop.f32.mrb[95].mxu0  ;;  %4558 = vmatprep.mubr.msk.f32.mxu0 %vm376_vm1, %v2142_v17  ;;  %v5444_v17 = vld [vmem:[%s8168_s0 + $0x20] sm:$0xff] }
 0x75f   :  { %v2162_v7 = vpop.f32.mrb[40].mxu1 }
 0x760   :  { %v2164_v28 = vpop.f32.mrb[41].mxu1 }
 0x763   :  { %v2167_v12 = vpop.f32.mrb[42].mxu1 }
 0x764   :  { %v2169_v20 = vpop.f32.mrb[43].mxu1 }
 0x767   :  { %v2172_v8 = vpop.f32.mrb[44].mxu1 }
 0x768   :  { %v2174_v10 = vpop.f32.mrb[45].mxu1 }
 0x769   :  { %v5445_v10 = vld [vmem:[%s8168_s0 + $0x38] sm:$0xff] }
 0x76b   :  { %v2177_v0 = vpop.f32.mrb[46].mxu1 }
 0x76c   :  { %v2179_v4 = vpop.f32.mrb[47].mxu1 }
 0x76d   :  { %v5446_v4 = vld [vmem:[%s8168_s0 + $0x30] sm:$0xff] }
 0x76f   :  { %v2147_v60 = vpop.f32.mrb[96].mxu0 }
 0x770   :  { %v2149_v45 = vpop.f32.mrb[97].mxu0  ;;  %4559 = vmatmul.mubr.msk.f32.gmra.mrb[100].mxu0 %vm376_vm1, %v2147_v60 }
 0x771   :  { %4561 = vmatprep.mubr.msk.f32.mxu0 %vm376_vm1, %v2152_v38 }
 0x774   :  { %4562 = vmatmul.mubr.msk.f32.gmra.mrb[102].mxu0 %vm376_vm1, %v2157_v37 }
 0x775   :  { %4564 = vmatprep.mubr.msk.f32.mxu0 %vm376_vm1, %v2162_v7 }
 0x778   :  { %4565 = vmatmul.mubr.msk.f32.gmra.mrb[104].mxu0 %vm376_vm1, %v2167_v12 }
 0x779   :  { %4567 = vmatprep.mubr.msk.f32.mxu0 %vm376_vm1, %v2172_v8 }
 0x77c   :  { %4568 = vmatmul.mubr.msk.f32.gmra.mrb[106].mxu0 %vm376_vm1, %v2177_v0 }
 0x78b   :  { %v2182_v15 = vpop.f32.mrb[48].mxu1 }
 0x78c   :  { %v2184_v51 = vpop.f32.mrb[49].mxu1  ;;  %4570 = vmatprep.mubr.msk.f32.mxu0 %vm376_vm1, %v2182_v15 }
 0x78f   :  { %v2187_v49 = vpop.f32.mrb[50].mxu1 }
 0x790   :  { %v2189_v53 = vpop.f32.mrb[51].mxu1  ;;  %4571 = vmatmul.mubr.msk.f32.gmra.mrb[108].mxu0 %vm376_vm1, %v2187_v49 }
 0x793   :  { %v2192_v27 = vpop.f32.mrb[52].mxu1 }
 0x794   :  { %v2194_v43 = vpop.f32.mrb[53].mxu1  ;;  %4573 = vmatprep.mubr.msk.f32.mxu0 %vm376_vm1, %v2192_v27 }
 0x795   :  { %v5447_v43 = vld [vmem:[%s8168_s0 + $0x48] sm:$0xff] }
 0x797   :  { %v2197_v42 = vpop.f32.mrb[54].mxu1 }
 0x798   :  { %v2199_v55 = vpop.f32.mrb[55].mxu1  ;;  %4574 = vmatmul.mubr.msk.f32.gmra.mrb[110].mxu0 %vm376_vm1, %v2197_v42 }
 0x799   :  { %v5448_v55 = vld [vmem:[%s8168_s0 + $0x40] sm:$0xff] }
 0x79b   :  { %v2202_v52 = vpop.f32.mrb[56].mxu1 }
 0x79c   :  { %v2204_v2 = vpop.f32.mrb[57].mxu1  ;;  %4576 = vmatprep.mubr.msk.f32.mxu0 %vm376_vm1, %v2202_v52 }
 0x79f   :  { %v2207_v6 = vpop.f32.mrb[58].mxu1 }
 0x7a0   :  { %v2209_v44 = vpop.f32.mrb[59].mxu1  ;;  %4577 = vmatmul.mubr.msk.f32.gmra.mrb[112].mxu0 %vm376_vm1, %v2207_v6 }
 0x7a3   :  { %v2212_v33 = vpop.f32.mrb[60].mxu1 }
 0x7a4   :  { %v2214_v36 = vpop.f32.mrb[61].mxu1  ;;  %4579 = vmatprep.mubr.msk.f32.mxu0 %vm376_vm1, %v2212_v33 }
 0x7a7   :  { %v2217_v50 = vpop.f32.mrb[62].mxu1 }
 0x7a8   :  { %v2219_v30 = vpop.f32.mrb[63].mxu1  ;;  %4580 = vmatmul.mubr.msk.f32.gmra.mrb[114].mxu0 %vm376_vm1, %v2217_v50 }
 0x7a9   :  { %4584 = vmatprep.mubr.msk.f32.mxu0 %vm376_vm1, %v6431_v40  ;;  %v8263_v40 = vld [vmem:[#allocation4_spill] sm:$0xff]  ;;  %v5449_v30 = vld [vmem:[%s8168_s0 + $0x58] sm:$0xff] }
 0x7ac   :  { %4585 = vmatmul.mubr.msk.f32.vlgmr.msra.gmra.mrb[98].mxu0 %vm376_vm1, %v6436_v61  ;;  %v8264_v61 = vld [vmem:[#allocation13_spill] sm:$0xff] }
 0x7ad   :  { %4587 = vmatprep.mubr.msk.f32.mxu0 %vm376_vm1, %v6440_v57  ;;  %v8265_v57 = vld [vmem:[#allocation18_spill] sm:$0xff] }
 0x7b0   :  { %4588 = vmatmul.mubr.msk.f32.gmra.mrb[100].mxu0 %vm376_vm1, %v6445_v11  ;;  %v8266_v11 = vld [vmem:[#allocation3_spill] sm:$0xff] }
 0x7b1   :  { %4590 = vmatprep.mubr.msk.f32.mxu0 %vm376_vm1, %v6449_v29  ;;  %v8267_v29 = vld [vmem:[#allocation2_spill] sm:$0xff] }
 0x7b4   :  { %4591 = vmatmul.mubr.msk.f32.gmra.mrb[102].mxu0 %vm376_vm1, %v6454_v24  ;;  %v8268_v24 = vld [vmem:[#allocation6_spill] sm:$0xff] }
 0x7b5   :  { %4593 = vmatprep.mubr.msk.f32.mxu0 %vm376_vm1, %v6456_v39  ;;  %v8269_v39 = vld [vmem:[#allocation5_spill] sm:$0xff] }
 0x7b8   :  { %4594 = vmatmul.mubr.msk.f32.gmra.mrb[104].mxu0 %vm376_vm1, %v6458_v14  ;;  %v8270_v14 = vld [vmem:[#allocation8_spill] sm:$0xff] }
 0x7b9   :  { %4596 = vmatprep.mubr.msk.f32.mxu0 %vm376_vm1, %v6460_v13  ;;  %v7015_v13 = vld [vmem:[%s8172_s5] ss:$0 sm:$0xff] }
 0x7bc   :  { %4597 = vmatmul.mubr.msk.f32.gmra.mrb[106].mxu0 %vm376_vm1, %v6462_v1 }
 0x7bd   :  { %4599 = vmatprep.mubr.msk.f32.mxu0 %vm376_vm1, %v8263_v40 }
 0x7c0   :  { %4600 = vmatmul.mubr.msk.f32.gmra.mrb[108].mxu0 %vm376_vm1, %v8264_v61  ;;  %v5450_v61 = vld [vmem:[%s8168_s0 + $0x50] sm:$0xff] }
 0x7c1   :  { %4602 = vmatprep.mubr.msk.f32.mxu0 %vm376_vm1, %v8265_v57 }
 0x7c4   :  { %4603 = vmatmul.mubr.msk.f32.gmra.mrb[110].mxu0 %vm376_vm1, %v8266_v11 }
 0x7c5   :  { %4605 = vmatprep.mubr.msk.f32.mxu0 %vm376_vm1, %v8267_v29 }
 0x7c8   :  { %4606 = vmatmul.mubr.msk.f32.gmra.mrb[112].mxu0 %vm376_vm1, %v8268_v24 }
 0x7c9   :  { %4608 = vmatprep.mubr.msk.f32.mxu0 %vm376_vm1, %v8269_v39 }
 0x7cc   :  { %4609 = vmatmul.mubr.msk.f32.gmra.mrb[114].mxu0 %vm376_vm1, %v8270_v14 }
 0x87f   :  { %v4586_v1 = vpop.f32.mrb[98].mxu0 }
 0x880   :  { %v2647_v54 = vadd.f32 %v4586_v1, %v7015_v13  ;;  %v2550_v34 = vpop.f32.mrb[99].mxu0 }
 0x881   :  { %v2646_v5 = vadd.f32 %v7015_v13, %v2550_v34 }
 0x882   :  { %v7022_v3 = vadd.f32 %v5439_v47, %v2647_v54  ;;  %v5451_v54 = vld [vmem:[%s8168_s0 + $0x68] sm:$0xff] }
 0x883   :  { %v7027_v32 = vadd.f32 %v5440_v46, %v2646_v5  ;;  %v4589_v56 = vpop.f32.mrb[100].mxu0  ;;  %v5452_v5 = vld [vmem:[%s8168_s0 + $0x60] sm:$0xff] }
 0x884   :  { %v2649_v26 = vadd.f32 %v4589_v56, %v7015_v13  ;;  %v2560_v63 = vpop.f32.mrb[101].mxu0  ;;  %v2685_v18 = vsel %vm74_vm0, %v7022_v3, 0.0 }
 0x885   :  { %v2648_v31 = vadd.f32 %v7015_v13, %v2560_v63  ;;  %2686 = vadd.xlane.f32.xlu1 %v2685_v18  ;;  %v2682_v25 = vsel %vm74_vm0, %v7027_v32, 0.0 }
 0x886   :  { %v7038_v48 = vadd.f32 %v5441_v62, %v2649_v26  ;;  %2683 = vadd.xlane.f32.xlu0 %v2682_v25  ;;  %v5453_v25 = vld [vmem:[%s8168_s0 + $0x78] sm:$0xff] }
 0x887   :  { %v7043_v22 = vadd.f32 %v5442_v21, %v2648_v31  ;;  %v4592_v9 = vpop.f32.mrb[102].mxu0  ;;  %v5454_v21 = vld [vmem:[%s8168_s0 + $0x70] sm:$0xff] }
 0x888   :  { %v2651_v58 = vadd.f32 %v4592_v9, %v7015_v13  ;;  %v2570_v16 = vpop.f32.mrb[103].mxu0  ;;  %v2691_v38 = vsel %vm74_vm0, %v7038_v48, 0.0 }
 0x889   :  { %v2650_v59 = vadd.f32 %v7015_v13, %v2570_v16  ;;  %2692 = vadd.xlane.f32.xlu1 %v2691_v38  ;;  %v2688_v23 = vsel %vm74_vm0, %v7043_v22, 0.0 }
 0x88a   :  { %v7054_v37 = vadd.f32 %v5443_v41, %v2651_v58  ;;  %2689 = vadd.xlane.f32.xlu0 %v2688_v23 }
 0x88b   :  { %v7059_v19 = vadd.f32 %v5444_v17, %v2650_v59  ;;  %v4595_v35 = vpop.f32.mrb[104].mxu0  ;;  %v5455_v17 = vld [vmem:[%s8168_s0 + $0x88] sm:$0xff] }
 0x88c   :  { %v2653_v7 = vadd.f32 %v4595_v35, %v7015_v13  ;;  %v2580_v28 = vpop.f32.mrb[105].mxu0  ;;  %v2697_v12 = vsel %vm74_vm0, %v7054_v37, 0.0 }
 0x88d   :  { %v2652_v20 = vadd.f32 %v7015_v13, %v2580_v28  ;;  %2698 = vadd.xlane.f32.xlu1 %v2697_v12  ;;  %v2694_v8 = vsel %vm74_vm0, %v7059_v19, 0.0 }
 0x88e   :  { %v7070_v0 = vadd.f32 %v5445_v10, %v2653_v7  ;;  %2695 = vadd.xlane.f32.xlu0 %v2694_v8  ;;  %v5456_v7 = vld [vmem:[%s8168_s0 + $0x80] sm:$0xff]  ;;  %v2968_v8 = vld [vmem:[%s8173_s6 + $0x8] sm:$0xff] }
 0x88f   :  { %v7075_v60 = vadd.f32 %v5446_v4, %v2652_v20  ;;  %v4598_v45 = vpop.f32.mrb[106].mxu0  ;;  %v2967_v20 = vld [vmem:[%s8173_s6] sm:$0xff] }
 0x890   :  { %v2655_v15 = vadd.f32 %v4598_v45, %v7015_v13  ;;  %v2590_v51 = vpop.f32.mrb[107].mxu0  ;;  %v2703_v49 = vsel %vm74_vm0, %v7070_v0, 0.0  ;;  %v4807_v10 = vpack.c.bf16 %v2968_v8, %v2967_v20 }
 0x891   :  { %v2654_v53 = vadd.f32 %v7015_v13, %v2590_v51  ;;  %2704 = vadd.xlane.f32.xlu1 %v2703_v49  ;;  %v2700_v27 = vsel %vm74_vm0, %v7075_v60, 0.0 }
 0x892   :  { %v7086_v42 = vadd.f32 %v5447_v43, %v2655_v15  ;;  %2701 = vadd.xlane.f32.xlu0 %v2700_v27  ;;  %4808 = vmatprep.subr.bf16.mxu1 %v4807_v10 }
 0x893   :  { %v7091_v52 = vadd.f32 %v5448_v55, %v2654_v53  ;;  %v4601_v2 = vpop.f32.mrb[108].mxu0  ;;  %4810 = vmatpush3.bf16.msra.mxu1 %v4807_v10 }
 0x894   :  { %v2657_v6 = vadd.f32 %v4601_v2, %v7015_v13  ;;  %v2600_v44 = vpop.f32.mrb[109].mxu0  ;;  %v2709_v33 = vsel %vm74_vm0, %v7086_v42, 0.0 }
 0x895   :  { %v2656_v36 = vadd.f32 %v7015_v13, %v2600_v44  ;;  %2710 = vadd.xlane.f32.xlu1 %v2709_v33  ;;  %v2706_v50 = vsel %vm74_vm0, %v7091_v52, 0.0 }
 0x896   :  { %v7102_v40 = vadd.f32 %v5449_v30, %v2657_v6  ;;  %2707 = vadd.xlane.f32.xlu0 %v2706_v50 }
 0x897   :  { %v7107_v57 = vadd.f32 %v5450_v61, %v2656_v36  ;;  %v4604_v11 = vpop.f32.mrb[110].mxu0 }
 0x898   :  { %v2659_v29 = vadd.f32 %v4604_v11, %v7015_v13  ;;  %v2610_v24 = vpop.f32.mrb[111].mxu0  ;;  %v2715_v39 = vsel %vm74_vm0, %v7102_v40, 0.0 }
 0x899   :  { %v2658_v14 = vadd.f32 %v7015_v13, %v2610_v24  ;;  %2716 = vadd.xlane.f32.xlu1 %v2715_v39  ;;  %v2712_v1 = vsel %vm74_vm0, %v7107_v57, 0.0 }
 0x89a   :  { %v7118_v34 = vadd.f32 %v5451_v54, %v2659_v29  ;;  %2713 = vadd.xlane.f32.xlu0 %v2712_v1 }
 0x89b   :  { %v7123_v47 = vadd.f32 %v5452_v5, %v2658_v14  ;;  %v4607_v46 = vpop.f32.mrb[112].mxu0 }
 0x89c   :  { %v2661_v56 = vadd.f32 %v4607_v46, %v7015_v13  ;;  %v2620_v26 = vpop.f32.mrb[113].mxu0  ;;  %v2721_v63 = vsel %vm74_vm0, %v7118_v34, 0.0 }
 0x89d   :  { %v2660_v18 = vadd.f32 %v7015_v13, %v2620_v26  ;;  %2722 = vadd.xlane.f32.xlu1 %v2721_v63  ;;  %v2718_v31 = vsel %vm74_vm0, %v7123_v47, 0.0 }
 0x89e   :  { %v7134_v62 = vadd.f32 %v5453_v25, %v2661_v56  ;;  %2719 = vadd.xlane.f32.xlu0 %v2718_v31 }
 0x89f   :  { %v7139_v9 = vadd.f32 %v5454_v21, %v2660_v18  ;;  %v4610_v58 = vpop.f32.mrb[114].mxu0 }
 0x8a0   :  { %v2663_v16 = vadd.f32 %v4610_v58, %v7015_v13  ;;  %v2630_v38 = vpop.f32.mrb[115].mxu0  ;;  %v2727_v59 = vsel %vm74_vm0, %v7134_v62, 0.0 }
 0x8a1   :  { %v2662_v23 = vadd.f32 %v7015_v13, %v2630_v38  ;;  %2728 = vadd.xlane.f32.xlu1 %v2727_v59  ;;  %v2724_v41 = vsel %vm74_vm0, %v7139_v9, 0.0 }
 0x8a2   :  { %v7150_v35 = vadd.f32 %v5455_v17, %v2663_v16  ;;  %2725 = vadd.xlane.f32.xlu0 %v2724_v41 }
 0x8a3   :  { %v7155_v28 = vadd.f32 %v5456_v7, %v2662_v23 }
 0x8a4   :  { %v2733_v13 = vsel %vm74_vm0, %v7150_v35, 0.0 }
 0x8a5   :  { %2734 = vadd.xlane.f32.xlu1 %v2733_v13  ;;  %v2730_v12 = vsel %vm74_vm0, %v7155_v28, 0.0 }
 0x8a6   :  { %2731 = vadd.xlane.f32.xlu0 %v2730_v12 }
 0x912   :  { %v2687_v4 = vpop.xlane.xlu1 %2686 }
 0x913   :  { %v2738_v45 = vmul.f32 0.0625, %v2687_v4  ;;  %v2684_v15 = vpop.xlane.xlu0 %2683 }
 0x914   :  { %v2737_v51 = vmul.f32 0.0625, %v2684_v15 }
 0x915   :  { %v7168_v49 = vsub.f32 %v7022_v3, %v2738_v45 }
 0x916   :  { %v7171_v53 = vsub.f32 %v7027_v32, %v2737_v51  ;;  %v2693_v27 = vpop.xlane.xlu1 %2692 }
 0x917   :  { %v2740_v43 = vmul.f32 0.0625, %v2693_v27  ;;  %v2690_v55 = vpop.xlane.xlu0 %2689  ;;  %v2774_v2 = vmul.f32 %v7168_v49, %v7168_v49 }
 0x918   :  { %v2739_v6 = vmul.f32 0.0625, %v2690_v55  ;;  %v2773_v44 = vmul.f32 %v7171_v53, %v7171_v53 }
 0x919   :  { %v7178_v33 = vsub.f32 %v7038_v48, %v2740_v43  ;;  %v2794_v36 = vsel %vm74_vm0, %v2774_v2, 0.0 }
 0x91a   :  { %v7182_v3 = vsub.f32 %v7043_v22, %v2739_v6  ;;  %v2699_v32 = vpop.xlane.xlu1 %2698  ;;  %2795 = vadd.xlane.f32.xlu1 %v2794_v36  ;;  %v2791_v50 = vsel %vm74_vm0, %v2773_v44, 0.0 }
 0x91b   :  { %v2742_v30 = vmul.f32 0.0625, %v2699_v32  ;;  %v2696_v61 = vpop.xlane.xlu0 %2695  ;;  %2792 = vadd.xlane.f32.xlu0 %v2791_v50  ;;  %v2776_v11 = vmul.f32 %v7178_v33, %v7178_v33 }
 0x91c   :  { %v2741_v29 = vmul.f32 0.0625, %v2696_v61  ;;  %v2775_v48 = vmul.f32 %v7182_v3, %v7182_v3 }
 0x91d   :  { %v7190_v24 = vsub.f32 %v7054_v37, %v2742_v30  ;;  %v2800_v22 = vsel %vm74_vm0, %v2776_v11, 0.0 }
 0x91e   :  { %v7194_v39 = vsub.f32 %v7059_v19, %v2741_v29  ;;  %v2705_v14 = vpop.xlane.xlu1 %2704  ;;  %2801 = vadd.xlane.f32.xlu1 %v2800_v22  ;;  %v2797_v1 = vsel %vm74_vm0, %v2775_v48, 0.0 }
 0x91f   :  { %v2744_v54 = vmul.f32 0.0625, %v2705_v14  ;;  %v2702_v5 = vpop.xlane.xlu0 %2701  ;;  %2798 = vadd.xlane.f32.xlu0 %v2797_v1  ;;  %v2778_v46 = vmul.f32 %v7190_v24, %v7190_v24 }
 0x920   :  { %v2743_v56 = vmul.f32 0.0625, %v2702_v5  ;;  %v2777_v37 = vmul.f32 %v7194_v39, %v7194_v39 }
 0x921   :  { %v7202_v26 = vsub.f32 %v7070_v0, %v2744_v54  ;;  %v2806_v19 = vsel %vm74_vm0, %v2778_v46, 0.0 }
 0x922   :  { %v7206_v63 = vsub.f32 %v7075_v60, %v2743_v56  ;;  %v2711_v18 = vpop.xlane.xlu1 %2710  ;;  %2807 = vadd.xlane.f32.xlu1 %v2806_v19  ;;  %v2803_v31 = vsel %vm74_vm0, %v2777_v37, 0.0 }
 0x923   :  { %v2746_v25 = vmul.f32 0.0625, %v2711_v18  ;;  %v2708_v21 = vpop.xlane.xlu0 %2707  ;;  %2804 = vadd.xlane.f32.xlu0 %v2803_v31  ;;  %v2780_v58 = vmul.f32 %v7202_v26, %v7202_v26 }
 0x924   :  { %v2745_v16 = vmul.f32 0.0625, %v2708_v21  ;;  %v2779_v0 = vmul.f32 %v7206_v63, %v7206_v63 }
 0x925   :  { %v7214_v38 = vsub.f32 %v7086_v42, %v2746_v25  ;;  %v2812_v60 = vsel %vm74_vm0, %v2780_v58, 0.0 }
 0x926   :  { %v7218_v59 = vsub.f32 %v7091_v52, %v2745_v16  ;;  %v2717_v23 = vpop.xlane.xlu1 %2716  ;;  %2813 = vadd.xlane.f32.xlu1 %v2812_v60  ;;  %v2809_v41 = vsel %vm74_vm0, %v2779_v0, 0.0 }
 0x927   :  { %v2748_v17 = vmul.f32 0.0625, %v2717_v23  ;;  %v2714_v7 = vpop.xlane.xlu0 %2713  ;;  %2810 = vadd.xlane.f32.xlu0 %v2809_v41  ;;  %v2782_v13 = vmul.f32 %v7214_v38, %v7214_v38 }
 0x928   :  { %v2747_v12 = vmul.f32 0.0625, %v2714_v7  ;;  %v2781_v42 = vmul.f32 %v7218_v59, %v7218_v59 }
 0x929   :  { %v7226_v20 = vsub.f32 %v7102_v40, %v2748_v17  ;;  %v2818_v52 = vsel %vm74_vm0, %v2782_v13, 0.0 }
 0x92a   :  { %v7230_v8 = vsub.f32 %v7107_v57, %v2747_v12  ;;  %v2723_v10 = vpop.xlane.xlu1 %2722  ;;  %2819 = vadd.xlane.f32.xlu1 %v2818_v52  ;;  %v2815_v4 = vsel %vm74_vm0, %v2781_v42, 0.0 }
 0x92b   :  { %v2750_v45 = vmul.f32 0.0625, %v2723_v10  ;;  %v2720_v15 = vpop.xlane.xlu0 %2719  ;;  %2816 = vadd.xlane.f32.xlu0 %v2815_v4  ;;  %v2784_v51 = vmul.f32 %v7226_v20, %v7226_v20 }
 0x92c   :  { %v2749_v27 = vmul.f32 0.0625, %v2720_v15  ;;  %v2783_v40 = vmul.f32 %v7230_v8, %v7230_v8 }
 0x92d   :  { %v7238_v43 = vsub.f32 %v7118_v34, %v2750_v45  ;;  %v2824_v57 = vsel %vm74_vm0, %v2784_v51, 0.0 }
 0x92e   :  { %v7242_v55 = vsub.f32 %v7123_v47, %v2749_v27  ;;  %v2729_v2 = vpop.xlane.xlu1 %2728  ;;  %2825 = vadd.xlane.f32.xlu1 %v2824_v57  ;;  %v2821_v6 = vsel %vm74_vm0, %v2783_v40, 0.0  ;;  %v7278_v40 = vld [vmem:[%s8174_s10] ss:$0 sm:$0xff] }
 0x92f   :  { %v2752_v44 = vmul.f32 0.0625, %v2729_v2  ;;  %v2726_v36 = vpop.xlane.xlu0 %2725  ;;  %2822 = vadd.xlane.f32.xlu0 %v2821_v6  ;;  %v2786_v32 = vmul.f32 %v7238_v43, %v7238_v43 }
 0x930   :  { %v2751_v50 = vmul.f32 0.0625, %v2726_v36  ;;  %v2785_v34 = vmul.f32 %v7242_v55, %v7242_v55 }
 0x931   :  { %v7250_v30 = vsub.f32 %v7134_v62, %v2752_v44  ;;  %v2830_v47 = vsel %vm74_vm0, %v2786_v32, 0.0 }
 0x932   :  { %v7254_v61 = vsub.f32 %v7139_v9, %v2751_v50  ;;  %2831 = vadd.xlane.f32.xlu1 %v2830_v47  ;;  %v2735_v11 = vpop.xlane.xlu1 %2734  ;;  %v2827_v29 = vsel %vm74_vm0, %v2785_v34, 0.0  ;;  %v7285_v47 = vld [vmem:[%s8175_s11] ss:$0 sm:$0xff] }
 0x933   :  { %v2754_v48 = vmul.f32 0.0625, %v2735_v11  ;;  %2828 = vadd.xlane.f32.xlu0 %v2827_v29  ;;  %v2732_v22 = vpop.xlane.xlu0 %2731  ;;  %v2788_v14 = vmul.f32 %v7250_v30, %v7250_v30 }
 0x934   :  { %v2753_v1 = vmul.f32 0.0625, %v2732_v22  ;;  %v2787_v62 = vmul.f32 %v7254_v61, %v7254_v61 }
 0x935   :  { %v7262_v54 = vsub.f32 %v7150_v35, %v2754_v48  ;;  %v2836_v9 = vsel %vm74_vm0, %v2788_v14, 0.0 }
 0x936   :  { %v7266_v5 = vsub.f32 %v7155_v28, %v2753_v1  ;;  %2837 = vadd.xlane.f32.xlu1 %v2836_v9  ;;  %v2833_v46 = vsel %vm74_vm0, %v2787_v62, 0.0 }
 0x937   :  { %2834 = vadd.xlane.f32.xlu0 %v2833_v46  ;;  %v2790_v56 = vmul.f32 %v7262_v54, %v7262_v54 }
 0x938   :  { %v2789_v37 = vmul.f32 %v7266_v5, %v7266_v5 }
 0x939   :  { %v2842_v19 = vsel %vm74_vm0, %v2790_v56, 0.0 }
 0x93a   :  { %2843 = vadd.xlane.f32.xlu1 %v2842_v19  ;;  %v2839_v35 = vsel %vm74_vm0, %v2789_v37, 0.0 }
 0x93b   :  { %2840 = vadd.xlane.f32.xlu0 %v2839_v35 }
 0x9a7   :  { %v2796_v18 = vpop.xlane.xlu1 %2795 }
 0x9a8   :  { %v2846_v31 = vmul.f32 0.0625, %v2796_v18  ;;  %v2793_v28 = vpop.xlane.xlu0 %2792 }
 0x9a9   :  { %v2845_v25 = vmul.f32 0.0625, %v2793_v28 }
 0x9aa   :  { %v2864_v21 = vadd.f32 1e-05, %v2846_v31 }
 0x9ab   :  { %v2863_v58 = vadd.f32 1e-05, %v2845_v25  ;;  %v2802_v16 = vpop.xlane.xlu1 %2801 }
 0x9ac   :  { %5259 = vrsqrt.f32 %v2864_v21  ;;  %v2848_v0 = vmul.f32 0.0625, %v2802_v16  ;;  %v2799_v60 = vpop.xlane.xlu0 %2798 }
 0x9ad   :  { %5261 = vrsqrt.f32 %v2863_v58  ;;  %v2847_v23 = vmul.f32 0.0625, %v2799_v60 }
 0x9ae   :  { %v2866_v41 = vadd.f32 1e-05, %v2848_v0 }
 0x9af   :  { %v2865_v17 = vadd.f32 1e-05, %v2847_v23  ;;  %v2808_v7 = vpop.xlane.xlu1 %2807 }
 0x9b0   :  { %5263 = vrsqrt.f32 %v2866_v41  ;;  %v2850_v13 = vmul.f32 0.0625, %v2808_v7  ;;  %v2805_v12 = vpop.xlane.xlu0 %2804 }
 0x9b1   :  { %5265 = vrsqrt.f32 %v2865_v17  ;;  %v2849_v42 = vmul.f32 0.0625, %v2805_v12 }
 0x9b2   :  { %v2868_v52 = vadd.f32 1e-05, %v2850_v13 }
 0x9b3   :  { %v2867_v10 = vadd.f32 1e-05, %v2849_v42  ;;  %v2814_v4 = vpop.xlane.xlu1 %2813 }
 0x9b4   :  { %5267 = vrsqrt.f32 %v2868_v52  ;;  %v2852_v45 = vmul.f32 0.0625, %v2814_v4  ;;  %v2811_v15 = vpop.xlane.xlu0 %2810 }
 0x9b5   :  { %5269 = vrsqrt.f32 %v2867_v10  ;;  %v2851_v51 = vmul.f32 0.0625, %v2811_v15 }
 0x9b6   :  { %v5260_v27 = vpop.eup %5259  ;;  %v2870_v57 = vadd.f32 1e-05, %v2852_v45 }
 0x9b7   :  { %v5262_v2 = vpop.eup %5261  ;;  %v2900_v6 = vmul.f32 %v5260_v27, %v7168_v49  ;;  %v2869_v44 = vadd.f32 1e-05, %v2851_v51  ;;  %v2820_v36 = vpop.xlane.xlu1 %2819 }
 0x9b8   :  { %5271 = vrsqrt.f32 %v2870_v57  ;;  %v2854_v32 = vmul.f32 0.0625, %v2820_v36  ;;  %v2817_v50 = vpop.xlane.xlu0 %2816  ;;  %v2899_v34 = vmul.f32 %v5262_v2, %v7171_v53 }
 0x9b9   :  { %v2925_v11 = vmul.f32 %v7278_v40, %v2900_v6  ;;  %5273 = vrsqrt.f32 %v2869_v44  ;;  %v2853_v29 = vmul.f32 0.0625, %v2817_v50 }
 0x9ba   :  { %v5264_v48 = vpop.eup %5263  ;;  %v2872_v22 = vadd.f32 1e-05, %v2854_v32  ;;  %v2924_v49 = vmul.f32 %v7278_v40, %v2899_v34 }
 0x9bb   :  { %v5266_v14 = vpop.eup %5265  ;;  %v2871_v1 = vadd.f32 1e-05, %v2853_v29  ;;  %v2826_v62 = vpop.xlane.xlu1 %2825  ;;  %v2902_v9 = vmul.f32 %v5264_v48, %v7178_v33  ;;  %v7295_v19 = vadd.f32 %v7285_v47, %v2925_v11 }
 0x9bc   :  { %5275 = vrsqrt.f32 %v2872_v22  ;;  %v2856_v53 = vmul.f32 0.0625, %v2826_v62  ;;  %v2823_v46 = vpop.xlane.xlu0 %2822  ;;  %v7291_v56 = vadd.f32 %v7285_v47, %v2924_v49  ;;  %v2901_v37 = vmul.f32 %v5266_v14, %v7182_v3 }
 0x9bd   :  { %5277 = vrsqrt.f32 %v2871_v1  ;;  %v2855_v35 = vmul.f32 0.0625, %v2823_v46  ;;  %v2927_v18 = vmul.f32 %v7278_v40, %v2902_v9 }
 0x9be   :  { %v5268_v31 = vpop.eup %5267  ;;  %v2874_v28 = vadd.f32 1e-05, %v2856_v53  ;;  %4615 = vmatprep.mubr.msk.f32.mxu1 %vm74_vm0, %v7291_v56  ;;  %v2926_v33 = vmul.f32 %v7278_v40, %v2901_v37 }
 0x9bf   :  { %v5270_v25 = vpop.eup %5269  ;;  %v2873_v21 = vadd.f32 1e-05, %v2855_v35  ;;  %v2832_v58 = vpop.xlane.xlu1 %2831  ;;  %4616 = vmatmul.mubr.msk.f32.vlgmr.msra.gmra.mrb[64].mxu1 %vm74_vm0, %v7295_v19  ;;  %v2904_v3 = vmul.f32 %v5268_v31, %v7190_v24  ;;  %v7309_v17 = vadd.f32 %v7285_v47, %v2927_v18 }
 0x9c0   :  { %5279 = vrsqrt.f32 %v2874_v28  ;;  %v2858_v16 = vmul.f32 0.0625, %v2832_v58  ;;  %v2829_v0 = vpop.xlane.xlu0 %2828  ;;  %v7305_v60 = vadd.f32 %v7285_v47, %v2926_v33  ;;  %v2903_v23 = vmul.f32 %v5270_v25, %v7194_v39 }
 0x9c1   :  { %5281 = vrsqrt.f32 %v2873_v21  ;;  %v2857_v41 = vmul.f32 0.0625, %v2829_v0  ;;  %v2929_v7 = vmul.f32 %v7278_v40, %v2904_v3 }
 0x9c2   :  { %v5272_v13 = vpop.eup %5271  ;;  %v2876_v12 = vadd.f32 1e-05, %v2858_v16  ;;  %4618 = vmatprep.mubr.msk.f32.mxu1 %vm74_vm0, %v7305_v60  ;;  %v2928_v24 = vmul.f32 %v7278_v40, %v2903_v23 }
 0x9c3   :  { %v5274_v42 = vpop.eup %5273  ;;  %v2875_v52 = vadd.f32 1e-05, %v2857_v41  ;;  %v2838_v10 = vpop.xlane.xlu1 %2837  ;;  %4619 = vmatmul.mubr.msk.f32.gmra.mrb[66].mxu1 %vm74_vm0, %v7309_v17  ;;  %v2906_v39 = vmul.f32 %v5272_v13, %v7202_v26  ;;  %v7323_v57 = vadd.f32 %v7285_v47, %v2929_v7 }
 0x9c4   :  { %5283 = vrsqrt.f32 %v2876_v12  ;;  %v2860_v4 = vmul.f32 0.0625, %v2838_v10  ;;  %v2835_v45 = vpop.xlane.xlu0 %2834  ;;  %v7319_v15 = vadd.f32 %v7285_v47, %v2928_v24  ;;  %v2905_v51 = vmul.f32 %v5274_v42, %v7206_v63 }
 0x9c5   :  { %5285 = vrsqrt.f32 %v2875_v52  ;;  %v2859_v27 = vmul.f32 0.0625, %v2835_v45  ;;  %v2931_v2 = vmul.f32 %v7278_v40, %v2906_v39 }
 0x9c6   :  { %v5276_v6 = vpop.eup %5275  ;;  %v2878_v44 = vadd.f32 1e-05, %v2860_v4  ;;  %4621 = vmatprep.mubr.msk.f32.mxu1 %vm74_vm0, %v7319_v15  ;;  %v2930_v26 = vmul.f32 %v7278_v40, %v2905_v51  ;;  %v3674_v51 = vld [vmem:[%s8176_s8 + $0x18] sm:$0xff] }
 0x9c7   :  { %v5278_v36 = vpop.eup %5277  ;;  %v2877_v32 = vadd.f32 1e-05, %v2859_v27  ;;  %v2844_v50 = vpop.xlane.xlu1 %2843  ;;  %4622 = vmatmul.mubr.msk.f32.gmra.mrb[68].mxu1 %vm74_vm0, %v7323_v57  ;;  %v2908_v63 = vmul.f32 %v5276_v6, %v7214_v38  ;;  %v7337_v49 = vadd.f32 %v7285_v47, %v2931_v2  ;;  %v7426_v2 = vld [vmem:[%s8177_s7] ss:$0 sm:$0xff] }
 0x9c8   :  { %5287 = vrsqrt.f32 %v2878_v44  ;;  %v2862_v34 = vmul.f32 0.0625, %v2844_v50  ;;  %v2841_v11 = vpop.xlane.xlu0 %2840  ;;  %v7333_v29 = vadd.f32 %v7285_v47, %v2930_v26  ;;  %v2907_v48 = vmul.f32 %v5278_v36, %v7218_v59 }
 0x9c9   :  { %5289 = vrsqrt.f32 %v2877_v32  ;;  %v2861_v22 = vmul.f32 0.0625, %v2841_v11  ;;  %8272 = vst [vmem:[#allocation12_spill] sm:$0xff] %v7337_v49  ;;  %v2933_v14 = vmul.f32 %v7278_v40, %v2908_v63 }
 0x9ca   :  { %8271 = vst [vmem:[#allocation10_spill] sm:$0xff] %v7333_v29  ;;  %v5280_v1 = vpop.eup %5279  ;;  %v2880_v62 = vadd.f32 1e-05, %v2862_v34  ;;  %4624 = vmatprep.mubr.msk.f32.mxu1 %vm74_vm0, %v7333_v29  ;;  %v2932_v38 = vmul.f32 %v7278_v40, %v2907_v48 }
 0x9cb   :  { %v5282_v9 = vpop.eup %5281  ;;  %v2879_v53 = vadd.f32 1e-05, %v2861_v22  ;;  %4625 = vmatmul.mubr.msk.f32.gmra.mrb[70].mxu1 %vm74_vm0, %v7337_v49  ;;  %v2910_v59 = vmul.f32 %v5280_v1, %v7226_v20  ;;  %v7351_v35 = vadd.f32 %v7285_v47, %v2933_v14 }
 0x9cc   :  { %5291 = vrsqrt.f32 %v2880_v62  ;;  %v7347_v46 = vadd.f32 %v7285_v47, %v2932_v38  ;;  %v2909_v37 = vmul.f32 %v5282_v9, %v7230_v8 }
 0x9cd   :  { %5293 = vrsqrt.f32 %v2879_v53  ;;  %8274 = vst [vmem:[#allocation15_spill] sm:$0xff] %v7351_v35  ;;  %v2935_v18 = vmul.f32 %v7278_v40, %v2910_v59 }
 0x9ce   :  { %8273 = vst [vmem:[#allocation14_spill] sm:$0xff] %v7347_v46  ;;  %v5284_v31 = vpop.eup %5283  ;;  %4627 = vmatprep.mubr.msk.f32.mxu1 %vm74_vm0, %v7347_v46  ;;  %v2934_v28 = vmul.f32 %v7278_v40, %v2909_v37 }
 0x9cf   :  { %v5286_v33 = vpop.eup %5285  ;;  %4628 = vmatmul.mubr.msk.f32.gmra.mrb[72].mxu1 %vm74_vm0, %v7351_v35  ;;  %v2912_v20 = vmul.f32 %v5284_v31, %v7238_v43  ;;  %v7365_v21 = vadd.f32 %v7285_v47, %v2935_v18 }
 0x9d0   :  { %v7361_v8 = vadd.f32 %v7285_v47, %v2934_v28  ;;  %v2911_v25 = vmul.f32 %v5286_v33, %v7242_v55 }
 0x9d1   :  { %8276 = vst [vmem:[#allocation17_spill] sm:$0xff] %v7365_v21  ;;  %v2937_v58 = vmul.f32 %v7278_v40, %v2912_v20 }
 0x9d2   :  { %8275 = vst [vmem:[#allocation16_spill] sm:$0xff] %v7361_v8  ;;  %v5288_v3 = vpop.eup %5287  ;;  %4630 = vmatprep.mubr.msk.f32.mxu1 %vm74_vm0, %v7361_v8  ;;  %v2936_v16 = vmul.f32 %v7278_v40, %v2911_v25 }
 0x9d3   :  { %v5290_v0 = vpop.eup %5289  ;;  %4631 = vmatmul.mubr.msk.f32.gmra.mrb[74].mxu1 %vm74_vm0, %v7365_v21  ;;  %v2914_v43 = vmul.f32 %v5288_v3, %v7250_v30  ;;  %v7379_v41 = vadd.f32 %v7285_v47, %v2937_v58 }
 0x9d4   :  { %v7375_v23 = vadd.f32 %v7285_v47, %v2936_v16  ;;  %v2913_v55 = vmul.f32 %v5290_v0, %v7254_v61 }
 0x9d5   :  { %8278 = vst [vmem:[#allocation9_spill] sm:$0xff] %v7379_v41  ;;  %v2939_v7 = vmul.f32 %v7278_v40, %v2914_v43 }
 0x9d6   :  { %8277 = vst [vmem:[#allocation7_spill] sm:$0xff] %v7375_v23  ;;  %v5292_v13 = vpop.eup %5291  ;;  %4633 = vmatprep.mubr.msk.f32.mxu1 %vm74_vm0, %v7375_v23  ;;  %v2938_v12 = vmul.f32 %v7278_v40, %v2913_v55 }
 0x9d7   :  { %v5294_v24 = vpop.eup %5293  ;;  %4634 = vmatmul.mubr.msk.f32.gmra.mrb[76].mxu1 %vm74_vm0, %v7379_v41  ;;  %v2916_v30 = vmul.f32 %v5292_v13, %v7262_v54  ;;  %v7393_v52 = vadd.f32 %v7285_v47, %v2939_v7 }
 0x9d8   :  { %v7389_v42 = vadd.f32 %v7285_v47, %v2938_v12  ;;  %v2915_v61 = vmul.f32 %v5294_v24, %v7266_v5  ;;  %v3671_v5 = vld [vmem:[%s8176_s8] sm:$0xff] }
 0x9d9   :  { %8280 = vst [vmem:[#allocation4_spill] sm:$0xff] %v7393_v52  ;;  %v2941_v10 = vmul.f32 %v7278_v40, %v2916_v30 }
 0x9da   :  { %8279 = vst [vmem:[#allocation11_spill] sm:$0xff] %v7389_v42  ;;  %4636 = vmatprep.mubr.msk.f32.mxu1 %vm74_vm0, %v7389_v42  ;;  %v2940_v39 = vmul.f32 %v7278_v40, %v2915_v61  ;;  %v3672_v40 = vld [vmem:[%s8176_s8 + $0x8] sm:$0xff] }
 0x9db   :  { %4637 = vmatmul.mubr.msk.f32.gmra.mrb[78].mxu1 %vm74_vm0, %v7393_v52  ;;  %v7405_v4 = vadd.f32 %v7285_v47, %v2941_v10  ;;  %v4811_v45 = vpack.c.bf16 %v3672_v40, %v3671_v5  ;;  %v8206_v5 = vmov -1.0  }
 0x9dc   :  { %v7402_v54 = vadd.f32 %v7285_v47, %v2940_v39  ;;  %v3673_v47 = vld [vmem:[%s8176_s8 + $0x10] sm:$0xff] }
 0x9dd   :  { %8282 = vst [vmem:[#allocation18_spill] sm:$0xff] %v7405_v4  ;;  %4812 = vmatprep.subr.bf16.mxu1 %v4811_v45  ;;  %v4815_v27 = vpack.c.bf16 %v3674_v51, %v3673_v47 }
 0x9de   :  { %8281 = vst [vmem:[#allocation13_spill] sm:$0xff] %v7402_v54  ;;  %4639 = vmatprep.mubr.msk.f32.mxu1 %vm74_vm0, %v7402_v54  ;;  %4814 = vmatpush3.bf16.msra.mxu1 %v4811_v45 }
 0x9df   :  { %4640 = vmatmul.mubr.msk.f32.gmra.mrb[80].mxu1 %vm74_vm0, %v7405_v4  ;;  %4816 = vmatprep.subr.bf16.mxu1 %v4815_v27 }
 0x9e2   :  { %4818 = vmatpush3.bf16.msra.mxu1 %v4815_v27 }
 0xa92   :  { %v4617_v6 = vpop.f32.mrb[64].mxu1 }
 0xa93   :  { %v3102_v44 = vadd.f32 %v4617_v6, %v7426_v2  ;;  %v3096_v26 = vpop.f32.mrb[65].mxu1 }
 0xa94   :  { %v3097_v36 = vadd.f32 %v7426_v2, %v3096_v26 }
 0xa95   :  { %v3204_v32 = vmul.f32 0.70710677, %v3102_v44  ;;  %v7437_v25 = vmul.f32 0.5, %v3102_v44 }
 0xa96   :  { %v3203_v50 = vmul.f32 0.70710677, %v3097_v36  ;;  %v4620_v63 = vpop.f32.mrb[66].mxu1  ;;  %v7443_v43 = vmul.f32 0.5, %v3097_v36 }
 0xa97   :  { %v3258_v34 = vand.u32 2147483647, %v3204_v32  ;;  %v3112_v11 = vadd.f32 %v4620_v63, %v7426_v2  ;;  %v3106_v48 = vpop.f32.mrb[67].mxu1  ;;  %vm3222_vm3 = vcmp.ge.f32.partialorder %v3204_v32, 0.0 }
 0xa98   :  { %v3257_v22 = vand.u32 2147483647, %v3203_v50  ;;  %v3107_v14 = vadd.f32 %v7426_v2, %v3106_v48  ;;  %vm3221_vm4 = vcmp.ge.f32.partialorder %v3203_v50, 0.0  ;;  %v7457_v40 = vsel %vm3222_vm3, 1.0, %v8206_v5 }
 0xa99   :  { %v3276_v1 = vmul.f32 0.3275911, %v3258_v34  ;;  %v7432_v38 = vmul.f32 0.70710677, %v3112_v11  ;;  %v3510_v28 = vsub.f32 0.0, %v3258_v34  ;;  %v7463_v6 = vsel %vm3221_vm4, 1.0, %v8206_v5 }
 0xa9a   :  { %v3275_v62 = vmul.f32 0.3275911, %v3257_v22  ;;  %v7434_v53 = vmul.f32 0.70710677, %v3107_v14  ;;  %v4623_v59 = vpop.f32.mrb[68].mxu1  ;;  %v3509_v58 = vsub.f32 0.0, %v3257_v22 }
 0xa9b   :  { %v3294_v9 = vadd.f32 1.0, %v3276_v1  ;;  %v3260_v18 = vand.u32 2147483647, %v7432_v38  ;;  %v3116_v31 = vpop.f32.mrb[69].mxu1  ;;  %v7441_v16 = vadd.f32 %v4623_v59, %v7426_v2  ;;  %v3528_v30 = vmul.f32 %v3510_v28, %v3258_v34 }
 0xa9c   :  { %v3293_v37 = vadd.f32 1.0, %v3275_v62  ;;  %v3259_v3 = vand.u32 2147483647, %v7434_v53  ;;  %v7446_v7 = vadd.f32 %v7426_v2, %v3116_v31  ;;  %v3527_v45 = vmul.f32 %v3509_v58, %v3257_v22 }
 0xa9d   :  { %5295 = vrcp.f32 %v3294_v9  ;;  %v3278_v33 = vmul.f32 0.3275911, %v3260_v18  ;;  %v3512_v13 = vsub.f32 0.0, %v3260_v18  ;;  %v7449_v24 = vmul.f32 0.70710677, %v7441_v16 }
 0xa9e   :  { %5297 = vrcp.f32 %v3293_v37  ;;  %v4626_v20 = vpop.f32.mrb[70].mxu1  ;;  %v3277_v12 = vmul.f32 0.3275911, %v3259_v3  ;;  %v3511_v61 = vsub.f32 0.0, %v3259_v3  ;;  %v7452_v10 = vmul.f32 0.70710677, %v7446_v7 }
 0xa9f   :  { %v3126_v0 = vpop.f32.mrb[71].mxu1  ;;  %v3296_v55 = vadd.f32 1.0, %v3278_v33  ;;  %v3262_v51 = vand.u32 2147483647, %v7449_v24  ;;  %v7465_v44 = vmul.f32 0.5, %v3112_v11  ;;  %v7467_v26 = vmul.f32 0.5, %v3107_v14 }
 0xaa0   :  { %v3295_v47 = vadd.f32 1.0, %v3277_v12  ;;  %v3261_v36 = vand.u32 2147483647, %v7452_v10  ;;  %v3530_v32 = vmul.f32 %v3512_v13, %v3260_v18  ;;  %v3547_v34 = vmul.f32 1.442695, %v3528_v30 }
 0xaa1   :  { %5299 = vrcp.f32 %v3296_v55  ;;  %v3280_v50 = vmul.f32 0.3275911, %v3262_v51  ;;  %v3514_v63 = vsub.f32 0.0, %v3262_v51  ;;  %v3529_v48 = vmul.f32 %v3511_v61, %v3259_v3 }
 0xaa2   :  { %v7454_v39 = vpop.f32.mrb[72].mxu1  ;;  %5301 = vrcp.f32 %v3295_v47  ;;  %v3279_v22 = vmul.f32 0.3275911, %v3261_v36  ;;  %v7471_v1 = vadd.f32 %v4626_v20, %v7426_v2  ;;  %v3545_v11 = vmul.f32 1.442695, %v3527_v45 }
 0xaa3   :  { %v7460_v27 = vpop.f32.mrb[73].mxu1  ;;  %vm3224_vm5 = vcmp.ge.f32.partialorder %v7432_v38, 0.0  ;;  %v3298_v14 = vadd.f32 1.0, %v3280_v50  ;;  %v3513_v59 = vsub.f32 0.0, %v3261_v36  ;;  %v3532_v28 = vmul.f32 %v3514_v63, %v3262_v51 }
 0xaa4   :  { %v3297_v33 = vadd.f32 1.0, %v3279_v22  ;;  %v7484_v20 = vadd.f32 %v7426_v2, %v3126_v0  ;;  %v3551_v3 = vmul.f32 1.442695, %v3530_v32  ;;  %v7488_v55 = vmul.f32 0.70710677, %v7471_v1 }
 0xaa5   :  { %5303 = vrcp.f32 %v3298_v14  ;;  %v7491_v13 = vsel %vm3224_vm5, 1.0, %v8206_v5  ;;  %v3549_v12 = vmul.f32 1.442695, %v3529_v48  ;;  %vm3223_vm6 = vcmp.ge.f32.partialorder %v7434_v53, 0.0 }
 0xaa6   :  { %v7473_v62 = vpop.f32.mrb[74].mxu1  ;;  %5305 = vrcp.f32 %v3297_v33  ;;  %v3264_v0 = vand.u32 2147483647, %v7488_v55  ;;  %v3555_v32 = vmul.f32 1.442695, %v3532_v28  ;;  %v3531_v50 = vmul.f32 %v3513_v59, %v3261_v36 }
 0xaa7   :  { %v7475_v9 = vpop.eup %5295  ;;  %v7478_v37 = vpop.f32.mrb[75].mxu1  ;;  %v7503_v63 = vmul.f32 0.70710677, %v7484_v20  ;;  %5307 = vpow2.f32 %v3547_v34  ;;  %v7508_v33 = vsel %vm3223_vm6, 1.0, %v8206_v5  ;;  %vm3226_vm8 = vcmp.ge.f32.partialorder %v7449_v24, 0.0 }
 0xaa8   :  { %v7480_v18 = vpop.eup %5297  ;;  %v3348_v31 = vmul.f32 1.0614054, %v7475_v9  ;;  %v3282_v14 = vmul.f32 0.3275911, %v3264_v0  ;;  %5309 = vpow2.f32 %v3545_v11  ;;  %v3553_v34 = vmul.f32 1.442695, %v3531_v50 }
 0xaa9   :  { %v3347_v58 = vmul.f32 1.0614054, %v7480_v18  ;;  %vm3225_vm9 = vcmp.ge.f32.partialorder %v7452_v10, 0.0  ;;  %vm3228_vm10 = vcmp.ge.f32.partialorder %v7488_v55, 0.0  ;;  %vm3227_vm11 = vcmp.ge.f32.partialorder %v7503_v63, 0.0 }
 0xaaa   :  { %v3366_v38 = vadd.f32 -1.4531521, %v3348_v31  ;;  %v7493_v30 = vpop.f32.mrb[76].mxu1  ;;  %v3516_v31 = vsub.f32 0.0, %v3264_v0 }
 0xaab   :  { %v3365_v61 = vadd.f32 -1.4531521, %v3347_v58  ;;  %v7497_v45 = vpop.f32.mrb[77].mxu1  ;;  %v7499_v47 = vpop.eup %5299  ;;  %v3263_v58 = vand.u32 2147483647, %v7503_v63 }
 0xaac   :  { %v3384_v51 = vmul.f32 %v7475_v9, %v3366_v38  ;;  %v3350_v22 = vmul.f32 1.0614054, %v7499_v47  ;;  %v7513_v28 = vpop.eup %5301  ;;  %v3300_v38 = vadd.f32 1.0, %v3282_v14  ;;  %v3534_v23 = vmul.f32 %v3516_v31, %v3264_v0 }
 0xaad   :  { %v3383_v48 = vmul.f32 %v7480_v18, %v3365_v61  ;;  %v3281_v42 = vmul.f32 0.3275911, %v3263_v58 }
 0xaae   :  { %v3402_v53 = vadd.f32 1.4214138, %v3384_v51  ;;  %v7511_v54 = vpop.f32.mrb[78].mxu1  ;;  %v3368_v59 = vadd.f32 -1.4531521, %v3350_v22  ;;  %5311 = vrcp.f32 %v3300_v38 }
 0xaaf   :  { %v3401_v36 = vadd.f32 1.4214138, %v3383_v48  ;;  %v7515_v61 = vpop.f32.mrb[79].mxu1  ;;  %v3349_v51 = vmul.f32 1.0614054, %v7513_v28  ;;  %5313 = vpow2.f32 %v3551_v3  ;;  %v3299_v11 = vadd.f32 1.0, %v3281_v42  ;;  %v7521_v22 = vpop.eup %5303 }
 0xab0   :  { %v3420_v4 = vmul.f32 %v7475_v9, %v3402_v53  ;;  %v3386_v52 = vmul.f32 %v7499_v47, %v3368_v59  ;;  %5315 = vpow2.f32 %v3549_v12  ;;  %v3515_v53 = vsub.f32 0.0, %v3263_v58  ;;  %v7525_v50 = vpop.eup %5305 }
 0xab1   :  { %v3419_v5 = vmul.f32 %v7480_v18, %v3401_v36  ;;  %v3367_v48 = vadd.f32 -1.4531521, %v3349_v51  ;;  %v3352_v0 = vmul.f32 1.0614054, %v7521_v22  ;;  %5317 = vrcp.f32 %v3299_v11  ;;  %v5308_v35 = vpop.eup %5307 }
 0xab2   :  { %v3438_v41 = vadd.f32 -0.28449672, %v3420_v4  ;;  %v3404_v8 = vadd.f32 1.4214138, %v3386_v52  ;;  %v7523_v21 = vpop.f32.mrb[80].mxu1  ;;  %5319 = vpow2.f32 %v3555_v32  ;;  %v7543_v32 = vadd.f32 %v7454_v39, %v7426_v2 }
 0xab3   :  { %v3437_v14 = vadd.f32 -0.28449672, %v3419_v5  ;;  %v3385_v59 = vmul.f32 %v7513_v28, %v3367_v48  ;;  %v7530_v4 = vpop.f32.mrb[81].mxu1  ;;  %v3351_v52 = vmul.f32 1.0614054, %v7525_v50  ;;  %v3533_v48 = vmul.f32 %v3515_v53, %v3263_v58 }
 0xab4   :  { %v3456_v36 = vmul.f32 %v7475_v9, %v3438_v41  ;;  %v3422_v5 = vmul.f32 %v7499_v47, %v3404_v8  ;;  %v3559_v3 = vmul.f32 1.442695, %v3534_v23  ;;  %v3370_v38 = vadd.f32 -1.4531521, %v3352_v0  ;;  %v5310_v8 = vpop.eup %5309 }
 0xab5   :  { %v3455_v42 = vmul.f32 %v7480_v18, %v3437_v14  ;;  %v3403_v31 = vadd.f32 1.4214138, %v3385_v59  ;;  %v3369_v46 = vadd.f32 -1.4531521, %v3351_v52  ;;  %5321 = vpow2.f32 %v3553_v34 }
 0xab6   :  { %v3474_v12 = vadd.f32 0.2548296, %v3456_v36  ;;  %v3440_v41 = vadd.f32 -0.28449672, %v3422_v5  ;;  %v3388_v14 = vmul.f32 %v7521_v22, %v3370_v38  ;;  %5323 = vpow2.f32 %v3559_v3 }
 0xab7   :  { %v3473_v51 = vadd.f32 0.2548296, %v3455_v42  ;;  %v3421_v29 = vmul.f32 %v7513_v28, %v3403_v31  ;;  %v3387_v36 = vmul.f32 %v7525_v50, %v3369_v46  ;;  %v3557_v5 = vmul.f32 1.442695, %v3533_v48 }
 0xab8   :  { %v3492_v11 = vmul.f32 %v7475_v9, %v3474_v12  ;;  %v3458_v23 = vmul.f32 %v7499_v47, %v3440_v41  ;;  %v3406_v59 = vadd.f32 1.4214138, %v3388_v14  ;;  %v7545_v9 = vpop.eup %5311 }
 0xab9   :  { %v3491_v49 = vmul.f32 %v7480_v18, %v3473_v51  ;;  %v3439_v53 = vadd.f32 -0.28449672, %v3421_v29  ;;  %v3405_v42 = vadd.f32 1.4214138, %v3387_v36  ;;  %v5314_v18 = vpop.eup %5313  ;;  %5325 = vpow2.f32 %v3557_v5 }
 0xaba   :  { %v3582_v58 = vmul.f32 %v5308_v35, %v3492_v11  ;;  %v3476_v34 = vadd.f32 0.2548296, %v3458_v23  ;;  %v3424_v46 = vmul.f32 %v7521_v22, %v3406_v59  ;;  %v3354_v35 = vmul.f32 1.0614054, %v7545_v9  ;;  %v5316_v29 = vpop.eup %5315 }
 0xabb   :  { %v3581_v0 = vmul.f32 %v5310_v8, %v3491_v49  ;;  %v3457_v12 = vmul.f32 %v7513_v28, %v3439_v53  ;;  %v3423_v31 = vmul.f32 %v7525_v50, %v3405_v42  ;;  %v7554_v49 = vmul.f32 0.70710677, %v7543_v32  ;;  %v7556_v38 = vpop.eup %5317 }
 0xabc   :  { %v3600_v52 = vsub.f32 1.0, %v3582_v58  ;;  %v3494_v3 = vmul.f32 %v7499_v47, %v3476_v34  ;;  %v3442_v48 = vadd.f32 -0.28449672, %v3424_v46  ;;  %v3372_v11 = vadd.f32 -1.4531521, %v3354_v35  ;;  %v5320_v36 = vpop.eup %5319 }
 0xabd   :  { %v3599_v39 = vsub.f32 1.0, %v3581_v0  ;;  %v3475_v41 = vadd.f32 0.2548296, %v3457_v12  ;;  %v3441_v23 = vadd.f32 -0.28449672, %v3423_v31  ;;  %vm3230_vm12 = vcmp.ge.f32.partialorder %v7554_v49, 0.0 }
 0xabe   :  { %v3618_v51 = vmul.f32 %v3600_v52, %v7457_v40  ;;  %v3584_v8 = vmul.f32 %v5314_v18, %v3494_v3  ;;  %v3353_v47 = vmul.f32 1.0614054, %v7556_v38  ;;  %v3460_v59 = vmul.f32 %v7521_v22, %v3442_v48 }
 0xabf   :  { %v3617_v14 = vmul.f32 %v3599_v39, %v7463_v6  ;;  %v3493_v53 = vmul.f32 %v7513_v28, %v3475_v41  ;;  %v3390_v0 = vmul.f32 %v7545_v9, %v3372_v11  ;;  %v3459_v42 = vmul.f32 %v7525_v50, %v3441_v23  ;;  %v5322_v12 = vpop.eup %5321 }
 0xac0   :  { %v3636_v58 = vadd.f32 1.0, %v3618_v51  ;;  %v3602_v34 = vsub.f32 1.0, %v3584_v8  ;;  %v3371_v52 = vadd.f32 -1.4531521, %v3353_v47  ;;  %v3478_v46 = vadd.f32 0.2548296, %v3460_v59  ;;  %v5324_v51 = vpop.eup %5323 }
 0xac1   :  { %v3635_v40 = vadd.f32 1.0, %v3617_v14  ;;  %v3583_v18 = vmul.f32 %v5316_v29, %v3493_v53  ;;  %v3408_v35 = vadd.f32 1.4214138, %v3390_v0  ;;  %v3477_v28 = vadd.f32 0.2548296, %v3459_v42 }
 0xac2   :  { %v3654_v6 = vmul.f32 %v3636_v58, %v7437_v25  ;;  %v3620_v3 = vmul.f32 %v3602_v34, %v7491_v13  ;;  %v3389_v31 = vmul.f32 %v7556_v38, %v3371_v52  ;;  %v3496_v48 = vmul.f32 %v7521_v22, %v3478_v46 }
 0xac3   :  { %v3653_v39 = vmul.f32 %v3635_v40, %v7443_v43  ;;  %v3601_v41 = vsub.f32 1.0, %v3583_v18  ;;  %v3426_v11 = vmul.f32 %v7545_v9, %v3408_v35  ;;  %v3266_v14 = vand.u32 2147483647, %v7554_v49 }
 0xac4   :  { %v3495_v25 = vmul.f32 %v7525_v50, %v3477_v28  ;;  %v3407_v29 = vadd.f32 1.4214138, %v3389_v31  ;;  %v7576_v43 = vadd.f32 %v7426_v2, %v7460_v27  ;;  %v3586_v8 = vmul.f32 %v5320_v36, %v3496_v48 }
 0xac5   :  { %4650 = vmatprep.mubr.msk.f32.mxu1 %vm3682_vm7, %v3653_v39  ;;  %v3619_v13 = vmul.f32 %v3601_v41, %v7508_v33  ;;  %v3444_v23 = vadd.f32 -0.28449672, %v3426_v11  ;;  %v3284_v47 = vmul.f32 0.3275911, %v3266_v14  ;;  %v3638_v22 = vadd.f32 1.0, %v3620_v3  ;;  %v5326_v11 = vpop.eup %5325 }
 0xac6   :  { %4651 = vmatmul.mubr.msk.f32.vlgmr.msra.gmra.mrb[82].mxu1 %vm3682_vm7, %v3654_v6  ;;  %v8283_v58 = vmov -1.0   ;;  %v3585_v53 = vmul.f32 %v5322_v12, %v3495_v25  ;;  %v3425_v5 = vmul.f32 %v7556_v38, %v3407_v29  ;;  %v3604_v27 = vsub.f32 1.0, %v3586_v8 }
 0xac7   :  { %v3244_v50 = vsel %vm3226_vm8, 1.0, %v8283_v58  ;;  %v3637_v59 = vadd.f32 1.0, %v3619_v13  ;;  %v3462_v0 = vmul.f32 %v7545_v9, %v3444_v23  ;;  %v3302_v40 = vadd.f32 1.0, %v3284_v47 }
 0xac8   :  { %v3243_v33 = vsel %vm3225_vm9, 1.0, %v8283_v58  ;;  %v3603_v36 = vsub.f32 1.0, %v3585_v53  ;;  %v3443_v34 = vadd.f32 -0.28449672, %v3425_v5  ;;  %v7590_v42 = vmul.f32 0.70710677, %v7576_v43 }
 0xac9   :  { %v3655_v24 = vmul.f32 %v3637_v59, %v7467_v26  ;;  %v3622_v52 = vmul.f32 %v3604_v27, %v3244_v50  ;;  %v3480_v12 = vadd.f32 0.2548296, %v3462_v0  ;;  %5327 = vrcp.f32 %v3302_v40 }
 0xaca   :  { %v3656_v6 = vmul.f32 %v3638_v22, %v7465_v44  ;;  %v3621_v18 = vmul.f32 %v3603_v36, %v3243_v33  ;;  %v3461_v46 = vmul.f32 %v7556_v38, %v3443_v34  ;;  %v7597_v35 = vadd.f32 %v7473_v62, %v7426_v2 }
 0xacb   :  { %v3640_v10 = vadd.f32 1.0, %v3622_v52  ;;  %v3498_v39 = vmul.f32 %v7545_v9, %v3480_v12  ;;  %v3265_v3 = vand.u32 2147483647, %v7590_v42  ;;  %4653 = vmatprep.mubr.msk.f32.mxu1 %vm3682_vm7, %v3655_v24  ;;  %v3189_v26 = vmul.f32 0.5, %v7446_v7 }
 0xacc   :  { %v3639_v28 = vadd.f32 1.0, %v3621_v18  ;;  %v3479_v44 = vadd.f32 0.2548296, %v3461_v46  ;;  %4654 = vmatmul.mubr.msk.f32.gmra.mrb[84].mxu1 %vm3682_vm7, %v3656_v6  ;;  %v3190_v31 = vmul.f32 0.5, %v7441_v16  ;;  %v3518_v62 = vsub.f32 0.0, %v3266_v14 }
 0xacd   :  { %v3588_v41 = vmul.f32 %v5324_v51, %v3498_v39  ;;  %v3283_v48 = vmul.f32 0.3275911, %v3265_v3  ;;  %v7608_v29 = vmul.f32 0.70710677, %v7597_v35  ;;  %v7612_v7 = vadd.f32 %v7426_v2, %v7478_v37 }
 0xace   :  { %v3657_v25 = vmul.f32 %v3639_v28, %v3189_v26  ;;  %v3497_v9 = vmul.f32 %v7556_v38, %v3479_v44  ;;  %v3658_v55 = vmul.f32 %v3640_v10, %v3190_v31  ;;  %v3246_v13 = vsel %vm3228_vm10, 1.0, %v8283_v58 }
 0xacf   :  { %v3606_v8 = vsub.f32 1.0, %v3588_v41  ;;  %v3301_v23 = vadd.f32 1.0, %v3283_v48  ;;  %v3268_v51 = vand.u32 2147483647, %v7608_v29  ;;  %v7619_v38 = vadd.f32 %v7493_v30, %v7426_v2 }
 0xad0   :  { %v3587_v16 = vmul.f32 %v5326_v11, %v3497_v9  ;;  %4656 = vmatprep.mubr.msk.f32.mxu1 %vm3682_vm7, %v3657_v25  ;;  %v3536_v22 = vmul.f32 %v3518_v62, %v3266_v14  ;;  %v7624_v53 = vmul.f32 0.70710677, %v7612_v7  ;;  %v3245_v5 = vsel %vm3227_vm11, 1.0, %v8283_v58 }
 0xad1   :  { %v3624_v47 = vmul.f32 %v3606_v8, %v3246_v13  ;;  %5329 = vrcp.f32 %v3301_v23  ;;  %4657 = vmatmul.mubr.msk.f32.gmra.mrb[86].mxu1 %vm3682_vm7, %v3658_v55  ;;  %v3286_v50 = vmul.f32 0.3275911, %v3268_v51  ;;  %v3517_v59 = vsub.f32 0.0, %v3265_v3 }
 0xad2   :  { %v3605_v37 = vsub.f32 1.0, %v3587_v16  ;;  %v7631_v40 = vmul.f32 0.70710677, %v7619_v38  ;;  %v3191_v36 = vmul.f32 0.5, %v7484_v20  ;;  %v3267_v14 = vand.u32 2147483647, %v7624_v53 }
 0xad3   :  { %v7626_v63 = vpop.eup %5327  ;;  %v3304_v0 = vadd.f32 1.0, %v3286_v50  ;;  %v3642_v33 = vadd.f32 1.0, %v3624_v47  ;;  %v3563_v52 = vmul.f32 1.442695, %v3536_v22  ;;  %v3192_v12 = vmul.f32 0.5, %v7471_v1 }
 0xad4   :  { %v3623_v27 = vmul.f32 %v3605_v37, %v3245_v5  ;;  %v3356_v30 = vmul.f32 1.0614054, %v7626_v63  ;;  %v3285_v6 = vmul.f32 0.3275911, %v3267_v14  ;;  %v3535_v10 = vmul.f32 %v3517_v59, %v3265_v3 }
 0xad5   :  { %5331 = vrcp.f32 %v3304_v0  ;;  %v7638_v39 = vand.u32 2147483647, %v7631_v40  ;;  %v3660_v26 = vmul.f32 %v3642_v33, %v3192_v12  ;;  %v3520_v28 = vsub.f32 0.0, %v3268_v51 }
 0xad6   :  { %v3641_v34 = vadd.f32 1.0, %v3623_v27  ;;  %v3374_v24 = vadd.f32 -1.4531521, %v3356_v30  ;;  %v3303_v44 = vadd.f32 1.0, %v3285_v6  ;;  %v7642_v20 = vadd.f32 %v7426_v2, %v7497_v45 }
 0xad7   :  { %5333 = vpow2.f32 %v3563_v52  ;;  %v3288_v41 = vmul.f32 0.3275911, %v7638_v39  ;;  %v7649_v3 = vmul.f32 0.5, %v7543_v32  ;;  %v7656_v48 = vadd.f32 %v7511_v54, %v7426_v2 }
 0xad8   :  { %v3659_v18 = vmul.f32 %v3641_v34, %v3191_v36  ;;  %v3392_v46 = vmul.f32 %v7626_v63, %v3374_v24  ;;  %5335 = vrcp.f32 %v3303_v44  ;;  %v7652_v62 = vmul.f32 0.70710677, %v7642_v20 }
 0xad9   :  { %v3306_v25 = vadd.f32 1.0, %v3288_v41  ;;  %vm3229_vm13 = vcmp.ge.f32.partialorder %v7590_v42, 0.0  ;;  %v3561_v32 = vmul.f32 1.442695, %v3535_v10  ;;  %v3538_v9 = vmul.f32 %v3520_v28, %v3268_v51 }
 0xada   :  { %v3410_v31 = vadd.f32 1.4214138, %v3392_v46  ;;  %4659 = vmatprep.mubr.msk.f32.mxu1 %vm3682_vm7, %v3659_v18  ;;  %v3269_v55 = vand.u32 2147483647, %v7652_v62  ;;  %v3519_v23 = vsub.f32 0.0, %v3267_v14  ;;  %v3248_v54 = vsel %vm3230_vm12, 1.0, %v8283_v58 }
 0xadb   :  { %v7646_v1 = vpop.eup %5329  ;;  %4660 = vmatmul.mubr.msk.f32.gmra.mrb[88].mxu1 %vm3682_vm7, %v3660_v26  ;;  %5337 = vrcp.f32 %v3306_v25  ;;  %v7666_v16 = vmul.f32 0.5, %v7576_v43  ;;  %v7669_v47 = vmul.f32 0.70710677, %v7656_v48  ;;  %v7675_v51 = vsel %vm3229_vm13, 1.0, %v8283_v58 }
 0xadc   :  { %v3428_v45 = vmul.f32 %v7626_v63, %v3410_v31  ;;  %v3355_v11 = vmul.f32 1.0614054, %v7646_v1  ;;  %v3287_v49 = vmul.f32 0.3275911, %v3269_v55  ;;  %v7680_v50 = vadd.f32 %v7426_v2, %v7515_v61 }
 0xadd   :  { %5339 = vpow2.f32 %v3561_v32  ;;  %vm3232_vm14 = vcmp.ge.f32.partialorder %v7608_v29, 0.0  ;;  %v3567_v30 = vmul.f32 1.442695, %v3538_v9  ;;  %v3537_v0 = vmul.f32 %v3519_v23, %v3267_v14 }
 0xade   :  { %v3446_v13 = vadd.f32 -0.28449672, %v3428_v45  ;;  %v3373_v8 = vadd.f32 -1.4531521, %v3355_v11  ;;  %v3305_v5 = vadd.f32 1.0, %v3287_v49  ;;  %v3522_v36 = vsub.f32 0.0, %v7638_v39 }
 0xadf   :  { %v7671_v37 = vpop.eup %5331  ;;  %v3272_v34 = vand.u32 2147483647, %v7669_v47  ;;  %v3521_v12 = vsub.f32 0.0, %v3269_v55  ;;  %v7689_v6 = vmul.f32 0.70710677, %v7680_v50  ;;  %v7694_v46 = vmul.f32 0.5, %v7597_v35 }
 0xae0   :  { %v3464_v42 = vmul.f32 %v7626_v63, %v3446_v13  ;;  %v3391_v22 = vmul.f32 %v7646_v1, %v3373_v8  ;;  %v3358_v43 = vmul.f32 1.0614054, %v7671_v37  ;;  %5341 = vrcp.f32 %v3305_v5 }
 0xae1   :  { %v5334_v24 = vpop.eup %5333  ;;  %v7699_v14 = vsel %vm3232_vm14, 1.0, %v8283_v58  ;;  %v3290_v26 = vmul.f32 0.3275911, %v3272_v34  ;;  %5343 = vpow2.f32 %v3567_v30  ;;  %v3565_v41 = vmul.f32 1.442695, %v3537_v0 }
 0xae2   :  { %v3482_v59 = vadd.f32 0.2548296, %v3464_v42  ;;  %v3409_v27 = vadd.f32 1.4214138, %v3391_v22  ;;  %v3376_v33 = vadd.f32 -1.4531521, %v3358_v43  ;;  %v7691_v18 = vpop.eup %5335  ;;  %v3540_v45 = vmul.f32 %v3522_v36, %v7638_v39 }
 0xae3   :  { %v3357_v44 = vmul.f32 1.0614054, %v7691_v18  ;;  %v3308_v11 = vadd.f32 1.0, %v3290_v26  ;;  %v3539_v32 = vmul.f32 %v3521_v12, %v3269_v55  ;;  %v7708_v9 = vand.u32 2147483647, %v7689_v6 }
 0xae4   :  { %v3500_v61 = vmul.f32 %v7626_v63, %v3482_v59  ;;  %v3427_v52 = vmul.f32 %v7646_v1, %v3409_v27  ;;  %v3394_v10 = vmul.f32 %v7671_v37, %v3376_v33  ;;  %v7716_v22 = vadd.f32 %v7523_v21, %v7426_v2 }
 0xae5   :  { %v7704_v35 = vpop.eup %5337  ;;  %v3375_v29 = vadd.f32 -1.4531521, %v3357_v44  ;;  %5345 = vrcp.f32 %v3308_v11  ;;  %v3289_v39 = vmul.f32 0.3275911, %v7708_v9  ;;  %v3524_v59 = vsub.f32 0.0, %v3272_v34 }
 0xae6   :  { %v3590_v63 = vmul.f32 %v5334_v24, %v3500_v61  ;;  %v3445_v28 = vadd.f32 -0.28449672, %v3427_v52  ;;  %v3412_v31 = vadd.f32 1.4214138, %v3394_v10  ;;  %v3360_v23 = vmul.f32 1.0614054, %v7704_v35 }
 0xae7   :  { %v3393_v42 = vmul.f32 %v7691_v18, %v3375_v29  ;;  %v5340_v43 = vpop.eup %5339  ;;  %5347 = vpow2.f32 %v3565_v41  ;;  %v3571_v0 = vmul.f32 1.442695, %v3540_v45  ;;  %v3307_v33 = vadd.f32 1.0, %v3289_v39 }
 0xae8   :  { %v3463_v25 = vmul.f32 %v7646_v1, %v3445_v28  ;;  %v3608_v13 = vsub.f32 1.0, %v3590_v63  ;;  %v3430_v8 = vmul.f32 %v7671_v37, %v3412_v31  ;;  %v3378_v5 = vadd.f32 -1.4531521, %v3360_v23 }
 0xae9   :  { %v3411_v30 = vadd.f32 1.4214138, %v3393_v42  ;;  %v3569_v12 = vmul.f32 1.442695, %v3539_v32  ;;  %v7726_v63 = vmul.f32 0.70710677, %v7716_v22  ;;  %v3542_v44 = vmul.f32 %v3524_v59, %v3272_v34 }
 0xaea   :  { %v3481_v49 = vadd.f32 0.2548296, %v3463_v25  ;;  %v3448_v55 = vadd.f32 -0.28449672, %v3430_v8  ;;  %v7719_v36 = vpop.eup %5341  ;;  %v3626_v24 = vmul.f32 %v3608_v13, %v3248_v54  ;;  %v3396_v52 = vmul.f32 %v7704_v35, %v3378_v5 }
 0xaeb   :  { %v3429_v10 = vmul.f32 %v7691_v18, %v3411_v30  ;;  %v3359_v26 = vmul.f32 1.0614054, %v7719_v36  ;;  %5349 = vrcp.f32 %v3307_v33  ;;  %v5344_v31 = vpop.eup %5343  ;;  %vm3231_vm15 = vcmp.ge.f32.partialorder %v7624_v53, 0.0 }
 0xaec   :  { %v3499_v27 = vmul.f32 %v7646_v1, %v3481_v49  ;;  %v3466_v61 = vmul.f32 %v7671_v37, %v3448_v55  ;;  %v3414_v28 = vadd.f32 1.4214138, %v3396_v52  ;;  %5351 = vpow2.f32 %v3571_v0 }
 0xaed   :  { %v3447_v54 = vadd.f32 -0.28449672, %v3429_v10  ;;  %v3377_v45 = vadd.f32 -1.4531521, %v3359_v26  ;;  %v3644_v11 = vadd.f32 1.0, %v3626_v24  ;;  %5353 = vpow2.f32 %v3569_v12 }
 0xaee   :  { %v3589_v21 = vmul.f32 %v5340_v43, %v3499_v27  ;;  %v3484_v1 = vadd.f32 0.2548296, %v3466_v61  ;;  %v3432_v29 = vmul.f32 %v7704_v35, %v3414_v28  ;;  %v7735_v34 = vand.u32 2147483647, %v7726_v63 }
 0xaef   :  { %v3465_v13 = vmul.f32 %v7691_v18, %v3447_v54  ;;  %v3395_v8 = vmul.f32 %v7719_v36, %v3377_v45  ;;  %v7737_v23 = vpop.eup %5345  ;;  %v3575_v39 = vmul.f32 1.442695, %v3542_v44  ;;  %v3523_v5 = vsub.f32 0.0, %v7708_v9 }
 0xaf0   :  { %v3607_v41 = vsub.f32 1.0, %v3589_v21  ;;  %v3502_v25 = vmul.f32 %v7671_v37, %v3484_v1  ;;  %v3450_v42 = vadd.f32 -0.28449672, %v3432_v29  ;;  %v3362_v30 = vmul.f32 1.0614054, %v7737_v23 }
 0xaf1   :  { %v3483_v43 = vadd.f32 0.2548296, %v3465_v13  ;;  %v3413_v55 = vadd.f32 1.4214138, %v3395_v8  ;;  %v5348_v59 = vpop.eup %5347  ;;  %v3292_v0 = vmul.f32 0.3275911, %v7735_v34  ;;  %v3662_v33 = vmul.f32 %v3644_v11, %v7649_v3 }
 0xaf2   :  { %v3625_v32 = vmul.f32 %v3607_v41, %v7675_v51  ;;  %v3592_v49 = vmul.f32 %v5344_v31, %v3502_v25  ;;  %v3468_v27 = vmul.f32 %v7704_v35, %v3450_v42  ;;  %v3380_v21 = vadd.f32 -1.4531521, %v3362_v30 }
 0xaf3   :  { %v3501_v61 = vmul.f32 %v7691_v18, %v3483_v43  ;;  %v3431_v52 = vmul.f32 %v7719_v36, %v3413_v55  ;;  %v3310_v10 = vadd.f32 1.0, %v3292_v0  ;;  %v7749_v26 = vadd.f32 %v7426_v2, %v7530_v4 }
 0xaf4   :  { %v3643_v37 = vadd.f32 1.0, %v3625_v32  ;;  %v3610_v51 = vsub.f32 1.0, %v3592_v49  ;;  %v3486_v12 = vadd.f32 0.2548296, %v3468_v27  ;;  %vm3234_vm1 = vcmp.ge.f32.partialorder %v7631_v40, 0.0 }
 0xaf5   :  { %v3591_v1 = vmul.f32 %v5348_v59, %v3501_v61  ;;  %v3449_v28 = vadd.f32 -0.28449672, %v3431_v52  ;;  %v3541_v44 = vmul.f32 %v3523_v5, %v7708_v9  ;;  %v7754_v3 = vpop.eup %5349  ;;  %v3398_v31 = vmul.f32 %v7737_v23, %v3380_v21 }
 0xaf6   :  { %v3661_v24 = vmul.f32 %v3643_v37, %v7666_v16  ;;  %v3628_v16 = vmul.f32 %v3610_v51, %v7699_v14  ;;  %v3504_v18 = vmul.f32 %v7704_v35, %v3486_v12  ;;  %5355 = vrcp.f32 %v3310_v10  ;;  %v5352_v2 = vpop.eup %5351 }
 0xaf7   :  { %v3249_v4 = vsel %vm3231_vm15, 1.0, %v8283_v58  ;;  %v3609_v41 = vsub.f32 1.0, %v3591_v1  ;;  %v3467_v9 = vmul.f32 %v7719_v36, %v3449_v28  ;;  %v3361_v54 = vmul.f32 1.0614054, %v7754_v3  ;;  %v5354_v13 = vpop.eup %5353 }
 0xaf8   :  { %4662 = vmatprep.mubr.msk.f32.mxu1 %vm3682_vm7, %v3661_v24  ;;  %v3594_v45 = vmul.f32 %v5352_v2, %v3504_v18  ;;  %v3416_v11 = vadd.f32 1.4214138, %v3398_v31  ;;  %5357 = vpow2.f32 %v3575_v39  ;;  %v7766_v14 = vmul.f32 0.70710677, %v7749_v26 }
 0xaf9   :  { %4663 = vmatmul.mubr.msk.f32.gmra.mrb[90].mxu1 %vm3682_vm7, %v3662_v33  ;;  %v3627_v35 = vmul.f32 %v3609_v41, %v3249_v4  ;;  %v3485_v25 = vadd.f32 0.2548296, %v3467_v9  ;;  %v3379_v29 = vadd.f32 -1.4531521, %v3361_v54  ;;  %v3573_v32 = vmul.f32 1.442695, %v3541_v44 }
 0xafa   :  { %v3646_v8 = vadd.f32 1.0, %v3628_v16  ;;  %v3612_v49 = vsub.f32 1.0, %v3594_v45  ;;  %v3434_v53 = vmul.f32 %v7737_v23, %v3416_v11  ;;  %v3273_v42 = vand.u32 2147483647, %v7766_v14 }
 0xafb   :  { %v3195_v37 = vmul.f32 0.5, %v7612_v7  ;;  %v3645_v43 = vadd.f32 1.0, %v3627_v35  ;;  %v3503_v55 = vmul.f32 %v7719_v36, %v3485_v25  ;;  %v3397_v39 = vmul.f32 %v7754_v3, %v3379_v29 }
 0xafc   :  { %v3252_v5 = vsel %vm3234_vm1, 1.0, %v8283_v58  ;;  %vm3233_vm2 = vcmp.ge.f32.partialorder %v7652_v62, 0.0  ;;  %v3452_v59 = vadd.f32 -0.28449672, %v3434_v53  ;;  %v3291_v51 = vmul.f32 0.3275911, %v3273_v42 }
 0xafd   :  { %v3663_v27 = vmul.f32 %v3645_v43, %v3195_v37  ;;  %v3593_v30 = vmul.f32 %v5354_v13, %v3503_v55  ;;  %v3415_v0 = vadd.f32 1.4214138, %v3397_v39  ;;  %5359 = vpow2.f32 %v3573_v32 }
 0xafe   :  { %v3664_v33 = vmul.f32 %v3646_v8, %v7694_v46  ;;  %v3630_v7 = vmul.f32 %v3612_v49, %v3252_v5  ;;  %v3470_v24 = vmul.f32 %v7737_v23, %v3452_v59  ;;  %v3309_v36 = vadd.f32 1.0, %v3291_v51 }
 0xaff   :  { %v3611_v61 = vsub.f32 1.0, %v3593_v30  ;;  %v3433_v52 = vmul.f32 %v7754_v3, %v3415_v0  ;;  %v3526_v40 = vsub.f32 0.0, %v7735_v34  ;;  %4665 = vmatprep.mubr.msk.f32.mxu1 %vm3682_vm7, %v3663_v27  ;;  %v3251_v21 = vsel %vm3233_vm2, 1.0, %v8283_v58 }
 0xb00   :  { %v5356_v12 = vpop.eup %5355  ;;  %v3488_v10 = vadd.f32 0.2548296, %v3470_v24  ;;  %5361 = vrcp.f32 %v3309_v36  ;;  %4666 = vmatmul.mubr.msk.f32.gmra.mrb[92].mxu1 %vm3682_vm7, %v3664_v33  ;;  %v3648_v16 = vadd.f32 1.0, %v3630_v7  ;;  %v3197_v18 = vmul.f32 0.5, %v7642_v20 }
 0xb01   :  { %v3629_v46 = vmul.f32 %v3611_v61, %v3251_v21  ;;  %v3451_v1 = vadd.f32 -0.28449672, %v3433_v52  ;;  %v3364_v28 = vmul.f32 1.0614054, %v5356_v12  ;;  %v3544_v62 = vmul.f32 %v3526_v40, %v7735_v34 }
 0xb02   :  { %v5358_v44 = vpop.eup %5357  ;;  %v3506_v31 = vmul.f32 %v7737_v23, %v3488_v10  ;;  %v3198_v9 = vmul.f32 0.5, %v7619_v38  ;;  %vm3236_vm3 = vcmp.ge.f32.partialorder %v7669_v47, 0.0  ;;  %v3525_v32 = vsub.f32 0.0, %v3273_v42 }
 0xb03   :  { %v3647_v2 = vadd.f32 1.0, %v3629_v46  ;;  %v3469_v4 = vmul.f32 %v7754_v3, %v3451_v1  ;;  %v3382_v41 = vadd.f32 -1.4531521, %v3364_v28  ;;  %v3579_v8 = vmul.f32 1.442695, %v3544_v62 }
 0xb04   :  { %v3596_v54 = vmul.f32 %v5358_v44, %v3506_v31  ;;  %v3666_v25 = vmul.f32 %v3648_v16, %v3198_v9  ;;  %v3254_v38 = vsel %vm3236_vm3, 1.0, %v8283_v58  ;;  %vm3235_vm4 = vcmp.ge.f32.partialorder %v7689_v6, 0.0 }
 0xb05   :  { %v3665_v45 = vmul.f32 %v3647_v2, %v3197_v18  ;;  %v3487_v11 = vadd.f32 0.2548296, %v3469_v4  ;;  %v3400_v35 = vmul.f32 %v5356_v12, %v3382_v41  ;;  %v3543_v47 = vmul.f32 %v3525_v32, %v3273_v42 }
 0xb06   :  { %v3614_v29 = vsub.f32 1.0, %v3596_v54  ;;  %5363 = vpow2.f32 %v3579_v8  ;;  %v3199_v0 = vmul.f32 0.5, %v7680_v50  ;;  %v3200_v24 = vmul.f32 0.5, %v7656_v48 }
 0xb07   :  { %v5360_v20 = vpop.eup %5359  ;;  %v3505_v23 = vmul.f32 %v7754_v3, %v3487_v11  ;;  %v3418_v13 = vadd.f32 1.4214138, %v3400_v35  ;;  %4668 = vmatprep.mubr.msk.f32.mxu1 %vm3682_vm7, %v3665_v45  ;;  %v3253_v3 = vsel %vm3235_vm4, 1.0, %v8283_v58  ;;  %v3577_v30 = vmul.f32 1.442695, %v3543_v47 }
 0xb08   :  { %4669 = vmatmul.mubr.msk.f32.gmra.mrb[94].mxu1 %vm3682_vm7, %v3666_v25  ;;  %v3632_v37 = vmul.f32 %v3614_v29, %v3254_v38  ;;  %vm3238_vm5 = vcmp.ge.f32.partialorder %v7726_v63, 0.0  ;;  %vm3237_vm6 = vcmp.ge.f32.partialorder %v7766_v14, 0.0  ;;  %v3201_v62 = vmul.f32 0.5, %v7749_v26  ;;  %v7813_v14 = vld [vmem:[%s8178_s9] ss:$0 sm:$0xff] }
 0xb09   :  { %v3595_v34 = vmul.f32 %v5360_v20, %v3505_v23  ;;  %v3436_v49 = vmul.f32 %v5356_v12, %v3418_v13  ;;  %5365 = vpow2.f32 %v3577_v30  ;;  %v3256_v16 = vsel %vm3238_vm5, 1.0, %v8283_v58 }
 0xb0a   :  { %v5362_v53 = vpop.eup %5361  ;;  %v3650_v27 = vadd.f32 1.0, %v3632_v37  ;;  %v3255_v2 = vsel %vm3237_vm6, 1.0, %v8283_v58  ;;  %v3202_v54 = vmul.f32 0.5, %v7716_v22 }
 0xb0b   :  { %v3613_v43 = vsub.f32 1.0, %v3595_v34  ;;  %v3454_v55 = vadd.f32 -0.28449672, %v3436_v49  ;;  %v3363_v39 = vmul.f32 1.0614054, %v5362_v53 }
 0xb0c   :  { %v3668_v61 = vmul.f32 %v3650_v27, %v3200_v24  ;;  %v8285_v27 = vld [vmem:[#allocation10_spill] sm:$0xff] }
 0xb0d   :  { %v3631_v5 = vmul.f32 %v3613_v43, %v3253_v3  ;;  %v3472_v59 = vmul.f32 %v5356_v12, %v3454_v55  ;;  %v3381_v51 = vadd.f32 -1.4531521, %v3363_v39 }
 0xb0f   :  { %v3649_v33 = vadd.f32 1.0, %v3631_v5  ;;  %v3490_v6 = vadd.f32 0.2548296, %v3472_v59  ;;  %v3399_v7 = vmul.f32 %v5362_v53, %v3381_v51  ;;  %v8284_v51 = vld [vmem:[#allocation12_spill] sm:$0xff] }
 0xb10   :  { %v5364_v21 = vpop.eup %5363 }
 0xb11   :  { %v3667_v36 = vmul.f32 %v3649_v33, %v3199_v0  ;;  %v3417_v42 = vadd.f32 1.4214138, %v3399_v7  ;;  %v3508_v52 = vmul.f32 %v5356_v12, %v3490_v6 }
 0xb13   :  { %v3435_v40 = vmul.f32 %v5362_v53, %v3417_v42  ;;  %4671 = vmatprep.mubr.msk.f32.mxu1 %vm3682_vm7, %v3667_v36  ;;  %v3598_v46 = vmul.f32 %v5364_v21, %v3508_v52  ;;  %v5366_v48 = vpop.eup %5365  ;;  %v8286_v36 = vld [vmem:[#allocation15_spill] sm:$0xff] }
 0xb14   :  { %4672 = vmatmul.mubr.msk.f32.gmra.mrb[96].mxu1 %vm3682_vm7, %v3668_v61  ;;  %v8287_v61 = vld [vmem:[#allocation14_spill] sm:$0xff] }
 0xb15   :  { %v3453_v10 = vadd.f32 -0.28449672, %v3435_v40  ;;  %v3616_v28 = vsub.f32 1.0, %v3598_v46 }
 0xb17   :  { %v3471_v1 = vmul.f32 %v5362_v53, %v3453_v10  ;;  %v3634_v18 = vmul.f32 %v3616_v28, %v3256_v16  ;;  %v8288_v28 = vld [vmem:[#allocation17_spill] sm:$0xff] }
 0xb19   :  { %v3489_v50 = vadd.f32 0.2548296, %v3471_v1  ;;  %v3652_v41 = vadd.f32 1.0, %v3634_v18 }
 0xb1b   :  { %v3507_v44 = vmul.f32 %v5362_v53, %v3489_v50  ;;  %v3670_v45 = vmul.f32 %v3652_v41, %v3202_v54  ;;  %v8291_v54 = vld [vmem:[#allocation7_spill] sm:$0xff] }
 0xb1d   :  { %v3597_v12 = vmul.f32 %v5366_v48, %v3507_v44  ;;  %v8289_v48 = vld [vmem:[#allocation16_spill] sm:$0xff] }
 0xb1f   :  { %v3615_v31 = vsub.f32 1.0, %v3597_v12 }
 0xb21   :  { %v3633_v4 = vmul.f32 %v3615_v31, %v3255_v2 }
 0xb23   :  { %v3651_v9 = vadd.f32 1.0, %v3633_v4 }
 0xb25   :  { %v3669_v63 = vmul.f32 %v3651_v9, %v3201_v62  ;;  %v8290_v62 = vld [vmem:[#allocation9_spill] sm:$0xff] }
 0xb27   :  { %4674 = vmatprep.mubr.msk.f32.mxu1 %vm3682_vm7, %v3669_v63 }
 0xb28   :  { %4675 = vmatmul.mubr.msk.f32.gmra.mrb[98].mxu1 %vm3682_vm7, %v3670_v45 }
 0xb99   :  { %v4652_v11 = vpop.f32.mrb[82].mxu1 }
 0xb9a   :  { %v3809_v58 = vadd.f32 %v4652_v11, %v7813_v14  ;;  %v3803_v35 = vpop.f32.mrb[83].mxu1 }
 0xb9b   :  { %v3804_v26 = vadd.f32 %v7813_v14, %v3803_v35 }
 0xb9c   :  { %v7818_v25 = vadd.f32 %v3809_v58, %v7295_v19 }
 0xb9d   :  { %v7821_v22 = vadd.f32 %v3804_v26, %v7291_v56 }
 0xb9e   :  { %v3913_v29 = vsel %vm74_vm0, %v7818_v25, 0.0 }
 0xb9f   :  { %3914 = vadd.xlane.f32.xlu1 %v3913_v29  ;;  %v3910_v32 = vsel %vm74_vm0, %v7821_v22, 0.0  ;;  %v4655_v20 = vpop.f32.mrb[84].mxu1 }
 0xba0   :  { %3911 = vadd.xlane.f32.xlu0 %v3910_v32  ;;  %v3819_v23 = vadd.f32 %v4655_v20, %v7813_v14  ;;  %v3813_v13 = vpop.f32.mrb[85].mxu1  ;;  %v8292_v32 = vld [vmem:[#allocation4_spill] sm:$0xff] }
 0xba1   :  { %v3814_v8 = vadd.f32 %v7813_v14, %v3813_v13 }
 0xba2   :  { %v7830_v19 = vadd.f32 %v3819_v23, %v7309_v17  ;;  %v8293_v23 = vld [vmem:[#allocation11_spill] sm:$0xff] }
 0xba3   :  { %v7833_v56 = vadd.f32 %v3814_v8, %v7305_v60 }
 0xba4   :  { %v4658_v38 = vpop.f32.mrb[86].mxu1  ;;  %v3919_v34 = vsel %vm74_vm0, %v7830_v19, 0.0 }
 0xba5   :  { %v3829_v49 = vadd.f32 %v4658_v38, %v7813_v14  ;;  %v3823_v53 = vpop.f32.mrb[87].mxu1  ;;  %3920 = vadd.xlane.f32.xlu1 %v3919_v34  ;;  %v3916_v37 = vsel %vm74_vm0, %v7833_v56, 0.0 }
 0xba6   :  { %v3824_v47 = vadd.f32 %v7813_v14, %v3823_v53  ;;  %3917 = vadd.xlane.f32.xlu0 %v3916_v37 }
 0xba7   :  { %v7842_v17 = vadd.f32 %v3829_v49, %v7323_v57 }
 0xba8   :  { %v7845_v60 = vadd.f32 %v3824_v47, %v7319_v15  ;;  %v8294_v47 = vld [vmem:[#allocation18_spill] sm:$0xff] }
 0xba9   :  { %v3925_v43 = vsel %vm74_vm0, %v7842_v17, 0.0 }
 0xbaa   :  { %3926 = vadd.xlane.f32.xlu1 %v3925_v43  ;;  %v3922_v55 = vsel %vm74_vm0, %v7845_v60, 0.0 }
 0xbab   :  { %3923 = vadd.xlane.f32.xlu0 %v3922_v55  ;;  %v8295_v55 = vld [vmem:[#allocation13_spill] sm:$0xff] }
 0xbae   :  { %v4661_v39 = vpop.f32.mrb[88].mxu1 }
 0xbaf   :  { %v3839_v3 = vadd.f32 %v4661_v39, %v7813_v14  ;;  %v3833_v5 = vpop.f32.mrb[89].mxu1 }
 0xbb0   :  { %v3834_v59 = vadd.f32 %v7813_v14, %v3833_v5 }
 0xbb1   :  { %v7854_v57 = vadd.f32 %v3839_v3, %v8284_v51 }
 0xbb2   :  { %v7857_v15 = vadd.f32 %v3834_v59, %v8285_v27 }
 0xbb3   :  { %v3931_v30 = vsel %vm74_vm0, %v7854_v57, 0.0 }
 0xbb4   :  { %3932 = vadd.xlane.f32.xlu1 %v3931_v30  ;;  %v3928_v0 = vsel %vm74_vm0, %v7857_v15, 0.0 }
 0xbb5   :  { %3929 = vadd.xlane.f32.xlu0 %v3928_v0 }
 0xbcc   :  { %v4664_v33 = vpop.f32.mrb[90].mxu1 }
 0xbcd   :  { %v3849_v6 = vadd.f32 %v4664_v33, %v7813_v14  ;;  %v3843_v7 = vpop.f32.mrb[91].mxu1 }
 0xbce   :  { %v3844_v24 = vadd.f32 %v7813_v14, %v3843_v7 }
 0xbcf   :  { %v7866_v42 = vadd.f32 %v3849_v6, %v8286_v36 }
 0xbd0   :  { %v7869_v52 = vadd.f32 %v3844_v24, %v8287_v61 }
 0xbd1   :  { %v3937_v40 = vsel %vm74_vm0, %v7866_v42, 0.0 }
 0xbd2   :  { %3938 = vadd.xlane.f32.xlu1 %v3937_v40  ;;  %v3934_v21 = vsel %vm74_vm0, %v7869_v52, 0.0 }
 0xbd3   :  { %3935 = vadd.xlane.f32.xlu0 %v3934_v21  ;;  %v4667_v10 = vpop.f32.mrb[92].mxu1 }
 0xbd4   :  { %v3859_v46 = vadd.f32 %v4667_v10, %v7813_v14  ;;  %v3853_v1 = vpop.f32.mrb[93].mxu1 }
 0xbd5   :  { %v3854_v50 = vadd.f32 %v7813_v14, %v3853_v1 }
 0xbd6   :  { %v7878_v44 = vadd.f32 %v3859_v46, %v8288_v28 }
 0xbd7   :  { %v7881_v16 = vadd.f32 %v3854_v50, %v8289_v48 }
 0xbd8   :  { %v3943_v12 = vsel %vm74_vm0, %v7878_v44, 0.0 }
 0xbd9   :  { %3944 = vadd.xlane.f32.xlu1 %v3943_v12  ;;  %v3940_v18 = vsel %vm74_vm0, %v7881_v16, 0.0 }
 0xbda   :  { %3941 = vadd.xlane.f32.xlu0 %v3940_v18 }
 0xbdb   :  { %v4670_v31 = vpop.f32.mrb[94].mxu1 }
 0xbdc   :  { %v3869_v2 = vadd.f32 %v4670_v31, %v7813_v14  ;;  %v3863_v4 = vpop.f32.mrb[95].mxu1 }
 0xbdd   :  { %v3864_v41 = vadd.f32 %v7813_v14, %v3863_v4 }
 0xbde   :  { %v7890_v9 = vadd.f32 %v3869_v2, %v8290_v62 }
 0xbdf   :  { %v7893_v63 = vadd.f32 %v3864_v41, %v8291_v54 }
 0xbe0   :  { %v3949_v45 = vsel %vm74_vm0, %v7890_v9, 0.0 }
 0xbe1   :  { %3950 = vadd.xlane.f32.xlu1 %v3949_v45  ;;  %v3946_v11 = vsel %vm74_vm0, %v7893_v63, 0.0 }
 0xbe2   :  { %3947 = vadd.xlane.f32.xlu0 %v3946_v11 }
 0xbe7   :  { %v4673_v58 = vpop.f32.mrb[96].mxu1 }
 0xbe8   :  { %v3879_v35 = vadd.f32 %v4673_v58, %v7813_v14  ;;  %v3873_v26 = vpop.f32.mrb[97].mxu1 }
 0xbe9   :  { %v3874_v29 = vadd.f32 %v7813_v14, %v3873_v26 }
 0xbea   :  { %v7902_v20 = vadd.f32 %v3879_v35, %v8292_v32 }
 0xbeb   :  { %v7905_v13 = vadd.f32 %v3874_v29, %v8293_v23 }
 0xbec   :  { %v3955_v8 = vsel %vm74_vm0, %v7902_v20, 0.0 }
 0xbed   :  { %3956 = vadd.xlane.f32.xlu1 %v3955_v8  ;;  %v3952_v38 = vsel %vm74_vm0, %v7905_v13, 0.0 }
 0xbee   :  { %3953 = vadd.xlane.f32.xlu0 %v3952_v38 }
 0xbfb   :  { %v4676_v34 = vpop.f32.mrb[98].mxu1 }
 0xbfc   :  { %v3889_v49 = vadd.f32 %v4676_v34, %v7813_v14  ;;  %v3883_v53 = vpop.f32.mrb[99].mxu1 }
 0xbfd   :  { %v3884_v37 = vadd.f32 %v7813_v14, %v3883_v53 }
 0xbfe   :  { %v7914_v43 = vadd.f32 %v3889_v49, %v8294_v47 }
 0xbff   :  { %v7917_v39 = vadd.f32 %v3884_v37, %v8295_v55 }
 0xc00   :  { %v3961_v3 = vsel %vm74_vm0, %v7914_v43, 0.0 }
 0xc01   :  { %3962 = vadd.xlane.f32.xlu1 %v3961_v3  ;;  %v3958_v5 = vsel %vm74_vm0, %v7917_v39, 0.0 }
 0xc02   :  { %3959 = vadd.xlane.f32.xlu0 %v3958_v5 }
 0xc2c   :  { %v3915_v59 = vpop.xlane.xlu1 %3914 }
 0xc2d   :  { %v3965_v51 = vmul.f32 0.0625, %v3915_v59  ;;  %v3912_v27 = vpop.xlane.xlu0 %3911 }
 0xc2e   :  { %v3964_v30 = vmul.f32 0.0625, %v3912_v27 }
 0xc2f   :  { %v7924_v14 = vsub.f32 %v7818_v25, %v3965_v51 }
 0xc30   :  { %v7927_v0 = vsub.f32 %v7821_v22, %v3964_v30 }
 0xc31   :  { %v4001_v33 = vmul.f32 %v7924_v14, %v7924_v14 }
 0xc32   :  { %v4000_v6 = vmul.f32 %v7927_v0, %v7927_v0  ;;  %v3921_v7 = vpop.xlane.xlu1 %3920 }
 0xc33   :  { %v4021_v24 = vsel %vm74_vm0, %v4001_v33, 0.0  ;;  %v3967_v36 = vmul.f32 0.0625, %v3921_v7  ;;  %v3918_v61 = vpop.xlane.xlu0 %3917 }
 0xc34   :  { %4022 = vadd.xlane.f32.xlu1 %v4021_v24  ;;  %v4018_v40 = vsel %vm74_vm0, %v4000_v6, 0.0  ;;  %v3966_v21 = vmul.f32 0.0625, %v3918_v61 }
 0xc35   :  { %4019 = vadd.xlane.f32.xlu0 %v4018_v40  ;;  %v7936_v25 = vsub.f32 %v7830_v19, %v3967_v36 }
 0xc36   :  { %v7939_v22 = vsub.f32 %v7833_v56, %v3966_v21 }
 0xc37   :  { %v3927_v10 = vpop.xlane.xlu1 %3926  ;;  %v4003_v46 = vmul.f32 %v7936_v25, %v7936_v25 }
 0xc38   :  { %v3969_v1 = vmul.f32 0.0625, %v3927_v10  ;;  %v3924_v50 = vpop.xlane.xlu0 %3923  ;;  %v4002_v28 = vmul.f32 %v7939_v22, %v7939_v22 }
 0xc39   :  { %v3968_v48 = vmul.f32 0.0625, %v3924_v50  ;;  %v4027_v12 = vsel %vm74_vm0, %v4003_v46, 0.0 }
 0xc3a   :  { %v7947_v18 = vsub.f32 %v7842_v17, %v3969_v1  ;;  %4028 = vadd.xlane.f32.xlu1 %v4027_v12  ;;  %v4024_v19 = vsel %vm74_vm0, %v4002_v28, 0.0 }
 0xc3b   :  { %v7951_v56 = vsub.f32 %v7845_v60, %v3968_v48  ;;  %4025 = vadd.xlane.f32.xlu0 %v4024_v19 }
 0xc3c   :  { %v4005_v31 = vmul.f32 %v7947_v18, %v7947_v18 }
 0xc3d   :  { %v4004_v2 = vmul.f32 %v7951_v56, %v7951_v56 }
 0xc3e   :  { %v4033_v4 = vsel %vm74_vm0, %v4005_v31, 0.0 }
 0xc3f   :  { %4034 = vadd.xlane.f32.xlu1 %v4033_v4  ;;  %v4030_v41 = vsel %vm74_vm0, %v4004_v2, 0.0 }
 0xc40   :  { %4031 = vadd.xlane.f32.xlu0 %v4030_v41 }
 0xc41   :  { %v3933_v17 = vpop.xlane.xlu1 %3932 }
 0xc42   :  { %v3971_v62 = vmul.f32 0.0625, %v3933_v17  ;;  %v3930_v54 = vpop.xlane.xlu0 %3929 }
 0xc43   :  { %v3970_v45 = vmul.f32 0.0625, %v3930_v54 }
 0xc44   :  { %v7960_v60 = vsub.f32 %v7854_v57, %v3971_v62 }
 0xc45   :  { %v7963_v11 = vsub.f32 %v7857_v15, %v3970_v45 }
 0xc46   :  { %v4007_v58 = vmul.f32 %v7960_v60, %v7960_v60 }
 0xc47   :  { %v4006_v35 = vmul.f32 %v7963_v11, %v7963_v11 }
 0xc48   :  { %v4039_v26 = vsel %vm74_vm0, %v4007_v58, 0.0 }
 0xc49   :  { %4040 = vadd.xlane.f32.xlu1 %v4039_v26  ;;  %v4036_v29 = vsel %vm74_vm0, %v4006_v35, 0.0 }
 0xc4a   :  { %4037 = vadd.xlane.f32.xlu0 %v4036_v29 }
 0xc5f   :  { %v3939_v32 = vpop.xlane.xlu1 %3938 }
 0xc60   :  { %v3973_v23 = vmul.f32 0.0625, %v3939_v32  ;;  %v3936_v8 = vpop.xlane.xlu0 %3935 }
 0xc61   :  { %v3972_v57 = vmul.f32 0.0625, %v3936_v8 }
 0xc62   :  { %v7972_v38 = vsub.f32 %v7866_v42, %v3973_v23 }
 0xc63   :  { %v7975_v15 = vsub.f32 %v7869_v52, %v3972_v57 }
 0xc64   :  { %v4009_v34 = vmul.f32 %v7972_v38, %v7972_v38 }
 0xc65   :  { %v4008_v49 = vmul.f32 %v7975_v15, %v7975_v15 }
 0xc66   :  { %v4045_v53 = vsel %vm74_vm0, %v4009_v34, 0.0  ;;  %v3945_v47 = vpop.xlane.xlu1 %3944 }
 0xc67   :  { %4046 = vadd.xlane.f32.xlu1 %v4045_v53  ;;  %v4042_v37 = vsel %vm74_vm0, %v4008_v49, 0.0  ;;  %v3975_v55 = vmul.f32 0.0625, %v3945_v47  ;;  %v3942_v3 = vpop.xlane.xlu0 %3941 }
 0xc68   :  { %4043 = vadd.xlane.f32.xlu0 %v4042_v37  ;;  %v3974_v42 = vmul.f32 0.0625, %v3942_v3 }
 0xc69   :  { %v7984_v5 = vsub.f32 %v7878_v44, %v3975_v55 }
 0xc6a   :  { %v7987_v52 = vsub.f32 %v7881_v16, %v3974_v42  ;;  %v8034_v42 = vld [vmem:[%s8179_s12] ss:$0 sm:$0xff] }
 0xc6b   :  { %v4011_v59 = vmul.f32 %v7984_v5, %v7984_v5 }
 0xc6c   :  { %v4010_v51 = vmul.f32 %v7987_v52, %v7987_v52 }
 0xc6d   :  { %v4051_v27 = vsel %vm74_vm0, %v4011_v59, 0.0 }
 0xc6e   :  { %v3951_v30 = vpop.xlane.xlu1 %3950  ;;  %4052 = vadd.xlane.f32.xlu1 %v4051_v27  ;;  %v4048_v33 = vsel %vm74_vm0, %v4010_v51, 0.0 }
 0xc6f   :  { %v3977_v6 = vmul.f32 0.0625, %v3951_v30  ;;  %v3948_v7 = vpop.xlane.xlu0 %3947  ;;  %4049 = vadd.xlane.f32.xlu0 %v4048_v33  ;;  %v8040_v33 = vld [vmem:[%s8180_s13] ss:$0 sm:$0xff] }
 0xc70   :  { %v3976_v44 = vmul.f32 0.0625, %v3948_v7 }
 0xc71   :  { %v7996_v24 = vsub.f32 %v7890_v9, %v3977_v6 }
 0xc72   :  { %v7999_v16 = vsub.f32 %v7893_v63, %v3976_v44 }
 0xc73   :  { %v4013_v36 = vmul.f32 %v7996_v24, %v7996_v24 }
 0xc74   :  { %v4012_v61 = vmul.f32 %v7999_v16, %v7999_v16 }
 0xc75   :  { %v4057_v40 = vsel %vm74_vm0, %v4013_v36, 0.0 }
 0xc76   :  { %4058 = vadd.xlane.f32.xlu1 %v4057_v40  ;;  %v4054_v21 = vsel %vm74_vm0, %v4012_v61, 0.0 }
 0xc77   :  { %4055 = vadd.xlane.f32.xlu0 %v4054_v21 }
 0xc7a   :  { %v3957_v10 = vpop.xlane.xlu1 %3956 }
 0xc7b   :  { %v3979_v46 = vmul.f32 0.0625, %v3957_v10  ;;  %v3954_v1 = vpop.xlane.xlu0 %3953 }
 0xc7c   :  { %v3978_v9 = vmul.f32 0.0625, %v3954_v1 }
 0xc7d   :  { %v8008_v50 = vsub.f32 %v7902_v20, %v3979_v46 }
 0xc7e   :  { %v8011_v63 = vsub.f32 %v7905_v13, %v3978_v9 }
 0xc7f   :  { %v4015_v28 = vmul.f32 %v8008_v50, %v8008_v50 }
 0xc80   :  { %v4014_v48 = vmul.f32 %v8011_v63, %v8011_v63 }
 0xc81   :  { %v4063_v12 = vsel %vm74_vm0, %v4015_v28, 0.0 }
 0xc82   :  { %4064 = vadd.xlane.f32.xlu1 %v4063_v12  ;;  %v4060_v19 = vsel %vm74_vm0, %v4014_v48, 0.0 }
 0xc83   :  { %4061 = vadd.xlane.f32.xlu0 %v4060_v19 }
 0xc8e   :  { %v3963_v31 = vpop.xlane.xlu1 %3962 }
 0xc8f   :  { %v3981_v2 = vmul.f32 0.0625, %v3963_v31  ;;  %v3960_v4 = vpop.xlane.xlu0 %3959 }
 0xc90   :  { %v3980_v20 = vmul.f32 0.0625, %v3960_v4 }
 0xc91   :  { %v8020_v41 = vsub.f32 %v7914_v43, %v3981_v2 }
 0xc92   :  { %v8023_v13 = vsub.f32 %v7917_v39, %v3980_v20 }
 0xc93   :  { %v4017_v17 = vmul.f32 %v8020_v41, %v8020_v41 }
 0xc94   :  { %v4016_v62 = vmul.f32 %v8023_v13, %v8023_v13 }
 0xc95   :  { %v4069_v54 = vsel %vm74_vm0, %v4017_v17, 0.0 }
 0xc96   :  { %4070 = vadd.xlane.f32.xlu1 %v4069_v54  ;;  %v4066_v45 = vsel %vm74_vm0, %v4016_v62, 0.0 }
 0xc97   :  { %4067 = vadd.xlane.f32.xlu0 %v4066_v45 }
 0xcc1   :  { %v4023_v58 = vpop.xlane.xlu1 %4022 }
 0xcc2   :  { %v4073_v35 = vmul.f32 0.0625, %v4023_v58  ;;  %v4020_v26 = vpop.xlane.xlu0 %4019 }
 0xcc3   :  { %v4072_v43 = vmul.f32 0.0625, %v4020_v26 }
 0xcc4   :  { %v4091_v29 = vadd.f32 1e-05, %v4073_v35 }
 0xcc5   :  { %v4090_v32 = vadd.f32 1e-05, %v4072_v43 }
 0xcc6   :  { %5367 = vrsqrt.f32 %v4091_v29 }
 0xcc7   :  { %5369 = vrsqrt.f32 %v4090_v32  ;;  %v4029_v39 = vpop.xlane.xlu1 %4028 }
 0xcc8   :  { %v4075_v23 = vmul.f32 0.0625, %v4029_v39  ;;  %v4026_v8 = vpop.xlane.xlu0 %4025 }
 0xcc9   :  { %v4074_v57 = vmul.f32 0.0625, %v4026_v8 }
 0xcca   :  { %v4093_v34 = vadd.f32 1e-05, %v4075_v23 }
 0xccb   :  { %v4092_v49 = vadd.f32 1e-05, %v4074_v57 }
 0xccc   :  { %5371 = vrsqrt.f32 %v4093_v34  ;;  %v4035_v53 = vpop.xlane.xlu1 %4034 }
 0xccd   :  { %5373 = vrsqrt.f32 %v4092_v49  ;;  %v4077_v37 = vmul.f32 0.0625, %v4035_v53  ;;  %v4032_v47 = vpop.xlane.xlu0 %4031 }
 0xcce   :  { %v4076_v55 = vmul.f32 0.0625, %v4032_v47 }
 0xccf   :  { %v4095_v59 = vadd.f32 1e-05, %v4077_v37 }
 0xcd0   :  { %v5368_v3 = vpop.eup %5367  ;;  %v4094_v30 = vadd.f32 1e-05, %v4076_v55 }
 0xcd1   :  { %v5370_v51 = vpop.eup %5369  ;;  %v4127_v27 = vmul.f32 %v5368_v3, %v7924_v14  ;;  %5375 = vrsqrt.f32 %v4095_v59 }
 0xcd2   :  { %v4126_v6 = vmul.f32 %v5370_v51, %v7927_v0  ;;  %5377 = vrsqrt.f32 %v4094_v30 }
 0xcd3   :  { %v4152_v7 = vmul.f32 %v8034_v42, %v4127_v27 }
 0xcd4   :  { %v4151_v44 = vmul.f32 %v8034_v42, %v4126_v6 }
 0xcd5   :  { %v4177_v36 = vadd.f32 %v8040_v33, %v4152_v7 }
 0xcd6   :  { %v4176_v61 = vadd.f32 %v8040_v33, %v4151_v44  ;;  %v5372_v40 = vpop.eup %5371  ;;  %v4041_v14 = vpop.xlane.xlu1 %4040 }
 0xcd7   :  { %4195 = vst.msk [vmem:[%s8181_s14 + $0x8] sm:$0xff] %vm74_vm0, %v4177_v36  ;;  %v5374_v21 = vpop.eup %5373  ;;  %v4129_v0 = vmul.f32 %v5372_v40, %v7936_v25  ;;  %v4079_v10 = vmul.f32 0.0625, %v4041_v14  ;;  %v4038_v46 = vpop.xlane.xlu0 %4037 }
 0xcd8   :  { %4194 = vst.msk [vmem:[%s8181_s14] sm:$0xff] %vm74_vm0, %v4176_v61  ;;  %v4128_v1 = vmul.f32 %v5374_v21, %v7939_v22  ;;  %v4078_v9 = vmul.f32 0.0625, %v4038_v46 }
 0xcd9   :  { %v4154_v28 = vmul.f32 %v8034_v42, %v4129_v0  ;;  %v4097_v48 = vadd.f32 1e-05, %v4079_v10 }
 0xcda   :  { %v4153_v12 = vmul.f32 %v8034_v42, %v4128_v1  ;;  %v4096_v19 = vadd.f32 1e-05, %v4078_v9 }
 0xcdb   :  { %v5376_v31 = vpop.eup %5375  ;;  %v4179_v2 = vadd.f32 %v8040_v33, %v4154_v28  ;;  %5379 = vrsqrt.f32 %v4097_v48 }
 0xcdc   :  { %v5378_v4 = vpop.eup %5377  ;;  %v4178_v20 = vadd.f32 %v8040_v33, %v4153_v12  ;;  %v4131_v25 = vmul.f32 %v5376_v31, %v7947_v18  ;;  %5381 = vrsqrt.f32 %v4096_v19 }
 0xcdd   :  { %4197 = vst.msk [vmem:[%s8181_s14 + $0x18] sm:$0xff] %vm74_vm0, %v4179_v2  ;;  %v4130_v22 = vmul.f32 %v5378_v4, %v7951_v56 }
 0xcde   :  { %4196 = vst.msk [vmem:[%s8181_s14 + $0x10] sm:$0xff] %vm74_vm0, %v4178_v20  ;;  %v4156_v17 = vmul.f32 %v8034_v42, %v4131_v25 }
 0xcdf   :  { %v4155_v62 = vmul.f32 %v8034_v42, %v4130_v22 }
 0xce0   :  { %v4181_v54 = vadd.f32 %v8040_v33, %v4156_v17 }
 0xce1   :  { %v4180_v18 = vadd.f32 %v8040_v33, %v4155_v62 }
 0xce2   :  { %4199 = vst.msk [vmem:[%s8181_s14 + $0x28] sm:$0xff] %vm74_vm0, %v4181_v54 }
 0xce3   :  { %4198 = vst.msk [vmem:[%s8181_s14 + $0x20] sm:$0xff] %vm74_vm0, %v4180_v18 }
 0xce5   :  { %v5380_v56 = vpop.eup %5379 }
 0xce6   :  { %v5382_v45 = vpop.eup %5381  ;;  %v4133_v58 = vmul.f32 %v5380_v56, %v7960_v60 }
 0xce7   :  { %v4132_v35 = vmul.f32 %v5382_v45, %v7963_v11 }
 0xce8   :  { %v4158_v26 = vmul.f32 %v8034_v42, %v4133_v58 }
 0xce9   :  { %v4157_v43 = vmul.f32 %v8034_v42, %v4132_v35 }
 0xcea   :  { %v4183_v29 = vadd.f32 %v8040_v33, %v4158_v26 }
 0xceb   :  { %v4182_v32 = vadd.f32 %v8040_v33, %v4157_v43 }
 0xcec   :  { %4201 = vst.msk [vmem:[%s8181_s14 + $0x38] sm:$0xff] %vm74_vm0, %v4183_v29 }
 0xced   :  { %4200 = vst.msk [vmem:[%s8181_s14 + $0x30] sm:$0xff] %vm74_vm0, %v4182_v32 }
 0xcf4   :  { %v4047_v60 = vpop.xlane.xlu1 %4046 }
 0xcf5   :  { %v4081_v11 = vmul.f32 0.0625, %v4047_v60  ;;  %v4044_v39 = vpop.xlane.xlu0 %4043 }
 0xcf6   :  { %v4080_v23 = vmul.f32 0.0625, %v4044_v39 }
 0xcf7   :  { %v4099_v8 = vadd.f32 1e-05, %v4081_v11 }
 0xcf8   :  { %v4098_v57 = vadd.f32 1e-05, %v4080_v23 }
 0xcf9   :  { %5383 = vrsqrt.f32 %v4099_v8 }
 0xcfa   :  { %5385 = vrsqrt.f32 %v4098_v57 }
 0xcfb   :  { %v4053_v34 = vpop.xlane.xlu1 %4052 }
 0xcfc   :  { %v4083_v49 = vmul.f32 0.0625, %v4053_v34  ;;  %v4050_v53 = vpop.xlane.xlu0 %4049 }
 0xcfd   :  { %v4082_v37 = vmul.f32 0.0625, %v4050_v53 }
 0xcfe   :  { %v4101_v47 = vadd.f32 1e-05, %v4083_v49 }
 0xcff   :  { %v4100_v55 = vadd.f32 1e-05, %v4082_v37 }
 0xd00   :  { %5387 = vrsqrt.f32 %v4101_v47 }
 0xd01   :  { %5389 = vrsqrt.f32 %v4100_v55 }
 0xd03   :  { %v5384_v3 = vpop.eup %5383  ;;  %v4059_v6 = vpop.xlane.xlu1 %4058 }
 0xd04   :  { %v5386_v59 = vpop.eup %5385  ;;  %v4135_v51 = vmul.f32 %v5384_v3, %v7972_v38  ;;  %v4085_v44 = vmul.f32 0.0625, %v4059_v6  ;;  %v4056_v36 = vpop.xlane.xlu0 %4055 }
 0xd05   :  { %v4134_v27 = vmul.f32 %v5386_v59, %v7975_v15  ;;  %v4084_v40 = vmul.f32 0.0625, %v4056_v36 }
 0xd06   :  { %v4160_v30 = vmul.f32 %v8034_v42, %v4135_v51  ;;  %v4103_v21 = vadd.f32 1e-05, %v4085_v44 }
 0xd07   :  { %v4159_v7 = vmul.f32 %v8034_v42, %v4134_v27  ;;  %v4102_v38 = vadd.f32 1e-05, %v4084_v40 }
 0xd08   :  { %v4185_v61 = vadd.f32 %v8040_v33, %v4160_v30  ;;  %5391 = vrsqrt.f32 %v4103_v21 }
 0xd09   :  { %v4184_v14 = vadd.f32 %v8040_v33, %v4159_v7  ;;  %5393 = vrsqrt.f32 %v4102_v38 }
 0xd0a   :  { %4203 = vst.msk [vmem:[%s8181_s14 + $0x48] sm:$0xff] %vm74_vm0, %v4185_v61  ;;  %v5388_v15 = vpop.eup %5387 }
 0xd0b   :  { %4202 = vst.msk [vmem:[%s8181_s14 + $0x40] sm:$0xff] %vm74_vm0, %v4184_v14  ;;  %v5390_v0 = vpop.eup %5389  ;;  %v4137_v10 = vmul.f32 %v5388_v15, %v7984_v5 }
 0xd0c   :  { %v4136_v46 = vmul.f32 %v5390_v0, %v7987_v52 }
 0xd0d   :  { %v4162_v1 = vmul.f32 %v8034_v42, %v4137_v10 }
 0xd0e   :  { %v4161_v9 = vmul.f32 %v8034_v42, %v4136_v46 }
 0xd0f   :  { %v4187_v28 = vadd.f32 %v8040_v33, %v4162_v1  ;;  %v4065_v48 = vpop.xlane.xlu1 %4064 }
 0xd10   :  { %v4186_v12 = vadd.f32 %v8040_v33, %v4161_v9  ;;  %v4087_v19 = vmul.f32 0.0625, %v4065_v48  ;;  %v4062_v31 = vpop.xlane.xlu0 %4061 }
 0xd11   :  { %4205 = vst.msk [vmem:[%s8181_s14 + $0x58] sm:$0xff] %vm74_vm0, %v4187_v28  ;;  %v4086_v2 = vmul.f32 0.0625, %v4062_v31 }
 0xd12   :  { %v5392_v5 = vpop.eup %5391  ;;  %4204 = vst.msk [vmem:[%s8181_s14 + $0x50] sm:$0xff] %vm74_vm0, %v4186_v12  ;;  %v4105_v52 = vadd.f32 1e-05, %v4087_v19 }
 0xd13   :  { %v5394_v4 = vpop.eup %5393  ;;  %v4139_v20 = vmul.f32 %v5392_v5, %v7996_v24  ;;  %v4104_v25 = vadd.f32 1e-05, %v4086_v2 }
 0xd14   :  { %v4138_v22 = vmul.f32 %v5394_v4, %v7999_v16  ;;  %5395 = vrsqrt.f32 %v4105_v52 }
 0xd15   :  { %v4164_v17 = vmul.f32 %v8034_v42, %v4139_v20  ;;  %5397 = vrsqrt.f32 %v4104_v25 }
 0xd16   :  { %v4163_v62 = vmul.f32 %v8034_v42, %v4138_v22 }
 0xd17   :  { %v4189_v54 = vadd.f32 %v8040_v33, %v4164_v17 }
 0xd18   :  { %v4188_v18 = vadd.f32 %v8040_v33, %v4163_v62 }
 0xd19   :  { %4207 = vst.msk [vmem:[%s8181_s14 + $0x68] sm:$0xff] %vm74_vm0, %v4189_v54 }
 0xd1a   :  { %4206 = vst.msk [vmem:[%s8181_s14 + $0x60] sm:$0xff] %vm74_vm0, %v4188_v18 }
 0xd1e   :  { %v5396_v24 = vpop.eup %5395 }
 0xd1f   :  { %v5398_v16 = vpop.eup %5397  ;;  %v4141_v56 = vmul.f32 %v5396_v24, %v8008_v50 }
 0xd20   :  { %v4140_v45 = vmul.f32 %v5398_v16, %v8011_v63 }
 0xd21   :  { %v4166_v58 = vmul.f32 %v8034_v42, %v4141_v56 }
 0xd22   :  { %v4165_v35 = vmul.f32 %v8034_v42, %v4140_v45 }
 0xd23   :  { %v4191_v26 = vadd.f32 %v8040_v33, %v4166_v58  ;;  %v4071_v43 = vpop.xlane.xlu1 %4070 }
 0xd24   :  { %v4190_v29 = vadd.f32 %v8040_v33, %v4165_v35  ;;  %v4089_v32 = vmul.f32 0.0625, %v4071_v43  ;;  %v4068_v60 = vpop.xlane.xlu0 %4067 }
 0xd25   :  { %4209 = vst.msk [vmem:[%s8181_s14 + $0x78] sm:$0xff] %vm74_vm0, %v4191_v26  ;;  %v4088_v11 = vmul.f32 0.0625, %v4068_v60 }
 0xd26   :  { %4208 = vst.msk [vmem:[%s8181_s14 + $0x70] sm:$0xff] %vm74_vm0, %v4190_v29  ;;  %v4107_v50 = vadd.f32 1e-05, %v4089_v32 }
 0xd27   :  { %v4106_v63 = vadd.f32 1e-05, %v4088_v11 }
 0xd28   :  { %5399 = vrsqrt.f32 %v4107_v50 }
 0xd29   :  { %5401 = vrsqrt.f32 %v4106_v63 }
 0xd32   :  { %v5400_v39 = vpop.eup %5399 }
 0xd33   :  { %v5402_v23 = vpop.eup %5401  ;;  %v4143_v8 = vmul.f32 %v5400_v39, %v8020_v41 }
 0xd34   :  { %v4142_v57 = vmul.f32 %v5402_v23, %v8023_v13 }
 0xd35   :  { %v4168_v34 = vmul.f32 %v8034_v42, %v4143_v8 }
 0xd36   :  { %v4167_v49 = vmul.f32 %v8034_v42, %v4142_v57 }
 0xd37   :  { %v4193_v53 = vadd.f32 %v8040_v33, %v4168_v34 }
 0xd38   :  { %v4192_v37 = vadd.f32 %v8040_v33, %v4167_v49 }
 0xd39   :  { %4211 = vst.msk [vmem:[%s8181_s14 + $0x88] sm:$0xff] %vm74_vm0, %v4193_v53 }
 0xd3a   :  { %4210 = vst.msk [vmem:[%s8181_s14 + $0x80] sm:$0xff] %vm74_vm0, %v4192_v37 }

// kernel: motion_ae_forward.13
= control target key start
LH: loop header
LB: loop body
LE: loop exit
PB: predicated region body
PF: predicated region fallthrough
CT: control target
= control target key end

     0   :  { %v221_v3 = vmov 0.0|0.0   ;;  %vm44_vm0 = vcmask 130048   ;;  %s344_s0 = inlined_call_operand.vmem [shape: f32[16,144], index: 0, kind: input, shape index: {}]   ;;  %s345_s1 = inlined_call_operand.vmem [shape: f32[144,24], index: 1, kind: input, shape index: {}]   ;;  %s346_s2 = inlined_call_operand.vmem [shape: f32[1,24], index: 2, kind: input, shape index: {}]   ;;  %s347_s3 = inlined_call_operand.hbm [shape: f32[16,24], index: 3, kind: output, shape index: {}]  }
   0x1   :  { %v19_v0 = vld [vmem:[%s345_s1] sm:$0xff]  ;;  %v20_v1 = vld [vmem:[%s345_s1 + $0x8] sm:$0xff]  ;;  %v21_v2 = vld [vmem:[%s345_s1 + $0x10] sm:$0xff]  ;;  %148 = vmatprep.subr.bf16.mxu0 %v221_v3  ;;  %175 = vmatprep.subr.bf16.mxu1 %v221_v3 }
   0x2   :  { %v149_v4 = vpack.c.bf16 %v20_v1, %v19_v0  ;;  %v22_v5 = vld [vmem:[%s345_s1 + $0x18] sm:$0xff]  ;;  %v23_v7 = vld [vmem:[%s345_s1 + $0x20] sm:$0xff]  ;;  %v24_v8 = vld [vmem:[%s345_s1 + $0x28] sm:$0xff] }
   0x3   :  { %v152_v6 = vpack.c.bf16 %v22_v5, %v21_v2  ;;  %v16_v9 = vld [vmem:[%s344_s0 + $0x8] sm:$0xff]  ;;  %v18_v10 = vld [vmem:[%s344_s0 + $0x18] sm:$0xff]  ;;  %v155_v11 = vpack.c.bf16 %v24_v8, %v23_v7 }
   0x4   :  { %150 = vmatpush1.bf16.msra.mxu0 %v149_v4  ;;  %184 = vmatpush1.bf16.msra.mxu1 %v149_v4 }
   0x5   :  { %151 = vmatprep.subr.bf16.mxu0 %v221_v3  ;;  %176 = vmatprep.subr.bf16.mxu1 %v221_v3 }
   0x8   :  { %153 = vmatpush1.bf16.msra.mxu0 %v152_v6  ;;  %185 = vmatpush1.bf16.msra.mxu1 %v152_v6 }
   0x9   :  { %8 = vsyncpa [#allocation3], 0  ;;  %154 = vmatprep.subr.bf16.mxu0 %v221_v3  ;;  %177 = vmatprep.subr.bf16.mxu1 %v221_v3  ;;  %v25_v12 = vld [vmem:[%s345_s1 + $0x30] sm:$0xff]  ;;  %v26_v13 = vld [vmem:[%s345_s1 + $0x38] sm:$0xff]  ;;  %vm126_vm1 = vcmask 195584  }
   0xa   :  { %146 = vmatprep.mubr.msk.f32.mxu0 %vm44_vm0, %v16_v9  ;;  %147 = vmatprep.mubr.msk.f32.mxu1 %vm44_vm0, %v18_v10  ;;  %v158_v14 = vpack.c.bf16 %v26_v13, %v25_v12  ;;  %v27_v15 = vld [vmem:[%s345_s1 + $0x40] sm:$0xff]  ;;  %v28_v16 = vld [vmem:[%s345_s1 + $0x48] sm:$0xff]  ;;  %v29_v18 = vld [vmem:[%s345_s1 + $0x50] sm:$0xff] }
   0xb   :  { %v161_v17 = vpack.c.bf16 %v28_v16, %v27_v15  ;;  %v30_v19 = vld [vmem:[%s345_s1 + $0x58] sm:$0xff]  ;;  %v31_v21 = vld [vmem:[%s345_s1 + $0x60] sm:$0xff]  ;;  %v32_v22 = vld [vmem:[%s345_s1 + $0x68] sm:$0xff] }
   0xc   :  { %156 = vmatpush1.bf16.msra.mxu0 %v155_v11  ;;  %186 = vmatpush1.bf16.msra.mxu1 %v155_v11  ;;  %v164_v20 = vpack.c.bf16 %v30_v19, %v29_v18  ;;  %v167_v23 = vpack.c.bf16 %v32_v22, %v31_v21  ;;  %v33_v24 = vld [vmem:[%s345_s1 + $0x70] sm:$0xff]  ;;  %v34_v25 = vld [vmem:[%s345_s1 + $0x78] sm:$0xff]  ;;  %v35_v27 = vld [vmem:[%s345_s1 + $0x80] sm:$0xff] }
   0xd   :  { %157 = vmatprep.subr.bf16.mxu0 %v221_v3  ;;  %178 = vmatprep.subr.bf16.mxu1 %v221_v3  ;;  %v170_v26 = vpack.c.bf16 %v34_v25, %v33_v24  ;;  %v36_v28 = vld [vmem:[%s345_s1 + $0x88] sm:$0xff]  ;;  %v15_v30 = vld [vmem:[%s344_s0] sm:$0xff]  ;;  %v17_v31 = vld [vmem:[%s344_s0 + $0x10] sm:$0xff]  ;;  %s222_s1 = smov [#allocation2]  }
   0xe   :  { %v173_v29 = vpack.c.bf16 %v36_v28, %v35_v27  ;;  %s134_s29 = sshll.u32 %s222_s1, 4  ;;  %v145_v32 = vld [vmem:[%s346_s2] ss:$0 sm:$0xff]  ;;  %s135_s29 = int_to_ptr.vmem [resolvable:$true] %s134_s29 }
   0xf   :  { %s197_s5 = scalar_lea.vmem %s135_s29, 256  ;;  %p202_p1 = scmp.lt.s32.totalorder %s135_s29, %s135_s29 }
  0x10   :  { %159 = vmatpush1.bf16.msra.mxu0 %v158_v14  ;;  %187 = vmatpush1.bf16.msra.mxu1 %v158_v14  ;;  %p198_p0 = scmp.ne.s32.totalorder %s135_s29, %s197_s5  ;;  %p203_p2 = scmp.lt.s32.totalorder %s197_s5, %s197_s5 }
  0x11   :  { %160 = vmatprep.subr.bf16.mxu0 %v221_v3  ;;  %179 = vmatprep.subr.bf16.mxu1 %v221_v3 }
  0x12   :  { %p204_p3 = por %p203_p2, %p202_p1 }
  0x14   :  { %162 = vmatpush1.bf16.msra.mxu0 %v161_v17  ;;  %188 = vmatpush1.bf16.msra.mxu1 %v161_v17  ;;  %p205_p4 = pnand %p204_p3, %p198_p0 }
  0x15   :  { %163 = vmatprep.subr.bf16.mxu0 %v221_v3  ;;  %180 = vmatprep.subr.bf16.mxu1 %v221_v3 }
  0x18   :  { %165 = vmatpush1.bf16.msra.mxu0 %v164_v20  ;;  %189 = vmatpush1.bf16.msra.mxu1 %v164_v20 }
  0x19   :  { %166 = vmatprep.subr.bf16.mxu0 %v221_v3  ;;  %181 = vmatprep.subr.bf16.mxu1 %v221_v3 }
  0x1c   :  { %168 = vmatpush1.bf16.msra.mxu0 %v167_v23  ;;  %190 = vmatpush1.bf16.msra.mxu1 %v167_v23 }
  0x1d   :  { %169 = vmatprep.subr.bf16.mxu0 %v221_v3  ;;  %182 = vmatprep.subr.bf16.mxu1 %v221_v3 }
  0x20   :  { %171 = vmatpush1.bf16.msra.mxu0 %v170_v26  ;;  %191 = vmatpush1.bf16.msra.mxu1 %v170_v26 }
  0x21   :  { %172 = vmatprep.subr.bf16.mxu0 %v221_v3  ;;  %183 = vmatprep.subr.bf16.mxu1 %v221_v3 }
  0x24   :  { %174 = vmatpush1.bf16.msra.mxu0 %v173_v29  ;;  %192 = vmatpush1.bf16.msra.mxu1 %v173_v29 }
  0x27   :  { %116 = vmatmul.mubr.f32.vlgmr.msra.gmra.mrb[0].mxu0 %v15_v30  ;;  %121 = vmatmul.mubr.f32.vlgmr.msra.gmra.mrb[0].mxu1 %v17_v31 }
  0xfa   :  { %v117_v33 = vpop.f32.mrb[0].mxu0  ;;  %v122_v34 = vpop.f32.mrb[0].mxu1 }
  0xfb   :  { %v118_v35 = vadd.f32 %v145_v32, %v117_v33  ;;  %v123_v36 = vadd.f32 %v145_v32, %v122_v34  ;;  %v119_v37 = vpop.f32.mrb[1].mxu0  ;;  %v124_v38 = vpop.f32.mrb[1].mxu1 }
  0xfd   :  { %127 = vst.msk [vmem:[#allocation2] sm:$0xff] %vm126_vm1, %v118_v35  ;;  %128 = vst.msk [vmem:[#allocation2 + $0x8] sm:$0xff] %vm126_vm1, %v123_v36 }
  0xfe   :  { %208 = shalt.err (!%p205_p4)
}
  0xff   :  { %s209_s2 = scalar_lea.hbm %s347_s3, 256 }
 0x100   :  { %p210_p5 = scmp.ne.s32.totalorder %s347_s3, %s209_s2  ;;  %p213_p6 = scmp.lt.u32.totalorder %s209_s2, %s347_s3 }
 0x102   :  { %p215_p7 = pnand %p213_p6, %p210_p5 }
 0x104   :  { %218 = shalt.err (!%p215_p7)
}
 0x105   :  { %s223_s11 = smov 128   ;;  %s224_s12 = smov 8  }
 0x106   :  { %140 = dma.vmem_to_hbm [thread:$0]  %s135_s29, 256, %s347_s3, [#allocation3], %s223_s11, %s223_s11, %s224_s12  }
 0x107   :  { %219 = dma.done.wait [#allocation3], 256  }
 0x108   :  { %220 = vsyncadd [#allocation3], 4294967040 }
 0x109   :  { %144 = vsyncpa [#allocation3], 1 }

</bundles_post_ra>
